<compile_context>
chip_gen: v7x
topology: tpu7x:2x2x1
jax: 0.10.0
libtpu: 0.0.40
codegen_flags: <defaults>
</compile_context>

<pallas_src>
import numpy as np
import jax
import jax.numpy as jnp
from jax import lax
from jax.experimental import pallas as pl
from jax.experimental.pallas import tpu as pltpu

# ----------------------------- configuration -------------------------------
B = 2
D_MODEL = 32
N_HEADS = 4
HEAD_DIM = D_MODEL // N_HEADS
N_LEVELS = 2
N_POINTS = 2
D_FFN = 64
NUM_LAYERS = 2
SPATIAL_SHAPES = ((8, 8), (4, 4))                       # per-level (H, W)
LEVEL_START = (0, SPATIAL_SHAPES[0][0] * SPATIAL_SHAPES[0][1])
LEN_IN = sum(h * w for h, w in SPATIAL_SHAPES)          # 80
LN_EPS = 1e-5

N_OFF = N_HEADS * N_LEVELS * N_POINTS * 2               # 32 sampling-offset cols
N_AW = N_HEADS * N_LEVELS * N_POINTS                    # 16 attention-weight cols
PH = N_POINTS * N_HEADS                                 # 8 (point, head) blocks / level
G_LANES = PH * LEN_IN                                   # 640 fused sampling lanes

# packed weight-slab column offsets (all matrices stored as (in_dim, out_dim))
_COL_WV = 0                                             # value_proj
_COL_QO = D_MODEL                                        # [sampling_offsets | attn_weights]
_QO_W = N_OFF + N_AW                                     # 48
_COL_WO = _COL_QO + _QO_W                                # output_proj (80)
_COL_W1 = _COL_WO + D_MODEL                              # linear1 (112)
_W32_COLS = _COL_W1 + D_FFN                              # 176

# packed bias/vector slab rows (width 64)
_BIAS_W = 64
_ROW_BV, _ROW_BOA, _ROW_BO, _ROW_LN1, _ROW_B1, _ROW_B2, _ROW_LN2 = range(7)
_BIAS_ROWS = 8


# ------------------------------- kernel ------------------------------------
def _encoder_kernel(src_ref, pos_ref, refpix_ref, w32_ref, wqo_ref, w2_ref,
                    bias_ref, ebc_ref, rep_ref, hmask_ref, grid_ref, out_ref):
    f32 = jnp.float32
    bf16 = jnp.bfloat16

    x = src_ref[...]                              # (Lq, C)
    pos = pos_ref[...]                            # (Lq, C)
    ref_pix = refpix_ref[...]                     # (Lq, 32): [x*W-0.5 (16) | y*H-0.5 (16)]
    e_bc = ebc_ref[...]                           # (16, G) scalar->lane-block broadcast
    rep = rep_ref[...]                            # (G, Lq) bf16 0/1 value replication
    hmask = hmask_ref[...]                        # (G, C)  per-head channel mask
    ixc = grid_ref[0:1, :]                        # (1, G) lane pixel x
    iyc = grid_ref[1:2, :]                        # (1, G) lane pixel y
    Lq = x.shape[0]

    # pos @ [offsets|attn] weights of ALL layers in one dot (layer-invariant).
    pos_qo = jnp.dot(pos, wqo_ref[...], preferred_element_type=f32)  # (Lq, L*48)

    num_layers = w32_ref.shape[0]
    for layer in range(num_layers):               # fused layers: x stays in VMEM
        w32 = w32_ref[layer]                      # (C, 176)
        w2 = w2_ref[layer]                        # (D_FFN, C)
        bias = bias_ref[layer]                    # (8, 64)

        # ---- fused [value_proj | sampling_offsets | attn_weights] projection.
        # qo = (x+pos) @ Wqo + b  ==  x @ Wqo + (pos @ Wqo, cached) + b
        proj = jnp.dot(x, w32[:, _COL_WV:_COL_QO + _QO_W],
                       preferred_element_type=f32)                    # (Lq, 80)
        value = proj[:, 0:D_MODEL] + bias[_ROW_BV:_ROW_BV + 1, 0:D_MODEL]
        qo = (proj[:, _COL_QO:_COL_QO + _QO_W]
              + pos_qo[:, layer * _QO_W:(layer + 1) * _QO_W]
              + bias[_ROW_BOA:_ROW_BOA + 1, 0:_QO_W])                 # (Lq, 48)
        offs = qo[:, 0:N_OFF]                     # (Lq, 32): [x offsets (16) | y offsets (16)]
        attw = qo[:, N_OFF:_QO_W]                 # (Lq, 16): col = l*8 + p*4 + h

        # ---- per-head softmax over (level, point).  Column j's head is j % 4,
        # so a lane-halving tree gives the EXACT per-head max / sum (no global
        # max -> no per-head denominator underflow / NaN).
        m1 = jnp.maximum(attw[:, 0:8], attw[:, 8:16])
        m2 = jnp.maximum(m1[:, 0:4], m1[:, 4:8])                      # (Lq, 4) per-head max
        mh = jnp.concatenate([m2, m2, m2, m2], axis=1)                # (Lq, 16)
        aexp = jnp.exp(attw - mh)
        s1 = aexp[:, 0:8] + aexp[:, 8:16]
        s2 = s1[:, 0:4] + s1[:, 4:8]                                  # (Lq, 4) per-head sum
        sh = jnp.concatenate([s2, s2, s2, s2], axis=1)
        attn = aexp * pl.reciprocal(sh, approx=True)                  # (Lq, 16)

        # ---- fused multi-scale deformable sampling core (ALL levels at once).
        # pixel coords (grid_sample, align_corners=False):
        #   pix = (ref + off/[W,H]) * [W,H] - 0.5 = ref*[W,H] - 0.5 + off_raw
        pxy = ref_pix + offs                                          # (Lq, 32)
        # broadcast px / py / attn scalars to their lane blocks with ONE dot
        lhs = jnp.concatenate([pxy[:, 0:16], pxy[:, 16:32], attn], axis=0)  # (3*Lq, 16)
        bc = jnp.dot(lhs, e_bc, preferred_element_type=f32)           # (3*Lq, G)
        pxb = bc[0:Lq]
        pyb = bc[Lq:2 * Lq]
        awb = bc[2 * Lq:3 * Lq]
        # bilinear "tent" weights == grid_sample(bilinear, zeros padding)
        wx = jnp.maximum(1.0 - jnp.abs(ixc - pxb), 0.0)
        wy = jnp.maximum(1.0 - jnp.abs(iyc - pyb), 0.0)
        m = (awb * wx * wy).astype(bf16)                              # (Lq, G)

        # block-diagonal per-head value matrix via 0/1 replication MATMUL
        # (no VMEM concat copies) + precomputed head mask.
        v_bd = (jnp.dot(rep, value.astype(bf16), preferred_element_type=f32)
                * hmask).astype(bf16)                                 # (G, C)
        samp = jnp.dot(m, v_bd, preferred_element_type=f32)           # (Lq, C)

        # single full-K output projection (all heads at once)
        attn_out = (jnp.dot(samp, w32[:, _COL_WO:_COL_WO + D_MODEL],
                            preferred_element_type=f32)
                    + bias[_ROW_BO:_ROW_BO + 1, 0:D_MODEL])

        # ---- residual + LayerNorm1 (dropout1 = identity) ----
        x1 = x + attn_out
        mu = jnp.mean(x1, axis=-1, keepdims=True)
        var = jnp.mean((x1 - mu) * (x1 - mu), axis=-1, keepdims=True)
        xn = ((x1 - mu) * lax.rsqrt(var + LN_EPS)
              * bias[_ROW_LN1:_ROW_LN1 + 1, 0:D_MODEL]
              + bias[_ROW_LN1:_ROW_LN1 + 1, D_MODEL:2 * D_MODEL])

        # ---- FFN + residual + LayerNorm2 (dropout2/3 = identity) ----
        h1 = (jnp.dot(xn, w32[:, _COL_W1:_COL_W1 + D_FFN],
                      preferred_element_type=f32)
              + bias[_ROW_B1:_ROW_B1 + 1, 0:D_FFN])
        h1 = jnp.maximum(h1, 0.0)                                     # relu
        ff = (jnp.dot(h1, w2, preferred_element_type=f32)
              + bias[_ROW_B2:_ROW_B2 + 1, 0:D_MODEL])
        y = xn + ff
        mu2 = jnp.mean(y, axis=-1, keepdims=True)
        var2 = jnp.mean((y - mu2) * (y - mu2), axis=-1, keepdims=True)
        x = ((y - mu2) * lax.rsqrt(var2 + LN_EPS)
             * bias[_ROW_LN2:_ROW_LN2 + 1, 0:D_MODEL]
             + bias[_ROW_LN2:_ROW_LN2 + 1, D_MODEL:2 * D_MODEL])

    out_ref[...] = x.astype(out_ref.dtype)


# --------------------- precomputed sampling constants -----------------------
def build_sampling_constants():
    """Lane layout: for l in levels, for block b=(p*H+h), for j in range(H_l*W_l)."""
    lane_level, lane_block, lane_pos = [], [], []
    for l, (H_, W_) in enumerate(SPATIAL_SHAPES):
        for b in range(PH):
            for j in range(H_ * W_):
                lane_level.append(l)
                lane_block.append(b)
                lane_pos.append(j)
    lane_level = np.asarray(lane_level)
    lane_block = np.asarray(lane_block)
    lane_pos = np.asarray(lane_pos)

    w_per = np.asarray([SPATIAL_SHAPES[l][1] for l in range(N_LEVELS)])
    lvl_start = np.asarray(LEVEL_START)

    ix = (lane_pos % w_per[lane_level]).astype(np.float32)
    iy = (lane_pos // w_per[lane_level]).astype(np.float32)
    grid_xy = np.stack([ix, iy], axis=0)                              # (2, G)

    # scalar column r = l*PH + b  ->  lane blocks of that (level, point, head)
    rr = np.arange(N_LEVELS * PH)
    e_bc = ((lane_level[None, :] * PH + lane_block[None, :])
            == rr[:, None]).astype(np.float32)                        # (16, G)

    # lane g replicates value row LEVEL_START[l] + j
    vrow = lvl_start[lane_level] + lane_pos
    rep = (vrow[:, None] == np.arange(LEN_IN)[None, :]).astype(np.float32)  # (G, Len_in)

    # head of lane g is (block % H); channel c belongs to head c // HEAD_DIM
    hmask = ((lane_block % N_HEADS)[:, None]
             == (np.arange(D_MODEL) // HEAD_DIM)[None, :]).astype(np.float32)  # (G, C)

    return (jnp.asarray(e_bc, jnp.float32),
            jnp.asarray(grid_xy, jnp.float32),
            jnp.asarray(rep, jnp.bfloat16),
            jnp.asarray(hmask, jnp.float32))


# ------------------------------ wrapper -------------------------------------
def get_reference_points(spatial_shapes, valid_ratios):
    """Port of DeformableTransformerEncoder.get_reference_points (plain JAX glue)."""
    ref_list = []
    for lvl, (H_, W_) in enumerate(spatial_shapes):
        ref_y, ref_x = jnp.meshgrid(
            jnp.linspace(0.5, H_ - 0.5, H_, dtype=jnp.float32),
            jnp.linspace(0.5, W_ - 0.5, W_, dtype=jnp.float32),
            indexing="ij")
        ref_y = ref_y.reshape(-1)[None] / (valid_ratios[:, None, lvl, 1] * H_)
        ref_x = ref_x.reshape(-1)[None] / (valid_ratios[:, None, lvl, 0] * W_)
        ref = jnp.stack((ref_x, ref_y), -1)
        ref_list.append(ref)
    reference_points = jnp.concatenate(ref_list, 1)          # (B, Len_in, 2)
    reference_points = reference_points[:, :, None] * valid_ratios[:, None]
    return reference_points                                  # (B, Len_in, L, 2)


def deformable_transformer_encoder(src, pos, valid_ratios, packed_params, consts):
    """Forward of DeformableTransformerEncoder (all layers in one pallas_call)."""
    w32, wqo, w2, bias = packed_params
    e_bc, grid_xy, rep, hmask = consts
    Bb, Lq, C = src.shape

    reference_points = get_reference_points(SPATIAL_SHAPES, valid_ratios)  # (B,Lq,L,2)
    # pre-scale to pixel coords and broadcast over the 8 (p,h) columns / level
    wh = jnp.asarray([[float(W_), float(H_)] for (H_, W_) in SPATIAL_SHAPES],
                     jnp.float32)                                          # (L, 2) [W, H]
    ref_scaled = reference_points * wh[None, None] - 0.5                   # (B,Lq,L,2)
    ref_x = jnp.repeat(ref_scaled[..., 0], PH, axis=-1)                    # (B,Lq,16)
    ref_y = jnp.repeat(ref_scaled[..., 1], PH, axis=-1)                    # (B,Lq,16)
    ref_pix = jnp.concatenate([ref_x, ref_y], axis=-1)                     # (B,Lq,32)

    return pl.pallas_call(
        _encoder_kernel,
        out_shape=jax.ShapeDtypeStruct((Bb, Lq, C), jnp.float32),
        grid=(Bb,),
        in_specs=[
            pl.BlockSpec((None, Lq, C), lambda b: (b, 0, 0)),              # src
            pl.BlockSpec((None, Lq, C), lambda b: (b, 0, 0)),              # pos
            pl.BlockSpec((None, Lq, N_OFF), lambda b: (b, 0, 0)),          # ref pixel coords
            pl.BlockSpec(w32.shape, lambda b: (0, 0, 0)),                  # weight slab
            pl.BlockSpec(wqo.shape, lambda b: (0, 0)),                     # all-layer Wqo
            pl.BlockSpec(w2.shape, lambda b: (0, 0, 0)),                   # linear2 weight
            pl.BlockSpec(bias.shape, lambda b: (0, 0, 0)),                 # bias slab
            pl.BlockSpec(e_bc.shape, lambda b: (0, 0)),                    # broadcast matrix
            pl.BlockSpec(rep.shape, lambda b: (0, 0)),                     # value replication
            pl.BlockSpec(hmask.shape, lambda b: (0, 0)),                   # head mask
            pl.BlockSpec(grid_xy.shape, lambda b: (0, 0)),                 # lane pixel grid
        ],
        out_specs=pl.BlockSpec((None, Lq, C), lambda b: (b, 0, 0)),
        compiler_params=pltpu.CompilerParams(
            dimension_semantics=("parallel",)),   # one batch per TC on v7x megacore
    )(src, pos, ref_pix, w32, wqo, w2, bias, e_bc, rep, hmask, grid_xy)


# ------------------------- parameter construction ---------------------------
def init_layer_params_torch_layout(key):
    """Synthetic parameters in the PyTorch module's native column ordering.

    All matrices are stored (in_dim, out_dim), i.e. transposed from nn.Linear's
    (out, in) weight.
    """
    ks = jax.random.split(key, 6)
    C = D_MODEL

    def lin(k, fi, fo, scale):
        return jax.random.normal(k, (fi, fo), jnp.float32) * scale

    return dict(
        wv=lin(ks[0], C, C, 0.05), bv=jnp.zeros((C,), jnp.float32),
        wof=lin(ks[1], C, N_OFF, 0.02), bof=jnp.zeros((N_OFF,), jnp.float32),
        waw=lin(ks[2], C, N_AW, 0.05), baw=jnp.zeros((N_AW,), jnp.float32),
        wo=lin(ks[3], C, C, 0.05), bo=jnp.zeros((C,), jnp.float32),
        g1=jnp.ones((C,), jnp.float32), be1=jnp.zeros((C,), jnp.float32),
        w1=lin(ks[4], C, D_FFN, 0.05), b1=jnp.zeros((D_FFN,), jnp.float32),
        w2=lin(ks[5], D_FFN, C, 0.05), b2=jnp.zeros((C,), jnp.float32),
        g2=jnp.ones((C,), jnp.float32), be2=jnp.zeros((C,), jnp.float32),
    )


def _offset_col_perm():
    # torch col: ((h*L + l)*P + p)*2 + coord  ->  kernel col: coord*16 + l*8 + p*4 + h
    perm = []
    for coord in range(2):
        for l in range(N_LEVELS):
            for p in range(N_POINTS):
                for h in range(N_HEADS):
                    perm.append(((h * N_LEVELS + l) * N_POINTS + p) * 2 + coord)
    return jnp.array(perm, jnp.int32)


def _attn_col_perm():
    # torch col: (h*L + l)*P + p  ->  kernel col: l*8 + p*4 + h
    perm = []
    for l in range(N_LEVELS):
        for p in range(N_POINTS):
            for h in range(N_HEADS):
                perm.append((h * N_LEVELS + l) * N_POINTS + p)
    return jnp.array(perm, jnp.int32)


def pack_layer_params(p):
    """Pack one layer's 18 tensors into (weight-slab, Wqo, w2, bias-slab)."""
    off_perm = _offset_col_perm()
    aw_perm = _attn_col_perm()
    wof = p["wof"][:, off_perm]
    bof = p["bof"][off_perm]
    waw = p["waw"][:, aw_perm]
    baw = p["baw"][aw_perm]

    wqo = jnp.concatenate([wof, waw], axis=1)                             # (32, 48)
    w32 = jnp.concatenate([p["wv"], wqo, p["wo"], p["w1"]], axis=1)       # (32, 176)
    w2 = p["w2"]                                                          # (64, 32)

    def row(*vs):
        v = jnp.concatenate(vs) if len(vs) > 1 else vs[0]
        return jnp.pad(v, (0, _BIAS_W - v.shape[0]))[None, :]

    bias = jnp.concatenate([
        row(p["bv"]),                 # _ROW_BV
        row(bof, baw),                # _ROW_BOA
        row(p["bo"]),                 # _ROW_BO
        row(p["g1"], p["be1"]),       # _ROW_LN1
        row(p["b1"]),                 # _ROW_B1
        row(p["b2"]),                 # _ROW_B2
        row(p["g2"], p["be2"]),       # _ROW_LN2
        row(jnp.zeros((_BIAS_W,), jnp.float32)),
    ], axis=0)                                                            # (8, 64)
    return w32, wqo, w2, bias


def pack_all_layers(layer_param_list):
    packed = [pack_layer_params(p) for p in layer_param_list]
    return (jnp.stack([q[0] for q in packed]),            # (NUM_LAYERS, 32, 176)
            jnp.concatenate([q[1] for q in packed], 1),   # (32, NUM_LAYERS*48)
            jnp.stack([q[2] for q in packed]),            # (NUM_LAYERS, 64, 32)
            jnp.stack([q[3] for q in packed]))            # (NUM_LAYERS, 8, 64)


# -------------------------------- main --------------------------------------
if __name__ == "__main__":
    key = jax.random.PRNGKey(0)
    k_src, k_pos, k_vr, k_par = jax.random.split(key, 4)

    src = jax.random.normal(k_src, (B, LEN_IN, D_MODEL), jnp.float32)
    pos = jax.random.normal(k_pos, (B, LEN_IN, D_MODEL), jnp.float32)
    valid_ratios = 0.8 + 0.2 * jax.random.uniform(k_vr, (B, N_LEVELS, 2),
                                                  dtype=jnp.float32)

    layer_keys = jax.random.split(k_par, NUM_LAYERS)
    raw_layers = [init_layer_params_torch_layout(k) for k in layer_keys]
    packed_params = pack_all_layers(raw_layers)
    consts = build_sampling_constants()

    fwd = jax.jit(deformable_transformer_encoder)
    out = fwd(src, pos, valid_ratios, packed_params, consts)
    out = jax.block_until_ready(out)

    assert out.shape == (B, LEN_IN, D_MODEL)
    assert bool(jnp.all(jnp.isfinite(out)))
    print("KERNEL_OK")
</pallas_src>

<mosaic_0001>
module attributes {stable_mosaic.version = 11 : i64} {
  func.func @_encoder_kernel(%arg0: i32, %arg1: memref<1x80x32xf32, #tpu.memory_space<vmem>>, %arg2: memref<1x80x32xf32, #tpu.memory_space<vmem>>, %arg3: memref<1x80x32xf32, #tpu.memory_space<vmem>>, %arg4: memref<2x32x176xf32, #tpu.memory_space<vmem>>, %arg5: memref<32x96xf32, #tpu.memory_space<vmem>>, %arg6: memref<2x64x32xf32, #tpu.memory_space<vmem>>, %arg7: memref<2x8x64xf32, #tpu.memory_space<vmem>>, %arg8: memref<16x640xf32, #tpu.memory_space<vmem>>, %arg9: memref<640x80xbf16, #tpu.memory_space<vmem>>, %arg10: memref<640x32xf32, #tpu.memory_space<vmem>>, %arg11: memref<2x640xf32, #tpu.memory_space<vmem>>, %arg12: memref<1x80x32xf32, #tpu.memory_space<vmem>>) attributes {dimension_semantics = [#tpu.dimension_semantics<parallel>], iteration_bounds = array<i64: 2>, scalar_prefetch = 0 : i64, scratch_operands = 0 : i64, tpu.core_type = #tpu.core_type<tc>, window_params = [{transform_indices = @transform_0, window_bounds = array<i64: 1, 80, 32>}, {transform_indices = @transform_1, window_bounds = array<i64: 1, 80, 32>}, {transform_indices = @transform_2, window_bounds = array<i64: 1, 80, 32>}, {pipeline_mode = #tpu.pipeline_mode<synchronous>, transform_indices = @transform_3, window_bounds = array<i64: 2, 32, 176>}, {pipeline_mode = #tpu.pipeline_mode<synchronous>, transform_indices = @transform_4, window_bounds = array<i64: 32, 96>}, {pipeline_mode = #tpu.pipeline_mode<synchronous>, transform_indices = @transform_5, window_bounds = array<i64: 2, 64, 32>}, {pipeline_mode = #tpu.pipeline_mode<synchronous>, transform_indices = @transform_6, window_bounds = array<i64: 2, 8, 64>}, {pipeline_mode = #tpu.pipeline_mode<synchronous>, transform_indices = @transform_7, window_bounds = array<i64: 16, 640>}, {pipeline_mode = #tpu.pipeline_mode<synchronous>, transform_indices = @transform_8, window_bounds = array<i64: 640, 80>}, {pipeline_mode = #tpu.pipeline_mode<synchronous>, transform_indices = @transform_9, window_bounds = array<i64: 640, 32>}, {pipeline_mode = #tpu.pipeline_mode<synchronous>, transform_indices = @transform_10, window_bounds = array<i64: 2, 640>}, {transform_indices = @transform_11, window_bounds = array<i64: 1, 80, 32>}]} {
    %c0 = arith.constant 0 : index
    %c0_0 = arith.constant 0 : index
    %c0_1 = arith.constant 0 : index
    %0 = vector.load %arg1[%c0, %c0_0, %c0_1] : memref<1x80x32xf32, #tpu.memory_space<vmem>>, vector<1x80x32xf32>
    %1 = vector.shape_cast %0 : vector<1x80x32xf32> to vector<80x32xf32>
    %c0_2 = arith.constant 0 : index
    %c0_3 = arith.constant 0 : index
    %c0_4 = arith.constant 0 : index
    %2 = vector.load %arg2[%c0_2, %c0_3, %c0_4] : memref<1x80x32xf32, #tpu.memory_space<vmem>>, vector<1x80x32xf32>
    %3 = vector.shape_cast %2 : vector<1x80x32xf32> to vector<80x32xf32>
    %c0_5 = arith.constant 0 : index
    %c0_6 = arith.constant 0 : index
    %c0_7 = arith.constant 0 : index
    %4 = vector.load %arg3[%c0_5, %c0_6, %c0_7] : memref<1x80x32xf32, #tpu.memory_space<vmem>>, vector<1x80x32xf32>
    %5 = vector.shape_cast %4 : vector<1x80x32xf32> to vector<80x32xf32>
    %c0_8 = arith.constant 0 : index
    %c0_9 = arith.constant 0 : index
    %6 = vector.load %arg8[%c0_8, %c0_9] : memref<16x640xf32, #tpu.memory_space<vmem>>, vector<16x640xf32>
    %c0_10 = arith.constant 0 : index
    %c0_11 = arith.constant 0 : index
    %7 = vector.load %arg9[%c0_10, %c0_11] : memref<640x80xbf16, #tpu.memory_space<vmem>>, vector<640x80xbf16>
    %c0_12 = arith.constant 0 : index
    %c0_13 = arith.constant 0 : index
    %8 = vector.load %arg10[%c0_12, %c0_13] : memref<640x32xf32, #tpu.memory_space<vmem>>, vector<640x32xf32>
    %c0_14 = arith.constant 0 : index
    %c0_15 = arith.constant 0 : index
    %9 = vector.load %arg11[%c0_14, %c0_15] : memref<2x640xf32, #tpu.memory_space<vmem>>, vector<1x640xf32>
    %c1 = arith.constant 1 : index
    %c0_16 = arith.constant 0 : index
    %10 = vector.load %arg11[%c1, %c0_16] : memref<2x640xf32, #tpu.memory_space<vmem>>, vector<1x640xf32>
    %c0_17 = arith.constant 0 : index
    %c0_18 = arith.constant 0 : index
    %11 = vector.load %arg5[%c0_17, %c0_18] : memref<32x96xf32, #tpu.memory_space<vmem>>, vector<32x96xf32>
    %cst = arith.constant dense<0.000000e+00> : vector<80x96xf32>
    %12 = tpu.matmul %3, %11, %cst {dimension_numbers = #tpu.dot_dimension_numbers<[1], [0], [0], [1], [0, 0, 1, 1], [], []>} : vector<80x32xf32>, vector<32x96xf32>, vector<80x96xf32> -> vector<80x96xf32>
    %c0_19 = arith.constant 0 : index
    %c0_20 = arith.constant 0 : index
    %c0_21 = arith.constant 0 : index
    %13 = vector.load %arg4[%c0_19, %c0_20, %c0_21] : memref<2x32x176xf32, #tpu.memory_space<vmem>>, vector<1x32x176xf32>
    %14 = vector.shape_cast %13 : vector<1x32x176xf32> to vector<32x176xf32>
    %c0_22 = arith.constant 0 : index
    %c0_23 = arith.constant 0 : index
    %c0_24 = arith.constant 0 : index
    %15 = vector.load %arg6[%c0_22, %c0_23, %c0_24] : memref<2x64x32xf32, #tpu.memory_space<vmem>>, vector<1x64x32xf32>
    %16 = vector.shape_cast %15 : vector<1x64x32xf32> to vector<64x32xf32>
    %c0_25 = arith.constant 0 : index
    %c0_26 = arith.constant 0 : index
    %c0_27 = arith.constant 0 : index
    %17 = vector.load %arg7[%c0_25, %c0_26, %c0_27] : memref<2x8x64xf32, #tpu.memory_space<vmem>>, vector<1x8x64xf32>
    %18 = vector.shape_cast %17 : vector<1x8x64xf32> to vector<8x64xf32>
    %19 = vector.extract_strided_slice %14 {offsets = [0, 0], sizes = [32, 80], strides = [1, 1]} : vector<32x176xf32> to vector<32x80xf32>
    %cst_28 = arith.constant dense<0.000000e+00> : vector<80x80xf32>
    %20 = tpu.matmul %1, %19, %cst_28 {dimension_numbers = #tpu.dot_dimension_numbers<[1], [0], [0], [1], [0, 0, 1, 1], [], []>} : vector<80x32xf32>, vector<32x80xf32>, vector<80x80xf32> -> vector<80x80xf32>
    %21 = vector.extract_strided_slice %20 {offsets = [0, 0], sizes = [80, 32], strides = [1, 1]} : vector<80x80xf32> to vector<80x32xf32>
    %22 = vector.extract_strided_slice %18 {offsets = [0, 0], sizes = [1, 32], strides = [1, 1]} : vector<8x64xf32> to vector<1x32xf32>
    %23 = vector.broadcast %22 : vector<1x32xf32> to vector<80x32xf32>
    %24 = arith.addf %21, %23 : vector<80x32xf32>
    %25 = vector.extract_strided_slice %20 {offsets = [0, 32], sizes = [80, 48], strides = [1, 1]} : vector<80x80xf32> to vector<80x48xf32>
    %26 = vector.extract_strided_slice %12 {offsets = [0, 0], sizes = [80, 48], strides = [1, 1]} : vector<80x96xf32> to vector<80x48xf32>
    %27 = arith.addf %25, %26 : vector<80x48xf32>
    %28 = vector.extract_strided_slice %18 {offsets = [1, 0], sizes = [1, 48], strides = [1, 1]} : vector<8x64xf32> to vector<1x48xf32>
    %29 = vector.broadcast %28 : vector<1x48xf32> to vector<80x48xf32>
    %30 = arith.addf %27, %29 : vector<80x48xf32>
    %31 = vector.extract_strided_slice %30 {offsets = [0, 0], sizes = [80, 32], strides = [1, 1]} : vector<80x48xf32> to vector<80x32xf32>
    %32 = vector.extract_strided_slice %30 {offsets = [0, 32], sizes = [80, 16], strides = [1, 1]} : vector<80x48xf32> to vector<80x16xf32>
    %33 = vector.extract_strided_slice %32 {offsets = [0, 0], sizes = [80, 8], strides = [1, 1]} : vector<80x16xf32> to vector<80x8xf32>
    %34 = vector.extract_strided_slice %32 {offsets = [0, 8], sizes = [80, 8], strides = [1, 1]} : vector<80x16xf32> to vector<80x8xf32>
    %35 = arith.maximumf %33, %34 : vector<80x8xf32>
    %36 = vector.extract_strided_slice %35 {offsets = [0, 0], sizes = [80, 4], strides = [1, 1]} : vector<80x8xf32> to vector<80x4xf32>
    %37 = vector.extract_strided_slice %35 {offsets = [0, 4], sizes = [80, 4], strides = [1, 1]} : vector<80x8xf32> to vector<80x4xf32>
    %38 = arith.maximumf %36, %37 : vector<80x4xf32>
    %39 = tpu.concatenate %38, %38, %38, %38 in 1 : vector<80x4xf32>, vector<80x4xf32>, vector<80x4xf32>, vector<80x4xf32> -> vector<80x16xf32>
    %40 = arith.subf %32, %39 : vector<80x16xf32>
    %41 = math.exp %40 : vector<80x16xf32>
    %42 = vector.extract_strided_slice %41 {offsets = [0, 0], sizes = [80, 8], strides = [1, 1]} : vector<80x16xf32> to vector<80x8xf32>
    %43 = vector.extract_strided_slice %41 {offsets = [0, 8], sizes = [80, 8], strides = [1, 1]} : vector<80x16xf32> to vector<80x8xf32>
    %44 = arith.addf %42, %43 : vector<80x8xf32>
    %45 = vector.extract_strided_slice %44 {offsets = [0, 0], sizes = [80, 4], strides = [1, 1]} : vector<80x8xf32> to vector<80x4xf32>
    %46 = vector.extract_strided_slice %44 {offsets = [0, 4], sizes = [80, 4], strides = [1, 1]} : vector<80x8xf32> to vector<80x4xf32>
    %47 = arith.addf %45, %46 : vector<80x4xf32>
    %48 = tpu.concatenate %47, %47, %47, %47 in 1 : vector<80x4xf32>, vector<80x4xf32>, vector<80x4xf32>, vector<80x4xf32> -> vector<80x16xf32>
    %49 = tpu.reciprocal %48 {approx = true} : vector<80x16xf32> -> vector<80x16xf32>
    %50 = arith.mulf %41, %49 : vector<80x16xf32>
    %51 = arith.addf %5, %31 : vector<80x32xf32>
    %52 = vector.extract_strided_slice %51 {offsets = [0, 0], sizes = [80, 16], strides = [1, 1]} : vector<80x32xf32> to vector<80x16xf32>
    %53 = vector.extract_strided_slice %51 {offsets = [0, 16], sizes = [80, 16], strides = [1, 1]} : vector<80x32xf32> to vector<80x16xf32>
    %54 = tpu.concatenate %52, %53, %50 in 0 : vector<80x16xf32>, vector<80x16xf32>, vector<80x16xf32> -> vector<240x16xf32>
    %cst_29 = arith.constant dense<0.000000e+00> : vector<240x640xf32>
    %55 = tpu.matmul %54, %6, %cst_29 {dimension_numbers = #tpu.dot_dimension_numbers<[1], [0], [0], [1], [0, 0, 1, 1], [], []>} : vector<240x16xf32>, vector<16x640xf32>, vector<240x640xf32> -> vector<240x640xf32>
    %56 = vector.extract_strided_slice %55 {offsets = [0, 0], sizes = [80, 640], strides = [1, 1]} : vector<240x640xf32> to vector<80x640xf32>
    %57 = vector.extract_strided_slice %55 {offsets = [80, 0], sizes = [80, 640], strides = [1, 1]} : vector<240x640xf32> to vector<80x640xf32>
    %58 = vector.extract_strided_slice %55 {offsets = [160, 0], sizes = [80, 640], strides = [1, 1]} : vector<240x640xf32> to vector<80x640xf32>
    %59 = vector.broadcast %9 : vector<1x640xf32> to vector<80x640xf32>
    %60 = arith.subf %59, %56 : vector<80x640xf32>
    %61 = math.absf %60 : vector<80x640xf32>
    %cst_30 = arith.constant 1.000000e+00 : f32
    %62 = vector.broadcast %cst_30 : f32 to vector<80x640xf32>
    %63 = arith.subf %62, %61 : vector<80x640xf32>
    %cst_31 = arith.constant 0.000000e+00 : f32
    %64 = vector.broadcast %cst_31 : f32 to vector<80x640xf32>
    %65 = arith.maximumf %63, %64 : vector<80x640xf32>
    %66 = vector.broadcast %10 : vector<1x640xf32> to vector<80x640xf32>
    %67 = arith.subf %66, %57 : vector<80x640xf32>
    %68 = math.absf %67 : vector<80x640xf32>
    %cst_32 = arith.constant 1.000000e+00 : f32
    %69 = vector.broadcast %cst_32 : f32 to vector<80x640xf32>
    %70 = arith.subf %69, %68 : vector<80x640xf32>
    %cst_33 = arith.constant 0.000000e+00 : f32
    %71 = vector.broadcast %cst_33 : f32 to vector<80x640xf32>
    %72 = arith.maximumf %70, %71 : vector<80x640xf32>
    %73 = arith.mulf %58, %65 : vector<80x640xf32>
    %74 = arith.mulf %73, %72 : vector<80x640xf32>
    %75 = arith.truncf %74 : vector<80x640xf32> to vector<80x640xbf16>
    %76 = arith.truncf %24 : vector<80x32xf32> to vector<80x32xbf16>
    %cst_34 = arith.constant dense<0.000000e+00> : vector<640x32xf32>
    %77 = tpu.matmul %7, %76, %cst_34 {dimension_numbers = #tpu.dot_dimension_numbers<[1], [0], [0], [1], [0, 0, 1, 1], [], []>} : vector<640x80xbf16>, vector<80x32xbf16>, vector<640x32xf32> -> vector<640x32xf32>
    %78 = arith.mulf %77, %8 : vector<640x32xf32>
    %79 = arith.truncf %78 : vector<640x32xf32> to vector<640x32xbf16>
    %cst_35 = arith.constant dense<0.000000e+00> : vector<80x32xf32>
    %80 = tpu.matmul %75, %79, %cst_35 {dimension_numbers = #tpu.dot_dimension_numbers<[1], [0], [0], [1], [0, 0, 1, 1], [], []>} : vector<80x640xbf16>, vector<640x32xbf16>, vector<80x32xf32> -> vector<80x32xf32>
    %81 = vector.extract_strided_slice %14 {offsets = [0, 80], sizes = [32, 32], strides = [1, 1]} : vector<32x176xf32> to vector<32x32xf32>
    %cst_36 = arith.constant dense<0.000000e+00> : vector<80x32xf32>
    %82 = tpu.matmul %80, %81, %cst_36 {dimension_numbers = #tpu.dot_dimension_numbers<[1], [0], [0], [1], [0, 0, 1, 1], [], []>} : vector<80x32xf32>, vector<32x32xf32>, vector<80x32xf32> -> vector<80x32xf32>
    %83 = vector.extract_strided_slice %18 {offsets = [2, 0], sizes = [1, 32], strides = [1, 1]} : vector<8x64xf32> to vector<1x32xf32>
    %84 = vector.broadcast %83 : vector<1x32xf32> to vector<80x32xf32>
    %85 = arith.addf %82, %84 : vector<80x32xf32>
    %86 = arith.addf %1, %85 : vector<80x32xf32>
    %cst_37 = arith.constant dense<0.000000e+00> : vector<80xf32>
    %87 = vector.multi_reduction <add>, %86, %cst_37 [1] : vector<80x32xf32> to vector<80xf32>
    %88 = vector.shape_cast %87 : vector<80xf32> to vector<80x1xf32>
    %cst_38 = arith.constant 3.200000e+01 : f32
    %89 = vector.broadcast %cst_38 : f32 to vector<80x1xf32>
    %90 = arith.divf %88, %89 : vector<80x1xf32>
    %91 = vector.broadcast %90 : vector<80x1xf32> to vector<80x32xf32>
    %92 = arith.subf %86, %91 : vector<80x32xf32>
    %93 = vector.broadcast %90 : vector<80x1xf32> to vector<80x32xf32>
    %94 = arith.subf %86, %93 : vector<80x32xf32>
    %95 = arith.mulf %92, %94 : vector<80x32xf32>
    %cst_39 = arith.constant dense<0.000000e+00> : vector<80xf32>
    %96 = vector.multi_reduction <add>, %95, %cst_39 [1] : vector<80x32xf32> to vector<80xf32>
    %97 = vector.shape_cast %96 : vector<80xf32> to vector<80x1xf32>
    %cst_40 = arith.constant 3.200000e+01 : f32
    %98 = vector.broadcast %cst_40 : f32 to vector<80x1xf32>
    %99 = arith.divf %97, %98 : vector<80x1xf32>
    %100 = vector.broadcast %90 : vector<80x1xf32> to vector<80x32xf32>
    %101 = arith.subf %86, %100 : vector<80x32xf32>
    %cst_41 = arith.constant 9.99999974E-6 : f32
    %102 = vector.broadcast %cst_41 : f32 to vector<80x1xf32>
    %103 = arith.addf %99, %102 : vector<80x1xf32>
    %104 = math.rsqrt %103 : vector<80x1xf32>
    %105 = vector.broadcast %104 : vector<80x1xf32> to vector<80x32xf32>
    %106 = arith.mulf %101, %105 : vector<80x32xf32>
    %107 = vector.extract_strided_slice %18 {offsets = [3, 0], sizes = [1, 32], strides = [1, 1]} : vector<8x64xf32> to vector<1x32xf32>
    %108 = vector.broadcast %107 : vector<1x32xf32> to vector<80x32xf32>
    %109 = arith.mulf %106, %108 : vector<80x32xf32>
    %110 = vector.extract_strided_slice %18 {offsets = [3, 32], sizes = [1, 32], strides = [1, 1]} : vector<8x64xf32> to vector<1x32xf32>
    %111 = vector.broadcast %110 : vector<1x32xf32> to vector<80x32xf32>
    %112 = arith.addf %109, %111 : vector<80x32xf32>
    %113 = vector.extract_strided_slice %14 {offsets = [0, 112], sizes = [32, 64], strides = [1, 1]} : vector<32x176xf32> to vector<32x64xf32>
    %cst_42 = arith.constant dense<0.000000e+00> : vector<80x64xf32>
    %114 = tpu.matmul %112, %113, %cst_42 {dimension_numbers = #tpu.dot_dimension_numbers<[1], [0], [0], [1], [0, 0, 1, 1], [], []>} : vector<80x32xf32>, vector<32x64xf32>, vector<80x64xf32> -> vector<80x64xf32>
    %115 = vector.extract_strided_slice %18 {offsets = [4, 0], sizes = [1, 64], strides = [1, 1]} : vector<8x64xf32> to vector<1x64xf32>
    %116 = vector.broadcast %115 : vector<1x64xf32> to vector<80x64xf32>
    %117 = arith.addf %114, %116 : vector<80x64xf32>
    %cst_43 = arith.constant 0.000000e+00 : f32
    %118 = vector.broadcast %cst_43 : f32 to vector<80x64xf32>
    %119 = arith.maximumf %117, %118 : vector<80x64xf32>
    %cst_44 = arith.constant dense<0.000000e+00> : vector<80x32xf32>
    %120 = tpu.matmul %119, %16, %cst_44 {dimension_numbers = #tpu.dot_dimension_numbers<[1], [0], [0], [1], [0, 0, 1, 1], [], []>} : vector<80x64xf32>, vector<64x32xf32>, vector<80x32xf32> -> vector<80x32xf32>
    %121 = vector.extract_strided_slice %18 {offsets = [5, 0], sizes = [1, 32], strides = [1, 1]} : vector<8x64xf32> to vector<1x32xf32>
    %122 = vector.broadcast %121 : vector<1x32xf32> to vector<80x32xf32>
    %123 = arith.addf %120, %122 : vector<80x32xf32>
    %124 = arith.addf %112, %123 : vector<80x32xf32>
    %cst_45 = arith.constant dense<0.000000e+00> : vector<80xf32>
    %125 = vector.multi_reduction <add>, %124, %cst_45 [1] : vector<80x32xf32> to vector<80xf32>
    %126 = vector.shape_cast %125 : vector<80xf32> to vector<80x1xf32>
    %cst_46 = arith.constant 3.200000e+01 : f32
    %127 = vector.broadcast %cst_46 : f32 to vector<80x1xf32>
    %128 = arith.divf %126, %127 : vector<80x1xf32>
    %129 = vector.broadcast %128 : vector<80x1xf32> to vector<80x32xf32>
    %130 = arith.subf %124, %129 : vector<80x32xf32>
    %131 = vector.broadcast %128 : vector<80x1xf32> to vector<80x32xf32>
    %132 = arith.subf %124, %131 : vector<80x32xf32>
    %133 = arith.mulf %130, %132 : vector<80x32xf32>
    %cst_47 = arith.constant dense<0.000000e+00> : vector<80xf32>
    %134 = vector.multi_reduction <add>, %133, %cst_47 [1] : vector<80x32xf32> to vector<80xf32>
    %135 = vector.shape_cast %134 : vector<80xf32> to vector<80x1xf32>
    %cst_48 = arith.constant 3.200000e+01 : f32
    %136 = vector.broadcast %cst_48 : f32 to vector<80x1xf32>
    %137 = arith.divf %135, %136 : vector<80x1xf32>
    %138 = vector.broadcast %128 : vector<80x1xf32> to vector<80x32xf32>
    %139 = arith.subf %124, %138 : vector<80x32xf32>
    %cst_49 = arith.constant 9.99999974E-6 : f32
    %140 = vector.broadcast %cst_49 : f32 to vector<80x1xf32>
    %141 = arith.addf %137, %140 : vector<80x1xf32>
    %142 = math.rsqrt %141 : vector<80x1xf32>
    %143 = vector.broadcast %142 : vector<80x1xf32> to vector<80x32xf32>
    %144 = arith.mulf %139, %143 : vector<80x32xf32>
    %145 = vector.extract_strided_slice %18 {offsets = [6, 0], sizes = [1, 32], strides = [1, 1]} : vector<8x64xf32> to vector<1x32xf32>
    %146 = vector.broadcast %145 : vector<1x32xf32> to vector<80x32xf32>
    %147 = arith.mulf %144, %146 : vector<80x32xf32>
    %148 = vector.extract_strided_slice %18 {offsets = [6, 32], sizes = [1, 32], strides = [1, 1]} : vector<8x64xf32> to vector<1x32xf32>
    %149 = vector.broadcast %148 : vector<1x32xf32> to vector<80x32xf32>
    %150 = arith.addf %147, %149 : vector<80x32xf32>
    %c1_50 = arith.constant 1 : index
    %c0_51 = arith.constant 0 : index
    %c0_52 = arith.constant 0 : index
    %151 = vector.load %arg4[%c1_50, %c0_51, %c0_52] : memref<2x32x176xf32, #tpu.memory_space<vmem>>, vector<1x32x176xf32>
    %152 = vector.shape_cast %151 : vector<1x32x176xf32> to vector<32x176xf32>
    %c1_53 = arith.constant 1 : index
    %c0_54 = arith.constant 0 : index
    %c0_55 = arith.constant 0 : index
    %153 = vector.load %arg6[%c1_53, %c0_54, %c0_55] : memref<2x64x32xf32, #tpu.memory_space<vmem>>, vector<1x64x32xf32>
    %154 = vector.shape_cast %153 : vector<1x64x32xf32> to vector<64x32xf32>
    %c1_56 = arith.constant 1 : index
    %c0_57 = arith.constant 0 : index
    %c0_58 = arith.constant 0 : index
    %155 = vector.load %arg7[%c1_56, %c0_57, %c0_58] : memref<2x8x64xf32, #tpu.memory_space<vmem>>, vector<1x8x64xf32>
    %156 = vector.shape_cast %155 : vector<1x8x64xf32> to vector<8x64xf32>
    %157 = vector.extract_strided_slice %152 {offsets = [0, 0], sizes = [32, 80], strides = [1, 1]} : vector<32x176xf32> to vector<32x80xf32>
    %cst_59 = arith.constant dense<0.000000e+00> : vector<80x80xf32>
    %158 = tpu.matmul %150, %157, %cst_59 {dimension_numbers = #tpu.dot_dimension_numbers<[1], [0], [0], [1], [0, 0, 1, 1], [], []>} : vector<80x32xf32>, vector<32x80xf32>, vector<80x80xf32> -> vector<80x80xf32>
    %159 = vector.extract_strided_slice %158 {offsets = [0, 0], sizes = [80, 32], strides = [1, 1]} : vector<80x80xf32> to vector<80x32xf32>
    %160 = vector.extract_strided_slice %156 {offsets = [0, 0], sizes = [1, 32], strides = [1, 1]} : vector<8x64xf32> to vector<1x32xf32>
    %161 = vector.broadcast %160 : vector<1x32xf32> to vector<80x32xf32>
    %162 = arith.addf %159, %161 : vector<80x32xf32>
    %163 = vector.extract_strided_slice %158 {offsets = [0, 32], sizes = [80, 48], strides = [1, 1]} : vector<80x80xf32> to vector<80x48xf32>
    %164 = vector.extract_strided_slice %12 {offsets = [0, 48], sizes = [80, 48], strides = [1, 1]} : vector<80x96xf32> to vector<80x48xf32>
    %165 = arith.addf %163, %164 : vector<80x48xf32>
    %166 = vector.extract_strided_slice %156 {offsets = [1, 0], sizes = [1, 48], strides = [1, 1]} : vector<8x64xf32> to vector<1x48xf32>
    %167 = vector.broadcast %166 : vector<1x48xf32> to vector<80x48xf32>
    %168 = arith.addf %165, %167 : vector<80x48xf32>
    %169 = vector.extract_strided_slice %168 {offsets = [0, 0], sizes = [80, 32], strides = [1, 1]} : vector<80x48xf32> to vector<80x32xf32>
    %170 = vector.extract_strided_slice %168 {offsets = [0, 32], sizes = [80, 16], strides = [1, 1]} : vector<80x48xf32> to vector<80x16xf32>
    %171 = vector.extract_strided_slice %170 {offsets = [0, 0], sizes = [80, 8], strides = [1, 1]} : vector<80x16xf32> to vector<80x8xf32>
    %172 = vector.extract_strided_slice %170 {offsets = [0, 8], sizes = [80, 8], strides = [1, 1]} : vector<80x16xf32> to vector<80x8xf32>
    %173 = arith.maximumf %171, %172 : vector<80x8xf32>
    %174 = vector.extract_strided_slice %173 {offsets = [0, 0], sizes = [80, 4], strides = [1, 1]} : vector<80x8xf32> to vector<80x4xf32>
    %175 = vector.extract_strided_slice %173 {offsets = [0, 4], sizes = [80, 4], strides = [1, 1]} : vector<80x8xf32> to vector<80x4xf32>
    %176 = arith.maximumf %174, %175 : vector<80x4xf32>
    %177 = tpu.concatenate %176, %176, %176, %176 in 1 : vector<80x4xf32>, vector<80x4xf32>, vector<80x4xf32>, vector<80x4xf32> -> vector<80x16xf32>
    %178 = arith.subf %170, %177 : vector<80x16xf32>
    %179 = math.exp %178 : vector<80x16xf32>
    %180 = vector.extract_strided_slice %179 {offsets = [0, 0], sizes = [80, 8], strides = [1, 1]} : vector<80x16xf32> to vector<80x8xf32>
    %181 = vector.extract_strided_slice %179 {offsets = [0, 8], sizes = [80, 8], strides = [1, 1]} : vector<80x16xf32> to vector<80x8xf32>
    %182 = arith.addf %180, %181 : vector<80x8xf32>
    %183 = vector.extract_strided_slice %182 {offsets = [0, 0], sizes = [80, 4], strides = [1, 1]} : vector<80x8xf32> to vector<80x4xf32>
    %184 = vector.extract_strided_slice %182 {offsets = [0, 4], sizes = [80, 4], strides = [1, 1]} : vector<80x8xf32> to vector<80x4xf32>
    %185 = arith.addf %183, %184 : vector<80x4xf32>
    %186 = tpu.concatenate %185, %185, %185, %185 in 1 : vector<80x4xf32>, vector<80x4xf32>, vector<80x4xf32>, vector<80x4xf32> -> vector<80x16xf32>
    %187 = tpu.reciprocal %186 {approx = true} : vector<80x16xf32> -> vector<80x16xf32>
    %188 = arith.mulf %179, %187 : vector<80x16xf32>
    %189 = arith.addf %5, %169 : vector<80x32xf32>
    %190 = vector.extract_strided_slice %189 {offsets = [0, 0], sizes = [80, 16], strides = [1, 1]} : vector<80x32xf32> to vector<80x16xf32>
    %191 = vector.extract_strided_slice %189 {offsets = [0, 16], sizes = [80, 16], strides = [1, 1]} : vector<80x32xf32> to vector<80x16xf32>
    %192 = tpu.concatenate %190, %191, %188 in 0 : vector<80x16xf32>, vector<80x16xf32>, vector<80x16xf32> -> vector<240x16xf32>
    %cst_60 = arith.constant dense<0.000000e+00> : vector<240x640xf32>
    %193 = tpu.matmul %192, %6, %cst_60 {dimension_numbers = #tpu.dot_dimension_numbers<[1], [0], [0], [1], [0, 0, 1, 1], [], []>} : vector<240x16xf32>, vector<16x640xf32>, vector<240x640xf32> -> vector<240x640xf32>
    %194 = vector.extract_strided_slice %193 {offsets = [0, 0], sizes = [80, 640], strides = [1, 1]} : vector<240x640xf32> to vector<80x640xf32>
    %195 = vector.extract_strided_slice %193 {offsets = [80, 0], sizes = [80, 640], strides = [1, 1]} : vector<240x640xf32> to vector<80x640xf32>
    %196 = vector.extract_strided_slice %193 {offsets = [160, 0], sizes = [80, 640], strides = [1, 1]} : vector<240x640xf32> to vector<80x640xf32>
    %197 = vector.broadcast %9 : vector<1x640xf32> to vector<80x640xf32>
    %198 = arith.subf %197, %194 : vector<80x640xf32>
    %199 = math.absf %198 : vector<80x640xf32>
    %cst_61 = arith.constant 1.000000e+00 : f32
    %200 = vector.broadcast %cst_61 : f32 to vector<80x640xf32>
    %201 = arith.subf %200, %199 : vector<80x640xf32>
    %cst_62 = arith.constant 0.000000e+00 : f32
    %202 = vector.broadcast %cst_62 : f32 to vector<80x640xf32>
    %203 = arith.maximumf %201, %202 : vector<80x640xf32>
    %204 = vector.broadcast %10 : vector<1x640xf32> to vector<80x640xf32>
    %205 = arith.subf %204, %195 : vector<80x640xf32>
    %206 = math.absf %205 : vector<80x640xf32>
    %cst_63 = arith.constant 1.000000e+00 : f32
    %207 = vector.broadcast %cst_63 : f32 to vector<80x640xf32>
    %208 = arith.subf %207, %206 : vector<80x640xf32>
    %cst_64 = arith.constant 0.000000e+00 : f32
    %209 = vector.broadcast %cst_64 : f32 to vector<80x640xf32>
    %210 = arith.maximumf %208, %209 : vector<80x640xf32>
    %211 = arith.mulf %196, %203 : vector<80x640xf32>
    %212 = arith.mulf %211, %210 : vector<80x640xf32>
    %213 = arith.truncf %212 : vector<80x640xf32> to vector<80x640xbf16>
    %214 = arith.truncf %162 : vector<80x32xf32> to vector<80x32xbf16>
    %cst_65 = arith.constant dense<0.000000e+00> : vector<640x32xf32>
    %215 = tpu.matmul %7, %214, %cst_65 {dimension_numbers = #tpu.dot_dimension_numbers<[1], [0], [0], [1], [0, 0, 1, 1], [], []>} : vector<640x80xbf16>, vector<80x32xbf16>, vector<640x32xf32> -> vector<640x32xf32>
    %216 = arith.mulf %215, %8 : vector<640x32xf32>
    %217 = arith.truncf %216 : vector<640x32xf32> to vector<640x32xbf16>
    %cst_66 = arith.constant dense<0.000000e+00> : vector<80x32xf32>
    %218 = tpu.matmul %213, %217, %cst_66 {dimension_numbers = #tpu.dot_dimension_numbers<[1], [0], [0], [1], [0, 0, 1, 1], [], []>} : vector<80x640xbf16>, vector<640x32xbf16>, vector<80x32xf32> -> vector<80x32xf32>
    %219 = vector.extract_strided_slice %152 {offsets = [0, 80], sizes = [32, 32], strides = [1, 1]} : vector<32x176xf32> to vector<32x32xf32>
    %cst_67 = arith.constant dense<0.000000e+00> : vector<80x32xf32>
    %220 = tpu.matmul %218, %219, %cst_67 {dimension_numbers = #tpu.dot_dimension_numbers<[1], [0], [0], [1], [0, 0, 1, 1], [], []>} : vector<80x32xf32>, vector<32x32xf32>, vector<80x32xf32> -> vector<80x32xf32>
    %221 = vector.extract_strided_slice %156 {offsets = [2, 0], sizes = [1, 32], strides = [1, 1]} : vector<8x64xf32> to vector<1x32xf32>
    %222 = vector.broadcast %221 : vector<1x32xf32> to vector<80x32xf32>
    %223 = arith.addf %220, %222 : vector<80x32xf32>
    %224 = arith.addf %150, %223 : vector<80x32xf32>
    %cst_68 = arith.constant dense<0.000000e+00> : vector<80xf32>
    %225 = vector.multi_reduction <add>, %224, %cst_68 [1] : vector<80x32xf32> to vector<80xf32>
    %226 = vector.shape_cast %225 : vector<80xf32> to vector<80x1xf32>
    %cst_69 = arith.constant 3.200000e+01 : f32
    %227 = vector.broadcast %cst_69 : f32 to vector<80x1xf32>
    %228 = arith.divf %226, %227 : vector<80x1xf32>
    %229 = vector.broadcast %228 : vector<80x1xf32> to vector<80x32xf32>
    %230 = arith.subf %224, %229 : vector<80x32xf32>
    %231 = vector.broadcast %228 : vector<80x1xf32> to vector<80x32xf32>
    %232 = arith.subf %224, %231 : vector<80x32xf32>
    %233 = arith.mulf %230, %232 : vector<80x32xf32>
    %cst_70 = arith.constant dense<0.000000e+00> : vector<80xf32>
    %234 = vector.multi_reduction <add>, %233, %cst_70 [1] : vector<80x32xf32> to vector<80xf32>
    %235 = vector.shape_cast %234 : vector<80xf32> to vector<80x1xf32>
    %cst_71 = arith.constant 3.200000e+01 : f32
    %236 = vector.broadcast %cst_71 : f32 to vector<80x1xf32>
    %237 = arith.divf %235, %236 : vector<80x1xf32>
    %238 = vector.broadcast %228 : vector<80x1xf32> to vector<80x32xf32>
    %239 = arith.subf %224, %238 : vector<80x32xf32>
    %cst_72 = arith.constant 9.99999974E-6 : f32
    %240 = vector.broadcast %cst_72 : f32 to vector<80x1xf32>
    %241 = arith.addf %237, %240 : vector<80x1xf32>
    %242 = math.rsqrt %241 : vector<80x1xf32>
    %243 = vector.broadcast %242 : vector<80x1xf32> to vector<80x32xf32>
    %244 = arith.mulf %239, %243 : vector<80x32xf32>
    %245 = vector.extract_strided_slice %156 {offsets = [3, 0], sizes = [1, 32], strides = [1, 1]} : vector<8x64xf32> to vector<1x32xf32>
    %246 = vector.broadcast %245 : vector<1x32xf32> to vector<80x32xf32>
    %247 = arith.mulf %244, %246 : vector<80x32xf32>
    %248 = vector.extract_strided_slice %156 {offsets = [3, 32], sizes = [1, 32], strides = [1, 1]} : vector<8x64xf32> to vector<1x32xf32>
    %249 = vector.broadcast %248 : vector<1x32xf32> to vector<80x32xf32>
    %250 = arith.addf %247, %249 : vector<80x32xf32>
    %251 = vector.extract_strided_slice %152 {offsets = [0, 112], sizes = [32, 64], strides = [1, 1]} : vector<32x176xf32> to vector<32x64xf32>
    %cst_73 = arith.constant dense<0.000000e+00> : vector<80x64xf32>
    %252 = tpu.matmul %250, %251, %cst_73 {dimension_numbers = #tpu.dot_dimension_numbers<[1], [0], [0], [1], [0, 0, 1, 1], [], []>} : vector<80x32xf32>, vector<32x64xf32>, vector<80x64xf32> -> vector<80x64xf32>
    %253 = vector.extract_strided_slice %156 {offsets = [4, 0], sizes = [1, 64], strides = [1, 1]} : vector<8x64xf32> to vector<1x64xf32>
    %254 = vector.broadcast %253 : vector<1x64xf32> to vector<80x64xf32>
    %255 = arith.addf %252, %254 : vector<80x64xf32>
    %cst_74 = arith.constant 0.000000e+00 : f32
    %256 = vector.broadcast %cst_74 : f32 to vector<80x64xf32>
    %257 = arith.maximumf %255, %256 : vector<80x64xf32>
    %cst_75 = arith.constant dense<0.000000e+00> : vector<80x32xf32>
    %258 = tpu.matmul %257, %154, %cst_75 {dimension_numbers = #tpu.dot_dimension_numbers<[1], [0], [0], [1], [0, 0, 1, 1], [], []>} : vector<80x64xf32>, vector<64x32xf32>, vector<80x32xf32> -> vector<80x32xf32>
    %259 = vector.extract_strided_slice %156 {offsets = [5, 0], sizes = [1, 32], strides = [1, 1]} : vector<8x64xf32> to vector<1x32xf32>
    %260 = vector.broadcast %259 : vector<1x32xf32> to vector<80x32xf32>
    %261 = arith.addf %258, %260 : vector<80x32xf32>
    %262 = arith.addf %250, %261 : vector<80x32xf32>
    %cst_76 = arith.constant dense<0.000000e+00> : vector<80xf32>
    %263 = vector.multi_reduction <add>, %262, %cst_76 [1] : vector<80x32xf32> to vector<80xf32>
    %264 = vector.shape_cast %263 : vector<80xf32> to vector<80x1xf32>
    %cst_77 = arith.constant 3.200000e+01 : f32
    %265 = vector.broadcast %cst_77 : f32 to vector<80x1xf32>
    %266 = arith.divf %264, %265 : vector<80x1xf32>
    %267 = vector.broadcast %266 : vector<80x1xf32> to vector<80x32xf32>
    %268 = arith.subf %262, %267 : vector<80x32xf32>
    %269 = vector.broadcast %266 : vector<80x1xf32> to vector<80x32xf32>
    %270 = arith.subf %262, %269 : vector<80x32xf32>
    %271 = arith.mulf %268, %270 : vector<80x32xf32>
    %cst_78 = arith.constant dense<0.000000e+00> : vector<80xf32>
    %272 = vector.multi_reduction <add>, %271, %cst_78 [1] : vector<80x32xf32> to vector<80xf32>
    %273 = vector.shape_cast %272 : vector<80xf32> to vector<80x1xf32>
    %cst_79 = arith.constant 3.200000e+01 : f32
    %274 = vector.broadcast %cst_79 : f32 to vector<80x1xf32>
    %275 = arith.divf %273, %274 : vector<80x1xf32>
    %276 = vector.broadcast %266 : vector<80x1xf32> to vector<80x32xf32>
    %277 = arith.subf %262, %276 : vector<80x32xf32>
    %cst_80 = arith.constant 9.99999974E-6 : f32
    %278 = vector.broadcast %cst_80 : f32 to vector<80x1xf32>
    %279 = arith.addf %275, %278 : vector<80x1xf32>
    %280 = math.rsqrt %279 : vector<80x1xf32>
    %281 = vector.broadcast %280 : vector<80x1xf32> to vector<80x32xf32>
    %282 = arith.mulf %277, %281 : vector<80x32xf32>
    %283 = vector.extract_strided_slice %156 {offsets = [6, 0], sizes = [1, 32], strides = [1, 1]} : vector<8x64xf32> to vector<1x32xf32>
    %284 = vector.broadcast %283 : vector<1x32xf32> to vector<80x32xf32>
    %285 = arith.mulf %282, %284 : vector<80x32xf32>
    %286 = vector.extract_strided_slice %156 {offsets = [6, 32], sizes = [1, 32], strides = [1, 1]} : vector<8x64xf32> to vector<1x32xf32>
    %287 = vector.broadcast %286 : vector<1x32xf32> to vector<80x32xf32>
    %288 = arith.addf %285, %287 : vector<80x32xf32>
    %c0_81 = arith.constant 0 : index
    %c0_82 = arith.constant 0 : index
    %c0_83 = arith.constant 0 : index
    %289 = vector.load %arg12[%c0_81, %c0_82, %c0_83] : memref<1x80x32xf32, #tpu.memory_space<vmem>>, vector<1x80x32xf32>
    %290 = vector.shape_cast %289 : vector<1x80x32xf32> to vector<80x32xf32>
    %291 = vector.shape_cast %288 : vector<80x32xf32> to vector<1x80x32xf32>
    tpu.vector_store %arg12[%c0_81, %c0_82, %c0_83], %291 {strides = array<i32>} : memref<1x80x32xf32, #tpu.memory_space<vmem>>, vector<1x80x32xf32>,
    return
  }
  func.func @transform_0(%arg0: i32) -> (i32, i32, i32) {
    %c0_i32 = arith.constant 0 : i32
    %c0_i32_0 = arith.constant 0 : i32
    %c0_i32_1 = arith.constant 0 : i32
    return %arg0, %c0_i32, %c0_i32_0 : i32, i32, i32
  }
  func.func @transform_1(%arg0: i32) -> (i32, i32, i32) {
    %c0_i32 = arith.constant 0 : i32
    %c0_i32_0 = arith.constant 0 : i32
    %c0_i32_1 = arith.constant 0 : i32
    return %arg0, %c0_i32, %c0_i32_0 : i32, i32, i32
  }
  func.func @transform_2(%arg0: i32) -> (i32, i32, i32) {
    %c0_i32 = arith.constant 0 : i32
    %c0_i32_0 = arith.constant 0 : i32
    %c0_i32_1 = arith.constant 0 : i32
    return %arg0, %c0_i32, %c0_i32_0 : i32, i32, i32
  }
  func.func @transform_3(%arg0: i32) -> (i32, i32, i32) {
    %c0_i32 = arith.constant 0 : i32
    %c0_i32_0 = arith.constant 0 : i32
    %c0_i32_1 = arith.constant 0 : i32
    %c0_i32_2 = arith.constant 0 : i32
    return %c0_i32, %c0_i32_0, %c0_i32_1 : i32, i32, i32
  }
  func.func @transform_4(%arg0: i32) -> (i32, i32) {
    %c0_i32 = arith.constant 0 : i32
    %c0_i32_0 = arith.constant 0 : i32
    %c0_i32_1 = arith.constant 0 : i32
    return %c0_i32, %c0_i32_0 : i32, i32
  }
  func.func @transform_5(%arg0: i32) -> (i32, i32, i32) {
    %c0_i32 = arith.constant 0 : i32
    %c0_i32_0 = arith.constant 0 : i32
    %c0_i32_1 = arith.constant 0 : i32
    %c0_i32_2 = arith.constant 0 : i32
    return %c0_i32, %c0_i32_0, %c0_i32_1 : i32, i32, i32
  }
  func.func @transform_6(%arg0: i32) -> (i32, i32, i32) {
    %c0_i32 = arith.constant 0 : i32
    %c0_i32_0 = arith.constant 0 : i32
    %c0_i32_1 = arith.constant 0 : i32
    %c0_i32_2 = arith.constant 0 : i32
    return %c0_i32, %c0_i32_0, %c0_i32_1 : i32, i32, i32
  }
  func.func @transform_7(%arg0: i32) -> (i32, i32) {
    %c0_i32 = arith.constant 0 : i32
    %c0_i32_0 = arith.constant 0 : i32
    %c0_i32_1 = arith.constant 0 : i32
    return %c0_i32, %c0_i32_0 : i32, i32
  }
  func.func @transform_8(%arg0: i32) -> (i32, i32) {
    %c0_i32 = arith.constant 0 : i32
    %c0_i32_0 = arith.constant 0 : i32
    %c0_i32_1 = arith.constant 0 : i32
    return %c0_i32, %c0_i32_0 : i32, i32
  }
  func.func @transform_9(%arg0: i32) -> (i32, i32) {
    %c0_i32 = arith.constant 0 : i32
    %c0_i32_0 = arith.constant 0 : i32
    %c0_i32_1 = arith.constant 0 : i32
    return %c0_i32, %c0_i32_0 : i32, i32
  }
  func.func @transform_10(%arg0: i32) -> (i32, i32) {
    %c0_i32 = arith.constant 0 : i32
    %c0_i32_0 = arith.constant 0 : i32
    %c0_i32_1 = arith.constant 0 : i32
    return %c0_i32, %c0_i32_0 : i32, i32
  }
  func.func @transform_11(%arg0: i32) -> (i32, i32, i32) {
    %c0_i32 = arith.constant 0 : i32
    %c0_i32_0 = arith.constant 0 : i32
    %c0_i32_1 = arith.constant 0 : i32
    return %arg0, %c0_i32, %c0_i32_0 : i32, i32, i32
  }
}

</mosaic_0001>

<bundles_post_ra>
// kernel: deformable_transformer_encoder.1
= control target key start
LH: loop header
LB: loop body
LE: loop exit
PB: predicated region body
PF: predicated region fallthrough
CT: control target
= control target key end

     0   :  { %s11002_s17 = smov 0   ;;  %s16101_s0 = inlined_call_operand.vmem [shape: f32[2,80,32], index: 0, kind: input, shape index: {}]   ;;  %s16102_s1 = inlined_call_operand.vmem [shape: f32[2,80,32], index: 1, kind: input, shape index: {}]   ;;  %s16103_s2 = inlined_call_operand.vmem [shape: f32[2,80,32], index: 2, kind: input, shape index: {}]   ;;  %s16104_s3 = inlined_call_operand.vmem [shape: f32[2,32,176], index: 3, kind: input, shape index: {}]   ;;  %s16105_s4 = inlined_call_operand.vmem [shape: f32[32,96], index: 4, kind: input, shape index: {}]   ;;  %s16106_s5 = inlined_call_operand.vmem [shape: f32[2,64,32], index: 5, kind: input, shape index: {}]   ;;  %s16107_s6 = inlined_call_operand.vmem [shape: f32[2,8,64], index: 6, kind: input, shape index: {}]   ;;  %s16108_s7 = inlined_call_operand.vmem [shape: f32[16,640], index: 7, kind: input, shape index: {}]   ;;  %s16109_s8 = inlined_call_operand.vmem [shape: bf16[640,80], index: 8, kind: input, shape index: {}]   ;;  %s16110_s9 = inlined_call_operand.vmem [shape: f32[640,32], index: 9, kind: input, shape index: {}]   ;;  %s16111_s10 = inlined_call_operand.vmem [shape: f32[2,640], index: 10, kind: input, shape index: {}]   ;;  %s16112_s11 = inlined_call_operand.vmem [shape: f32[2,80,32], index: 11, kind: output, shape index: {}]  }
   0x1 LB: > { %s8878_s18 = sadd.s32 4294967295, %s10927_s17   ;;  %p8882_p0 = scmp.ge.s32.totalorder %s10927_s17, 1  ;;  %s10927_s17 = sphi %s11002_s17, %s21_s17  }
   0x2   : > { %p357_p1 = scmp.lt.s32.totalorder %s10927_s17, 3 }
   0x4   : > { %p358_p2 = pnand %p8882_p0, %p357_p1 }
   0x6   : > { %361 = sbr.rel (%p358_p2) target bundleno = 6844 (0x1abc), region = 64 }
   0xd   : > { %v631_v0 = vld [vmem:[%s16105_s4] sm:$0xff]  ;;  %v632_v1 = vld [vmem:[%s16105_s4 + $0x8] sm:$0xff]  ;;  %v633_v2 = vld [vmem:[%s16105_s4 + $0x10] sm:$0xff]  ;;  %p407_p3 = scmp.lt.s32.totalorder %s8878_s18, 1  ;;  %vm635_vm0 = vcmask 261120   ;;  %v943_v32 = vlaneseq  ;;  %s10929_s16 = smov 32  }
   0xe   : > { %v10368_v3 = vpack.c.bf16 %v632_v1, %v631_v0  ;;  %v634_v4 = vld [vmem:[%s16105_s4 + $0x18] sm:$0xff]  ;;  %v781_v6 = vld [vmem:[%s16104_s3] sm:$0xff]  ;;  %v783_v7 = vld [vmem:[%s16104_s3 + $0x10] sm:$0xff]  ;;  %s10930_s19 = smov 120   ;;  %s10931_s20 = smov 124   ;;  %vm1255_vm1 = vcmask 31744  }
   0xf   : > { %v10372_v5 = vpack.c.bf16 %v634_v4, %v633_v2  ;;  %s16721_s18 = smov (!%p407_p3, %s8878_s18), 1  ;;  %v10376_v8 = vpack.c.bf16 %v783_v7, %v781_v6  ;;  %v785_v10 = vld [vmem:[%s16104_s3 + $0x20] sm:$0xff]  ;;  %v787_v11 = vld [vmem:[%s16104_s3 + $0x30] sm:$0xff]  ;;  %v461_v33 = vld [vmem:[%s16108_s7 + $0x18] sm:$0xff]  ;;  %v11090_v38 = vshrl.u32 %v943_v32, 7  ;;  %s10932_s21 = smov 68  }
  0x10   : > { %10369 = vmatprep.subr.bf16.mxu0 %v10368_v3  ;;  %10480 = vmatprep.subr.bf16.mxu1 %v10368_v3  ;;  %s11028_s12 = smul.u32 80, %s16721_s18  ;;  %v10380_v17 = vpack.c.bf16 %v787_v11, %v785_v10  ;;  %v466_v34 = vld [vmem:[%s16108_s7 + $0x40] sm:$0xff]  ;;  %v460_v36 = vld [vmem:[%s16108_s7 + $0x10] sm:$0xff]  ;;  %v465_v37 = vld [vmem:[%s16108_s7 + $0x38] sm:$0xff]  ;;  %s16160_s18 = smov 64   ;;  %vm1266_vm2 = vcmask 64512  }
  0x11   : > { %10371 = vmatpush3.bf16.msra.mxu0 %v10368_v3  ;;  %10482 = vmatpush3.bf16.msra.mxu1 %v10368_v3  ;;  %v11082_v35 = vpack.c.bf16 %v466_v34, %v461_v33  ;;  %16250 = vst [vmem:[#allocation3_spill] sm:$0xff] %v11090_v38  ;;  %v11092_v39 = vpack.c.bf16 %v465_v37, %v460_v36  ;;  %v11097_v40 = vsub.s32 1, %v11090_v38  ;;  %v797_v41 = vld [vmem:[%s16107_s6] sm:$0xff]  ;;  %v11113_v45 = vsub.s32 0, %v11090_v38  ;;  %s16133_s22 = smov 76   ;;  %s16131_s24 = smov 72  }
  0x12   : > { %10373 = vmatprep.subr.bf16.mxu0 %v10372_v5  ;;  %10481 = vmatprep.subr.bf16.mxu1 %v10372_v5  ;;  %s416_s15 = scalar_lea.vmem %s16102_s1, %s11028_s12  ;;  %s11046_s23 = scalar_lea.vmem %s16101_s0, %s11028_s12  ;;  %vm1277_vm3 = vcmask 97280   ;;  %vm1778_vm4 = vcmask 130048   ;;  %vm3326_vm5 = vcmask 654336   ;;  %vm10940_vm6 = vmmov 0  }
  0x13   : > { %v438_v9 = vld [vmem:[%s416_s15] sm:$0xff]  ;;  %v439_v12 = vld [vmem:[%s416_s15 + $0x8] sm:$0xff]  ;;  %v440_v13 = vld [vmem:[%s416_s15 + $0x10] sm:$0xff]  ;;  %16249 = vst [vmem:[#allocation2_spill] sm:$0xff] %v11082_v35  ;;  %v1010_v46 = vrot.slane %v797_v41, %v11097_v40  ;;  %v946_v51 = vrot.slane %v797_v41, %v11113_v45  ;;  %s11489_s27 = scalar_lea.vmem %s16103_s2, %s11028_s12  ;;  %s10938_s28 = smov 112   ;;  %vm4664_vm7 = vcmask 523264  }
  0x14   : > { %9803 = vmatprep.mubr.msk.f32.mxu0 %vm635_vm0, %v438_v9  ;;  %v444_v14 = vld [vmem:[%s416_s15 + $0x30] sm:$0xff]  ;;  %v445_v15 = vld [vmem:[%s416_s15 + $0x38] sm:$0xff]  ;;  %v446_v16 = vld [vmem:[%s416_s15 + $0x40] sm:$0xff]  ;;  %16251 = vst [vmem:[#allocation4_spill] sm:$0xff] %v11092_v39  ;;  %s16201_s25 = smov 48   ;;  %s16199_s30 = smov 16  }
  0x15   : > { %10375 = vmatpush3.bf16.msra.mxu0 %v10372_v5  ;;  %10483 = vmatpush3.bf16.msra.mxu1 %v10372_v5  ;;  %v441_v18 = vld [vmem:[%s416_s15 + $0x18] sm:$0xff]  ;;  %v442_v19 = vld [vmem:[%s416_s15 + $0x20] sm:$0xff]  ;;  %v447_v20 = vld [vmem:[%s416_s15 + $0x48] sm:$0xff]  ;;  %16252 = vst [vmem:[#allocation5_spill] sm:$0xff] %v11097_v40  ;;  %s16518_s29 = smov 72   ;;  %s16714_s26 = smov 16  }
  0x16   : > { %9812 = vmatprep.mubr.msk.f32.mxu1 %vm635_vm0, %v444_v14  ;;  %10377 = vmatprep.subr.bf16.mxu1 %v10376_v8  ;;  %v428_v21 = vld [vmem:[%s11046_s23] sm:$0xff]  ;;  %v443_v22 = vld [vmem:[%s416_s15 + $0x28] sm:$0xff]  ;;  %v430_v24 = vld [vmem:[%s11046_s23 + $0x10] sm:$0xff]  ;;  %16256 = vst [vmem:[#allocation9_spill] sm:$0xff] %v11113_v45  ;;  %s10937_s15 = smov 96  }
  0x17   : > { %v429_v23 = vld [vmem:[%s11046_s23 + $0x8] sm:$0xff]  ;;  %v431_v25 = vld [vmem:[%s11046_s23 + $0x18] sm:$0xff]  ;;  %v432_v26 = vld [vmem:[%s11046_s23 + $0x20] sm:$0xff] }
  0x18   : > { %9804 = vmatmul.mubr.msk.f32.vlgmr.msra.gmra.mrb[0].mxu0 %vm635_vm0, %v439_v12  ;;  %9813 = vmatmul.mubr.msk.f32.vlgmr.msra.gmra.mrb[0].mxu1 %vm635_vm0, %v445_v15  ;;  %v433_v27 = vld [vmem:[%s11046_s23 + $0x28] sm:$0xff]  ;;  %v434_v28 = vld [vmem:[%s11046_s23 + $0x30] sm:$0xff]  ;;  %v435_v29 = vld [vmem:[%s11046_s23 + $0x38] sm:$0xff] }
  0x19   : > { %9806 = vmatprep.mubr.msk.f32.mxu0 %vm635_vm0, %v440_v13  ;;  %9815 = vmatprep.mubr.msk.f32.mxu1 %vm635_vm0, %v446_v16  ;;  %v436_v30 = vld [vmem:[%s11046_s23 + $0x40] sm:$0xff]  ;;  %v437_v31 = vld [vmem:[%s11046_s23 + $0x48] sm:$0xff] }
  0x1a   : > { %10379 = vmatpush3.bf16.msra.mxu1 %v10376_v8 }
  0x1b   : > { %10381 = vmatprep.subr.bf16.mxu1 %v10380_v17 }
  0x1c   : > { %9807 = vmatmul.mubr.msk.f32.gmra.mrb[2].mxu0 %vm635_vm0, %v441_v18  ;;  %9816 = vmatmul.mubr.msk.f32.gmra.mrb[2].mxu1 %vm635_vm0, %v447_v20 }
  0x1d   : > { %9809 = vmatprep.mubr.msk.f32.mxu0 %vm635_vm0, %v442_v19  ;;  %9826 = vmatprep.mubr.msk.f32.mxu1 %vm635_vm0, %v428_v21 }
  0x1e   : > { %10383 = vmatpush3.bf16.msra.mxu1 %v10380_v17 }
  0x1f   : > { %10389 = vmatprep.subr.bf16.mxu1 %v11082_v35 }
  0x20   : > { %9810 = vmatmul.mubr.msk.f32.gmra.mrb[4].mxu0 %vm635_vm0, %v443_v22 }
  0x21   : > { %9827 = vmatmul.mubr.msk.f32.vlgmr.msra.gmra.mrb[4].mxu1 %vm635_vm0, %v429_v23 }
  0x22   : > { %9829 = vmatprep.mubr.msk.f32.mxu1 %vm635_vm0, %v430_v24  ;;  %10391 = vmatpush1.bf16.msra.mxu1 %v11092_v39 }
  0x25   : > { %9830 = vmatmul.mubr.msk.f32.gmra.mrb[6].mxu1 %vm635_vm0, %v431_v25 }
  0x26   : > { %9832 = vmatprep.mubr.msk.f32.mxu1 %vm635_vm0, %v432_v26 }
  0x29   : > { %9833 = vmatmul.mubr.msk.f32.gmra.mrb[8].mxu1 %vm635_vm0, %v433_v27 }
  0x2a   : > { %9835 = vmatprep.mubr.msk.f32.mxu1 %vm635_vm0, %v434_v28 }
  0x2d   : > { %9836 = vmatmul.mubr.msk.f32.gmra.mrb[10].mxu1 %vm635_vm0, %v435_v29 }
  0x2e   : > { %9838 = vmatprep.mubr.msk.f32.mxu1 %vm635_vm0, %v436_v30 }
  0x31   : > { %9839 = vmatmul.mubr.msk.f32.gmra.mrb[12].mxu1 %vm635_vm0, %v437_v31 }
  0xeb   : > { %v11102_v42 = vpop.f32.mrb[0].mxu0  ;;  %v11108_v44 = vpop.f32.mrb[0].mxu1 }
  0xec   : > { %16253 = vst [vmem:[#allocation6_spill] sm:$0xff] %v11102_v42  ;;  %969 = vrot.lane.b32.xlu1 %v11102_v42, %s10929_s16  ;;  %v11106_v43 = vpop.f32.mrb[1].mxu0  ;;  %16255 = vst [vmem:[#allocation8_spill] sm:$0xff] %v11108_v44  ;;  %v11116_v47 = vpop.f32.mrb[1].mxu1 }
  0xed   : > { %16254 = vst [vmem:[#allocation7_spill] sm:$0xff] %v11106_v43  ;;  %967 = vrot.lane.b32.xlu0 %v11106_v43, %s10929_s16  ;;  %16257 = vst [vmem:[#allocation10_spill] sm:$0xff] %v11116_v47 }
  0xef   : > { %v11118_v48 = vpop.f32.mrb[2].mxu0  ;;  %v11122_v50 = vpop.f32.mrb[2].mxu1 }
  0xf0   : > { %16258 = vst [vmem:[#allocation11_spill] sm:$0xff] %v11118_v48  ;;  %v11120_v49 = vpop.f32.mrb[3].mxu0  ;;  %16260 = vst [vmem:[#allocation13_spill] sm:$0xff] %v11122_v50  ;;  %v11128_v52 = vpop.f32.mrb[3].mxu1 }
  0xf1   : > { %16259 = vst [vmem:[#allocation12_spill] sm:$0xff] %v11120_v49  ;;  %1012 = vrot.lane.b32.xlu0 %v1010_v46, %s10929_s16  ;;  %971 = vrot.lane.b32.xlu1 %v11120_v49, %s10929_s16  ;;  %16261 = vst [vmem:[#allocation14_spill] sm:$0xff] %v11128_v52 }
  0xf3   : > { %v11130_v53 = vpop.f32.mrb[4].mxu0 }
  0xf4   : > { %16262 = vst [vmem:[#allocation15_spill] sm:$0xff] %v11130_v53  ;;  %v11132_v54 = vpop.f32.mrb[5].mxu0  ;;  %v9828_v55 = vpop.f32.mrb[4].mxu1 }
  0xf5   : > { %16263 = vst [vmem:[#allocation16_spill] sm:$0xff] %v11132_v54  ;;  %973 = vrot.lane.b32.xlu0 %v11118_v48, %s10929_s16  ;;  %975 = vrot.lane.b32.xlu1 %v11132_v54, %s10929_s16  ;;  %v948_v56 = vadd.f32 %v9828_v55, %v946_v51  ;;  %v894_v57 = vpop.f32.mrb[5].mxu1 }
  0xf6   : > { %v947_v58 = vadd.f32 %v946_v51, %v894_v57 }
  0xf8   : > { %v9831_v59 = vpop.f32.mrb[6].mxu1  ;;  %v11138_v60 = vpack.c.bf16 %v948_v56, %v947_v58 }
  0xf9   : > { %977 = vrot.lane.b32.xlu0 %v11130_v53, %s10929_s16  ;;  %979 = vrot.lane.b32.xlu1 %v11116_v47, %s10929_s16  ;;  %v950_v61 = vadd.f32 %v9831_v59, %v946_v51  ;;  %v904_v62 = vpop.f32.mrb[7].mxu1 }
  0xfa   : > { %v949_v63 = vadd.f32 %v946_v51, %v904_v62  ;;  %9890 = vmatprep.subr.bf16.mxu1 %v11138_v60 }
  0xfc   : > { %v9834_v0 = vpop.f32.mrb[8].mxu1  ;;  %v11145_v1 = vpack.c.bf16 %v950_v61, %v949_v63 }
  0xfd   : > { %981 = vrot.lane.b32.xlu0 %v11108_v44, %s10929_s16  ;;  %983 = vrot.lane.b32.xlu1 %v11128_v52, %s10929_s16  ;;  %v952_v2 = vadd.f32 %v9834_v0, %v946_v51  ;;  %v914_v3 = vpop.f32.mrb[9].mxu1 }
  0xfe   : > { %v951_v4 = vadd.f32 %v946_v51, %v914_v3 }
 0x100   : > { %v9837_v5 = vpop.f32.mrb[10].mxu1  ;;  %v11151_v6 = vpack.c.bf16 %v952_v2, %v951_v4 }
 0x101   : > { %985 = vrot.lane.b32.xlu0 %v11122_v50, %s10929_s16  ;;  %v954_v7 = vadd.f32 %v9837_v5, %v946_v51  ;;  %v924_v8 = vpop.f32.mrb[11].mxu1 }
 0x102   : > { %v953_v9 = vadd.f32 %v946_v51, %v924_v8 }
 0x104   : > { %v9840_v10 = vpop.f32.mrb[12].mxu1  ;;  %v11155_v11 = vpack.c.bf16 %v954_v7, %v953_v9 }
 0x105   : > { %v956_v12 = vadd.f32 %v9840_v10, %v946_v51  ;;  %v934_v13 = vpop.f32.mrb[13].mxu1 }
 0x106   : > { %v955_v14 = vadd.f32 %v946_v51, %v934_v13 }
 0x108   : > { %v11157_v15 = vpack.c.bf16 %v956_v12, %v955_v14 }
 0x15e   : > { %v970_v16 = vpop.permute.xlu1 %969 }
 0x15f   : > { %v968_v17 = vpop.permute.xlu0 %967  ;;  %v998_v18 = vadd.f32 %v9828_v55, %v970_v16 }
 0x160   : > { %v997_v19 = vadd.f32 %v968_v17, %v894_v57 }
 0x163   : > { %v1013_v20 = vpop.permute.xlu0 %1012  ;;  %v972_v21 = vpop.permute.xlu1 %971 }
 0x164   : > { %v999_v22 = vadd.f32 %v972_v21, %v904_v62  ;;  %v11159_v23 = vadd.f32 %v1013_v20, %v998_v18  ;;  %v11161_v24 = vadd.f32 %v1013_v20, %v997_v19 }
 0x166   : > { %1037 = vrot.lane.b32.xlu0 %v11159_v23, %s10930_s19  ;;  %1035 = vrot.lane.b32.xlu1 %v11161_v24, %s10930_s19  ;;  %v11167_v29 = vadd.f32 %v1013_v20, %v999_v22 }
 0x167   : > { %v974_v25 = vpop.permute.xlu0 %973  ;;  %v976_v26 = vpop.permute.xlu1 %975 }
 0x168   : > { %v1000_v27 = vadd.f32 %v9831_v59, %v974_v25  ;;  %v1001_v28 = vadd.f32 %v976_v26, %v914_v3 }
 0x16a   : > { %v11169_v30 = vadd.f32 %v1013_v20, %v1000_v27  ;;  %1039 = vrot.lane.b32.xlu1 %v11167_v29, %s10930_s19  ;;  %v11175_v36 = vadd.f32 %v1013_v20, %v1001_v28 }
 0x16b   : > { %v978_v31 = vpop.permute.xlu0 %977  ;;  %v980_v32 = vpop.permute.xlu1 %979 }
 0x16c   : > { %v1002_v33 = vadd.f32 %v9834_v0, %v978_v31  ;;  %v1003_v34 = vadd.f32 %v980_v32, %v924_v8  ;;  %1041 = vrot.lane.b32.xlu0 %v11169_v30, %s10930_s19 }
 0x16e   : > { %v11177_v37 = vadd.f32 %v1013_v20, %v1002_v33  ;;  %1043 = vrot.lane.b32.xlu1 %v11175_v36, %s10930_s19  ;;  %v11183_v56 = vadd.f32 %v1013_v20, %v1003_v34 }
 0x16f   : > { %v982_v41 = vpop.permute.xlu0 %981  ;;  %v984_v46 = vpop.permute.xlu1 %983 }
 0x170   : > { %v1004_v51 = vadd.f32 %v9837_v5, %v982_v41  ;;  %v1005_v55 = vadd.f32 %v984_v46, %v934_v13  ;;  %1045 = vrot.lane.b32.xlu0 %v11177_v37, %s10930_s19 }
 0x172   : > { %v11185_v57 = vadd.f32 %v1013_v20, %v1004_v51  ;;  %1047 = vrot.lane.b32.xlu1 %v11183_v56, %s10930_s19  ;;  %v11191_v61 = vadd.f32 %v1013_v20, %v1005_v55 }
 0x173   : > { %v986_v58 = vpop.permute.xlu0 %985 }
 0x174   : > { %v1006_v59 = vadd.f32 %v9840_v10, %v986_v58  ;;  %1049 = vrot.lane.b32.xlu0 %v11185_v57, %s10930_s19 }
 0x176   : > { %v11193_v62 = vadd.f32 %v1013_v20, %v1006_v59  ;;  %1051 = vrot.lane.b32.xlu1 %v11191_v61, %s10930_s19 }
 0x178   : > { %1053 = vrot.lane.b32.xlu0 %v11193_v62, %s10930_s19 }
 0x1d8   : > { %v1038_v63 = vpop.permute.xlu0 %1037  ;;  %v1036_v0 = vpop.permute.xlu1 %1035 }
 0x1d9   : > { %v1066_v2 = vmax.f32 %v11159_v23, %v1038_v63  ;;  %v1065_v3 = vmax.f32 %v11161_v24, %v1036_v0 }
 0x1db   : > { %1087 = vrot.lane.b32.xlu0 %v1066_v2, %s10931_s20  ;;  %1085 = vrot.lane.b32.xlu1 %v1065_v3, %s10931_s20 }
 0x1dc   : > { %v1040_v4 = vpop.permute.xlu1 %1039 }
 0x1dd   : > { %v1067_v5 = vmax.f32 %v11167_v29, %v1040_v4 }
 0x1de   : > { %v1042_v7 = vpop.permute.xlu0 %1041 }
 0x1df   : > { %v1068_v8 = vmax.f32 %v11169_v30, %v1042_v7  ;;  %1089 = vrot.lane.b32.xlu1 %v1067_v5, %s10931_s20 }
 0x1e0   : > { %v1044_v9 = vpop.permute.xlu1 %1043 }
 0x1e1   : > { %1091 = vrot.lane.b32.xlu0 %v1068_v8, %s10931_s20  ;;  %v1069_v17 = vmax.f32 %v11175_v36, %v1044_v9 }
 0x1e2   : > { %v1046_v10 = vpop.permute.xlu0 %1045 }
 0x1e3   : > { %v1070_v19 = vmax.f32 %v11177_v37, %v1046_v10 }
 0x1e4   : > { %v1048_v12 = vpop.permute.xlu1 %1047 }
 0x1e5   : > { %v1071_v13 = vmax.f32 %v11183_v56, %v1048_v12 }
 0x1e6   : > { %v1050_v14 = vpop.permute.xlu0 %1049 }
 0x1e7   : > { %v1072_v16 = vmax.f32 %v11185_v57, %v1050_v14  ;;  %1097 = vrot.lane.b32.xlu1 %v1071_v13, %s10931_s20 }
 0x1e8   : > { %v1052_v18 = vpop.permute.xlu1 %1051 }
 0x1e9   : > { %1099 = vrot.lane.b32.xlu0 %v1072_v16, %s10931_s20  ;;  %v1073_v21 = vmax.f32 %v11191_v61, %v1052_v18 }
 0x1ea   : > { %v1054_v20 = vpop.permute.xlu0 %1053 }
 0x1eb   : > { %1093 = vrot.lane.b32.xlu1 %v1069_v17, %s10931_s20  ;;  %v1074_v22 = vmax.f32 %v11193_v62, %v1054_v20 }
 0x1ed   : > { %1095 = vrot.lane.b32.xlu0 %v1070_v19, %s10931_s20 }
 0x1ef   : > { %1101 = vrot.lane.b32.xlu1 %v1073_v21, %s10931_s20 }
 0x1f1   : > { %1103 = vrot.lane.b32.xlu0 %v1074_v22, %s10931_s20 }
 0x24d   : > { %v1088_v25 = vpop.permute.xlu0 %1087  ;;  %v1086_v28 = vpop.permute.xlu1 %1085 }
 0x24e   : > { %v1116_v26 = vmax.f32 %v1066_v2, %v1088_v25  ;;  %v1115_v33 = vmax.f32 %v1065_v3, %v1086_v28 }
 0x250   : > { %1167 = vrot.lane.b32.xlu0 %v1116_v26, %s10932_s21  ;;  %1137 = vrot.lane.b32.xlu1 %v1116_v26, %s16160_s18 }
 0x251   : > { %v1090_v34 = vpop.permute.xlu1 %1089 }
 0x252   : > { %v1117_v55 = vmax.f32 %v1067_v5, %v1090_v34 }
 0x253   : > { %v1092_v27 = vpop.permute.xlu0 %1091 }
 0x254   : > { %1227 = vrot.lane.b32.xlu0 %v1116_v26, %s16133_s22  ;;  %1197 = vrot.lane.b32.xlu1 %v1116_v26, %s16131_s24  ;;  %v1118_v51 = vmax.f32 %v1068_v8, %v1092_v27 }
 0x259   : > { %v1098_v41 = vpop.permute.xlu1 %1097 }
 0x25a   : > { %v1121_v46 = vmax.f32 %v1071_v13, %v1098_v41 }
 0x25b   : > { %v1100_v31 = vpop.permute.xlu0 %1099 }
 0x25c   : > { %v1122_v32 = vmax.f32 %v1072_v16, %v1100_v31 }
 0x25d   : > { %v1094_v63 = vpop.permute.xlu1 %1093 }
 0x25e   : > { %1179 = vrot.lane.b32.xlu0 %v1122_v32, %s10932_s21  ;;  %1149 = vrot.lane.b32.xlu1 %v1122_v32, %s16160_s18  ;;  %v1119_v0 = vmax.f32 %v1069_v17, %v1094_v63 }
 0x25f   : > { %v1096_v58 = vpop.permute.xlu0 %1095 }
 0x260   : > { %v1120_v59 = vmax.f32 %v1070_v19, %v1096_v58 }
 0x261   : > { %v1102_v2 = vpop.permute.xlu1 %1101 }
 0x262   : > { %1165 = vrot.lane.b32.xlu0 %v1115_v33, %s10932_s21  ;;  %1135 = vrot.lane.b32.xlu1 %v1115_v33, %s16160_s18  ;;  %v1123_v3 = vmax.f32 %v1073_v21, %v1102_v2 }
 0x263   : > { %v1104_v4 = vpop.permute.xlu0 %1103 }
 0x264   : > { %v1124_v5 = vmax.f32 %v1074_v22, %v1104_v4 }
 0x266   : > { %1225 = vrot.lane.b32.xlu0 %v1115_v33, %s16133_s22  ;;  %1195 = vrot.lane.b32.xlu1 %v1115_v33, %s16131_s24 }
 0x26a   : > { %1177 = vrot.lane.b32.xlu0 %v1121_v46, %s10932_s21  ;;  %1147 = vrot.lane.b32.xlu1 %v1121_v46, %s16160_s18 }
 0x26e   : > { %1237 = vrot.lane.b32.xlu0 %v1121_v46, %s16133_s22  ;;  %1207 = vrot.lane.b32.xlu1 %v1121_v46, %s16131_s24 }
 0x272   : > { %1171 = vrot.lane.b32.xlu0 %v1118_v51, %s10932_s21  ;;  %1141 = vrot.lane.b32.xlu1 %v1118_v51, %s16160_s18 }
 0x276   : > { %1231 = vrot.lane.b32.xlu0 %v1118_v51, %s16133_s22  ;;  %1201 = vrot.lane.b32.xlu1 %v1118_v51, %s16131_s24 }
 0x27a   : > { %1169 = vrot.lane.b32.xlu0 %v1117_v55, %s10932_s21  ;;  %1139 = vrot.lane.b32.xlu1 %v1117_v55, %s16160_s18 }
 0x27e   : > { %1229 = vrot.lane.b32.xlu0 %v1117_v55, %s16133_s22  ;;  %1199 = vrot.lane.b32.xlu1 %v1117_v55, %s16131_s24 }
 0x282   : > { %1175 = vrot.lane.b32.xlu0 %v1120_v59, %s10932_s21  ;;  %1145 = vrot.lane.b32.xlu1 %v1120_v59, %s16160_s18 }
 0x286   : > { %1235 = vrot.lane.b32.xlu0 %v1120_v59, %s16133_s22  ;;  %1205 = vrot.lane.b32.xlu1 %v1120_v59, %s16131_s24 }
 0x28a   : > { %1173 = vrot.lane.b32.xlu0 %v1119_v0, %s10932_s21  ;;  %1143 = vrot.lane.b32.xlu1 %v1119_v0, %s16160_s18 }
 0x28e   : > { %1233 = vrot.lane.b32.xlu0 %v1119_v0, %s16133_s22  ;;  %1203 = vrot.lane.b32.xlu1 %v1119_v0, %s16131_s24 }
 0x292   : > { %1239 = vrot.lane.b32.xlu0 %v1122_v32, %s16133_s22  ;;  %1209 = vrot.lane.b32.xlu1 %v1122_v32, %s16131_s24 }
 0x296   : > { %1181 = vrot.lane.b32.xlu0 %v1123_v3, %s10932_s21  ;;  %1151 = vrot.lane.b32.xlu1 %v1123_v3, %s16160_s18 }
 0x29a   : > { %1241 = vrot.lane.b32.xlu0 %v1123_v3, %s16133_s22  ;;  %1211 = vrot.lane.b32.xlu1 %v1123_v3, %s16131_s24 }
 0x29e   : > { %1183 = vrot.lane.b32.xlu0 %v1124_v5, %s10932_s21  ;;  %1153 = vrot.lane.b32.xlu1 %v1124_v5, %s16160_s18 }
 0x2a2   : > { %1243 = vrot.lane.b32.xlu0 %v1124_v5, %s16133_s22  ;;  %1213 = vrot.lane.b32.xlu1 %v1124_v5, %s16131_s24 }
 0x2c2   : > { %v1168_v7 = vpop.permute.xlu0 %1167  ;;  %v1138_v8 = vpop.permute.xlu1 %1137 }
 0x2c3   : > { %v1257_v9 = vsel %vm1255_vm1, %v1138_v8, %v1168_v7 }
 0x2c6   : > { %v1228_v10 = vpop.permute.xlu0 %1227  ;;  %v1198_v12 = vpop.permute.xlu1 %1197 }
 0x2c7   : > { %v1268_v13 = vsel %vm1266_vm2, %v1257_v9, %v1198_v12 }
 0x2c8   : > { %v1279_v14 = vsel %vm1277_vm3, %v1268_v13, %v1228_v10 }
 0x2c9   : > { %1300 = vrot.lane.b32.xlu0 %v1279_v14, %s16160_s18 }
 0x2d0   : > { %v1180_v16 = vpop.permute.xlu0 %1179  ;;  %v1150_v17 = vpop.permute.xlu1 %1149 }
 0x2d4   : > { %v1166_v18 = vpop.permute.xlu0 %1165  ;;  %v1136_v19 = vpop.permute.xlu1 %1135 }
 0x2d5   : > { %v1256_v20 = vsel %vm1255_vm1, %v1136_v19, %v1166_v18 }
 0x2d8   : > { %v1226_v21 = vpop.permute.xlu0 %1225  ;;  %v1196_v22 = vpop.permute.xlu1 %1195 }
 0x2d9   : > { %v1267_v25 = vsel %vm1266_vm2, %v1256_v20, %v1196_v22 }
 0x2da   : > { %v1278_v26 = vsel %vm1277_vm3, %v1267_v25, %v1226_v21 }
 0x2db   : > { %1298 = vrot.lane.b32.xlu1 %v1278_v26, %s16160_s18 }
 0x2dc   : > { %v1178_v27 = vpop.permute.xlu0 %1177  ;;  %v1148_v28 = vpop.permute.xlu1 %1147 }
 0x2dd   : > { %v1262_v26 = vsel %vm1255_vm1, %v1148_v28, %v1178_v27 }
 0x2e0   : > { %v1238_v31 = vpop.permute.xlu0 %1237  ;;  %v1208_v32 = vpop.permute.xlu1 %1207 }
 0x2e4   : > { %v1172_v33 = vpop.permute.xlu0 %1171  ;;  %v1142_v34 = vpop.permute.xlu1 %1141 }
 0x2e5   : > { %v1259_v41 = vsel %vm1255_vm1, %v1142_v34, %v1172_v33  ;;  %v1273_v34 = vsel %vm1266_vm2, %v1262_v26, %v1208_v32 }
 0x2e8   : > { %v1232_v46 = vpop.permute.xlu0 %1231  ;;  %v1202_v51 = vpop.permute.xlu1 %1201 }
 0x2e9   : > { %v1270_v55 = vsel %vm1266_vm2, %v1259_v41, %v1202_v51  ;;  %v1263_v41 = vsel %vm1255_vm1, %v1150_v17, %v1180_v16 }
 0x2ea   : > { %v1281_v58 = vsel %vm1277_vm3, %v1270_v55, %v1232_v46 }
 0x2eb   : > { %1304 = vrot.lane.b32.xlu0 %v1281_v58, %s16160_s18  ;;  %v1284_v58 = vsel %vm1277_vm3, %v1273_v34, %v1238_v31 }
 0x2ec   : > { %v1170_v59 = vpop.permute.xlu0 %1169  ;;  %v1140_v63 = vpop.permute.xlu1 %1139 }
 0x2ed   : > { %v1258_v0 = vsel %vm1255_vm1, %v1140_v63, %v1170_v59 }
 0x2f0   : > { %v1230_v2 = vpop.permute.xlu0 %1229  ;;  %v1200_v3 = vpop.permute.xlu1 %1199 }
 0x2f1   : > { %v1269_v4 = vsel %vm1266_vm2, %v1258_v0, %v1200_v3 }
 0x2f2   : > { %v1280_v5 = vsel %vm1277_vm3, %v1269_v4, %v1230_v2 }
 0x2f3   : > { %1302 = vrot.lane.b32.xlu1 %v1280_v5, %s16160_s18 }
 0x2f4   : > { %v1176_v7 = vpop.permute.xlu0 %1175  ;;  %v1146_v8 = vpop.permute.xlu1 %1145 }
 0x2f5   : > { %v1261_v9 = vsel %vm1255_vm1, %v1146_v8, %v1176_v7 }
 0x2f8   : > { %v1236_v10 = vpop.permute.xlu0 %1235  ;;  %v1206_v12 = vpop.permute.xlu1 %1205 }
 0x2f9   : > { %v1272_v13 = vsel %vm1266_vm2, %v1261_v9, %v1206_v12 }
 0x2fa   : > { %v1283_v14 = vsel %vm1277_vm3, %v1272_v13, %v1236_v10 }
 0x2fb   : > { %1308 = vrot.lane.b32.xlu0 %v1283_v14, %s16160_s18 }
 0x2fc   : > { %v1174_v18 = vpop.permute.xlu0 %1173  ;;  %v1144_v19 = vpop.permute.xlu1 %1143 }
 0x2fd   : > { %v1260_v20 = vsel %vm1255_vm1, %v1144_v19, %v1174_v18 }
 0x300   : > { %v1234_v21 = vpop.permute.xlu0 %1233  ;;  %v1204_v22 = vpop.permute.xlu1 %1203 }
 0x301   : > { %v1271_v25 = vsel %vm1266_vm2, %v1260_v20, %v1204_v22 }
 0x302   : > { %v1282_v33 = vsel %vm1277_vm3, %v1271_v25, %v1234_v21 }
 0x303   : > { %1306 = vrot.lane.b32.xlu1 %v1282_v33, %s16160_s18 }
 0x304   : > { %v1240_v46 = vpop.permute.xlu0 %1239  ;;  %v1210_v51 = vpop.permute.xlu1 %1209 }
 0x305   : > { %v1274_v55 = vsel %vm1266_vm2, %v1263_v41, %v1210_v51 }
 0x306   : > { %v1285_v59 = vsel %vm1277_vm3, %v1274_v55, %v1240_v46 }
 0x307   : > { %1310 = vrot.lane.b32.xlu1 %v1284_v58, %s16160_s18  ;;  %1312 = vrot.lane.b32.xlu0 %v1285_v59, %s16160_s18 }
 0x308   : > { %v1182_v27 = vpop.permute.xlu0 %1181  ;;  %v1152_v28 = vpop.permute.xlu1 %1151 }
 0x309   : > { %v1264_v32 = vsel %vm1255_vm1, %v1152_v28, %v1182_v27 }
 0x30c   : > { %v1242_v63 = vpop.permute.xlu0 %1241  ;;  %v1212_v0 = vpop.permute.xlu1 %1211 }
 0x30d   : > { %v1275_v16 = vsel %vm1266_vm2, %v1264_v32, %v1212_v0 }
 0x30e   : > { %v1286_v17 = vsel %vm1277_vm3, %v1275_v16, %v1242_v63 }
 0x30f   : > { %1314 = vrot.lane.b32.xlu1 %v1286_v17, %s16160_s18 }
 0x310   : > { %v1184_v2 = vpop.permute.xlu0 %1183  ;;  %v1154_v31 = vpop.permute.xlu1 %1153 }
 0x311   : > { %v1265_v3 = vsel %vm1255_vm1, %v1154_v31, %v1184_v2 }
 0x314   : > { %v1244_v4 = vpop.permute.xlu0 %1243  ;;  %v1214_v5 = vpop.permute.xlu1 %1213 }
 0x315   : > { %v1276_v7 = vsel %vm1266_vm2, %v1265_v3, %v1214_v5 }
 0x316   : > { %v1287_v8 = vsel %vm1277_vm3, %v1276_v7, %v1244_v4 }
 0x317   : > { %1316 = vrot.lane.b32.xlu0 %v1287_v8, %s16160_s18 }
 0x33b   : > { %v1301_v9 = vpop.permute.xlu0 %1300 }
 0x33c   : > { %v1329_v10 = vsub.f32 %v11159_v23, %v1301_v9 }
 0x33e   : > { %v1340_v12 = vmul.f32 1.442695, %v1329_v10 }
 0x340   : > { %10606 = vpow2.f32 %v1340_v12 }
 0x34a   : > { %v11300_v13 = vpop.eup %10606 }
 0x34b   : > { %1370 = vrot.lane.b32.xlu0 %v11300_v13, %s10930_s19 }
 0x34d   : > { %v1299_v14 = vpop.permute.xlu1 %1298 }
 0x34e   : > { %v1328_v18 = vsub.f32 %v11161_v24, %v1299_v14 }
 0x350   : > { %v1338_v19 = vmul.f32 1.442695, %v1328_v18 }
 0x352   : > { %10608 = vpow2.f32 %v1338_v19 }
 0x35c   : > { %v11305_v20 = vpop.eup %10608 }
 0x35d   : > { %v1305_v21 = vpop.permute.xlu0 %1304  ;;  %1368 = vrot.lane.b32.xlu1 %v11305_v20, %s10930_s19 }
 0x35e   : > { %v1331_v22 = vsub.f32 %v11169_v30, %v1305_v21 }
 0x360   : > { %v1344_v25 = vmul.f32 1.442695, %v1331_v22 }
 0x362   : > { %10610 = vpow2.f32 %v1344_v25 }
 0x365   : > { %v1303_v26 = vpop.permute.xlu1 %1302 }
 0x366   : > { %v1330_v33 = vsub.f32 %v11167_v29, %v1303_v26 }
 0x368   : > { %v1342_v34 = vmul.f32 1.442695, %v1330_v33 }
 0x36a   : > { %10612 = vpow2.f32 %v1342_v34 }
 0x36c   : > { %v11311_v41 = vpop.eup %10610 }
 0x36d   : > { %v1309_v46 = vpop.permute.xlu0 %1308  ;;  %1374 = vrot.lane.b32.xlu0 %v11311_v41, %s10930_s19 }
 0x36e   : > { %v1333_v51 = vsub.f32 %v11177_v37, %v1309_v46 }
 0x370   : > { %v1348_v55 = vmul.f32 1.442695, %v1333_v51 }
 0x372   : > { %10614 = vpow2.f32 %v1348_v55 }
 0x374   : > { %v11316_v58 = vpop.eup %10612 }
 0x375   : > { %1372 = vrot.lane.b32.xlu1 %v11316_v58, %s10930_s19  ;;  %v1307_v59 = vpop.permute.xlu1 %1306 }
 0x376   : > { %v1332_v27 = vsub.f32 %v11175_v36, %v1307_v59 }
 0x378   : > { %v1346_v28 = vmul.f32 1.442695, %v1332_v27 }
 0x379   : > { %v1313_v32 = vpop.permute.xlu0 %1312  ;;  %v1311_v63 = vpop.permute.xlu1 %1310 }
 0x37a   : > { %10616 = vpow2.f32 %v1346_v28  ;;  %v1335_v0 = vsub.f32 %v11185_v57, %v1313_v32  ;;  %v1334_v16 = vsub.f32 %v11183_v56, %v1311_v63 }
 0x37c   : > { %v11323_v17 = vpop.eup %10614  ;;  %v1352_v2 = vmul.f32 1.442695, %v1335_v0  ;;  %v1350_v31 = vmul.f32 1.442695, %v1334_v16 }
 0x37d   : > { %1378 = vrot.lane.b32.xlu0 %v11323_v17, %s10930_s19 }
 0x37e   : > { %10618 = vpow2.f32 %v1352_v2 }
 0x37f   : > { %10620 = vpow2.f32 %v1350_v31 }
 0x381   : > { %v1315_v3 = vpop.permute.xlu1 %1314 }
 0x382   : > { %v1336_v4 = vsub.f32 %v11191_v61, %v1315_v3 }
 0x384   : > { %v11328_v5 = vpop.eup %10616  ;;  %v1354_v7 = vmul.f32 1.442695, %v1336_v4 }
 0x385   : > { %1376 = vrot.lane.b32.xlu1 %v11328_v5, %s10930_s19 }
 0x386   : > { %10622 = vpow2.f32 %v1354_v7 }
 0x388   : > { %v11332_v8 = vpop.eup %10618 }
 0x389   : > { %v11334_v9 = vpop.eup %10620  ;;  %1382 = vrot.lane.b32.xlu0 %v11332_v8, %s10930_s19  ;;  %v1317_v10 = vpop.permute.xlu0 %1316 }
 0x38a   : > { %v1337_v12 = vsub.f32 %v11193_v62, %v1317_v10  ;;  %1380 = vrot.lane.b32.xlu1 %v11334_v9, %s10930_s19 }
 0x38c   : > { %v1356_v14 = vmul.f32 1.442695, %v1337_v12 }
 0x38e   : > { %10624 = vpow2.f32 %v1356_v14 }
 0x390   : > { %v11341_v18 = vpop.eup %10622 }
 0x391   : > { %1384 = vrot.lane.b32.xlu1 %v11341_v18, %s10930_s19 }
 0x398   : > { %v11345_v19 = vpop.eup %10624 }
 0x399   : > { %1386 = vrot.lane.b32.xlu0 %v11345_v19, %s10930_s19 }
 0x3bd   : > { %v1371_v21 = vpop.permute.xlu0 %1370 }
 0x3be   : > { %v1399_v22 = vadd.f32 %v11300_v13, %v1371_v21 }
 0x3c0   : > { %1420 = vrot.lane.b32.xlu0 %v1399_v22, %s10931_s20 }
 0x3cf   : > { %v1369_v25 = vpop.permute.xlu1 %1368 }
 0x3d0   : > { %v1398_v26 = vadd.f32 %v11305_v20, %v1369_v25 }
 0x3d2   : > { %1418 = vrot.lane.b32.xlu1 %v1398_v26, %s10931_s20 }
 0x3df   : > { %v1375_v33 = vpop.permute.xlu0 %1374 }
 0x3e0   : > { %v1401_v32 = vadd.f32 %v11311_v41, %v1375_v33 }
 0x3e7   : > { %v1373_v34 = vpop.permute.xlu1 %1372 }
 0x3e8   : > { %v1400_v63 = vadd.f32 %v11316_v58, %v1373_v34 }
 0x3ef   : > { %v1379_v46 = vpop.permute.xlu0 %1378 }
 0x3f0   : > { %v1403_v4 = vadd.f32 %v11323_v17, %v1379_v46 }
 0x3f7   : > { %v1377_v51 = vpop.permute.xlu1 %1376 }
 0x3f8   : > { %v1402_v2 = vadd.f32 %v11328_v5, %v1377_v51 }
 0x3fb   : > { %v1383_v55 = vpop.permute.xlu0 %1382 }
 0x3fc   : > { %v1405_v59 = vadd.f32 %v11332_v8, %v1383_v55  ;;  %v1381_v27 = vpop.permute.xlu1 %1380 }
 0x3fd   : > { %v1404_v28 = vadd.f32 %v11334_v9, %v1381_v27 }
 0x3fe   : > { %1432 = vrot.lane.b32.xlu0 %v1405_v59, %s10931_s20 }
 0x3ff   : > { %1430 = vrot.lane.b32.xlu1 %v1404_v28, %s10931_s20 }
 0x402   : > { %1424 = vrot.lane.b32.xlu0 %v1401_v32, %s10931_s20 }
 0x403   : > { %1422 = vrot.lane.b32.xlu1 %v1400_v63, %s10931_s20  ;;  %v1385_v0 = vpop.permute.xlu1 %1384 }
 0x404   : > { %v11362_v16 = vadd.f32 %v11341_v18, %v1385_v0  ;;  %v464_v0 = vld [vmem:[%s16108_s7 + $0x30] sm:$0xff] }
 0x407   : > { %1434 = vrot.lane.b32.xlu1 %v11362_v16, %s10931_s20 }
 0x40b   : > { %1426 = vrot.lane.b32.xlu1 %v1402_v2, %s10931_s20  ;;  %v1387_v31 = vpop.permute.xlu0 %1386 }
 0x40c   : > { %v11369_v3 = vadd.f32 %v11345_v19, %v1387_v31 }
 0x40e   : > { %1436 = vrot.lane.b32.xlu0 %v11369_v3, %s10931_s20 }
 0x412   : > { %1428 = vrot.lane.b32.xlu0 %v1403_v4, %s10931_s20 }
 0x432   : > { %v1421_v7 = vpop.permute.xlu0 %1420 }
 0x433   : > { %v1449_v10 = vadd.f32 %v1421_v7, %v1399_v22  ;;  %v463_v7 = vld [vmem:[%s16108_s7 + $0x28] sm:$0xff] }
 0x435   : > { %1500 = vrot.lane.b32.xlu0 %v1449_v10, %s10932_s21  ;;  %1470 = vrot.lane.b32.xlu1 %v1449_v10, %s16160_s18 }
 0x439   : > { %1560 = vrot.lane.b32.xlu0 %v1449_v10, %s16133_s22  ;;  %1530 = vrot.lane.b32.xlu1 %v1449_v10, %s16131_s24 }
 0x444   : > { %v1419_v21 = vpop.permute.xlu1 %1418 }
 0x445   : > { %v1448_v22 = vadd.f32 %v1419_v21, %v1398_v26 }
 0x470   : > { %v1433_v12 = vpop.permute.xlu0 %1432 }
 0x471   : > { %v1455_v14 = vadd.f32 %v1433_v12, %v1405_v59  ;;  %v1431_v25 = vpop.permute.xlu1 %1430 }
 0x472   : > { %v1454_v33 = vadd.f32 %v1431_v25, %v1404_v28 }
 0x473   : > { %1512 = vrot.lane.b32.xlu0 %v1455_v14, %s10932_s21  ;;  %1482 = vrot.lane.b32.xlu1 %v1455_v14, %s16160_s18 }
 0x474   : > { %v1425_v34 = vpop.permute.xlu0 %1424 }
 0x475   : > { %v1451_v26 = vadd.f32 %v1425_v34, %v1401_v32  ;;  %v1423_v46 = vpop.permute.xlu1 %1422 }
 0x476   : > { %v1450_v55 = vadd.f32 %v1423_v46, %v1400_v63  ;;  %v459_v63 = vld [vmem:[%s16108_s7 + $0x8] sm:$0xff] }
 0x477   : > { %1572 = vrot.lane.b32.xlu0 %v1455_v14, %s16133_s22  ;;  %1542 = vrot.lane.b32.xlu1 %v1455_v14, %s16131_s24  ;;  %v11409_v31 = vpack.c.bf16 %v464_v0, %v459_v63  ;;  %v16129_v14 = vmov 0.0  }
 0x478   : > { %1903 = vmatprep.mubr.f32.mxu0 %v16129_v14  ;;  %2148 = vmatprep.mubr.f32.mxu1 %v16129_v14 }
 0x479   : > { %v1435_v27 = vpop.permute.xlu1 %1434  ;;  %16264 = vst [vmem:[#allocation17_spill] sm:$0xff] %v11409_v31  ;;  %10385 = vmatprep.subr.bf16.mxu0 %v11409_v31 }
 0x47a   : > { %v1456_v21 = vadd.f32 %v1435_v27, %v11362_v16 }
 0x47b   : > { %1498 = vrot.lane.b32.xlu0 %v1448_v22, %s10932_s21  ;;  %1468 = vrot.lane.b32.xlu1 %v1448_v22, %s16160_s18 }
 0x47d   : > { %v1427_v32 = vpop.permute.xlu1 %1426 }
 0x47e   : > { %v1452_v12 = vadd.f32 %v1427_v32, %v1402_v2 }
 0x47f   : > { %1558 = vrot.lane.b32.xlu0 %v1448_v22, %s16133_s22  ;;  %1528 = vrot.lane.b32.xlu1 %v1448_v22, %s16131_s24 }
 0x480   : > { %v1437_v51 = vpop.permute.xlu0 %1436 }
 0x481   : > { %v1457_v2 = vadd.f32 %v1437_v51, %v11369_v3 }
 0x483   : > { %1510 = vrot.lane.b32.xlu0 %v1454_v33, %s10932_s21  ;;  %1480 = vrot.lane.b32.xlu1 %v1454_v33, %s16160_s18 }
 0x484   : > { %v1429_v59 = vpop.permute.xlu0 %1428 }
 0x485   : > { %v1453_v28 = vadd.f32 %v1429_v59, %v1403_v4  ;;  %v458_v4 = vld [vmem:[%s16108_s7] sm:$0xff] }
 0x486   : > { %v11417_v10 = vpack.c.bf16 %v463_v7, %v458_v4 }
 0x487   : > { %1570 = vrot.lane.b32.xlu0 %v1454_v33, %s16133_s22  ;;  %1540 = vrot.lane.b32.xlu1 %v1454_v33, %s16131_s24 }
 0x488   : > { %16265 = vst [vmem:[#allocation18_spill] sm:$0xff] %v11417_v10  ;;  %10387 = vmatpush1.bf16.msra.mxu0 %v11417_v10 }
 0x48b   : > { %1504 = vrot.lane.b32.xlu0 %v1451_v26, %s10932_s21  ;;  %1474 = vrot.lane.b32.xlu1 %v1451_v26, %s16160_s18 }
 0x48f   : > { %1564 = vrot.lane.b32.xlu0 %v1451_v26, %s16133_s22  ;;  %1534 = vrot.lane.b32.xlu1 %v1451_v26, %s16131_s24 }
 0x493   : > { %1502 = vrot.lane.b32.xlu0 %v1450_v55, %s10932_s21  ;;  %1472 = vrot.lane.b32.xlu1 %v1450_v55, %s16160_s18 }
 0x497   : > { %1562 = vrot.lane.b32.xlu0 %v1450_v55, %s16133_s22  ;;  %1532 = vrot.lane.b32.xlu1 %v1450_v55, %s16131_s24 }
 0x49b   : > { %1508 = vrot.lane.b32.xlu0 %v1453_v28, %s10932_s21  ;;  %1478 = vrot.lane.b32.xlu1 %v1453_v28, %s16160_s18 }
 0x49f   : > { %1568 = vrot.lane.b32.xlu0 %v1453_v28, %s16133_s22  ;;  %1538 = vrot.lane.b32.xlu1 %v1453_v28, %s16131_s24 }
 0x4a3   : > { %1506 = vrot.lane.b32.xlu0 %v1452_v12, %s10932_s21  ;;  %1476 = vrot.lane.b32.xlu1 %v1452_v12, %s16160_s18 }
 0x4a7   : > { %1566 = vrot.lane.b32.xlu0 %v1452_v12, %s16133_s22  ;;  %1536 = vrot.lane.b32.xlu1 %v1452_v12, %s16131_s24  ;;  %v1471_v22 = vpop.permute.xlu1 %1470  ;;  %v1501_v16 = vpop.permute.xlu0 %1500 }
 0x4ab   : > { %1514 = vrot.lane.b32.xlu0 %v1456_v21, %s10932_s21  ;;  %1484 = vrot.lane.b32.xlu1 %v1456_v21, %s16160_s18  ;;  %v1531_v25 = vpop.permute.xlu1 %1530  ;;  %v1561_v33 = vpop.permute.xlu0 %1560 }
 0x4af   : > { %1544 = vrot.lane.b32.xlu0 %v1456_v21, %s16131_s24  ;;  %1678 = vrot.lane.b32.xlu1 %v11161_v24, %s10937_s15  ;;  %v1589_v24 = vsel %vm1255_vm1, %v1471_v22, %v1501_v16 }
 0x4b0   : > { %v1599_v3 = vsel %vm1266_vm2, %v1589_v24, %v1531_v25 }
 0x4b3   : > { %1486 = vrot.lane.b32.xlu0 %v1457_v2, %s16160_s18  ;;  %1574 = vrot.lane.b32.xlu1 %v1456_v21, %s16133_s22 }
 0x4b7   : > { %1680 = vrot.lane.b32.xlu0 %v11159_v23, %s10937_s15  ;;  %1516 = vrot.lane.b32.xlu1 %v1457_v2, %s10932_s21  ;;  %v1609_v23 = vsel %vm1277_vm3, %v1599_v3, %v1561_v33 }
 0x4b8   : > { %10626 = vrcp.f32 %v1609_v23 }
 0x4bb   : > { %1576 = vrot.lane.b32.xlu0 %v1457_v2, %s16133_s22  ;;  %1546 = vrot.lane.b32.xlu1 %v1457_v2, %s16131_s24 }
 0x4bf   : > { %1684 = vrot.lane.b32.xlu0 %v11169_v30, %s10937_s15  ;;  %1682 = vrot.lane.b32.xlu1 %v11167_v29, %s10937_s15 }
 0x4c2   : > { %v10627_v29 = vpop.eup %10626 }
 0x4c3   : > { %1688 = vrot.lane.b32.xlu0 %v11177_v37, %s10937_s15  ;;  %1686 = vrot.lane.b32.xlu1 %v11175_v36, %s10937_s15 }
 0x4c7   : > { %1692 = vrot.lane.b32.xlu0 %v11185_v57, %s10937_s15  ;;  %1690 = vrot.lane.b32.xlu1 %v11183_v56, %s10937_s15 }
 0x4cb   : > { %1696 = vrot.lane.b32.xlu0 %v11193_v62, %s10937_s15  ;;  %1694 = vrot.lane.b32.xlu1 %v11191_v61, %s10937_s15 }
 0x4cf   : > { %1640 = vrot.lane.b32.xlu0 %v10627_v29, %s16160_s18 }
 0x4e5   : > { %v1513_v30 = vpop.permute.xlu0 %1512  ;;  %v1483_v37 = vpop.permute.xlu1 %1482 }
 0x4e9   : > { %v1573_v34 = vpop.permute.xlu0 %1572  ;;  %v1543_v36 = vpop.permute.xlu1 %1542 }
 0x4ed   : > { %v1499_v26 = vpop.permute.xlu0 %1498  ;;  %v1469_v46 = vpop.permute.xlu1 %1468 }
 0x4ee   : > { %v1588_v57 = vsel %vm1255_vm1, %v1469_v46, %v1499_v26 }
 0x4f1   : > { %v1559_v51 = vpop.permute.xlu0 %1558  ;;  %v1529_v55 = vpop.permute.xlu1 %1528 }
 0x4f2   : > { %v1598_v56 = vsel %vm1266_vm2, %v1588_v57, %v1529_v55 }
 0x4f3   : > { %v1608_v62 = vsel %vm1277_vm3, %v1598_v56, %v1559_v51 }
 0x4f4   : > { %10628 = vrcp.f32 %v1608_v62 }
 0x4f5   : > { %v1511_v59 = vpop.permute.xlu0 %1510  ;;  %v1481_v61 = vpop.permute.xlu1 %1480 }
 0x4f6   : > { %v1594_v57 = vsel %vm1255_vm1, %v1481_v61, %v1511_v59 }
 0x4f9   : > { %v1571_v27 = vpop.permute.xlu0 %1570  ;;  %v1541_v28 = vpop.permute.xlu1 %1540 }
 0x4fa   : > { %v1604_v62 = vsel %vm1266_vm2, %v1594_v57, %v1541_v28 }
 0x4fd   : > { %v1505_v32 = vpop.permute.xlu0 %1504  ;;  %v1475_v63 = vpop.permute.xlu1 %1474 }
 0x4fe   : > { %v10629_v0 = vpop.eup %10628  ;;  %v1591_v4 = vsel %vm1255_vm1, %v1475_v63, %v1505_v32 }
 0x4ff   : > { %1638 = vrot.lane.b32.xlu1 %v10629_v0, %s16160_s18  ;;  %v1595_v0 = vsel %vm1255_vm1, %v1483_v37, %v1513_v30 }
 0x501   : > { %v1565_v7 = vpop.permute.xlu0 %1564  ;;  %v1535_v12 = vpop.permute.xlu1 %1534 }
 0x502   : > { %v1601_v21 = vsel %vm1266_vm2, %v1591_v4, %v1535_v12  ;;  %v1605_v4 = vsel %vm1266_vm2, %v1595_v0, %v1543_v36 }
 0x503   : > { %v1611_v2 = vsel %vm1277_vm3, %v1601_v21, %v1565_v7  ;;  %v1614_v7 = vsel %vm1277_vm3, %v1604_v62, %v1571_v27  ;;  %v1615_v21 = vsel %vm1277_vm3, %v1605_v4, %v1573_v34 }
 0x504   : > { %10630 = vrcp.f32 %v1611_v2 }
 0x505   : > { %v1503_v22 = vpop.permute.xlu0 %1502  ;;  %v1473_v16 = vpop.permute.xlu1 %1472 }
 0x506   : > { %v1590_v25 = vsel %vm1255_vm1, %v1473_v16, %v1503_v22  ;;  %v448_v16 = vld [vmem:[%s11489_s27] sm:$0xff] }
 0x509   : > { %v1563_v24 = vpop.permute.xlu0 %1562  ;;  %v1533_v33 = vpop.permute.xlu1 %1532 }
 0x50a   : > { %v1600_v3 = vsel %vm1266_vm2, %v1590_v25, %v1533_v33 }
 0x50b   : > { %v1610_v23 = vsel %vm1277_vm3, %v1600_v3, %v1563_v24 }
 0x50c   : > { %10632 = vrcp.f32 %v1610_v23 }
 0x50d   : > { %v1509_v29 = vpop.permute.xlu0 %1508  ;;  %v1479_v26 = vpop.permute.xlu1 %1478 }
 0x50e   : > { %v10631_v46 = vpop.eup %10630  ;;  %v1593_v51 = vsel %vm1255_vm1, %v1479_v26, %v1509_v29 }
 0x50f   : > { %1644 = vrot.lane.b32.xlu0 %v10631_v46, %s16160_s18 }
 0x511   : > { %v1569_v55 = vpop.permute.xlu0 %1568  ;;  %v1539_v56 = vpop.permute.xlu1 %1538 }
 0x512   : > { %v1603_v32 = vsel %vm1266_vm2, %v1593_v51, %v1539_v56  ;;  %v449_v56 = vld [vmem:[%s11489_s27 + $0x8] sm:$0xff] }
 0x513   : > { %v1613_v63 = vsel %vm1277_vm3, %v1603_v32, %v1569_v55 }
 0x514   : > { %10634 = vrcp.f32 %v1613_v63 }
 0x515   : > { %v1507_v12 = vpop.permute.xlu0 %1506  ;;  %v1477_v59 = vpop.permute.xlu1 %1476  ;;  %10636 = vrcp.f32 %v1614_v7 }
 0x516   : > { %v10633_v61 = vpop.eup %10632  ;;  %v1592_v28 = vsel %vm1255_vm1, %v1477_v59, %v1507_v12  ;;  %10638 = vrcp.f32 %v1615_v21  ;;  %v450_v12 = vld [vmem:[%s11489_s27 + $0x10] sm:$0xff] }
 0x517   : > { %1642 = vrot.lane.b32.xlu1 %v10633_v61, %s16160_s18 }
 0x519   : > { %v1567_v2 = vpop.permute.xlu0 %1566  ;;  %v1537_v22 = vpop.permute.xlu1 %1536 }
 0x51a   : > { %v1602_v30 = vsel %vm1266_vm2, %v1592_v28, %v1537_v22  ;;  %v451_v28 = vld [vmem:[%s11489_s27 + $0x18] sm:$0xff] }
 0x51b   : > { %v1612_v37 = vsel %vm1277_vm3, %v1602_v30, %v1567_v2  ;;  %v452_v30 = vld [vmem:[%s11489_s27 + $0x20] sm:$0xff] }
 0x51c   : > { %10640 = vrcp.f32 %v1612_v37 }
 0x51d   : > { %v1515_v36 = vpop.permute.xlu0 %1514  ;;  %v1485_v27 = vpop.permute.xlu1 %1484 }
 0x51e   : > { %v10635_v34 = vpop.eup %10634  ;;  %v1596_v23 = vsel %vm1255_vm1, %v1485_v27, %v1515_v36  ;;  %v453_v27 = vld [vmem:[%s11489_s27 + $0x28] sm:$0xff] }
 0x51f   : > { %1648 = vrot.lane.b32.xlu0 %v10635_v34, %s16160_s18  ;;  %v10637_v33 = vpop.eup %10636 }
 0x520   : > { %v10639_v29 = vpop.eup %10638 }
 0x521   : > { %v1545_v25 = vpop.permute.xlu0 %1544  ;;  %v1679_v24 = vpop.permute.xlu1 %1678 }
 0x522   : > { %v11493_v3 = vadd.f32 %v1679_v24, %v448_v16  ;;  %v1606_v26 = vsel %vm1266_vm2, %v1596_v23, %v1545_v25  ;;  %v454_v16 = vld [vmem:[%s11489_s27 + $0x30] sm:$0xff]  ;;  %v455_v24 = vld [vmem:[%s11489_s27 + $0x38] sm:$0xff]  ;;  %v456_v23 = vld [vmem:[%s11489_s27 + $0x40] sm:$0xff] }
 0x523   : > { %1650 = vrot.lane.b32.xlu0 %v10637_v33, %s16160_s18 }
 0x524   : > { %8908 = vmatmul.mubr.msk.f32.vlgmr.msra.gmra.mrb[6].mxu0 %vm1778_vm4, %v11493_v3  ;;  %8938 = vmatmul.mubr.msk.f32.vlgmr.msra.gmra.mrb[14].mxu1 %vm1778_vm4, %v11493_v3 }
 0x525   : > { %9891 = vmatpush3.bf16.msra.mxu1 %v11138_v60  ;;  %v1487_v46 = vpop.permute.xlu0 %1486  ;;  %v1575_v57 = vpop.permute.xlu1 %1574  ;;  %1909 = vmatprep.mubr.f32.mxu0 %v16129_v14 }
 0x526   : > { %v10641_v51 = vpop.eup %10640  ;;  %9892 = vmatprep.subr.bf16.mxu1 %v11145_v1  ;;  %v1616_v55 = vsel %vm1277_vm3, %v1606_v26, %v1575_v57  ;;  %2154 = vmatprep.mubr.f32.mxu1 %v16129_v14  ;;  %v457_v57 = vld [vmem:[%s11489_s27 + $0x48] sm:$0xff] }
 0x527   : > { %10642 = vrcp.f32 %v1616_v55  ;;  %1652 = vrot.lane.b32.xlu0 %v10639_v29, %s16160_s18  ;;  %1646 = vrot.lane.b32.xlu1 %v10641_v51, %s16160_s18 }
 0x529   : > { %9893 = vmatpush3.bf16.msra.mxu1 %v11145_v1  ;;  %v1681_v60 = vpop.permute.xlu0 %1680  ;;  %v1517_v62 = vpop.permute.xlu1 %1516 }
 0x52a   : > { %v11511_v32 = vadd.f32 %v1681_v60, %v449_v56  ;;  %9894 = vmatprep.subr.bf16.mxu1 %v11151_v6  ;;  %v1597_v63 = vsel %vm1255_vm1, %v1487_v46, %v1517_v62 }
 0x52b   : > { %1728 = vrot.lane.b32.xlu1 %v11493_v3, %s10938_s28 }
 0x52c   : > { %8909 = vmatmul.mubr.msk.f32.gmra.mrb[8].mxu0 %vm1778_vm4, %v11511_v32  ;;  %8939 = vmatmul.mubr.msk.f32.gmra.mrb[16].mxu1 %vm1778_vm4, %v11511_v32 }
 0x52d   : > { %9895 = vmatpush3.bf16.msra.mxu1 %v11151_v6  ;;  %v1577_v1 = vpop.permute.xlu0 %1576  ;;  %v1547_v0 = vpop.permute.xlu1 %1546  ;;  %1915 = vmatprep.mubr.f32.mxu0 %v16129_v14 }
 0x52e   : > { %9896 = vmatprep.subr.bf16.mxu1 %v11155_v11  ;;  %v1607_v4 = vsel %vm1266_vm2, %v1597_v63, %v1547_v0  ;;  %2160 = vmatprep.mubr.f32.mxu1 %v16129_v14 }
 0x52f   : > { %v1617_v7 = vsel %vm1277_vm3, %v1607_v4, %v1577_v1  ;;  %1730 = vrot.lane.b32.xlu1 %v11511_v32, %s10938_s28 }
 0x530   : > { %10644 = vrcp.f32 %v1617_v7 }
 0x531   : > { %v10643_v59 = vpop.eup %10642  ;;  %9897 = vmatpush3.bf16.msra.mxu1 %v11155_v11  ;;  %v1685_v6 = vpop.permute.xlu0 %1684 }
 0x532   : > { %v1683_v61 = vpop.permute.xlu1 %1682  ;;  %9898 = vmatprep.subr.bf16.mxu1 %v11157_v15  ;;  %1654 = vrot.lane.b32.xlu0 %v10643_v59, %s16160_s18  ;;  %v11543_v22 = vadd.f32 %v1685_v6, %v451_v28 }
 0x533   : > { %v11531_v21 = vadd.f32 %v1683_v61, %v450_v12 }
 0x535   : > { %1732 = vrot.lane.b32.xlu1 %v11531_v21, %s10938_s28  ;;  %8910 = vmatmul.mubr.msk.f32.gmra.mrb[10].mxu0 %vm1778_vm4, %v11531_v21  ;;  %v1689_v11 = vpop.permute.xlu0 %1688 }
 0x536   : > { %8940 = vmatmul.mubr.msk.f32.gmra.mrb[18].mxu1 %vm1778_vm4, %v11531_v21  ;;  %v1687_v2 = vpop.permute.xlu1 %1686  ;;  %1921 = vmatprep.mubr.f32.mxu0 %v16129_v14  ;;  %v11565_v25 = vadd.f32 %v1689_v11, %v453_v27 }
 0x537   : > { %9899 = vmatpush3.bf16.msra.mxu1 %v11157_v15  ;;  %2166 = vmatprep.mubr.f32.mxu1 %v16129_v14  ;;  %v11556_v15 = vadd.f32 %v1687_v2, %v452_v30 }
 0x539   : > { %1734 = vrot.lane.b32.xlu1 %v11543_v22, %s10938_s28  ;;  %8911 = vmatmul.mubr.msk.f32.gmra.mrb[12].mxu0 %vm1778_vm4, %v11543_v22  ;;  %v1693_v34 = vpop.permute.xlu0 %1692 }
 0x53a   : > { %8941 = vmatmul.mubr.msk.f32.gmra.mrb[20].mxu1 %vm1778_vm4, %v11543_v22  ;;  %v1691_v37 = vpop.permute.xlu1 %1690  ;;  %1927 = vmatprep.mubr.f32.mxu0 %v16129_v14  ;;  %v10645_v36 = vpop.eup %10644  ;;  %v11581_v46 = vadd.f32 %v1693_v34, %v455_v24 }
 0x53b   : > { %2172 = vmatprep.mubr.f32.mxu1 %v16129_v14  ;;  %1656 = vrot.lane.b32.xlu0 %v10645_v36, %s16160_s18  ;;  %v11571_v33 = vadd.f32 %v1691_v37, %v454_v16 }
 0x53d   : > { %1736 = vrot.lane.b32.xlu1 %v11556_v15, %s10938_s28  ;;  %8912 = vmatmul.mubr.msk.f32.gmra.mrb[14].mxu0 %vm1778_vm4, %v11556_v15  ;;  %v1697_v26 = vpop.permute.xlu0 %1696 }
 0x53e   : > { %8942 = vmatmul.mubr.msk.f32.gmra.mrb[22].mxu1 %vm1778_vm4, %v11556_v15  ;;  %1933 = vmatprep.mubr.f32.mxu0 %v16129_v14  ;;  %v1695_v29 = vpop.permute.xlu1 %1694  ;;  %v11596_v55 = vadd.f32 %v1697_v26, %v457_v57 }
 0x53f   : > { %2178 = vmatprep.mubr.f32.mxu1 %v16129_v14  ;;  %1738 = vrot.lane.b32.xlu0 %v11565_v25, %s10938_s28  ;;  %v11587_v51 = vadd.f32 %v1695_v29, %v456_v23 }
 0x541   : > { %8913 = vmatmul.mubr.msk.f32.gmra.mrb[16].mxu0 %vm1778_vm4, %v11565_v25  ;;  %1740 = vrot.lane.b32.xlu1 %v11571_v33, %s10938_s28  ;;  %v1641_v56 = vpop.permute.xlu0 %1640 }
 0x542   : > { %8943 = vmatmul.mubr.msk.f32.gmra.mrb[24].mxu1 %vm1778_vm4, %v11565_v25  ;;  %1939 = vmatprep.mubr.f32.mxu0 %v16129_v14  ;;  %v1669_v60 = vmul.f32 %v11300_v13, %v1641_v56 }
 0x543   : > { %2184 = vmatprep.mubr.f32.mxu1 %v16129_v14  ;;  %1742 = vrot.lane.b32.xlu0 %v11581_v46, %s10938_s28 }
 0x545   : > { %8914 = vmatmul.mubr.msk.f32.gmra.mrb[18].mxu0 %vm1778_vm4, %v11571_v33  ;;  %1744 = vrot.lane.b32.xlu1 %v11587_v51, %s10938_s28 }
 0x546   : > { %8944 = vmatmul.mubr.msk.f32.gmra.mrb[26].mxu1 %vm1778_vm4, %v11571_v33  ;;  %1945 = vmatprep.mubr.f32.mxu0 %v16129_v14 }
 0x547   : > { %2190 = vmatprep.mubr.f32.mxu1 %v16129_v14  ;;  %1746 = vrot.lane.b32.xlu0 %v11596_v55, %s10938_s28 }
 0x549   : > { %8915 = vmatmul.mubr.msk.f32.gmra.mrb[20].mxu0 %vm1778_vm4, %v11581_v46 }
 0x54a   : > { %8945 = vmatmul.mubr.msk.f32.gmra.mrb[28].mxu1 %vm1778_vm4, %v11581_v46  ;;  %1951 = vmatprep.mubr.f32.mxu0 %v16129_v14 }
 0x54b   : > { %2196 = vmatprep.mubr.f32.mxu1 %v16129_v14  ;;  %1760 = vrot.lane.b32.xlu0 %v1669_v60, %s16160_s18 }
 0x54d   : > { %8916 = vmatmul.mubr.msk.f32.gmra.mrb[22].mxu0 %vm1778_vm4, %v11587_v51 }
 0x54e   : > { %8946 = vmatmul.mubr.msk.f32.gmra.mrb[30].mxu1 %vm1778_vm4, %v11587_v51  ;;  %1957 = vmatprep.mubr.f32.mxu0 %v16129_v14 }
 0x54f   : > { %2202 = vmatprep.mubr.f32.mxu1 %v16129_v14 }
 0x551   : > { %8917 = vmatmul.mubr.msk.f32.gmra.mrb[24].mxu0 %vm1778_vm4, %v11596_v55 }
 0x552   : > { %8947 = vmatmul.mubr.msk.f32.gmra.mrb[32].mxu1 %vm1778_vm4, %v11596_v55  ;;  %1963 = vmatprep.mubr.f32.mxu0 %v16129_v14 }
 0x553   : > { %2208 = vmatprep.mubr.f32.mxu1 %v16129_v14 }
 0x571   : > { %v1639_v13 = vpop.permute.xlu1 %1638 }
 0x572   : > { %v1668_v62 = vmul.f32 %v11305_v20, %v1639_v13 }
 0x574   : > { %1758 = vrot.lane.b32.xlu1 %v1668_v62, %s16160_s18 }
 0x581   : > { %v1645_v63 = vpop.permute.xlu0 %1644 }
 0x582   : > { %v1671_v1 = vmul.f32 %v11311_v41, %v1645_v63 }
 0x584   : > { %1764 = vrot.lane.b32.xlu0 %v1671_v1, %s16160_s18 }
 0x589   : > { %v1643_v0 = vpop.permute.xlu1 %1642 }
 0x58a   : > { %v1670_v4 = vmul.f32 %v11316_v58, %v1643_v0 }
 0x58c   : > { %1762 = vrot.lane.b32.xlu1 %v1670_v4, %s16160_s18 }
 0x591   : > { %v1649_v7 = vpop.permute.xlu0 %1648 }
 0x592   : > { %v1673_v12 = vmul.f32 %v11323_v17, %v1649_v7 }
 0x594   : > { %1768 = vrot.lane.b32.xlu0 %v1673_v12, %s16160_s18 }
 0x595   : > { %v1651_v59 = vpop.permute.xlu0 %1650 }
 0x596   : > { %v1674_v58 = vmul.f32 %v11334_v9, %v1651_v59 }
 0x599   : > { %v1653_v6 = vpop.permute.xlu0 %1652  ;;  %v1647_v20 = vpop.permute.xlu1 %1646 }
 0x59a   : > { %v1675_v61 = vmul.f32 %v11332_v8, %v1653_v6  ;;  %v1672_v28 = vmul.f32 %v11328_v5, %v1647_v20  ;;  %v462_v5 = vld [vmem:[%s16108_s7 + $0x20] sm:$0xff]  ;;  %v467_v8 = vld [vmem:[%s16108_s7 + $0x48] sm:$0xff] }
 0x59b   : > { %v11660_v9 = vpack.c.bf16 %v467_v8, %v462_v5 }
 0x59c   : > { %1772 = vrot.lane.b32.xlu0 %v1675_v61, %s16160_s18  ;;  %1766 = vrot.lane.b32.xlu1 %v1672_v28, %s16160_s18 }
 0x59d   : > { %v11636_v41 = vpop.permute.xlu1 %1728  ;;  %16266 = vst [vmem:[#allocation19_spill] sm:$0xff] %v11660_v9  ;;  %10393 = vmatprep.subr.bf16.mxu0 %v11660_v9 }
 0x59e   : > { %8918 = vmatmul.mubr.msk.f32.gmra.mrb[26].mxu0 %vm1778_vm4, %v11636_v41  ;;  %8948 = vmatmul.mubr.msk.f32.gmra.mrb[34].mxu1 %vm1778_vm4, %v11636_v41 }
 0x59f   : > { %1969 = vmatprep.mubr.f32.mxu0 %v16129_v14  ;;  %2214 = vmatprep.mubr.f32.mxu1 %v16129_v14 }
 0x5a0   : > { %1770 = vrot.lane.b32.xlu1 %v1674_v58, %s16160_s18  ;;  %10395 = vmatpush3.bf16.msra.mxu0 %v11660_v9 }
 0x5a1   : > { %v11646_v17 = vpop.permute.xlu1 %1730 }
 0x5a2   : > { %8919 = vmatmul.mubr.msk.f32.gmra.mrb[28].mxu0 %vm1778_vm4, %v11646_v17  ;;  %8949 = vmatmul.mubr.msk.f32.gmra.mrb[36].mxu1 %vm1778_vm4, %v11646_v17 }
 0x5a3   : > { %1975 = vmatprep.mubr.f32.mxu0 %v16129_v14  ;;  %2220 = vmatprep.mubr.f32.mxu1 %v16129_v14 }
 0x5a4   : > { %v1655_v11 = vpop.permute.xlu0 %1654 }
 0x5a5   : > { %v1676_v2 = vmul.f32 %v11341_v18, %v1655_v11 }
 0x5a7   : > { %v11664_v30 = vpop.permute.xlu1 %1732  ;;  %1774 = vrot.lane.b32.xlu1 %v1676_v2, %s16160_s18 }
 0x5a8   : > { %8920 = vmatmul.mubr.msk.f32.gmra.mrb[30].mxu0 %vm1778_vm4, %v11664_v30  ;;  %8950 = vmatmul.mubr.msk.f32.gmra.mrb[38].mxu1 %vm1778_vm4, %v11664_v30 }
 0x5a9   : > { %1981 = vmatprep.mubr.f32.mxu0 %v16129_v14  ;;  %2226 = vmatprep.mubr.f32.mxu1 %v16129_v14 }
 0x5ab   : > { %v11674_v37 = vpop.permute.xlu1 %1734 }
 0x5ac   : > { %8921 = vmatmul.mubr.msk.f32.gmra.mrb[32].mxu0 %vm1778_vm4, %v11674_v37  ;;  %8951 = vmatmul.mubr.msk.f32.gmra.mrb[40].mxu1 %vm1778_vm4, %v11674_v37 }
 0x5ad   : > { %1987 = vmatprep.mubr.f32.mxu0 %v16129_v14  ;;  %v1657_v18 = vpop.permute.xlu0 %1656  ;;  %2232 = vmatprep.mubr.f32.mxu1 %v16129_v14 }
 0x5ae   : > { %v1677_v36 = vmul.f32 %v11345_v19, %v1657_v18 }
 0x5af   : > { %v11683_v27 = vpop.permute.xlu1 %1736 }
 0x5b0   : > { %8922 = vmatmul.mubr.msk.f32.gmra.mrb[34].mxu0 %vm1778_vm4, %v11683_v27  ;;  %8952 = vmatmul.mubr.msk.f32.gmra.mrb[42].mxu1 %vm1778_vm4, %v11683_v27 }
 0x5b1   : > { %1776 = vrot.lane.b32.xlu0 %v1677_v36, %s16160_s18  ;;  %v11690_v34 = vpop.permute.xlu0 %1738  ;;  %1993 = vmatprep.mubr.f32.mxu0 %v16129_v14 }
 0x5b2   : > { %2238 = vmatprep.mubr.f32.mxu1 %v16129_v14 }
 0x5b3   : > { %v11700_v19 = vpop.permute.xlu1 %1740 }
 0x5b4   : > { %8923 = vmatmul.mubr.msk.f32.gmra.mrb[36].mxu0 %vm1778_vm4, %v11690_v34  ;;  %8953 = vmatmul.mubr.msk.f32.gmra.mrb[44].mxu1 %vm1778_vm4, %v11690_v34 }
 0x5b5   : > { %1999 = vmatprep.mubr.f32.mxu0 %v16129_v14  ;;  %2244 = vmatprep.mubr.f32.mxu1 %v16129_v14  ;;  %v11708_v16 = vpop.permute.xlu0 %1742 }
 0x5b7   : > { %v11716_v24 = vpop.permute.xlu1 %1744 }
 0x5b8   : > { %8924 = vmatmul.mubr.msk.f32.gmra.mrb[38].mxu0 %vm1778_vm4, %v11700_v19  ;;  %8954 = vmatmul.mubr.msk.f32.gmra.mrb[46].mxu1 %vm1778_vm4, %v11700_v19 }
 0x5b9   : > { %2005 = vmatprep.mubr.f32.mxu0 %v16129_v14  ;;  %2250 = vmatprep.mubr.f32.mxu1 %v16129_v14  ;;  %v11724_v23 = vpop.permute.xlu0 %1746 }
 0x5bc   : > { %8925 = vmatmul.mubr.msk.f32.gmra.mrb[40].mxu0 %vm1778_vm4, %v11708_v16  ;;  %8955 = vmatmul.mubr.msk.f32.gmra.mrb[48].mxu1 %vm1778_vm4, %v11708_v16 }
 0x5bd   : > { %2011 = vmatprep.mubr.f32.mxu0 %v16129_v14  ;;  %2256 = vmatprep.mubr.f32.mxu1 %v16129_v14  ;;  %v11740_v26 = vpop.permute.xlu0 %1760 }
 0x5c0   : > { %8926 = vmatmul.mubr.msk.f32.gmra.mrb[42].mxu0 %vm1778_vm4, %v11716_v24  ;;  %8956 = vmatmul.mubr.msk.f32.gmra.mrb[50].mxu1 %vm1778_vm4, %v11716_v24 }
 0x5c1   : > { %2017 = vmatprep.mubr.f32.mxu0 %v16129_v14  ;;  %2262 = vmatprep.mubr.f32.mxu1 %v16129_v14 }
 0x5c4   : > { %8927 = vmatmul.mubr.msk.f32.gmra.mrb[44].mxu0 %vm1778_vm4, %v11724_v23  ;;  %8957 = vmatmul.mubr.msk.f32.gmra.mrb[52].mxu1 %vm1778_vm4, %v11724_v23 }
 0x5c5   : > { %2023 = vmatprep.mubr.f32.mxu0 %v16129_v14  ;;  %2268 = vmatprep.mubr.f32.mxu1 %v16129_v14 }
 0x5e6   : > { %v11732_v29 = vpop.permute.xlu1 %1758 }
 0x5e7   : > { %8928 = vmatmul.mubr.msk.f32.gmra.mrb[46].mxu0 %vm1778_vm4, %v11732_v29  ;;  %8958 = vmatmul.mubr.msk.f32.gmra.mrb[54].mxu1 %vm1778_vm4, %v11732_v29 }
 0x5e8   : > { %2029 = vmatprep.mubr.f32.mxu0 %v16129_v14  ;;  %2274 = vmatprep.mubr.f32.mxu1 %v16129_v14 }
 0x5eb   : > { %8929 = vmatmul.mubr.msk.f32.gmra.mrb[48].mxu0 %vm1778_vm4, %v11740_v26  ;;  %8959 = vmatmul.mubr.msk.f32.gmra.mrb[56].mxu1 %vm1778_vm4, %v11740_v26 }
 0x5ec   : > { %2035 = vmatprep.mubr.f32.mxu0 %v16129_v14  ;;  %2280 = vmatprep.mubr.f32.mxu1 %v16129_v14 }
 0x5f6   : > { %v11772_v7 = vpop.permute.xlu0 %1764 }
 0x5f7   : > { %v11748_v57 = vpop.f32.mrb[6].mxu0  ;;  %v11750_v56 = vpop.f32.mrb[14].mxu1 }
 0x5f8   : > { %v11752_v60 = vpop.f32.mrb[7].mxu0  ;;  %v11754_v13 = vpop.f32.mrb[15].mxu1 }
 0x5fe   : > { %v11756_v62 = vpop.permute.xlu1 %1762 }
 0x5ff   : > { %v11758_v63 = vpop.f32.mrb[8].mxu0  ;;  %8930 = vmatmul.mubr.msk.f32.gmra.mrb[50].mxu0 %vm1778_vm4, %v11756_v62  ;;  %v11762_v1 = vpop.f32.mrb[16].mxu1  ;;  %8960 = vmatmul.mubr.msk.f32.gmra.mrb[58].mxu1 %vm1778_vm4, %v11756_v62 }
 0x600   : > { %v11766_v0 = vpop.f32.mrb[9].mxu0  ;;  %v11768_v4 = vpop.f32.mrb[17].mxu1  ;;  %2041 = vmatprep.mubr.f32.mxu0 %v16129_v14  ;;  %2286 = vmatprep.mubr.f32.mxu1 %v16129_v14 }
 0x603   : > { %8931 = vmatmul.mubr.msk.f32.gmra.mrb[52].mxu0 %vm1778_vm4, %v11772_v7  ;;  %8961 = vmatmul.mubr.msk.f32.gmra.mrb[60].mxu1 %vm1778_vm4, %v11772_v7 }
 0x604   : > { %2047 = vmatprep.mubr.f32.mxu0 %v16129_v14  ;;  %2292 = vmatprep.mubr.f32.mxu1 %v16129_v14 }
 0x606   : > { %v11812_v39 = vpop.permute.xlu0 %1768 }
 0x608   : > { %v11780_v12 = vpop.f32.mrb[10].mxu0 }
 0x609   : > { %v11782_v59 = vpop.f32.mrb[18].mxu1  ;;  %v11784_v6 = vpop.f32.mrb[11].mxu0 }
 0x60a   : > { %v11786_v20 = vpop.f32.mrb[19].mxu1 }
 0x60c   : > { %v11788_v61 = vpop.f32.mrb[12].mxu0 }
 0x60d   : > { %v11790_v28 = vpop.f32.mrb[20].mxu1  ;;  %v11792_v58 = vpop.f32.mrb[13].mxu0 }
 0x60e   : > { %v11794_v5 = vpop.f32.mrb[21].mxu1  ;;  %v11796_v8 = vpop.permute.xlu1 %1766 }
 0x60f   : > { %8932 = vmatmul.mubr.msk.f32.gmra.mrb[54].mxu0 %vm1778_vm4, %v11796_v8  ;;  %8962 = vmatmul.mubr.msk.f32.gmra.mrb[62].mxu1 %vm1778_vm4, %v11796_v8  ;;  %v11842_v49 = vpop.permute.xlu0 %1772 }
 0x610   : > { %v11802_v11 = vpop.f32.mrb[14].mxu0  ;;  %2053 = vmatprep.mubr.f32.mxu0 %v16129_v14  ;;  %2298 = vmatprep.mubr.f32.mxu1 %v16129_v14 }
 0x611   : > { %v11804_v2 = vpop.f32.mrb[22].mxu1  ;;  %v11808_v18 = vpop.f32.mrb[15].mxu0 }
 0x612   : > { %v11810_v36 = vpop.f32.mrb[23].mxu1  ;;  %v11826_v53 = vpop.permute.xlu1 %1770 }
 0x613   : > { %8933 = vmatmul.mubr.msk.f32.gmra.mrb[56].mxu0 %vm1778_vm4, %v11812_v39  ;;  %8963 = vmatmul.mubr.msk.f32.gmra.mrb[64].mxu1 %vm1778_vm4, %v11812_v39 }
 0x614   : > { %v11818_v50 = vpop.f32.mrb[16].mxu0  ;;  %2059 = vmatprep.mubr.f32.mxu0 %v16129_v14  ;;  %2304 = vmatprep.mubr.f32.mxu1 %v16129_v14 }
 0x615   : > { %v11822_v44 = vpop.f32.mrb[24].mxu1  ;;  %v11824_v52 = vpop.f32.mrb[17].mxu0 }
 0x616   : > { %v11828_v47 = vpop.f32.mrb[25].mxu1 }
 0x617   : > { %8934 = vmatmul.mubr.msk.f32.gmra.mrb[58].mxu0 %vm1778_vm4, %v11826_v53  ;;  %8964 = vmatmul.mubr.msk.f32.gmra.mrb[66].mxu1 %vm1778_vm4, %v11826_v53 }
 0x618   : > { %v11830_v48 = vpop.f32.mrb[18].mxu0  ;;  %2065 = vmatprep.mubr.f32.mxu0 %v16129_v14  ;;  %2310 = vmatprep.mubr.f32.mxu1 %v16129_v14 }
 0x619   : > { %v11838_v54 = vpop.f32.mrb[26].mxu1  ;;  %v11840_v42 = vpop.f32.mrb[19].mxu0 }
 0x61a   : > { %16267 = vst [vmem:[#allocation20_spill] sm:$0xff] %v11838_v54  ;;  %16268 = vst [vmem:[#allocation21_spill] sm:$0xff] %v11840_v42  ;;  %v11844_v35 = vpop.f32.mrb[27].mxu1  ;;  %v11858_v31 = vpop.permute.xlu1 %1774 }
 0x61b   : > { %16269 = vst [vmem:[#allocation22_spill] sm:$0xff] %v11844_v35  ;;  %8935 = vmatmul.mubr.msk.f32.gmra.mrb[60].mxu0 %vm1778_vm4, %v11842_v49  ;;  %8965 = vmatmul.mubr.msk.f32.gmra.mrb[68].mxu1 %vm1778_vm4, %v11842_v49 }
 0x61c   : > { %v11846_v43 = vpop.f32.mrb[20].mxu0  ;;  %2071 = vmatprep.mubr.f32.mxu0 %v16129_v14  ;;  %2316 = vmatprep.mubr.f32.mxu1 %v16129_v14 }
 0x61d   : > { %16270 = vst [vmem:[#allocation23_spill] sm:$0xff] %v11846_v43  ;;  %v11854_v9 = vpop.f32.mrb[28].mxu1  ;;  %v11856_v10 = vpop.f32.mrb[21].mxu0 }
 0x61e   : > { %16271 = vst [vmem:[#allocation24_spill] sm:$0xff] %v11854_v9  ;;  %16272 = vst [vmem:[#allocation25_spill] sm:$0xff] %v11856_v10  ;;  %v11860_v42 = vpop.f32.mrb[29].mxu1  ;;  %v10566_v10 = vld [vmem:[%s16109_s8] sm:$0xff]  }
 0x61f   : > { %16273 = vst [vmem:[#allocation26_spill] sm:$0xff] %v11860_v42  ;;  %8936 = vmatmul.mubr.msk.f32.gmra.mrb[62].mxu0 %vm1778_vm4, %v11858_v31  ;;  %8966 = vmatmul.mubr.msk.f32.gmra.mrb[70].mxu1 %vm1778_vm4, %v11858_v31 }
 0x620   : > { %v11862_v35 = vpop.f32.mrb[22].mxu0  ;;  %2077 = vmatprep.mubr.f32.mxu0 %v16129_v14  ;;  %2322 = vmatprep.mubr.f32.mxu1 %v16129_v14  ;;  %v10567_v14 = vld [vmem:[%s16109_s8 + $0x8] sm:$0xff]  }
 0x621   : > { %16274 = vst [vmem:[#allocation27_spill] sm:$0xff] %v11862_v35  ;;  %v11873_v9 = vpop.f32.mrb[30].mxu1  ;;  %v11875_v43 = vpop.f32.mrb[23].mxu0 }
 0x622   : > { %16275 = vst [vmem:[#allocation28_spill] sm:$0xff] %v11873_v9  ;;  %16276 = vst [vmem:[#allocation29_spill] sm:$0xff] %v11875_v43  ;;  %v11877_v35 = vpop.f32.mrb[31].mxu1 }
 0x623   : > { %16277 = vst [vmem:[#allocation30_spill] sm:$0xff] %v11877_v35  ;;  %v11879_v42 = vpop.permute.xlu0 %1776  ;;  %v10568_v35 = vld [vmem:[%s16109_s8 + $0x10] sm:$0xff]  }
 0x624   : > { %v11881_v54 = vpop.f32.mrb[24].mxu0  ;;  %8937 = vmatmul.mubr.msk.f32.gmra.mrb[64].mxu0 %vm1778_vm4, %v11879_v42  ;;  %8967 = vmatmul.mubr.msk.f32.gmra.mrb[72].mxu1 %vm1778_vm4, %v11879_v42 }
 0x625   : > { %16278 = vst [vmem:[#allocation31_spill] sm:$0xff] %v11881_v54  ;;  %9845 = vmatprep.mubr.msk.f32.mxu0 %vm1778_vm4, %v11493_v3  ;;  %9900 = vmatprep.mubr.msk.bf16.mxu1 %vm3326_vm5, %v10566_v10  ;;  %v11896_v54 = vpop.f32.mrb[32].mxu1  ;;  %v11898_v43 = vpop.f32.mrb[25].mxu0  ;;  %v10569_v10 = vld [vmem:[%s16109_s8 + $0x18] sm:$0xff]   ;;  %v10570_v3 = vld [vmem:[%s16109_s8 + $0x20] sm:$0xff]  }
 0x626   : > { %v11900_v9 = vpop.f32.mrb[33].mxu1 }
 0x628   : > { %9846 = vmatmul.mubr.msk.f32.vlgmr.msra.gmra.mrb[66].mxu0 %vm1778_vm4, %v11511_v32  ;;  %9901 = vmatmul.mubr.msk.bf16.vlgmr.msra.gmra.mrb[76].mxu1 %vm3326_vm5, %v10567_v14  ;;  %v10572_v14 = vld [vmem:[%s16109_s8 + $0x30] sm:$0xff]   ;;  %v10573_v32 = vld [vmem:[%s16109_s8 + $0x38] sm:$0xff]  }
 0x629   : > { %9848 = vmatprep.mubr.msk.f32.mxu0 %vm1778_vm4, %v11531_v21  ;;  %9904 = vmatprep.mubr.msk.bf16.mxu1 %vm3326_vm5, %v10568_v35  ;;  %v10571_v35 = vld [vmem:[%s16109_s8 + $0x28] sm:$0xff]   ;;  %v10574_v21 = vld [vmem:[%s16109_s8 + $0x40] sm:$0xff]  }
 0x62c   : > { %9849 = vmatmul.mubr.msk.f32.gmra.mrb[68].mxu0 %vm1778_vm4, %v11543_v22  ;;  %v10575_v22 = vld [vmem:[%s16109_s8 + $0x48] sm:$0xff]  }
 0x62d   : > { %9851 = vmatprep.mubr.msk.f32.mxu0 %vm1778_vm4, %v11556_v15  ;;  %v10576_v15 = vld [vmem:[%s16109_s8 + $0x50] sm:$0xff]  }
 0x630   : > { %9852 = vmatmul.mubr.msk.f32.gmra.mrb[70].mxu0 %vm1778_vm4, %v11565_v25  ;;  %9905 = vmatmul.mubr.msk.bf16.gmra.mrb[80].mxu1 %vm3326_vm5, %v10569_v10  ;;  %v10577_v25 = vld [vmem:[%s16109_s8 + $0x58] sm:$0xff]   ;;  %v10590_v10 = vld [vmem:[%s16109_s8 + $0xc0] sm:$0xff]  }
 0x631   : > { %9854 = vmatprep.mubr.msk.f32.mxu0 %vm1778_vm4, %v11571_v33  ;;  %9908 = vmatprep.mubr.msk.bf16.mxu1 %vm3326_vm5, %v10570_v3  ;;  %v10578_v33 = vld [vmem:[%s16109_s8 + $0x60] sm:$0xff]  }
 0x634   : > { %9855 = vmatmul.mubr.msk.f32.gmra.mrb[72].mxu0 %vm1778_vm4, %v11581_v46  ;;  %v10579_v46 = vld [vmem:[%s16109_s8 + $0x68] sm:$0xff]  }
 0x635   : > { %9857 = vmatprep.mubr.msk.f32.mxu0 %vm1778_vm4, %v11587_v51  ;;  %v10580_v51 = vld [vmem:[%s16109_s8 + $0x70] sm:$0xff]  }
 0x638   : > { %9858 = vmatmul.mubr.msk.f32.gmra.mrb[74].mxu0 %vm1778_vm4, %v11596_v55  ;;  %9909 = vmatmul.mubr.msk.bf16.gmra.mrb[84].mxu1 %vm3326_vm5, %v10571_v35  ;;  %v10581_v55 = vld [vmem:[%s16109_s8 + $0x78] sm:$0xff]  }
 0x639   : > { %9860 = vmatprep.mubr.msk.f32.mxu0 %vm1778_vm4, %v11636_v41  ;;  %9912 = vmatprep.mubr.msk.bf16.mxu1 %vm3326_vm5, %v10572_v14 }
 0x63c   : > { %9861 = vmatmul.mubr.msk.f32.gmra.mrb[76].mxu0 %vm1778_vm4, %v11646_v17 }
 0x63d   : > { %9863 = vmatprep.mubr.msk.f32.mxu0 %vm1778_vm4, %v11664_v30 }
 0x640   : > { %9864 = vmatmul.mubr.msk.f32.gmra.mrb[78].mxu0 %vm1778_vm4, %v11674_v37  ;;  %9913 = vmatmul.mubr.msk.bf16.gmra.mrb[88].mxu1 %vm3326_vm5, %v10573_v32 }
 0x641   : > { %9866 = vmatprep.mubr.msk.f32.mxu0 %vm1778_vm4, %v11683_v27  ;;  %9916 = vmatprep.mubr.msk.bf16.mxu1 %vm3326_vm5, %v10574_v21  ;;  %v10587_v27 = vld [vmem:[%s16109_s8 + $0xa8] sm:$0xff]  }
 0x644   : > { %9867 = vmatmul.mubr.msk.f32.gmra.mrb[80].mxu0 %vm1778_vm4, %v11690_v34  ;;  %v10588_v34 = vld [vmem:[%s16109_s8 + $0xb0] sm:$0xff]  }
 0x645   : > { %9869 = vmatprep.mubr.msk.f32.mxu0 %vm1778_vm4, %v11700_v19 }
 0x648   : > { %9870 = vmatmul.mubr.msk.f32.gmra.mrb[82].mxu0 %vm1778_vm4, %v11708_v16  ;;  %9917 = vmatmul.mubr.msk.bf16.gmra.mrb[92].mxu1 %vm3326_vm5, %v10575_v22 }
 0x649   : > { %9872 = vmatprep.mubr.msk.f32.mxu0 %vm1778_vm4, %v11716_v24  ;;  %9920 = vmatprep.mubr.msk.bf16.mxu1 %vm3326_vm5, %v10576_v15  ;;  %v10591_v15 = vld [vmem:[%s16109_s8 + $0xc8] sm:$0xff]  }
 0x64c   : > { %9873 = vmatmul.mubr.msk.f32.gmra.mrb[84].mxu0 %vm1778_vm4, %v11724_v23 }
 0x64d   : > { %9875 = vmatprep.mubr.msk.f32.mxu0 %vm1778_vm4, %v11732_v29 }
 0x650   : > { %9876 = vmatmul.mubr.msk.f32.gmra.mrb[86].mxu0 %vm1778_vm4, %v11740_v26  ;;  %9921 = vmatmul.mubr.msk.bf16.gmra.mrb[96].mxu1 %vm3326_vm5, %v10577_v25  ;;  %v12090_v25 = vsub.s32 2, %v11090_v38 }
 0x651   : > { %9878 = vmatprep.mubr.msk.f32.mxu0 %vm1778_vm4, %v11756_v62  ;;  %9924 = vmatprep.mubr.msk.bf16.mxu1 %vm3326_vm5, %v10578_v33 }
 0x652   : > { %16286 = vst [vmem:[#allocation39_spill] sm:$0xff] %v12090_v25 }
 0x654   : > { %9879 = vmatmul.mubr.msk.f32.gmra.mrb[88].mxu0 %vm1778_vm4, %v11772_v7  ;;  %v10589_v7 = vld [vmem:[%s16109_s8 + $0xb8] sm:$0xff]  }
 0x655   : > { %9881 = vmatprep.mubr.msk.f32.mxu0 %vm1778_vm4, %v11796_v8 }
 0x658   : > { %9882 = vmatmul.mubr.msk.f32.gmra.mrb[90].mxu0 %vm1778_vm4, %v11812_v39  ;;  %9925 = vmatmul.mubr.msk.bf16.gmra.mrb[100].mxu1 %vm3326_vm5, %v10579_v46  ;;  %v10582_v39 = vld [vmem:[%s16109_s8 + $0x80] sm:$0xff]  }
 0x659   : > { %9884 = vmatprep.mubr.msk.f32.mxu0 %vm1778_vm4, %v11826_v53  ;;  %9928 = vmatprep.mubr.msk.bf16.mxu1 %vm3326_vm5, %v10580_v51  ;;  %v10584_v53 = vld [vmem:[%s16109_s8 + $0x90] sm:$0xff]  }
 0x65a   : > { %v10592_v51 = vld [vmem:[%s16109_s8 + $0xd0] sm:$0xff]  }
 0x65c   : > { %9885 = vmatmul.mubr.msk.f32.gmra.mrb[92].mxu0 %vm1778_vm4, %v11842_v49  ;;  %v10583_v49 = vld [vmem:[%s16109_s8 + $0x88] sm:$0xff]  }
 0x65d   : > { %9887 = vmatprep.mubr.msk.f32.mxu0 %vm1778_vm4, %v11858_v31  ;;  %v10586_v31 = vld [vmem:[%s16109_s8 + $0xa0] sm:$0xff]  }
 0x660   : > { %9888 = vmatmul.mubr.msk.f32.gmra.mrb[94].mxu0 %vm1778_vm4, %v11879_v42  ;;  %9929 = vmatmul.mubr.msk.bf16.gmra.mrb[104].mxu1 %vm3326_vm5, %v10581_v55  ;;  %v10585_v42 = vld [vmem:[%s16109_s8 + $0x98] sm:$0xff]   ;;  %v628_v55 = vld [vmem:[%s16111_s10] ss:$2 sm:$0x1f] }
 0x661   : > { %9932 = vmatprep.mubr.msk.bf16.mxu1 %vm3326_vm5, %v10582_v39  ;;  %v12103_v39 = vsub.s32 3, %v11090_v38  ;;  %v10593_v38 = vld [vmem:[%s16109_s8 + $0xd8] sm:$0xff]  }
 0x663   : > { %16289 = vst [vmem:[#allocation42_spill] sm:$0xff] %v12103_v39 }
 0x668   : > { %9933 = vmatmul.mubr.msk.bf16.gmra.mrb[108].mxu1 %vm3326_vm5, %v10583_v49 }
 0x669   : > { %9936 = vmatprep.mubr.msk.bf16.mxu1 %vm3326_vm5, %v10584_v53  ;;  %v12109_v53 = vrot.slane %v628_v55, %v11113_v45 }
 0x66b   : > { %16291 = vst [vmem:[#allocation44_spill] sm:$0xff] %v12109_v53 }
 0x670   : > { %9937 = vmatmul.mubr.msk.bf16.gmra.mrb[112].mxu1 %vm3326_vm5, %v10585_v42  ;;  %v12112_v42 = vrot.slane %v628_v55, %v12090_v25 }
 0x671   : > { %9940 = vmatprep.mubr.msk.bf16.mxu1 %vm3326_vm5, %v10586_v31  ;;  %v12034_v41 = vpop.f32.mrb[26].mxu0  ;;  %v12036_v17 = vpop.f32.mrb[34].mxu1 }
 0x672   : > { %v12038_v30 = vpop.f32.mrb[27].mxu0  ;;  %v12040_v37 = vpop.f32.mrb[35].mxu1  ;;  %16292 = vst [vmem:[#allocation45_spill] sm:$0xff] %v12112_v42 }
 0x675   : > { %v12048_v19 = vpop.f32.mrb[28].mxu0  ;;  %v12050_v16 = vpop.f32.mrb[36].mxu1 }
 0x676   : > { %v12052_v24 = vpop.f32.mrb[29].mxu0  ;;  %v12054_v23 = vpop.f32.mrb[37].mxu1 }
 0x678   : > { %9941 = vmatmul.mubr.msk.bf16.gmra.mrb[116].mxu1 %vm3326_vm5, %v10587_v27 }
 0x679   : > { %9944 = vmatprep.mubr.msk.bf16.mxu1 %vm3326_vm5, %v10588_v34  ;;  %v12120_v34 = vrot.slane %v628_v55, %v11097_v40 }
 0x67b   : > { %v12058_v29 = vpop.f32.mrb[30].mxu0  ;;  %v12060_v26 = vpop.f32.mrb[38].mxu1  ;;  %16295 = vst [vmem:[#allocation48_spill] sm:$0xff] %v12120_v34 }
 0x67c   : > { %v12062_v62 = vpop.f32.mrb[31].mxu0  ;;  %v12067_v8 = vpop.f32.mrb[39].mxu1 }
 0x67d   : > { %16279 = vst [vmem:[#allocation32_spill] sm:$0xff] %v12067_v8  ;;  %v2585_v8 = vsub.f32 %v12109_v53, %v11788_v61 }
 0x67f   : > { %v12072_v3 = vpop.f32.mrb[32].mxu0  ;;  %v12074_v35 = vpop.f32.mrb[40].mxu1 }
 0x680   : > { %16280 = vst [vmem:[#allocation33_spill] sm:$0xff] %v12072_v3  ;;  %16281 = vst [vmem:[#allocation34_spill] sm:$0xff] %v12074_v35  ;;  %v12076_v14 = vpop.f32.mrb[33].mxu0  ;;  %9945 = vmatmul.mubr.msk.bf16.gmra.mrb[120].mxu1 %vm3326_vm5, %v10589_v7  ;;  %v12079_v32 = vpop.f32.mrb[41].mxu1  ;;  %v12123_v7 = vrot.slane %v628_v55, %v12103_v39  ;;  %v10594_v55 = vld [vmem:[%s16109_s8 + $0xe0] sm:$0xff]  }
 0x681   : > { %16282 = vst [vmem:[#allocation35_spill] sm:$0xff] %v12076_v14  ;;  %16283 = vst [vmem:[#allocation36_spill] sm:$0xff] %v12079_v32  ;;  %9948 = vmatprep.mubr.msk.bf16.mxu1 %vm3326_vm5, %v10590_v10 }
 0x682   : > { %16296 = vst [vmem:[#allocation49_spill] sm:$0xff] %v12123_v7 }
 0x683   : > { %v12082_v21 = vpop.f32.mrb[34].mxu0  ;;  %v12084_v22 = vpop.f32.mrb[42].mxu1 }
 0x684   : > { %16284 = vst [vmem:[#allocation37_spill] sm:$0xff] %v12082_v21  ;;  %16285 = vst [vmem:[#allocation38_spill] sm:$0xff] %v12084_v22  ;;  %v12092_v33 = vpop.f32.mrb[35].mxu0  ;;  %v12094_v46 = vpop.f32.mrb[43].mxu1 }
 0x685   : > { %16287 = vst [vmem:[#allocation40_spill] sm:$0xff] %v12092_v33  ;;  %16288 = vst [vmem:[#allocation41_spill] sm:$0xff] %v12094_v46 }
 0x687   : > { %v12105_v49 = vpop.f32.mrb[36].mxu0  ;;  %v12114_v31 = vpop.f32.mrb[44].mxu1 }
 0x688   : > { %16290 = vst [vmem:[#allocation43_spill] sm:$0xff] %v12105_v49  ;;  %9949 = vmatmul.mubr.msk.bf16.gmra.mrb[124].mxu1 %vm3326_vm5, %v10591_v15  ;;  %16293 = vst [vmem:[#allocation46_spill] sm:$0xff] %v12114_v31  ;;  %v12116_v27 = vpop.f32.mrb[37].mxu0  ;;  %v12125_v10 = vpop.f32.mrb[45].mxu1  ;;  %v2570_v31 = vsub.f32 %v12109_v53, %v11748_v57  ;;  %v2575_v57 = vsub.f32 %v12109_v53, %v11758_v63 }
 0x689   : > { %16294 = vst [vmem:[#allocation47_spill] sm:$0xff] %v12116_v27  ;;  %9952 = vmatprep.mubr.msk.bf16.mxu1 %vm3326_vm5, %v10592_v51  ;;  %16297 = vst [vmem:[#allocation50_spill] sm:$0xff] %v12125_v10  ;;  %v2572_v51 = vsub.f32 %v12112_v42, %v11750_v56  ;;  %v2573_v10 = vsub.f32 %v12123_v7, %v11754_v13  ;;  %v2577_v56 = vsub.f32 %v12112_v42, %v11762_v1 }
 0x68a   : > { %v2576_v1 = vsub.f32 %v12120_v34, %v11766_v0  ;;  %v2625_v21 = vand.u32 2147483647, %v2575_v57  ;;  %v2581_v0 = vsub.f32 %v12120_v34, %v11784_v6  ;;  %v10596_v6 = vld [vmem:[%s16109_s8 + $0xf0] sm:$0xff]  }
 0x68b   : > { %v12127_v15 = vpop.f32.mrb[38].mxu0  ;;  %v12136_v27 = vpop.f32.mrb[46].mxu1  ;;  %v2622_v33 = vand.u32 2147483647, %v2572_v51  ;;  %v2627_v32 = vand.u32 2147483647, %v2577_v56 }
 0x68c   : > { %16298 = vst [vmem:[#allocation51_spill] sm:$0xff] %v12127_v15  ;;  %16299 = vst [vmem:[#allocation52_spill] sm:$0xff] %v12136_v27  ;;  %v12138_v49 = vpop.f32.mrb[39].mxu0  ;;  %v2571_v15 = vsub.f32 %v12120_v34, %v11752_v60  ;;  %v12147_v46 = vpop.f32.mrb[47].mxu1  ;;  %v2620_v60 = vand.u32 2147483647, %v2570_v31 }
 0x68d   : > { %16300 = vst [vmem:[#allocation53_spill] sm:$0xff] %v12138_v49  ;;  %16301 = vst [vmem:[#allocation54_spill] sm:$0xff] %v12147_v46  ;;  %v8887_v49 = vld [vmem:[%s16111_s10 + $0x1] ss:$2 sm:$0x1f]  ;;  %v2677_v14 = vsub.f32 1.0, %v2627_v32  ;;  %v2586_v32 = vsub.f32 %v12120_v34, %v11792_v58 }
 0x68e   : > { %v2621_v63 = vand.u32 2147483647, %v2571_v15  ;;  %v2623_v46 = vand.u32 2147483647, %v2573_v10  ;;  %v12173_v51 = vrot.slane %v8887_v49, %v11097_v40  ;;  %v2582_v10 = vsub.f32 %v12112_v42, %v11782_v59  ;;  %v10595_v15 = vld [vmem:[%s16109_s8 + $0xe8] sm:$0xff]  }
 0x68f   : > { %v12153_v27 = vpop.f32.mrb[40].mxu0  ;;  %v12159_v22 = vpop.f32.mrb[48].mxu1  ;;  %v12188_v57 = vrot.slane %v8887_v49, %v12090_v25  ;;  %v2670_v56 = vsub.f32 1.0, %v2620_v60  ;;  %v2631_v3 = vand.u32 2147483647, %v2581_v0  ;;  %v12232_v58 = vmax.f32 %v2677_v14, 0.0 }
 0x690   : > { %16302 = vst [vmem:[#allocation55_spill] sm:$0xff] %v12153_v27  ;;  %9953 = vmatmul.mubr.msk.bf16.gmra.mrb[128].mxu1 %vm3326_vm5, %v10593_v38  ;;  %16303 = vst [vmem:[#allocation56_spill] sm:$0xff] %v12159_v22  ;;  %v12161_v13 = vpop.f32.mrb[41].mxu0  ;;  %v12166_v27 = vpop.f32.mrb[49].mxu1  ;;  %v2578_v38 = vsub.f32 %v12123_v7, %v11768_v4  ;;  %v12185_v4 = vrot.slane %v8887_v49, %v11113_v45  ;;  %v2672_v45 = vsub.f32 1.0, %v2622_v33  ;;  %v2673_v60 = vsub.f32 1.0, %v2623_v46 }
 0x691   : > { %16304 = vst [vmem:[#allocation57_spill] sm:$0xff] %v12161_v13  ;;  %9956 = vmatprep.mubr.msk.bf16.mxu1 %vm3326_vm5, %v10594_v55  ;;  %16305 = vst [vmem:[#allocation58_spill] sm:$0xff] %v12166_v27  ;;  %v2580_v55 = vsub.f32 %v12109_v53, %v11780_v12  ;;  %v2583_v12 = vsub.f32 %v12123_v7, %v11786_v20  ;;  %v2671_v27 = vsub.f32 1.0, %v2621_v63  ;;  %v2626_v13 = vand.u32 2147483647, %v2576_v1  ;;  %v10598_v14 = vld [vmem:[%s16109_s8 + $0x100] sm:$0xff]  }
 0x692   : > { %16307 = vst [vmem:[#allocation60_spill] sm:$0xff] %v12173_v51  ;;  %16308 = vst [vmem:[#allocation61_spill] sm:$0xff] %v12185_v4  ;;  %v2675_v22 = vsub.f32 1.0, %v2625_v21  ;;  %v2628_v20 = vand.u32 2147483647, %v2578_v38  ;;  %v2587_v63 = vsub.f32 %v12112_v42, %v11790_v28  ;;  %v12220_v1 = vmax.f32 %v2672_v45, 0.0 }
 0x693   : > { %v12170_v31 = vpop.f32.mrb[42].mxu0  ;;  %16309 = vst [vmem:[#allocation62_spill] sm:$0xff] %v12188_v57  ;;  %v12192_v40 = vpop.f32.mrb[50].mxu1  ;;  %v2633_v33 = vand.u32 2147483647, %v2583_v12  ;;  %v12222_v61 = vmax.f32 %v2671_v27, 0.0 }
 0x694   : > { %16306 = vst [vmem:[#allocation59_spill] sm:$0xff] %v12170_v31  ;;  %16310 = vst [vmem:[#allocation63_spill] sm:$0xff] %v12192_v40  ;;  %v12194_v59 = vpop.f32.mrb[43].mxu0  ;;  %v12200_v31 = vrot.slane %v8887_v49, %v12103_v39  ;;  %v12202_v25 = vpop.f32.mrb[51].mxu1  ;;  %v2630_v40 = vand.u32 2147483647, %v2580_v55  ;;  %v2588_v55 = vsub.f32 %v12123_v7, %v11794_v5 }
 0x695   : > { %16311 = vst [vmem:[#allocation64_spill] sm:$0xff] %v12194_v59  ;;  %16313 = vst [vmem:[#allocation66_spill] sm:$0xff] %v12202_v25  ;;  %v2632_v59 = vand.u32 2147483647, %v2582_v10  ;;  %v12209_v49 = vmax.f32 %v2670_v56, 0.0  ;;  %v2676_v38 = vsub.f32 1.0, %v2626_v13 }
 0x696   : > { %16312 = vst [vmem:[#allocation65_spill] sm:$0xff] %v12200_v31  ;;  %v12228_v28 = vmax.f32 %v2673_v60, 0.0  ;;  %v12230_v0 = vmax.f32 %v2675_v22, 0.0  ;;  %v2680_v56 = vsub.f32 1.0, %v2630_v40  ;;  %v2635_v45 = vand.u32 2147483647, %v2585_v8 }
 0x697   : > { %v12204_v35 = vpop.f32.mrb[44].mxu0  ;;  %v12215_v21 = vpop.f32.mrb[52].mxu1  ;;  %v2682_v12 = vsub.f32 1.0, %v2632_v59  ;;  %v10597_v27 = vld [vmem:[%s16109_s8 + $0xf8] sm:$0xff]   ;;  %v2683_v13 = vsub.f32 1.0, %v2633_v33  ;;  %v2590_v60 = vsub.f32 %v12109_v53, %v11802_v11  ;;  %v12242_v22 = vmax.f32 %v2676_v38, 0.0 }
 0x698   : > { %16314 = vst [vmem:[#allocation67_spill] sm:$0xff] %v12204_v35  ;;  %9957 = vmatmul.mubr.msk.bf16.gmra.mrb[132].mxu1 %vm3326_vm5, %v10595_v15  ;;  %16315 = vst [vmem:[#allocation68_spill] sm:$0xff] %v12215_v21  ;;  %v12217_v46 = vpop.f32.mrb[45].mxu0  ;;  %v12226_v10 = vpop.f32.mrb[53].mxu1  ;;  %v2678_v15 = vsub.f32 1.0, %v2628_v20  ;;  %v2592_v8 = vsub.f32 %v12112_v42, %v11804_v2  ;;  %v2593_v20 = vsub.f32 %v12123_v7, %v11810_v36  ;;  %v2685_v2 = vsub.f32 1.0, %v2635_v45 }
 0x699   : > { %16316 = vst [vmem:[#allocation69_spill] sm:$0xff] %v12217_v46  ;;  %9960 = vmatprep.mubr.msk.bf16.mxu1 %vm3326_vm5, %v10596_v6  ;;  %16317 = vst [vmem:[#allocation70_spill] sm:$0xff] %v12226_v10  ;;  %v2681_v6 = vsub.f32 1.0, %v2631_v3  ;;  %v2637_v39 = vand.u32 2147483647, %v2587_v63  ;;  %v2591_v3 = vsub.f32 %v12120_v34, %v11808_v18  ;;  %v2595_v11 = vsub.f32 %v12109_v53, %v11818_v50 }
 0x69a   : > { %v2636_v5 = vand.u32 2147483647, %v2586_v32  ;;  %v2638_v40 = vand.u32 2147483647, %v2588_v55  ;;  %v12248_v59 = vmax.f32 %v2678_v15, 0.0  ;;  %v2597_v33 = vsub.f32 %v12112_v42, %v11822_v44 }
 0x69b   : > { %v12256_v63 = vmax.f32 %v2680_v56, 0.0  ;;  %v12258_v32 = vmax.f32 %v2682_v12, 0.0  ;;  %v12260_v38 = vmax.f32 %v2681_v6, 0.0  ;;  %v12263_v18 = vmax.f32 %v2683_v13, 0.0  ;;  %v16319_v13 = vld [vmem:[#allocation20_spill] sm:$0xff] }
 0x69c   : > { %v2687_v55 = vsub.f32 1.0, %v2637_v39  ;;  %v2686_v15 = vsub.f32 1.0, %v2636_v5  ;;  %v2640_v36 = vand.u32 2147483647, %v2590_v60  ;;  %v2688_v50 = vsub.f32 1.0, %v2638_v40  ;;  %v16320_v60 = vld [vmem:[#allocation21_spill] sm:$0xff] }
 0x69d   : > { %v2642_v10 = vand.u32 2147483647, %v2592_v8  ;;  %v2641_v46 = vand.u32 2147483647, %v2591_v3  ;;  %v2596_v44 = vsub.f32 %v12120_v34, %v11824_v52  ;;  %v2643_v56 = vand.u32 2147483647, %v2593_v20 }
 0x69e   : > { %v2645_v12 = vand.u32 2147483647, %v2595_v11  ;;  %v2647_v6 = vand.u32 2147483647, %v2597_v33  ;;  %v2598_v45 = vsub.f32 %v12123_v7, %v11828_v47  ;;  %v2600_v39 = vsub.f32 %v12109_v53, %v11830_v48  ;;  %v10599_v52 = vld [vmem:[%s16109_s8 + $0x108] sm:$0xff]   ;;  %v16323_v3 = vld [vmem:[#allocation22_spill] sm:$0xff] }
 0x69f   : > { %v2602_v5 = vsub.f32 %v12112_v42, %v16319_v13  ;;  %v12281_v40 = vmax.f32 %v2687_v55, 0.0  ;;  %v12283_v8 = vmax.f32 %v2686_v15, 0.0  ;;  %v2690_v47 = vsub.f32 1.0, %v2640_v36  ;;  %v10600_v48 = vld [vmem:[%s16109_s8 + $0x110] sm:$0xff]   ;;  %v16324_v36 = vld [vmem:[#allocation23_spill] sm:$0xff] }
 0x6a0   : > { %9961 = vmatmul.mubr.msk.bf16.gmra.mrb[136].mxu1 %vm3326_vm5, %v10597_v27  ;;  %v12270_v27 = vmax.f32 %v2685_v2, 0.0  ;;  %v2603_v20 = vsub.f32 %v12123_v7, %v16323_v3  ;;  %v12290_v11 = vmax.f32 %v2688_v50, 0.0  ;;  %v2692_v33 = vsub.f32 1.0, %v2642_v10  ;;  %v16325_v50 = vld [vmem:[#allocation24_spill] sm:$0xff] }
 0x6a1   : > { %9964 = vmatprep.mubr.msk.bf16.mxu1 %vm3326_vm5, %v10598_v14  ;;  %v2601_v14 = vsub.f32 %v12120_v34, %v16320_v60  ;;  %16321 = vst [vmem:[#allocation20_spill] sm:$0xff] %v12281_v40  ;;  %16322 = vst [vmem:[#allocation21_spill] sm:$0xff] %v12283_v8  ;;  %v2691_v2 = vsub.f32 1.0, %v2641_v46  ;;  %v2646_v13 = vand.u32 2147483647, %v2596_v44  ;;  %v2693_v60 = vsub.f32 1.0, %v2643_v56 }
 0x6a2   : > { %16318 = vst [vmem:[#allocation71_spill] sm:$0xff] %v12270_v27  ;;  %v2695_v21 = vsub.f32 1.0, %v2645_v12  ;;  %v2697_v35 = vsub.f32 1.0, %v2647_v6  ;;  %v2648_v55 = vand.u32 2147483647, %v2598_v45  ;;  %v2605_v40 = vsub.f32 %v12109_v53, %v16324_v36  ;;  %v16326_v46 = vld [vmem:[#allocation25_spill] sm:$0xff] }
 0x6a3   : > { %v2650_v25 = vand.u32 2147483647, %v2600_v39  ;;  %v2652_v15 = vand.u32 2147483647, %v2602_v5  ;;  %v2651_v8 = vand.u32 2147483647, %v2601_v14  ;;  %v2607_v10 = vsub.f32 %v12112_v42, %v16325_v50 }
 0x6a4   : > { %v12295_v3 = vmax.f32 %v2690_v47, 0.0  ;;  %v2653_v27 = vand.u32 2147483647, %v2603_v20  ;;  %v2606_v44 = vsub.f32 %v12120_v34, %v16326_v46  ;;  %v12302_v56 = vmax.f32 %v2692_v33, 0.0  ;;  %v16327_v45 = vld [vmem:[#allocation26_spill] sm:$0xff] }
 0x6a5   : > { %v12304_v12 = vmax.f32 %v2691_v2, 0.0  ;;  %v2696_v6 = vsub.f32 1.0, %v2646_v13  ;;  %v2608_v39 = vsub.f32 %v12123_v7, %v16327_v45  ;;  %v12308_v5 = vmax.f32 %v2693_v60, 0.0  ;;  %v10602_v60 = vld [vmem:[%s16109_s8 + $0x120] sm:$0xff]   ;;  %v16328_v45 = vld [vmem:[#allocation27_spill] sm:$0xff] }
 0x6a6   : > { %v12310_v14 = vmax.f32 %v2695_v21, 0.0  ;;  %v2698_v47 = vsub.f32 1.0, %v2648_v55  ;;  %v2700_v20 = vsub.f32 1.0, %v2650_v25  ;;  %v2702_v36 = vsub.f32 1.0, %v2652_v15 }
 0x6a7   : > { %v2701_v50 = vsub.f32 1.0, %v2651_v8  ;;  %v2655_v46 = vand.u32 2147483647, %v2605_v40  ;;  %v2703_v33 = vsub.f32 1.0, %v2653_v27  ;;  %v2657_v2 = vand.u32 2147483647, %v2607_v10 }
 0x6a8   : > { %9965 = vmatmul.mubr.msk.bf16.gmra.mrb[140].mxu1 %vm3326_vm5, %v10599_v52  ;;  %v12312_v52 = vmax.f32 %v2697_v35, 0.0  ;;  %v2656_v13 = vand.u32 2147483647, %v2606_v44  ;;  %v12320_v21 = vmax.f32 %v2696_v6, 0.0  ;;  %v2658_v35 = vand.u32 2147483647, %v2608_v39 }
 0x6a9   : > { %9968 = vmatprep.mubr.msk.bf16.mxu1 %vm3326_vm5, %v10600_v48  ;;  %v10601_v48 = vld [vmem:[%s16109_s8 + $0x118] sm:$0xff]   ;;  %v2610_v25 = vsub.f32 %v12109_v53, %v16328_v45  ;;  %v2796_v40 = vsub.f32 %v12185_v4, %v12034_v41  ;;  %v12326_v8 = vmax.f32 %v2698_v47, 0.0  ;;  %v2798_v27 = vsub.f32 %v12188_v57, %v12036_v17  ;;  %v16334_v17 = vld [vmem:[#allocation28_spill] sm:$0xff] }
 0x6aa   : > { %v2797_v55 = vsub.f32 %v12173_v51, %v12038_v30  ;;  %v2799_v15 = vsub.f32 %v12200_v31, %v12040_v37  ;;  %v12334_v10 = vmax.f32 %v2700_v20, 0.0  ;;  %v12336_v44 = vmax.f32 %v2702_v36, 0.0  ;;  %v16335_v20 = vld [vmem:[#allocation29_spill] sm:$0xff] }
 0x6ab   : > { %16329 = vst [vmem:[#allocation22_spill] sm:$0xff] %v12326_v8  ;;  %v12338_v6 = vmax.f32 %v2701_v50, 0.0  ;;  %v2705_v39 = vsub.f32 1.0, %v2655_v46  ;;  %v12341_v41 = vmax.f32 %v2703_v33, 0.0  ;;  %v2707_v47 = vsub.f32 1.0, %v2657_v2 }
 0x6ac   : > { %16330 = vst [vmem:[#allocation23_spill] sm:$0xff] %v12334_v10  ;;  %16331 = vst [vmem:[#allocation24_spill] sm:$0xff] %v12336_v44  ;;  %v2706_v45 = vsub.f32 1.0, %v2656_v13  ;;  %v2612_v8 = vsub.f32 %v12112_v42, %v16334_v17  ;;  %v2708_v30 = vsub.f32 1.0, %v2658_v35  ;;  %v2660_v37 = vand.u32 2147483647, %v2610_v25 }
 0x6ad   : > { %16332 = vst [vmem:[#allocation25_spill] sm:$0xff] %v12338_v6  ;;  %16333 = vst [vmem:[#allocation26_spill] sm:$0xff] %v12341_v41  ;;  %v2611_v36 = vsub.f32 %v12120_v34, %v16335_v20  ;;  %v2846_v44 = vand.u32 2147483647, %v2796_v40  ;;  %v2848_v50 = vand.u32 2147483647, %v2798_v27  ;;  %v2801_v2 = vsub.f32 %v12185_v4, %v12048_v19 }
 0x6ae   : > { %v2847_v6 = vand.u32 2147483647, %v2797_v55  ;;  %v2849_v46 = vand.u32 2147483647, %v2799_v15  ;;  %v12348_v10 = vmax.f32 %v2705_v39, 0.0  ;;  %v2803_v13 = vsub.f32 %v12188_v57, %v12050_v16  ;;  %v10604_v19 = vld [vmem:[%s16109_s8 + $0x130] sm:$0xff]  }
 0x6af   : > { %v12359_v35 = vmax.f32 %v2707_v47, 0.0  ;;  %v2662_v25 = vand.u32 2147483647, %v2612_v8  ;;  %v2802_v40 = vsub.f32 %v12173_v51, %v12052_v24  ;;  %v2804_v27 = vsub.f32 %v12200_v31, %v12054_v23 }
 0x6b0   : > { %9969 = vmatmul.mubr.msk.bf16.gmra.mrb[144].mxu1 %vm3326_vm5, %v10601_v48  ;;  %16336 = vst [vmem:[#allocation27_spill] sm:$0xff] %v12348_v10  ;;  %v16337_v48 = vld [vmem:[#allocation30_spill] sm:$0xff]  ;;  %v12368_v55 = vmax.f32 %v2706_v45, 0.0  ;;  %v12370_v16 = vmax.f32 %v2708_v30, 0.0  ;;  %v2710_v15 = vsub.f32 1.0, %v2660_v37  ;;  %v2896_v17 = vsub.f32 1.0, %v2846_v44 }
 0x6b1   : > { %9972 = vmatprep.mubr.msk.bf16.mxu1 %vm3326_vm5, %v10602_v60  ;;  %v2613_v33 = vsub.f32 %v12123_v7, %v16337_v48  ;;  %v10603_v60 = vld [vmem:[%s16109_s8 + $0x128] sm:$0xff]   ;;  %16338 = vst [vmem:[#allocation28_spill] sm:$0xff] %v12359_v35  ;;  %v2661_v39 = vand.u32 2147483647, %v2611_v36  ;;  %v2898_v47 = vsub.f32 1.0, %v2848_v50  ;;  %v2897_v20 = vsub.f32 1.0, %v2847_v6 }
 0x6b2   : > { %16339 = vst [vmem:[#allocation29_spill] sm:$0xff] %v12368_v55  ;;  %v2899_v8 = vsub.f32 1.0, %v2849_v46  ;;  %v2851_v24 = vand.u32 2147483647, %v2801_v2  ;;  %v2853_v35 = vand.u32 2147483647, %v2803_v13  ;;  %v2617_v6 = vsub.f32 %v12112_v42, %v11896_v54 }
 0x6b3   : > { %v12372_v48 = vand.u32 2147483647, %v2613_v33  ;;  %v2712_v23 = vsub.f32 1.0, %v2662_v25  ;;  %v16340_v10 = vld [vmem:[#allocation31_spill] sm:$0xff]  ;;  %v2852_v45 = vand.u32 2147483647, %v2802_v40  ;;  %v2616_v37 = vsub.f32 %v12120_v34, %v11898_v43 }
 0x6b4   : > { %v2615_v41 = vsub.f32 %v12109_v53, %v16340_v10  ;;  %v2854_v55 = vand.u32 2147483647, %v2804_v27  ;;  %v12378_v30 = vmax.f32 %v2710_v15, 0.0  ;;  %v2711_v44 = vsub.f32 1.0, %v2661_v39  ;;  %v10605_v54 = vld [vmem:[%s16109_s8 + $0x138] sm:$0xff]  }
 0x6b5   : > { %v2946_v36 = vmax.f32 %v2896_v17, 0.0  ;;  %v2948_v50 = vmax.f32 %v2898_v47, 0.0  ;;  %v2947_v46 = vmax.f32 %v2897_v20, 0.0  ;;  %v2949_v33 = vmax.f32 %v2899_v8, 0.0 }
 0x6b6   : > { %v2901_v10 = vsub.f32 1.0, %v2851_v24  ;;  %v2902_v15 = vsub.f32 1.0, %v2852_v45  ;;  %v2904_v43 = vsub.f32 1.0, %v2854_v55  ;;  %v2713_v47 = vsub.f32 1.0, %v12372_v48 }
 0x6b7   : > { %v12392_v20 = vand.u32 2147483647, %v2615_v41  ;;  %v2618_v8 = vsub.f32 %v12123_v7, %v11900_v9 }
 0x6b8   : > { %9973 = vmatmul.mubr.msk.bf16.gmra.mrb[148].mxu1 %vm3326_vm5, %v10603_v60  ;;  %v2903_v60 = vsub.f32 1.0, %v2853_v35 }
 0x6b9   : > { %9976 = vmatprep.mubr.msk.bf16.mxu1 %vm3326_vm5, %v10604_v19 }
 0x6ba   : > { %v2025_v2 = vpop.f32.mrb[46].mxu0  ;;  %v2270_v13 = vpop.f32.mrb[54].mxu1 }
 0x6bb   : > { %v2996_v25 = vmul.f32 %v12209_v49, %v2025_v2  ;;  %v2998_v40 = vmul.f32 %v12220_v1, %v2270_v13  ;;  %v2027_v27 = vpop.f32.mrb[47].mxu0  ;;  %v2272_v19 = vpop.f32.mrb[55].mxu1  ;;  %v12398_v1 = vmax.f32 %v2712_v23, 0.0  ;;  %v2951_v2 = vmax.f32 %v2901_v10, 0.0 }
 0x6bc   : > { %v2997_v39 = vmul.f32 %v12222_v61, %v2027_v27  ;;  %v2999_v17 = vmul.f32 %v12228_v28, %v2272_v19  ;;  %v2953_v28 = vmax.f32 %v2903_v60, 0.0  ;;  %v2952_v23 = vmax.f32 %v2902_v15, 0.0  ;;  %v16347_v15 = vld [vmem:[#allocation34_spill] sm:$0xff] }
 0x6bd   : > { %v12394_v35 = vmul.f32 %v2996_v25, %v2946_v36  ;;  %v12396_v49 = vmul.f32 %v2998_v40, %v2948_v50  ;;  %v2954_v50 = vmax.f32 %v2904_v43, 0.0  ;;  %v2807_v60 = vsub.f32 %v12173_v51, %v12062_v62  ;;  %v16348_v43 = vld [vmem:[#allocation35_spill] sm:$0xff] }
 0x6be   : > { %v3047_v24 = vmul.f32 %v2997_v39, %v2947_v46  ;;  %v12402_v45 = vmul.f32 %v2999_v17, %v2949_v33  ;;  %v2031_v55 = vpop.f32.mrb[48].mxu0  ;;  %v2276_v61 = vpop.f32.mrb[56].mxu1  ;;  %v12409_v46 = vmax.f32 %v2711_v44, 0.0  ;;  %v2806_v33 = vsub.f32 %v12185_v4, %v12058_v29  ;;  %v16346_v44 = vld [vmem:[#allocation33_spill] sm:$0xff] }
 0x6bf   : > { %16341 = vst [vmem:[#allocation30_spill] sm:$0xff] %v12396_v49  ;;  %v3001_v48 = vmul.f32 %v12230_v0, %v2031_v55  ;;  %v3003_v41 = vmul.f32 %v12232_v58, %v2276_v61  ;;  %v2033_v36 = vpop.f32.mrb[49].mxu0  ;;  %v2278_v13 = vpop.f32.mrb[57].mxu1  ;;  %v2808_v58 = vsub.f32 %v12188_v57, %v12060_v26  ;;  %v2811_v19 = vsub.f32 %v12185_v4, %v16346_v44 }
 0x6c0   : > { %16342 = vst [vmem:[#allocation31_spill] sm:$0xff] %v12402_v45  ;;  %9977 = vmatmul.mubr.msk.bf16.gmra.mrb[152].mxu1 %vm3326_vm5, %v10605_v54  ;;  %v3002_v25 = vmul.f32 %v12242_v22, %v2033_v36  ;;  %v3004_v9 = vmul.f32 %v12248_v59, %v2278_v13  ;;  %v16345_v22 = vld [vmem:[#allocation32_spill] sm:$0xff]  ;;  %v2813_v26 = vsub.f32 %v12188_v57, %v16347_v15  ;;  %v12437_v55 = vmax.f32 %v2713_v47, 0.0  ;;  %v16350_v36 = vld [vmem:[#allocation37_spill] sm:$0xff] }
 0x6c1   : > { %v12413_v10 = vmul.f32 %v3001_v48, %v2951_v2  ;;  %v12415_v0 = vmul.f32 %v3003_v41, %v2953_v28  ;;  %v2809_v59 = vsub.f32 %v12200_v31, %v16345_v22  ;;  %v2812_v62 = vsub.f32 %v12173_v51, %v16348_v43  ;;  %v16349_v28 = vld [vmem:[#allocation36_spill] sm:$0xff]  ;;  %v16353_v43 = vld [vmem:[#allocation41_spill] sm:$0xff] }
 0x6c2   : > { %v3052_v40 = vmul.f32 %v3002_v25, %v2952_v23  ;;  %v12421_v27 = vmul.f32 %v3004_v9, %v2954_v50  ;;  %v12439_v61 = vand.u32 2147483647, %v2617_v6  ;;  %v12441_v2 = vand.u32 2147483647, %v2616_v37  ;;  %v16351_v23 = vld [vmem:[#allocation38_spill] sm:$0xff] }
 0x6c3   : > { %16343 = vst [vmem:[#allocation72_spill] sm:$0xff] %v12415_v0  ;;  %v2814_v48 = vsub.f32 %v12200_v31, %v16349_v28  ;;  %v2856_v41 = vand.u32 2147483647, %v2806_v33  ;;  %v2816_v13 = vsub.f32 %v12185_v4, %v16350_v36  ;;  %v2818_v50 = vsub.f32 %v12188_v57, %v16351_v23 }
 0x6c4   : > { %16344 = vst [vmem:[#allocation73_spill] sm:$0xff] %v12421_v27  ;;  %v3097_v39 = vpack.c.bf16 %v3052_v40, %v3047_v24  ;;  %v16352_v24 = vld [vmem:[#allocation40_spill] sm:$0xff]  ;;  %v2858_v47 = vand.u32 2147483647, %v2808_v58  ;;  %v2857_v9 = vand.u32 2147483647, %v2807_v60  ;;  %v2819_v28 = vsub.f32 %v12200_v31, %v16353_v43 }
 0x6c5   : > { %v2817_v25 = vsub.f32 %v12173_v51, %v16352_v24  ;;  %v2859_v6 = vand.u32 2147483647, %v2809_v59  ;;  %v2861_v40 = vand.u32 2147483647, %v2811_v19  ;;  %v2863_v37 = vand.u32 2147483647, %v2813_v26 }
 0x6c6   : > { %3952 = vmatprep.mubr.bf16.mxu0 %v3097_v39  ;;  %v2862_v22 = vand.u32 2147483647, %v2812_v62  ;;  %v12452_v15 = vand.u32 2147483647, %v2618_v8  ;;  %v2864_v33 = vand.u32 2147483647, %v2814_v48 }
 0x6c7   : > { %v2866_v36 = vand.u32 2147483647, %v2816_v13  ;;  %v2868_v23 = vand.u32 2147483647, %v2818_v50  ;;  %v2867_v54 = vand.u32 2147483647, %v2817_v25 }
 0x6c8   : > { %v2906_v39 = vsub.f32 1.0, %v2856_v41  ;;  %v2908_v58 = vsub.f32 1.0, %v2858_v47  ;;  %v2907_v60 = vsub.f32 1.0, %v2857_v9  ;;  %v2909_v59 = vsub.f32 1.0, %v2859_v6  ;;  %v16354_v48 = vld [vmem:[#allocation43_spill] sm:$0xff]  ;;  %v16355_v6 = vld [vmem:[#allocation46_spill] sm:$0xff] }
 0x6c9   : > { %v2911_v19 = vsub.f32 1.0, %v2861_v40  ;;  %v2913_v26 = vsub.f32 1.0, %v2863_v37  ;;  %v2912_v62 = vsub.f32 1.0, %v2862_v22  ;;  %v2914_v8 = vsub.f32 1.0, %v2864_v33 }
 0x6ca   : > { %v12458_v29 = vand.u32 2147483647, %v2819_v28  ;;  %v2821_v43 = vsub.f32 %v12185_v4, %v16354_v48  ;;  %v2916_v50 = vsub.f32 1.0, %v2866_v36  ;;  %v2918_v25 = vsub.f32 1.0, %v2868_v23  ;;  %v16356_v48 = vld [vmem:[#allocation47_spill] sm:$0xff] }
 0x6cb   : > { %v2917_v24 = vsub.f32 1.0, %v2867_v54  ;;  %v2956_v41 = vmax.f32 %v2906_v39, 0.0  ;;  %v2958_v47 = vmax.f32 %v2908_v58, 0.0  ;;  %v2957_v9 = vmax.f32 %v2907_v60, 0.0  ;;  %v16357_v39 = vld [vmem:[#allocation50_spill] sm:$0xff] }
 0x6cc   : > { %v2823_v40 = vsub.f32 %v12188_v57, %v16355_v6  ;;  %v2959_v37 = vmax.f32 %v2909_v59, 0.0  ;;  %v2961_v22 = vmax.f32 %v2911_v19, 0.0  ;;  %v2963_v17 = vmax.f32 %v2913_v26, 0.0  ;;  %v16358_v26 = vld [vmem:[#allocation51_spill] sm:$0xff]  ;;  %v16359_v6 = vld [vmem:[#allocation52_spill] sm:$0xff] }
 0x6cd   : > { %v2962_v33 = vmax.f32 %v2912_v62, 0.0  ;;  %v2964_v28 = vmax.f32 %v2914_v8, 0.0  ;;  %v2919_v44 = vsub.f32 1.0, %v12458_v29  ;;  %v2871_v7 = vand.u32 2147483647, %v2821_v43 }
 0x6ce   : > { %v2822_v13 = vsub.f32 %v12173_v51, %v16356_v48  ;;  %v12468_v36 = vmax.f32 %v2916_v50, 0.0  ;;  %v12470_v54 = vmax.f32 %v2918_v25, 0.0  ;;  %v12472_v23 = vmax.f32 %v2917_v24, 0.0  ;;  %v16360_v24 = vld [vmem:[#allocation53_spill] sm:$0xff] }
 0x6cf   : > { %v2824_v58 = vsub.f32 %v12200_v31, %v16357_v39  ;;  %v2873_v19 = vand.u32 2147483647, %v2823_v40  ;;  %v2826_v62 = vsub.f32 %v12185_v4, %v16358_v26  ;;  %v2828_v25 = vsub.f32 %v12188_v57, %v16359_v6 }
 0x6d0   : > { %v2827_v48 = vsub.f32 %v12173_v51, %v16360_v24  ;;  %v2921_v40 = vsub.f32 1.0, %v2871_v7  ;;  %v2872_v42 = vand.u32 2147483647, %v2822_v13  ;;  %v16366_v7 = vld [vmem:[#allocation71_spill] sm:$0xff] }
 0x6d1   : > { %v2876_v0 = vand.u32 2147483647, %v2826_v62 }
 0x6d2   : > { %v2037_v60 = vpop.f32.mrb[50].mxu0  ;;  %v2282_v59 = vpop.f32.mrb[58].mxu1 }
 0x6d3   : > { %v3006_v29 = vmul.f32 %v12256_v63, %v2037_v60  ;;  %v3008_v8 = vmul.f32 %v12258_v32, %v2282_v59  ;;  %v2039_v43 = vpop.f32.mrb[51].mxu0  ;;  %v2284_v50 = vpop.f32.mrb[59].mxu1  ;;  %v2874_v63 = vand.u32 2147483647, %v2824_v58  ;;  %v16363_v32 = vld [vmem:[#allocation54_spill] sm:$0xff] }
 0x6d4   : > { %v3007_v39 = vmul.f32 %v12260_v38, %v2039_v43  ;;  %v3009_v34 = vmul.f32 %v12263_v18, %v2284_v50  ;;  %v2829_v60 = vsub.f32 %v12200_v31, %v16363_v32  ;;  %v16365_v38 = vld [vmem:[#allocation55_spill] sm:$0xff]  ;;  %v2878_v58 = vand.u32 2147483647, %v2828_v25  ;;  %v16368_v50 = vld [vmem:[#allocation21_spill] sm:$0xff] }
 0x6d5   : > { %v12486_v53 = vmul.f32 %v3006_v29, %v2956_v41  ;;  %v12488_v26 = vmul.f32 %v3008_v8, %v2958_v47  ;;  %v2831_v18 = vsub.f32 %v12185_v4, %v16365_v38  ;;  %v16367_v41 = vld [vmem:[#allocation20_spill] sm:$0xff]  ;;  %v2877_v43 = vand.u32 2147483647, %v2827_v48 }
 0x6d6   : > { %v12492_v59 = vmul.f32 %v3007_v39, %v2957_v9  ;;  %v12494_v6 = vmul.f32 %v3009_v34, %v2959_v37  ;;  %v2043_v49 = vpop.f32.mrb[52].mxu0  ;;  %v2288_v24 = vpop.f32.mrb[60].mxu1  ;;  %v16369_v34 = vld [vmem:[#allocation56_spill] sm:$0xff]  ;;  %v16370_v39 = vld [vmem:[#allocation57_spill] sm:$0xff] }
 0x6d7   : > { %16361 = vst [vmem:[#allocation32_spill] sm:$0xff] %v12486_v53  ;;  %16362 = vst [vmem:[#allocation33_spill] sm:$0xff] %v12488_v26  ;;  %v3011_v13 = vmul.f32 %v16366_v7, %v2043_v49  ;;  %v3013_v29 = vmul.f32 %v16367_v41, %v2288_v24  ;;  %v2045_v47 = vpop.f32.mrb[53].mxu0  ;;  %v2290_v8 = vpop.f32.mrb[61].mxu1  ;;  %v2833_v37 = vsub.f32 %v12188_v57, %v16369_v34  ;;  %v2879_v49 = vand.u32 2147483647, %v2829_v60 }
 0x6d8   : > { %16364 = vst [vmem:[#allocation34_spill] sm:$0xff] %v12494_v6  ;;  %v3012_v32 = vmul.f32 %v16368_v50, %v2045_v47  ;;  %v3014_v9 = vmul.f32 %v12290_v11, %v2290_v8  ;;  %v2832_v62 = vsub.f32 %v12173_v51, %v16370_v39  ;;  %v16372_v24 = vld [vmem:[#allocation58_spill] sm:$0xff]  ;;  %v2923_v41 = vsub.f32 1.0, %v2873_v19  ;;  %v16374_v8 = vld [vmem:[#allocation59_spill] sm:$0xff]  ;;  %v16376_v60 = vld [vmem:[#allocation64_spill] sm:$0xff] }
 0x6d9   : > { %v12506_v45 = vmul.f32 %v3011_v13, %v2961_v22  ;;  %v12508_v38 = vmul.f32 %v3013_v29, %v2963_v17  ;;  %v2834_v7 = vsub.f32 %v12200_v31, %v16372_v24  ;;  %v2881_v11 = vand.u32 2147483647, %v2831_v18  ;;  %v16375_v17 = vld [vmem:[#allocation63_spill] sm:$0xff] }
 0x6da   : > { %v12512_v25 = vmul.f32 %v3012_v32, %v2962_v33  ;;  %v12514_v48 = vmul.f32 %v3014_v9, %v2964_v28  ;;  %v2922_v22 = vsub.f32 1.0, %v2872_v42  ;;  %v2924_v13 = vsub.f32 1.0, %v2874_v63 }
 0x6db   : > { %16371 = vst [vmem:[#allocation35_spill] sm:$0xff] %v12508_v38  ;;  %v2926_v33 = vsub.f32 1.0, %v2876_v0  ;;  %v2928_v29 = vsub.f32 1.0, %v2878_v58  ;;  %v2883_v28 = vand.u32 2147483647, %v2833_v37  ;;  %v2969_v19 = vmax.f32 %v2919_v44, 0.0 }
 0x6dc   : > { %16373 = vst [vmem:[#allocation36_spill] sm:$0xff] %v12514_v48  ;;  %v2882_v50 = vand.u32 2147483647, %v2832_v62  ;;  %v2927_v18 = vsub.f32 1.0, %v2877_v43  ;;  %v2929_v32 = vsub.f32 1.0, %v2879_v49  ;;  %v2971_v34 = vmax.f32 %v2921_v40, 0.0 }
 0x6dd   : > { %v2884_v9 = vand.u32 2147483647, %v2834_v7  ;;  %v2973_v39 = vmax.f32 %v2923_v41, 0.0  ;;  %v2931_v24 = vsub.f32 1.0, %v2881_v11  ;;  %v2836_v42 = vsub.f32 %v12185_v4, %v16374_v8  ;;  %v16377_v7 = vld [vmem:[#allocation66_spill] sm:$0xff] }
 0x6de   : > { %v2972_v63 = vmax.f32 %v2922_v22, 0.0  ;;  %v2974_v47 = vmax.f32 %v2924_v13, 0.0  ;;  %v2838_v26 = vsub.f32 %v12188_v57, %v16375_v17  ;;  %v2837_v0 = vsub.f32 %v12173_v51, %v16376_v60 }
 0x6df   : > { %v2976_v58 = vmax.f32 %v2926_v33, 0.0  ;;  %v2978_v37 = vmax.f32 %v2928_v29, 0.0  ;;  %v2933_v44 = vsub.f32 1.0, %v2883_v28  ;;  %v2932_v43 = vsub.f32 1.0, %v2882_v50 }
 0x6e0   : > { %v2977_v62 = vmax.f32 %v2927_v18, 0.0  ;;  %v2979_v49 = vmax.f32 %v2929_v32, 0.0  ;;  %v2934_v40 = vsub.f32 1.0, %v2884_v9  ;;  %v2839_v41 = vsub.f32 %v12200_v31, %v16377_v7  ;;  %v16382_v7 = vld [vmem:[#allocation67_spill] sm:$0xff] }
 0x6e1   : > { %v12532_v22 = vmax.f32 %v2931_v24, 0.0  ;;  %v2886_v13 = vand.u32 2147483647, %v2836_v42  ;;  %v2888_v29 = vand.u32 2147483647, %v2838_v26  ;;  %v12538_v32 = vmax.f32 %v2933_v44, 0.0 }
 0x6e2   : > { %v2049_v11 = vpop.f32.mrb[54].mxu0  ;;  %v2294_v8 = vpop.f32.mrb[62].mxu1  ;;  %v2887_v28 = vand.u32 2147483647, %v2837_v0  ;;  %v12540_v9 = vmax.f32 %v2932_v43, 0.0  ;;  %v2841_v43 = vsub.f32 %v12185_v4, %v16382_v7  ;;  %v16391_v7 = vld [vmem:[#allocation23_spill] sm:$0xff] }
 0x6e3   : > { %v3016_v17 = vmul.f32 %v12295_v3, %v2049_v11  ;;  %v3018_v38 = vmul.f32 %v12302_v56, %v2294_v8  ;;  %v2051_v60 = vpop.f32.mrb[55].mxu0  ;;  %v2296_v33 = vpop.f32.mrb[63].mxu1  ;;  %v12548_v3 = vmax.f32 %v2934_v40, 0.0  ;;  %v2889_v56 = vand.u32 2147483647, %v2839_v41 }
 0x6e4   : > { %v3017_v50 = vmul.f32 %v12304_v12, %v2051_v60  ;;  %v3019_v18 = vmul.f32 %v12308_v5, %v2296_v33  ;;  %v2936_v44 = vsub.f32 1.0, %v2886_v13  ;;  %v2938_v40 = vsub.f32 1.0, %v2888_v29  ;;  %v16385_v33 = vld [vmem:[#allocation69_spill] sm:$0xff] }
 0x6e5   : > { %v12543_v24 = vmul.f32 %v3016_v17, %v12468_v36  ;;  %v12546_v42 = vmul.f32 %v3018_v38, %v12470_v54  ;;  %v2937_v8 = vsub.f32 1.0, %v2887_v28  ;;  %v2842_v13 = vsub.f32 %v12173_v51, %v16385_v33  ;;  %v16400_v51 = vld [vmem:[#allocation28_spill] sm:$0xff] }
 0x6e6   : > { %v12551_v26 = vmul.f32 %v3017_v50, %v12472_v23  ;;  %v12553_v0 = vmul.f32 %v3019_v18, %v2969_v19  ;;  %v2055_v12 = vpop.f32.mrb[56].mxu0  ;;  %v2300_v5 = vpop.f32.mrb[64].mxu1  ;;  %v16383_v23 = vld [vmem:[#allocation22_spill] sm:$0xff]  ;;  %v16384_v19 = vld [vmem:[#allocation68_spill] sm:$0xff] }
 0x6e7   : > { %16378 = vst [vmem:[#allocation37_spill] sm:$0xff] %v12543_v24  ;;  %16379 = vst [vmem:[#allocation38_spill] sm:$0xff] %v12546_v42  ;;  %v3021_v36 = vmul.f32 %v12310_v14, %v2055_v12  ;;  %v3023_v11 = vmul.f32 %v12312_v52, %v2300_v5  ;;  %v2057_v54 = vpop.f32.mrb[57].mxu0  ;;  %v2302_v38 = vpop.f32.mrb[65].mxu1  ;;  %v2843_v60 = vsub.f32 %v12188_v57, %v16384_v19  ;;  %v2939_v14 = vsub.f32 1.0, %v2889_v56  ;;  %v16388_v52 = vld [vmem:[#allocation70_spill] sm:$0xff] }
 0x6e8   : > { %16380 = vst [vmem:[#allocation40_spill] sm:$0xff] %v12551_v26  ;;  %16381 = vst [vmem:[#allocation41_spill] sm:$0xff] %v12553_v0  ;;  %v3022_v41 = vmul.f32 %v12320_v21, %v2057_v54  ;;  %v3024_v17 = vmul.f32 %v16383_v23, %v2302_v38  ;;  %v2844_v12 = vsub.f32 %v12200_v31, %v16388_v52  ;;  %v16392_v38 = vld [vmem:[#allocation24_spill] sm:$0xff]  ;;  %v16393_v56 = vld [vmem:[#allocation25_spill] sm:$0xff] }
 0x6e9   : > { %v12565_v50 = vmul.f32 %v3021_v36, %v2971_v34  ;;  %v12567_v18 = vmul.f32 %v3023_v11, %v2973_v39  ;;  %v2893_v52 = vand.u32 2147483647, %v2843_v60 }
 0x6ea   : > { %v12571_v29 = vmul.f32 %v3022_v41, %v2972_v63  ;;  %v12573_v28 = vmul.f32 %v3024_v17, %v2974_v47  ;;  %v2061_v21 = vpop.f32.mrb[58].mxu0  ;;  %v2306_v5 = vpop.f32.mrb[66].mxu1  ;;  %v16394_v63 = vld [vmem:[#allocation26_spill] sm:$0xff]  ;;  %v2891_v17 = vand.u32 2147483647, %v2841_v43  ;;  %v16399_v47 = vld [vmem:[#allocation27_spill] sm:$0xff] }
 0x6eb   : > { %16386 = vst [vmem:[#allocation43_spill] sm:$0xff] %v12565_v50  ;;  %16387 = vst [vmem:[#allocation46_spill] sm:$0xff] %v12567_v18  ;;  %v3026_v54 = vmul.f32 %v16391_v7, %v2061_v21  ;;  %v3028_v23 = vmul.f32 %v16392_v38, %v2306_v5  ;;  %v2063_v19 = vpop.f32.mrb[59].mxu0  ;;  %v2308_v33 = vpop.f32.mrb[67].mxu1  ;;  %v2892_v7 = vand.u32 2147483647, %v2842_v13 }
 0x6ec   : > { %16389 = vst [vmem:[#allocation47_spill] sm:$0xff] %v12571_v29  ;;  %16390 = vst [vmem:[#allocation50_spill] sm:$0xff] %v12573_v28  ;;  %v3027_v36 = vmul.f32 %v16393_v56, %v2063_v19  ;;  %v3029_v11 = vmul.f32 %v16394_v63, %v2308_v33  ;;  %v2894_v38 = vand.u32 2147483647, %v2844_v12  ;;  %v2986_v56 = vmax.f32 %v2936_v44, 0.0 }
 0x6ed   : > { %v12587_v21 = vmul.f32 %v3026_v54, %v2976_v58  ;;  %v12589_v5 = vmul.f32 %v3028_v23, %v2978_v37  ;;  %v2988_v63 = vmax.f32 %v2938_v40, 0.0  ;;  %v2987_v58 = vmax.f32 %v2937_v8, 0.0  ;;  %v16401_v37 = vld [vmem:[#allocation29_spill] sm:$0xff] }
 0x6ee   : > { %v12591_v34 = vmul.f32 %v3027_v36, %v2977_v62  ;;  %v12593_v39 = vmul.f32 %v3029_v11, %v2979_v49  ;;  %v2067_v19 = vpop.f32.mrb[60].mxu0  ;;  %v2312_v33 = vpop.f32.mrb[68].mxu1  ;;  %v2989_v54 = vmax.f32 %v2939_v14, 0.0  ;;  %v2941_v62 = vsub.f32 1.0, %v2891_v17 }
 0x6ef   : > { %16395 = vst [vmem:[#allocation51_spill] sm:$0xff] %v12587_v21  ;;  %16396 = vst [vmem:[#allocation52_spill] sm:$0xff] %v12589_v5  ;;  %v3031_v31 = vmul.f32 %v16399_v47, %v2067_v19  ;;  %v3033_v41 = vmul.f32 %v16400_v51, %v2312_v33  ;;  %v2069_v43 = vpop.f32.mrb[61].mxu0  ;;  %v2314_v60 = vpop.f32.mrb[69].mxu1  ;;  %v2943_v12 = vsub.f32 1.0, %v2893_v52  ;;  %v2942_v40 = vsub.f32 1.0, %v2892_v7 }
 0x6f0   : > { %16397 = vst [vmem:[#allocation53_spill] sm:$0xff] %v12591_v34  ;;  %16398 = vst [vmem:[#allocation54_spill] sm:$0xff] %v12593_v39  ;;  %v3032_v23 = vmul.f32 %v16401_v37, %v2069_v43  ;;  %v3034_v13 = vmul.f32 %v12370_v16, %v2314_v60  ;;  %v2944_v36 = vsub.f32 1.0, %v2894_v38  ;;  %v16407_v7 = vsub.f32 1.0, %v12439_v61 }
 0x6f1   : > { %v12600_v49 = vmul.f32 %v3031_v31, %v12532_v22  ;;  %v12603_v44 = vmul.f32 %v3033_v41, %v12538_v32 }
 0x6f2   : > { %v12606_v51 = vmul.f32 %v3032_v23, %v12540_v9  ;;  %v12609_v8 = vmul.f32 %v3034_v13, %v12548_v3  ;;  %v2073_v14 = vpop.f32.mrb[62].mxu0  ;;  %v2318_v11 = vpop.f32.mrb[70].mxu1  ;;  %v2767_v38 = vmax.f32 %v16407_v7, 0.0  ;;  %v549_v7 = vld [vmem:[%s16110_s9 + $0x8] sm:$0xff] }
 0x6f3   : > { %16402 = vst [vmem:[#allocation55_spill] sm:$0xff] %v12600_v49  ;;  %16403 = vst [vmem:[#allocation71_spill] sm:$0xff] %v12603_v44  ;;  %v3036_v16 = vmul.f32 %v12378_v30, %v2073_v14  ;;  %v3038_v47 = vmul.f32 %v12398_v1, %v2318_v11  ;;  %v2075_v17 = vpop.f32.mrb[63].mxu0  ;;  %v2320_v31 = vpop.f32.mrb[71].mxu1  ;;  %v16406_v1 = vsub.f32 1.0, %v12392_v20  ;;  %v2991_v14 = vmax.f32 %v2941_v62, 0.0 }
 0x6f4   : > { %16404 = vst [vmem:[#allocation20_spill] sm:$0xff] %v12606_v51  ;;  %16405 = vst [vmem:[#allocation21_spill] sm:$0xff] %v12609_v8  ;;  %v3037_v9 = vmul.f32 %v12409_v46, %v2075_v17  ;;  %v3039_v41 = vmul.f32 %v12437_v55, %v2320_v31  ;;  %v16410_v46 = vsub.f32 1.0, %v12441_v2  ;;  %v16411_v55 = vsub.f32 1.0, %v12452_v15  ;;  %v550_v62 = vld [vmem:[%s16110_s9 + $0x10] sm:$0xff]  ;;  %v557_v3 = vld [vmem:[%s16110_s9 + $0x48] sm:$0xff] }
 0x6f5   : > { %v2765_v52 = vmax.f32 %v16406_v1, 0.0  ;;  %v12627_v19 = vmul.f32 %v3036_v16, %v2986_v56  ;;  %v12629_v33 = vmul.f32 %v3038_v47, %v2988_v63  ;;  %v2993_v11 = vmax.f32 %v2943_v12, 0.0  ;;  %v561_v44 = vld [vmem:[%s16110_s9 + $0x68] sm:$0xff] }
 0x6f6   : > { %v2766_v43 = vmax.f32 %v16410_v46, 0.0  ;;  %v2768_v60 = vmax.f32 %v16411_v55, 0.0  ;;  %v12635_v37 = vmul.f32 %v3037_v9, %v2987_v58  ;;  %v12637_v23 = vmul.f32 %v3039_v41, %v2989_v54  ;;  %v548_v41 = vld [vmem:[%s16110_s9] sm:$0xff] }
 0x6f7   : > { %16408 = vst [vmem:[#allocation56_spill] sm:$0xff] %v12627_v19  ;;  %16409 = vst [vmem:[#allocation57_spill] sm:$0xff] %v12629_v33  ;;  %v2079_v13 = vpop.f32.mrb[64].mxu0  ;;  %v2324_v20 = vpop.f32.mrb[72].mxu1  ;;  %v2992_v63 = vmax.f32 %v2942_v40, 0.0  ;;  %v2994_v47 = vmax.f32 %v2944_v36, 0.0 }
 0x6f8   : > { %16412 = vst [vmem:[#allocation58_spill] sm:$0xff] %v12635_v37  ;;  %16413 = vst [vmem:[#allocation59_spill] sm:$0xff] %v12637_v23  ;;  %v3041_v61 = vmul.f32 %v2765_v52, %v2079_v13  ;;  %v3043_v17 = vmul.f32 %v2767_v38, %v2324_v20  ;;  %v2081_v56 = vpop.f32.mrb[65].mxu0  ;;  %v2326_v16 = vpop.f32.mrb[73].mxu1  ;;  %v551_v40 = vld [vmem:[%s16110_s9 + $0x18] sm:$0xff] }
 0x6f9   : > { %v3042_v31 = vmul.f32 %v2766_v43, %v2081_v56  ;;  %v3044_v2 = vmul.f32 %v2768_v60, %v2326_v16 }
 0x6fa   : > { %v12639_v1 = vmul.f32 %v3041_v61, %v2991_v14  ;;  %v12641_v15 = vmul.f32 %v3043_v17, %v2993_v11 }
 0x6fb   : > { %v12643_v58 = vmul.f32 %v3042_v31, %v2992_v63  ;;  %v12645_v54 = vmul.f32 %v3044_v2, %v2994_v47  ;;  %v12647_v9 = vpop.f32.mrb[66].mxu0  ;;  %v9902_v12 = vpop.f32.mrb[76].mxu1  ;;  %v12688_v47 = vld [vmem:[%s16104_s3] sm:$0xff]  ;;  %v10767_v31 = vld [vmem:[%s16104_s3 + $0x10] sm:$0xff] }
 0x6fc   : > { %16414 = vst [vmem:[#allocation63_spill] sm:$0xff] %v12639_v1  ;;  %16415 = vst [vmem:[#allocation64_spill] sm:$0xff] %v12641_v15  ;;  %v12655_v36 = vpop.f32.mrb[67].mxu0  ;;  %v3481_v52 = vpop.f32.mrb[77].mxu1  ;;  %v12671_v13 = vmul.f32 %v9902_v12, %v550_v62  ;;  %v10506_v2 = vpack.i.bf16 %v10767_v31, %v12688_v47  ;;  %v554_v12 = vld [vmem:[%s16110_s9 + $0x30] sm:$0xff]  ;;  %v16419_v31 = vld [vmem:[#allocation3_spill] sm:$0xff] }
 0x6fd   : > { %16416 = vst [vmem:[#allocation66_spill] sm:$0xff] %v12643_v58  ;;  %16417 = vst [vmem:[#allocation67_spill] sm:$0xff] %v12645_v54  ;;  %v9903_v43 = vpop.f32.mrb[78].mxu1  ;;  %v12675_v11 = vmul.f32 %v3481_v52, %v548_v41  ;;  %v555_v41 = vld [vmem:[%s16110_s9 + $0x38] sm:$0xff]  ;;  %v12712_v46 = vsub.s32 4, %v16419_v31 }
 0x6fe   : > { %v12673_v20 = vmul.f32 %v9903_v43, %v551_v40  ;;  %v3484_v14 = vpop.f32.mrb[79].mxu1  ;;  %16418 = vst [vmem:[#allocation22_spill] sm:$0xff] %v12688_v47  ;;  %10507 = vrot.lane.b32.xlu1 %v10506_v2, %s16201_s25  ;;  %v10768_v63 = vld [vmem:[%s16111_s10] ss:$2 sm:$0x1f] }
 0x6ff   : > { %v12677_v61 = vmul.f32 %v3484_v14, %v549_v7  ;;  %v9850_v17 = vpop.f32.mrb[68].mxu0  ;;  %v552_v7 = vld [vmem:[%s16110_s9 + $0x20] sm:$0xff]  ;;  %v553_v14 = vld [vmem:[%s16110_s9 + $0x28] sm:$0xff]  ;;  %16420 = vst [vmem:[#allocation68_spill] sm:$0xff] %v12712_v46 }
 0x700   : > { %v12681_v16 = vpop.f32.mrb[69].mxu0 }
 0x703   : > { %v12694_v62 = vpop.f32.mrb[70].mxu0  ;;  %v9906_v40 = vpop.f32.mrb[80].mxu1 }
 0x704   : > { %v12703_v52 = vpop.f32.mrb[71].mxu0  ;;  %v3497_v43 = vpop.f32.mrb[81].mxu1  ;;  %v12714_v32 = vmul.f32 %v9906_v40, %v554_v12  ;;  %v12732_v12 = vrot.slane %v10768_v63, %v12712_v46  ;;  %v556_v63 = vld [vmem:[%s16110_s9 + $0x40] sm:$0xff] }
 0x705   : > { %v9907_v60 = vpop.f32.mrb[82].mxu1  ;;  %v12718_v38 = vmul.f32 %v3497_v43, %v552_v7  ;;  %v559_v43 = vld [vmem:[%s16110_s9 + $0x58] sm:$0xff] }
 0x706   : > { %v12716_v30 = vmul.f32 %v9907_v60, %v555_v41  ;;  %v3500_v2 = vpop.f32.mrb[83].mxu1  ;;  %16421 = vst [vmem:[#allocation69_spill] sm:$0xff] %v12732_v12  ;;  %v558_v41 = vld [vmem:[%s16110_s9 + $0x50] sm:$0xff]  ;;  %v2579_v60 = vsub.f32 %v12732_v12, %v12647_v9  ;;  %v2574_v4 = vsub.f32 %v12732_v12, %v12655_v36  ;;  %v2589_v15 = vsub.f32 %v12732_v12, %v9850_v17 }
 0x707   : > { %v12720_v55 = vmul.f32 %v3500_v2, %v553_v14  ;;  %v12722_v22 = vpop.f32.mrb[72].mxu0  ;;  %v562_v17 = vld [vmem:[%s16110_s9 + $0x70] sm:$0xff]  ;;  %v2594_v28 = vsub.f32 %v12732_v12, %v12703_v52 }
 0x708   : > { %v12726_v56 = vpop.f32.mrb[73].mxu0  ;;  %v2629_v36 = vand.u32 2147483647, %v2579_v60 }
 0x70a   : > { %v2679_v8 = vsub.f32 1.0, %v2629_v36 }
 0x70b   : > { %v12736_v40 = vpop.f32.mrb[74].mxu0  ;;  %v9910_v7 = vpop.f32.mrb[84].mxu1 }
 0x70c   : > { %v12744_v14 = vpop.f32.mrb[75].mxu0  ;;  %v3513_v2 = vpop.f32.mrb[85].mxu1  ;;  %v12756_v31 = vmul.f32 %v9910_v7, %v558_v41  ;;  %v2624_v41 = vand.u32 2147483647, %v2574_v4  ;;  %v560_v4 = vld [vmem:[%s16110_s9 + $0x60] sm:$0xff] }
 0x70d   : > { %v9911_v57 = vpop.f32.mrb[86].mxu1  ;;  %v12761_v23 = vmul.f32 %v3513_v2, %v556_v63  ;;  %v10769_v63 = vld [vmem:[%s16111_s10 + $0x1] ss:$2 sm:$0x1f] }
 0x70e   : > { %v12758_v47 = vmul.f32 %v9911_v57, %v559_v43  ;;  %v3516_v33 = vpop.f32.mrb[87].mxu1  ;;  %v2584_v57 = vsub.f32 %v12732_v12, %v12681_v16  ;;  %v2639_v43 = vand.u32 2147483647, %v2589_v15  ;;  %v12781_v60 = vrot.slane %v10769_v63, %v12712_v46 }
 0x70f   : > { %v12763_v54 = vmul.f32 %v3516_v33, %v557_v3  ;;  %v9862_v5 = vpop.f32.mrb[76].mxu0  ;;  %v563_v33 = vld [vmem:[%s16110_s9 + $0x78] sm:$0xff]  ;;  %v2599_v15 = vsub.f32 %v12732_v12, %v12694_v62  ;;  %v2674_v46 = vsub.f32 1.0, %v2624_v41 }
 0x710   : > { %v2445_v9 = vpop.f32.mrb[77].mxu0  ;;  %16422 = vst [vmem:[#allocation70_spill] sm:$0xff] %v12781_v60  ;;  %v2634_v0 = vand.u32 2147483647, %v2584_v57  ;;  %v2689_v19 = vsub.f32 1.0, %v2639_v43  ;;  %v2805_v62 = vsub.f32 %v12781_v60, %v9862_v5  ;;  %v2609_v5 = vsub.f32 %v12732_v12, %v12722_v22 }
 0x711   : > { %v2800_v36 = vsub.f32 %v12781_v60, %v2445_v9  ;;  %v564_v9 = vld [vmem:[%s16110_s9 + $0x80] sm:$0xff]  ;;  %v2729_v43 = vmax.f32 %v2679_v8, 0.0 }
 0x712   : > { %v2855_v52 = vand.u32 2147483647, %v2805_v62  ;;  %v12835_v50 = vand.u32 2147483647, %v2609_v5 }
 0x713   : > { %v9865_v7 = vpop.f32.mrb[78].mxu0  ;;  %v9914_v3 = vpop.f32.mrb[88].mxu1  ;;  %v2850_v1 = vand.u32 2147483647, %v2800_v36 }
 0x714   : > { %v2455_v16 = vpop.f32.mrb[79].mxu0  ;;  %v3529_v2 = vpop.f32.mrb[89].mxu1  ;;  %v12791_v42 = vmul.f32 %v9914_v3, %v562_v17  ;;  %v2815_v41 = vsub.f32 %v12781_v60, %v9865_v7  ;;  %v2649_v3 = vand.u32 2147483647, %v2599_v15  ;;  %v567_v7 = vld [vmem:[%s16110_s9 + $0x98] sm:$0xff]  ;;  %v12827_v15 = vmax.f32 %v2689_v19, 0.0 }
 0x715   : > { %v9915_v39 = vpop.f32.mrb[90].mxu1  ;;  %v12797_v6 = vmul.f32 %v3529_v2, %v560_v4  ;;  %v2810_v57 = vsub.f32 %v12781_v60, %v2455_v16  ;;  %v2724_v16 = vmax.f32 %v2674_v46, 0.0  ;;  %v2604_v4 = vsub.f32 %v12732_v12, %v12726_v56 }
 0x716   : > { %v12793_v18 = vmul.f32 %v9915_v39, %v563_v33  ;;  %v3532_v63 = vpop.f32.mrb[91].mxu1  ;;  %v565_v33 = vld [vmem:[%s16110_s9 + $0x88] sm:$0xff]  ;;  %v12829_v39 = vand.u32 2147483647, %v2594_v28  ;;  %v2865_v21 = vand.u32 2147483647, %v2815_v41 }
 0x717   : > { %v12799_v48 = vmul.f32 %v3532_v63, %v561_v44  ;;  %v9868_v27 = vpop.f32.mrb[80].mxu0  ;;  %v566_v44 = vld [vmem:[%s16110_s9 + $0x90] sm:$0xff]  ;;  %v2684_v63 = vsub.f32 1.0, %v2634_v0  ;;  %v2860_v49 = vand.u32 2147483647, %v2810_v57  ;;  %v2699_v34 = vsub.f32 1.0, %v2649_v3 }
 0x718   : > { %v2465_v17 = vpop.f32.mrb[81].mxu0  ;;  %v2825_v8 = vsub.f32 %v12781_v60, %v9868_v27  ;;  %v2619_v0 = vsub.f32 %v12732_v12, %v12736_v40  ;;  %v12841_v41 = vand.u32 2147483647, %v2604_v4  ;;  %v2905_v57 = vsub.f32 1.0, %v2855_v52 }
 0x719   : > { %v2820_v56 = vsub.f32 %v12781_v60, %v2465_v17  ;;  %v2900_v27 = vsub.f32 1.0, %v2850_v1  ;;  %v2734_v17 = vmax.f32 %v2684_v63, 0.0  ;;  %v12852_v40 = vmax.f32 %v2699_v34, 0.0 }
 0x71a   : > { %v2694_v52 = vsub.f32 1.0, %v12829_v39  ;;  %v2704_v34 = vsub.f32 1.0, %v12841_v41  ;;  %v2955_v39 = vmax.f32 %v2905_v57, 0.0 }
 0x71b   : > { %v12825_v2 = vpop.f32.mrb[82].mxu0  ;;  %v9918_v22 = vpop.f32.mrb[92].mxu1  ;;  %v2950_v63 = vmax.f32 %v2900_v27, 0.0 }
 0x71c   : > { %v12831_v37 = vpop.f32.mrb[83].mxu0  ;;  %v3545_v58 = vpop.f32.mrb[93].mxu1  ;;  %v3818_v51 = vmul.f32 %v9918_v22, %v566_v44  ;;  %v2915_v44 = vsub.f32 1.0, %v2865_v21  ;;  %v12845_v22 = vand.u32 2147483647, %v2825_v8  ;;  %v2835_v21 = vsub.f32 %v12781_v60, %v12825_v2  ;;  %v568_v2 = vld [vmem:[%s16110_s9 + $0xa0] sm:$0xff] }
 0x71d   : > { %v9919_v46 = vpop.f32.mrb[94].mxu1  ;;  %v3816_v28 = vmul.f32 %v3545_v58, %v564_v9  ;;  %v570_v58 = vld [vmem:[%s16110_s9 + $0xb0] sm:$0xff]  ;;  %v571_v9 = vld [vmem:[%s16110_s9 + $0xb8] sm:$0xff] }
 0x71e   : > { %v3819_v24 = vmul.f32 %v9919_v46, %v567_v7  ;;  %v3548_v19 = vpop.f32.mrb[95].mxu1  ;;  %v2910_v7 = vsub.f32 1.0, %v2860_v49  ;;  %v12847_v46 = vand.u32 2147483647, %v2820_v56  ;;  %v16423_v56 = vpack.c.bf16 %v12677_v61, %v12675_v11 }
 0x71f   : > { %v3817_v62 = vmul.f32 %v3548_v19, %v565_v33  ;;  %v12839_v36 = vpop.f32.mrb[84].mxu0  ;;  %v12864_v33 = vand.u32 2147483647, %v2619_v0  ;;  %v569_v19 = vld [vmem:[%s16110_s9 + $0xa8] sm:$0xff]  ;;  %v2925_v0 = vsub.f32 1.0, %v12845_v22  ;;  %v16424_v22 = vpack.c.bf16 %v12673_v20, %v12671_v13  ;;  %v572_v13 = vld [vmem:[%s16110_s9 + $0xc0] sm:$0xff] }
 0x720   : > { %v3889_v26 = vpack.c.bf16 %v3819_v24, %v3818_v51  ;;  %v12843_v3 = vpop.f32.mrb[85].mxu0  ;;  %v2709_v24 = vsub.f32 1.0, %v12835_v50  ;;  %v2614_v51 = vsub.f32 %v12732_v12, %v12744_v14  ;;  %v2830_v50 = vsub.f32 %v12781_v60, %v12831_v37  ;;  %v575_v20 = vld [vmem:[%s16110_s9 + $0xd8] sm:$0xff] }
 0x721   : > { %v3888_v5 = vpack.c.bf16 %v3817_v62, %v3816_v28  ;;  %v2960_v62 = vmax.f32 %v2910_v7, 0.0  ;;  %v2920_v41 = vsub.f32 1.0, %v12847_v46  ;;  %v2885_v11 = vand.u32 2147483647, %v2835_v21 }
 0x722   : > { %v2880_v53 = vand.u32 2147483647, %v2830_v50  ;;  %v2840_v46 = vsub.f32 %v12781_v60, %v12843_v3  ;;  %v2664_v3 = vand.u32 2147483647, %v2614_v51 }
 0x723   : > { %v9877_v49 = vpop.f32.mrb[86].mxu0  ;;  %v9922_v1 = vpop.f32.mrb[96].mxu1  ;;  %9402 = vmatprep.subr.bf16.mxu0 %v3888_v5  ;;  %v2935_v50 = vsub.f32 1.0, %v2885_v11 }
 0x724   : > { %v3005_v4 = vmul.f32 %v9877_v49, %v2729_v43  ;;  %v2495_v14 = vpop.f32.mrb[87].mxu0  ;;  %v3561_v8 = vpop.f32.mrb[97].mxu1  ;;  %9403 = vmatpush3.bf16.msra.mxu0 %v16423_v56  ;;  %v2965_v43 = vmax.f32 %v2915_v44, 0.0  ;;  %v3822_v27 = vmul.f32 %v9922_v1, %v570_v58 }
 0x725   : > { %v3000_v37 = vmul.f32 %v2724_v16, %v2495_v14  ;;  %v9923_v28 = vpop.f32.mrb[98].mxu1  ;;  %9404 = vmatprep.subr.bf16.mxu0 %v3889_v26  ;;  %v3820_v56 = vmul.f32 %v3561_v8, %v568_v2  ;;  %v2845_v16 = vsub.f32 %v12781_v60, %v12839_v36  ;;  %v574_v36 = vld [vmem:[%s16110_s9 + $0xd0] sm:$0xff]  ;;  %v2719_v14 = vsub.f32 1.0, %v12864_v33 }
 0x726   : > { %v12879_v57 = vmul.f32 %v3005_v4, %v2955_v39  ;;  %v3823_v5 = vmul.f32 %v9923_v28, %v571_v9  ;;  %v3564_v49 = vpop.f32.mrb[99].mxu1  ;;  %v2754_v4 = vmax.f32 %v2704_v34, 0.0  ;;  %v2930_v2 = vsub.f32 1.0, %v2880_v53 }
 0x727   : > { %v12881_v61 = vmul.f32 %v3000_v37, %v2950_v63  ;;  %v3821_v12 = vmul.f32 %v3564_v49, %v569_v19  ;;  %v9880_v29 = vpop.f32.mrb[88].mxu0  ;;  %v2975_v63 = vmax.f32 %v2925_v0, 0.0  ;;  %v2895_v8 = vand.u32 2147483647, %v2845_v16 }
 0x728   : > { %v3891_v26 = vpack.c.bf16 %v3823_v5, %v3822_v27  ;;  %v3015_v44 = vmul.f32 %v9880_v29, %v12827_v15  ;;  %v2505_v7 = vpop.f32.mrb[89].mxu0  ;;  %9405 = vmatpush3.bf16.msra.mxu0 %v16424_v22  ;;  %v2744_v29 = vmax.f32 %v2694_v52, 0.0  ;;  %v2759_v15 = vmax.f32 %v2709_v24, 0.0  ;;  %v573_v52 = vld [vmem:[%s16110_s9 + $0xc8] sm:$0xff] }
 0x729   : > { %v3100_v58 = vpack.c.bf16 %v12879_v57, %v12881_v61  ;;  %v3890_v21 = vpack.c.bf16 %v3821_v12, %v3820_v56  ;;  %v3010_v1 = vmul.f32 %v2734_v17, %v2505_v7  ;;  %v16425_v37 = vpack.c.bf16 %v12720_v55, %v12718_v38 }
 0x72a   : > { %v12896_v9 = vmul.f32 %v3015_v44, %v2965_v43  ;;  %v2970_v28 = vmax.f32 %v2920_v41, 0.0  ;;  %v2890_v43 = vand.u32 2147483647, %v2840_v46  ;;  %v2985_v49 = vmax.f32 %v2935_v50, 0.0 }
 0x72b   : > { %v12904_v12 = vmul.f32 %v3010_v1, %v2960_v62  ;;  %v9883_v17 = vpop.f32.mrb[90].mxu0  ;;  %v9926_v39 = vpop.f32.mrb[100].mxu1  ;;  %9406 = vmatprep.subr.bf16.mxu0 %v3890_v21  ;;  %v2980_v41 = vmax.f32 %v2930_v2, 0.0  ;;  %v2945_v16 = vsub.f32 1.0, %v2895_v8  ;;  %v16426_v22 = vpack.c.bf16 %v12716_v30, %v12714_v32  ;;  %v579_v30 = vld [vmem:[%s16110_s9 + $0xf8] sm:$0xff]  ;;  %v577_v2 = vld [vmem:[%s16110_s9 + $0xe8] sm:$0xff] }
 0x72c   : > { %v3025_v19 = vmul.f32 %v9883_v17, %v12852_v40  ;;  %v2515_v24 = vpop.f32.mrb[91].mxu0  ;;  %v3577_v51 = vpop.f32.mrb[101].mxu1  ;;  %9407 = vmatpush3.bf16.msra.mxu0 %v16425_v37  ;;  %v3826_v53 = vmul.f32 %v9926_v39, %v574_v36  ;;  %v2714_v40 = vsub.f32 1.0, %v2664_v3  ;;  %v2940_v46 = vsub.f32 1.0, %v2890_v43 }
 0x72d   : > { %v3020_v62 = vmul.f32 %v2744_v29, %v2515_v24  ;;  %v9927_v27 = vpop.f32.mrb[102].mxu1  ;;  %9408 = vmatprep.subr.bf16.mxu0 %v3891_v26  ;;  %v3105_v34 = vpack.c.bf16 %v12896_v9, %v12904_v12  ;;  %v3824_v56 = vmul.f32 %v3577_v51, %v572_v13  ;;  %v2769_v13 = vmax.f32 %v2719_v14, 0.0 }
 0x72e   : > { %v12916_v33 = vmul.f32 %v3025_v19, %v2975_v63  ;;  %v3827_v0 = vmul.f32 %v9927_v27, %v575_v20  ;;  %v3580_v5 = vpop.f32.mrb[103].mxu1  ;;  %v2764_v32 = vmax.f32 %v2714_v40, 0.0  ;;  %v2995_v17 = vmax.f32 %v2945_v16, 0.0 }
 0x72f   : > { %v12918_v11 = vmul.f32 %v3020_v62, %v2970_v28  ;;  %v3825_v38 = vmul.f32 %v3580_v5, %v573_v52  ;;  %v9886_v55 = vpop.f32.mrb[92].mxu0  ;;  %v16427_v63 = vpack.c.bf16 %v12763_v54, %v12761_v23  ;;  %v2990_v8 = vmax.f32 %v2940_v46, 0.0 }
 0x730   : > { %v3893_v44 = vpack.c.bf16 %v3827_v0, %v3826_v53  ;;  %v3035_v7 = vmul.f32 %v9886_v55, %v2759_v15  ;;  %v2525_v26 = vpop.f32.mrb[93].mxu0  ;;  %9409 = vmatpush3.bf16.msra.mxu0 %v16426_v22  ;;  %v578_v15 = vld [vmem:[%s16110_s9 + $0xf0] sm:$0xff]  ;;  %v16428_v0 = vpack.c.bf16 %v12758_v47, %v12756_v31  ;;  %v580_v55 = vld [vmem:[%s16110_s9 + $0x100] sm:$0xff]  ;;  %v16429_v31 = vpack.c.bf16 %v12799_v48, %v12797_v6 }
 0x731   : > { %v3892_v21 = vpack.c.bf16 %v3825_v38, %v3824_v56  ;;  %v3030_v1 = vmul.f32 %v2754_v4, %v2525_v26  ;;  %v3110_v36 = vpack.c.bf16 %v12916_v33, %v12918_v11  ;;  %v576_v4 = vld [vmem:[%s16110_s9 + $0xe0] sm:$0xff]  ;;  %v583_v38 = vld [vmem:[%s16110_s9 + $0x118] sm:$0xff]  ;;  %v16430_v6 = vpack.c.bf16 %v12793_v18, %v12791_v42 }
 0x732   : > { %v12925_v29 = vmul.f32 %v3035_v7, %v2985_v49  ;;  %v582_v49 = vld [vmem:[%s16110_s9 + $0x110] sm:$0xff]  ;;  %v584_v42 = vld [vmem:[%s16110_s9 + $0x120] sm:$0xff] }
 0x733   : > { %v12927_v20 = vmul.f32 %v3030_v1, %v2980_v41  ;;  %v9889_v3 = vpop.f32.mrb[94].mxu0  ;;  %v9930_v50 = vpop.f32.mrb[104].mxu1  ;;  %9410 = vmatprep.subr.bf16.mxu0 %v3892_v21  ;;  %v581_v41 = vld [vmem:[%s16110_s9 + $0x108] sm:$0xff]  ;;  %v586_v1 = vld [vmem:[%s16110_s9 + $0x130] sm:$0xff] }
 0x734   : > { %v3045_v39 = vmul.f32 %v9889_v3, %v2769_v13  ;;  %v2535_v52 = vpop.f32.mrb[95].mxu0  ;;  %v3593_v14 = vpop.f32.mrb[105].mxu1  ;;  %9411 = vmatpush3.bf16.msra.mxu0 %v16427_v63  ;;  %v3830_v28 = vmul.f32 %v9930_v50, %v578_v15  ;;  %v16431_v3 = vpack.c.bf16 %v12413_v10, %v12394_v35  ;;  %v587_v15 = vld [vmem:[%s16110_s9 + $0x138] sm:$0xff]  ;;  %v16432_v50 = vpack.c.bf16 %v12512_v25, %v12492_v59  ;;  %v590_v25 = vld [vmem:[%s16110_s9 + $0x150] sm:$0xff] }
 0x735   : > { %v3040_v19 = vmul.f32 %v2764_v32, %v2535_v52  ;;  %v9931_v24 = vpop.f32.mrb[106].mxu1  ;;  %9412 = vmatprep.subr.bf16.mxu0 %v3893_v44  ;;  %v3115_v51 = vpack.c.bf16 %v12925_v29, %v12927_v20  ;;  %v3828_v23 = vmul.f32 %v3593_v14, %v576_v4  ;;  %v585_v32 = vld [vmem:[%s16110_s9 + $0x128] sm:$0xff]  ;;  %v16433_v63 = vld [vmem:[#allocation32_spill] sm:$0xff] }
 0x736   : > { %v12946_v37 = vmul.f32 %v3045_v39, %v2995_v17  ;;  %v3831_v43 = vmul.f32 %v9931_v24, %v579_v30  ;;  %v3596_v62 = vpop.f32.mrb[107].mxu1  ;;  %v13032_v24 = vld [vmem:[%s16104_s3 + $0x30] sm:$0xff] }
 0x737   : > { %v12948_v27 = vmul.f32 %v3040_v19, %v2990_v8  ;;  %v3829_v54 = vmul.f32 %v3596_v62, %v577_v2  ;;  %v16434_v2 = vpack.c.bf16 %v12506_v45, %v16433_v63  ;;  %v591_v8 = vld [vmem:[%s16110_s9 + $0x158] sm:$0xff]  ;;  %v13027_v19 = vld [vmem:[%s16104_s3 + $0x20] sm:$0xff]  ;;  %v16435_v62 = vld [vmem:[#allocation47_spill] sm:$0xff] }
 0x738   : > { %v3895_v53 = vpack.c.bf16 %v3831_v43, %v3830_v28  ;;  %9413 = vmatpush3.bf16.msra.mxu0 %v16428_v0  ;;  %v10511_v28 = vpack.i.bf16 %v13032_v24, %v13027_v19  ;;  %v588_v45 = vld [vmem:[%s16110_s9 + $0x140] sm:$0xff] }
 0x739   : > { %v3894_v5 = vpack.c.bf16 %v3829_v54, %v3828_v23  ;;  %v3120_v40 = vpack.c.bf16 %v12946_v37, %v12948_v27  ;;  %v16436_v23 = vld [vmem:[#allocation40_spill] sm:$0xff] }
 0x73a   : > { %v16437_v54 = vpack.c.bf16 %v16435_v62, %v16436_v23  ;;  %10512 = vrot.lane.b32.xlu0 %v10511_v28, %s16201_s25  ;;  %v16444_v62 = vld [vmem:[#allocation55_spill] sm:$0xff] }
 0x73b   : > { %v9934_v56 = vpop.f32.mrb[108].mxu1  ;;  %9414 = vmatprep.subr.bf16.mxu0 %v3894_v5  ;;  %v16445_v23 = vld [vmem:[#allocation51_spill] sm:$0xff] }
 0x73c   : > { %v3609_v47 = vpop.f32.mrb[109].mxu1  ;;  %9415 = vmatpush3.bf16.msra.mxu0 %v16429_v31  ;;  %v12970_v44 = vmul.f32 %v9934_v56, %v582_v49 }
 0x73d   : > { %v9935_v16 = vpop.f32.mrb[110].mxu1  ;;  %9416 = vmatprep.subr.bf16.mxu0 %v3895_v53  ;;  %v12974_v22 = vmul.f32 %v3609_v47, %v580_v55  ;;  %v589_v53 = vld [vmem:[%s16110_s9 + $0x148] sm:$0xff] }
 0x73e   : > { %v12972_v7 = vmul.f32 %v9935_v16, %v583_v38  ;;  %v3612_v26 = vpop.f32.mrb[111].mxu1 }
 0x73f   : > { %v12976_v46 = vmul.f32 %v3612_v26, %v581_v41  ;;  %v594_v41 = vld [vmem:[%s16110_s9 + $0x170] sm:$0xff]  ;;  %v16438_v26 = vld [vmem:[#allocation43_spill] sm:$0xff] }
 0x740   : > { %v3897_v21 = vpack.c.bf16 %v12972_v7, %v12970_v44  ;;  %9417 = vmatpush3.bf16.msra.mxu0 %v16430_v6  ;;  %v16439_v6 = vld [vmem:[#allocation37_spill] sm:$0xff]  ;;  %v605_v44 = vld [vmem:[%s16110_s9 + $0x1c8] sm:$0xff] }
 0x741   : > { %v3896_v48 = vpack.c.bf16 %v12976_v46, %v12974_v22  ;;  %v606_v46 = vld [vmem:[%s16110_s9 + $0x1d0] sm:$0xff] }
 0x743   : > { %v9938_v13 = vpop.f32.mrb[112].mxu1  ;;  %3953 = vmatmul.mubr.bf16.vlgmr.msra.gmra.mrb[96].mxu0 %v16431_v3  ;;  %v592_v3 = vld [vmem:[%s16110_s9 + $0x160] sm:$0xff] }
 0x744   : > { %v3625_v18 = vpop.f32.mrb[113].mxu1  ;;  %3960 = vmatprep.mubr.bf16.mxu0 %v16432_v50  ;;  %v13003_v35 = vmul.f32 %v9938_v13, %v586_v1  ;;  %v16440_v1 = vpack.c.bf16 %v16438_v26, %v16439_v6  ;;  %v595_v13 = vld [vmem:[%s16110_s9 + $0x178] sm:$0xff]  ;;  %v597_v6 = vld [vmem:[%s16110_s9 + $0x188] sm:$0xff] }
 0x745   : > { %v9939_v30 = vpop.f32.mrb[114].mxu1  ;;  %v13007_v39 = vmul.f32 %v3625_v18, %v584_v42  ;;  %v16441_v42 = vld [vmem:[#allocation20_spill] sm:$0xff]  ;;  %v16442_v18 = vld [vmem:[#allocation53_spill] sm:$0xff] }
 0x746   : > { %v13005_v10 = vmul.f32 %v9939_v30, %v587_v15  ;;  %v3628_v17 = vpop.f32.mrb[115].mxu1  ;;  %v16443_v50 = vpack.c.bf16 %v16441_v42, %v16442_v18 }
 0x747   : > { %v13009_v52 = vmul.f32 %v3628_v17, %v585_v32  ;;  %v593_v32 = vld [vmem:[%s16110_s9 + $0x168] sm:$0xff] }
 0x748   : > { %v3899_v4 = vpack.c.bf16 %v13005_v10, %v13003_v35  ;;  %v609_v35 = vld [vmem:[%s16110_s9 + $0x1e8] sm:$0xff] }
 0x749   : > { %v3898_v59 = vpack.c.bf16 %v13009_v52, %v13007_v39  ;;  %v610_v39 = vld [vmem:[%s16110_s9 + $0x1f0] sm:$0xff] }
 0x74b   : > { %v9942_v14 = vpop.f32.mrb[116].mxu1  ;;  %3961 = vmatmul.mubr.bf16.gmra.mrb[100].mxu0 %v16434_v2 }
 0x74c   : > { %v3641_v43 = vpop.f32.mrb[117].mxu1  ;;  %3968 = vmatprep.mubr.bf16.mxu0 %v16437_v54  ;;  %v13046_v5 = vmul.f32 %v9942_v14, %v590_v25  ;;  %v16446_v54 = vpack.c.bf16 %v16444_v62, %v16445_v23  ;;  %v16450_v62 = vld [vmem:[#allocation63_spill] sm:$0xff]  ;;  %v16451_v23 = vld [vmem:[#allocation56_spill] sm:$0xff] }
 0x74d   : > { %v9943_v0 = vpop.f32.mrb[118].mxu1  ;;  %v13050_v38 = vmul.f32 %v3641_v43, %v588_v45  ;;  %v598_v45 = vld [vmem:[%s16110_s9 + $0x190] sm:$0xff] }
 0x74e   : > { %v13048_v49 = vmul.f32 %v9943_v0, %v591_v8  ;;  %v3644_v56 = vpop.f32.mrb[119].mxu1  ;;  %v596_v0 = vld [vmem:[%s16110_s9 + $0x180] sm:$0xff] }
 0x74f   : > { %v13052_v55 = vmul.f32 %v3644_v56, %v589_v53  ;;  %v599_v53 = vld [vmem:[%s16110_s9 + $0x198] sm:$0xff] }
 0x750   : > { %v3901_v47 = vpack.c.bf16 %v13048_v49, %v13046_v5 }
 0x751   : > { %v3900_v31 = vpack.c.bf16 %v13052_v55, %v13050_v38 }
 0x753   : > { %v9946_v16 = vpop.f32.mrb[120].mxu1  ;;  %3969 = vmatmul.mubr.bf16.gmra.mrb[104].mxu0 %v16440_v1 }
 0x754   : > { %v3657_v15 = vpop.f32.mrb[121].mxu1  ;;  %3976 = vmatprep.mubr.bf16.mxu0 %v16443_v50  ;;  %v13076_v17 = vmul.f32 %v9946_v16, %v594_v41  ;;  %v16447_v41 = vld [vmem:[#allocation66_spill] sm:$0xff] }
 0x755   : > { %v9947_v30 = vpop.f32.mrb[122].mxu1  ;;  %v13080_v63 = vmul.f32 %v3657_v15, %v592_v3  ;;  %v16448_v16 = vld [vmem:[#allocation58_spill] sm:$0xff] }
 0x756   : > { %v13078_v25 = vmul.f32 %v9947_v30, %v595_v13  ;;  %v3660_v14 = vpop.f32.mrb[123].mxu1  ;;  %v16449_v26 = vpack.c.bf16 %v16447_v41, %v16448_v16  ;;  %v602_v30 = vld [vmem:[%s16110_s9 + $0x1b0] sm:$0xff]  ;;  %v601_v16 = vld [vmem:[%s16110_s9 + $0x1a8] sm:$0xff] }
 0x757   : > { %v13082_v2 = vmul.f32 %v3660_v14, %v593_v32 }
 0x758   : > { %v3903_v8 = vpack.c.bf16 %v13078_v25, %v13076_v17  ;;  %v619_v17 = vld [vmem:[%s16110_s9 + $0x238] sm:$0xff]  ;;  %v16460_v25 = vld [vmem:[#allocation36_spill] sm:$0xff] }
 0x759   : > { %v3902_v28 = vpack.c.bf16 %v13082_v2, %v13080_v63  ;;  %v16456_v63 = vmov 0.0   ;;  %v618_v2 = vld [vmem:[%s16110_s9 + $0x230] sm:$0xff] }
 0x75b   : > { %v9950_v43 = vpop.f32.mrb[124].mxu1  ;;  %3977 = vmatmul.mubr.bf16.gmra.mrb[108].mxu0 %v16446_v54  ;;  %v16452_v54 = vpack.c.bf16 %v16450_v62, %v16451_v23 }
 0x75c   : > { %v3673_v56 = vpop.f32.mrb[125].mxu1  ;;  %3984 = vmatprep.mubr.bf16.mxu0 %v16449_v26  ;;  %v3850_v13 = vmul.f32 %v9950_v43, %v598_v45  ;;  %v603_v45 = vld [vmem:[%s16110_s9 + $0x1b8] sm:$0xff]  ;;  %v600_v43 = vld [vmem:[%s16110_s9 + $0x1a0] sm:$0xff] }
 0x75d   : > { %v9951_v1 = vpop.f32.mrb[126].mxu1  ;;  %v3848_v42 = vmul.f32 %v3673_v56, %v596_v0  ;;  %v16453_v0 = vld [vmem:[#allocation73_spill] sm:$0xff]  ;;  %v16454_v56 = vld [vmem:[#allocation31_spill] sm:$0xff] }
 0x75e   : > { %v3851_v3 = vmul.f32 %v9951_v1, %v599_v53  ;;  %v3676_v15 = vpop.f32.mrb[127].mxu1  ;;  %v16455_v41 = vpack.c.bf16 %v16453_v0, %v16454_v56 }
 0x75f   : > { %v3849_v18 = vmul.f32 %v3676_v15, %v597_v6 }
 0x760   : > { %v3905_v50 = vpack.c.bf16 %v3851_v3, %v3850_v13 }
 0x761   : > { %v3904_v32 = vpack.c.bf16 %v3849_v18, %v3848_v42  ;;  %v607_v18 = vld [vmem:[%s16110_s9 + $0x1d8] sm:$0xff] }
 0x763   : > { %v9954_v14 = vpop.f32.mrb[128].mxu1  ;;  %3985 = vmatmul.mubr.bf16.gmra.mrb[112].mxu0 %v16452_v54  ;;  %9448 = vmatprep.subr.bf16.mxu0 %v3904_v32 }
 0x764   : > { %v3689_v53 = vpop.f32.mrb[129].mxu1  ;;  %9449 = vmatpush3.bf16.msra.mxu0 %v3896_v48  ;;  %4025 = vmatprep.mubr.bf16.mxu0 %v16455_v41  ;;  %v3854_v6 = vmul.f32 %v9954_v14, %v602_v30 }
 0x765   : > { %v9955_v26 = vpop.f32.mrb[130].mxu1  ;;  %9450 = vmatprep.subr.bf16.mxu0 %v3905_v50  ;;  %v3852_v3 = vmul.f32 %v3689_v53, %v600_v43  ;;  %v604_v50 = vld [vmem:[%s16110_s9 + $0x1c0] sm:$0xff] }
 0x766   : > { %v3855_v1 = vmul.f32 %v9955_v26, %v603_v45  ;;  %v3692_v13 = vpop.f32.mrb[131].mxu1  ;;  %v608_v43 = vld [vmem:[%s16110_s9 + $0x1e0] sm:$0xff] }
 0x767   : > { %v3853_v15 = vmul.f32 %v3692_v13, %v601_v16 }
 0x768   : > { %v3907_v42 = vpack.c.bf16 %v3855_v1, %v3854_v6  ;;  %9451 = vmatpush3.bf16.msra.mxu0 %v3897_v21 }
 0x769   : > { %v3906_v22 = vpack.c.bf16 %v3853_v15, %v3852_v3  ;;  %v612_v3 = vld [vmem:[%s16110_s9 + $0x200] sm:$0xff] }
 0x76b   : > { %v9958_v48 = vpop.f32.mrb[132].mxu1  ;;  %9452 = vmatprep.subr.bf16.mxu0 %v3906_v22 }
 0x76c   : > { %v3705_v32 = vpop.f32.mrb[133].mxu1  ;;  %9453 = vmatpush3.bf16.msra.mxu0 %v3898_v59  ;;  %v3858_v21 = vmul.f32 %v9958_v48, %v606_v46  ;;  %v611_v59 = vld [vmem:[%s16110_s9 + $0x1f8] sm:$0xff] }
 0x76d   : > { %v9959_v7 = vpop.f32.mrb[134].mxu1  ;;  %9454 = vmatprep.subr.bf16.mxu0 %v3907_v42  ;;  %v3856_v62 = vmul.f32 %v3705_v32, %v604_v50  ;;  %v615_v42 = vld [vmem:[%s16110_s9 + $0x218] sm:$0xff] }
 0x76e   : > { %v3859_v30 = vmul.f32 %v9959_v7, %v607_v18  ;;  %v3708_v14 = vpop.f32.mrb[135].mxu1  ;;  %v16457_v7 = vld [vmem:[#allocation72_spill] sm:$0xff] }
 0x76f   : > { %v3857_v23 = vmul.f32 %v3708_v14, %v605_v44 }
 0x770   : > { %v3909_v54 = vpack.c.bf16 %v3859_v30, %v3858_v21  ;;  %9455 = vmatpush3.bf16.msra.mxu0 %v3899_v4  ;;  %v10508_v4 = vpop.permute.xlu1 %10507  ;;  %v16458_v21 = vld [vmem:[#allocation30_spill] sm:$0xff] }
 0x771   : > { %v3908_v45 = vpack.c.bf16 %v3857_v23, %v3856_v62  ;;  %v10510_v16 = vunpack.i.h.bf16 %v10508_v4  ;;  %v10509_v26 = vunpack.i.l.bf16 %v10508_v4  ;;  %v16459_v30 = vpack.c.bf16 %v16457_v7, %v16458_v21  ;;  %v622_v4 = vld [vmem:[%s16110_s9 + $0x250] sm:$0xff]  ;;  %v16472_v7 = vld [vmem:[#allocation21_spill] sm:$0xff]  ;;  %v16473_v21 = vld [vmem:[#allocation54_spill] sm:$0xff] }
 0x773   : > { %v9962_v52 = vpop.f32.mrb[136].mxu1  ;;  %9456 = vmatprep.subr.bf16.mxu0 %v3908_v45  ;;  %v10396_v38 = vpack.c.bf16 %v10510_v16, %v10509_v26  ;;  %v617_v45 = vld [vmem:[%s16110_s9 + $0x228] sm:$0xff] }
 0x774   : > { %v3721_v53 = vpop.f32.mrb[137].mxu1  ;;  %9457 = vmatpush3.bf16.msra.mxu0 %v3900_v31  ;;  %v3862_v0 = vmul.f32 %v9962_v52, %v610_v39  ;;  %v614_v31 = vld [vmem:[%s16110_s9 + $0x210] sm:$0xff] }
 0x775   : > { %v9963_v10 = vpop.f32.mrb[138].mxu1  ;;  %9458 = vmatprep.subr.bf16.mxu0 %v3909_v54  ;;  %v3860_v6 = vmul.f32 %v3721_v53, %v608_v43  ;;  %10397 = vmatprep.subr.bf16.mxu1 %v10396_v38 }
 0x776   : > { %v3863_v56 = vmul.f32 %v9963_v10, %v611_v59  ;;  %v3724_v41 = vpop.f32.mrb[139].mxu1  ;;  %10399 = vmatpush3.bf16.msra.mxu1 %v10396_v38 }
 0x777   : > { %v3861_v1 = vmul.f32 %v3724_v41, %v609_v35  ;;  %v16464_v41 = vld [vmem:[#allocation33_spill] sm:$0xff] }
 0x778   : > { %v3911_v13 = vpack.c.bf16 %v3863_v56, %v3862_v0  ;;  %9459 = vmatpush3.bf16.msra.mxu0 %v3901_v47  ;;  %v613_v47 = vld [vmem:[%s16110_s9 + $0x208] sm:$0xff]  ;;  %v620_v0 = vld [vmem:[%s16110_s9 + $0x240] sm:$0xff] }
 0x779   : > { %v3910_v55 = vpack.c.bf16 %v3861_v1, %v3860_v6  ;;  %v16463_v56 = vld [vmem:[#allocation35_spill] sm:$0xff]  ;;  %v623_v6 = vld [vmem:[%s16110_s9 + $0x258] sm:$0xff]  ;;  %v16466_v1 = vld [vmem:[#allocation50_spill] sm:$0xff] }
 0x77a   : > { %v16465_v16 = vpack.c.bf16 %v16463_v56, %v16464_v41  ;;  %v16482_v56 = vld [vmem:[#allocation57_spill] sm:$0xff] }
 0x77b   : > { %9460 = vmatprep.subr.bf16.mxu0 %v3910_v55  ;;  %v9966_v15 = vpop.f32.mrb[140].mxu1 }
 0x77c   : > { %9461 = vmatpush3.bf16.msra.mxu0 %v3902_v28  ;;  %v3866_v5 = vmul.f32 %v9966_v15, %v614_v31  ;;  %v3737_v49 = vpop.f32.mrb[141].mxu1  ;;  %v616_v28 = vld [vmem:[%s16110_s9 + $0x220] sm:$0xff] }
 0x77d   : > { %9462 = vmatprep.subr.bf16.mxu0 %v3911_v13  ;;  %v3864_v22 = vmul.f32 %v3737_v49, %v612_v3  ;;  %v9967_v46 = vpop.f32.mrb[142].mxu1  ;;  %v16467_v13 = vld [vmem:[#allocation41_spill] sm:$0xff]  ;;  %v621_v3 = vld [vmem:[%s16110_s9 + $0x248] sm:$0xff] }
 0x77e   : > { %v3867_v48 = vmul.f32 %v9967_v46, %v615_v42  ;;  %v3740_v18 = vpop.f32.mrb[143].mxu1  ;;  %v16468_v38 = vpack.c.bf16 %v16466_v1, %v16467_v13  ;;  %v782_v13 = vld [vmem:[%s16104_s3 + $0x8] sm:$0xff] }
 0x77f   : > { %v3865_v50 = vmul.f32 %v3740_v18, %v613_v47  ;;  %v624_v18 = vld [vmem:[%s16110_s9 + $0x260] sm:$0xff] }
 0x780   : > { %v3913_v32 = vpack.c.bf16 %v3867_v48, %v3866_v5  ;;  %9463 = vmatpush3.bf16.msra.mxu0 %v3903_v8  ;;  %v16461_v8 = vld [vmem:[#allocation34_spill] sm:$0xff]  ;;  %v626_v48 = vld [vmem:[%s16110_s9 + $0x270] sm:$0xff] }
 0x781   : > { %v3912_v44 = vpack.c.bf16 %v3865_v50, %v3864_v22  ;;  %9980 = vmatprep.subr.bf16.mxu0 %v16456_v63  ;;  %v16462_v62 = vpack.c.bf16 %v16460_v25, %v16461_v8  ;;  %v16469_v50 = vld [vmem:[#allocation46_spill] sm:$0xff]  ;;  %v625_v25 = vld [vmem:[%s16110_s9 + $0x268] sm:$0xff] }
 0x783   : > { %4026 = vmatmul.mubr.bf16.vlgmr.msra.gmra.mrb[116].mxu0 %v16459_v30  ;;  %v9970_v14 = vpop.f32.mrb[144].mxu1  ;;  %v16474_v30 = vpack.c.bf16 %v16472_v7, %v16473_v21 }
 0x784   : > { %4033 = vmatprep.mubr.bf16.mxu0 %v16462_v62  ;;  %v3870_v23 = vmul.f32 %v9970_v14, %v618_v2  ;;  %9981 = vmatpush3.bf16.msra.mxu0 %v3912_v44  ;;  %v3753_v54 = vpop.f32.mrb[145].mxu1 }
 0x785   : > { %v3868_v39 = vmul.f32 %v3753_v54, %v616_v28  ;;  %v9971_v52 = vpop.f32.mrb[146].mxu1  ;;  %9982 = vmatprep.subr.bf16.mxu0 %v16456_v63  ;;  %v627_v28 = vld [vmem:[%s16110_s9 + $0x278] sm:$0xff] }
 0x786   : > { %v3871_v59 = vmul.f32 %v9971_v52, %v619_v17  ;;  %v3756_v43 = vpop.f32.mrb[147].mxu1 }
 0x787   : > { %v3869_v53 = vmul.f32 %v3756_v43, %v617_v45  ;;  %v16476_v43 = vld [vmem:[#allocation52_spill] sm:$0xff] }
 0x788   : > { %v3915_v35 = vpack.c.bf16 %v3871_v59, %v3870_v23  ;;  %9983 = vmatpush3.bf16.msra.mxu0 %v3913_v32  ;;  %v16470_v32 = vld [vmem:[#allocation38_spill] sm:$0xff]  ;;  %v16475_v59 = vld [vmem:[#allocation71_spill] sm:$0xff] }
 0x789   : > { %v3914_v10 = vpack.c.bf16 %v3869_v53, %v3868_v39  ;;  %9984 = vmatprep.subr.bf16.mxu0 %v16456_v63  ;;  %v16471_v44 = vpack.c.bf16 %v16469_v50, %v16470_v32  ;;  %v16477_v53 = vpack.c.bf16 %v16475_v59, %v16476_v43 }
 0x78b   : > { %4034 = vmatmul.mubr.bf16.gmra.mrb[120].mxu0 %v16465_v16  ;;  %v9974_v26 = vpop.f32.mrb[148].mxu1 }
 0x78c   : > { %4041 = vmatprep.mubr.bf16.mxu0 %v16468_v38  ;;  %v3874_v55 = vmul.f32 %v9974_v26, %v622_v4  ;;  %9985 = vmatpush3.bf16.msra.mxu0 %v3914_v10  ;;  %v3769_v31 = vpop.f32.mrb[149].mxu1  ;;  %v16479_v10 = vld [vmem:[#allocation59_spill] sm:$0xff]  ;;  %v16484_v38 = vld [vmem:[#allocation22_spill] sm:$0xff] }
 0x78d   : > { %v3872_v15 = vmul.f32 %v3769_v31, %v620_v0  ;;  %v9975_v42 = vpop.f32.mrb[150].mxu1  ;;  %9986 = vmatprep.subr.bf16.mxu0 %v16456_v63  ;;  %v16481_v0 = vld [vmem:[#allocation64_spill] sm:$0xff] }
 0x78e   : > { %v3875_v5 = vmul.f32 %v9975_v42, %v623_v6  ;;  %v3772_v49 = vpop.f32.mrb[151].mxu1  ;;  %v16483_v41 = vpack.c.bf16 %v16481_v0, %v16482_v56 }
 0x78f   : > { %v3873_v47 = vmul.f32 %v3772_v49, %v621_v3 }
 0x790   : > { %v3917_v22 = vpack.c.bf16 %v3875_v5, %v3874_v55  ;;  %9987 = vmatpush3.bf16.msra.mxu0 %v3915_v35  ;;  %v16478_v35 = vld [vmem:[#allocation67_spill] sm:$0xff]  ;;  %v10516_v55 = vpack.i.bf16 %v782_v13, %v16484_v38 }
 0x791   : > { %v3916_v46 = vpack.c.bf16 %v3873_v47, %v3872_v15  ;;  %9988 = vmatprep.subr.bf16.mxu0 %v16456_v63  ;;  %v16480_v4 = vpack.c.bf16 %v16478_v35, %v16479_v10 }
 0x792   : > { %10517 = vrot.lane.b32.xlu0 %v10516_v55, %s16199_s30 }
 0x793   : > { %4042 = vmatmul.mubr.bf16.gmra.mrb[124].mxu0 %v16471_v44  ;;  %v9978_v2 = vpop.f32.mrb[152].mxu1 }
 0x794   : > { %4049 = vmatprep.mubr.bf16.mxu0 %v16474_v30  ;;  %v3878_v14 = vmul.f32 %v9978_v2, %v626_v48  ;;  %9989 = vmatpush3.bf16.msra.mxu0 %v3916_v46  ;;  %v3785_v17 = vpop.f32.mrb[153].mxu1 }
 0x795   : > { %v3876_v8 = vmul.f32 %v3785_v17, %v624_v18  ;;  %v9979_v62 = vpop.f32.mrb[154].mxu1  ;;  %9990 = vmatprep.subr.bf16.mxu0 %v16456_v63 }
 0x796   : > { %v3879_v23 = vmul.f32 %v9979_v62, %v627_v28  ;;  %v3788_v54 = vpop.f32.mrb[155].mxu1 }
 0x797   : > { %v3877_v45 = vmul.f32 %v3788_v54, %v625_v25 }
 0x798   : > { %v3919_v39 = vpack.c.bf16 %v3879_v23, %v3878_v14  ;;  %9991 = vmatpush3.bf16.msra.mxu0 %v3917_v22 }
 0x799   : > { %v3918_v52 = vpack.c.bf16 %v3877_v45, %v3876_v8  ;;  %9992 = vmatprep.subr.bf16.mxu0 %v16456_v63 }
 0x79b   : > { %4050 = vmatmul.mubr.bf16.gmra.mrb[128].mxu0 %v16477_v53 }
 0x79c   : > { %4057 = vmatprep.mubr.bf16.mxu0 %v16480_v4  ;;  %9993 = vmatpush3.bf16.msra.mxu0 %v3918_v52 }
 0x79d   : > { %9994 = vmatprep.subr.bf16.mxu0 %v16456_v63 }
 0x7a0   : > { %9995 = vmatpush3.bf16.msra.mxu0 %v3919_v39 }
 0x7a3   : > { %4058 = vmatmul.mubr.bf16.gmra.mrb[132].mxu0 %v16483_v41 }
 0x7a4   : > { %9996 = vmatprep.mubr.msk.bf16.mxu0 %vm10940_vm6, %v16456_v63 }
 0x7ab   : > { %9997 = vmatmul.mubr.bf16.vlgmr.msra.gmra.mrb[136].mxu0 %v3100_v58 }
 0x7ac   : > { %10000 = vmatprep.mubr.msk.bf16.mxu0 %vm10940_vm6, %v16456_v63  ;;  %v10513_v16 = vpop.permute.xlu0 %10512 }
 0x7ad   : > { %v10515_v57 = vunpack.i.h.bf16 %v10513_v16  ;;  %v10514_v61 = vunpack.i.l.bf16 %v10513_v16 }
 0x7af   : > { %v10400_v58 = vpack.c.bf16 %v10515_v57, %v10514_v61 }
 0x7b1   : > { %10401 = vmatprep.subr.bf16.mxu1 %v10400_v58 }
 0x7b2   : > { %10403 = vmatpush3.bf16.msra.mxu1 %v10400_v58 }
 0x7b3   : > { %10001 = vmatmul.mubr.bf16.gmra.mrb[140].mxu0 %v3105_v34 }
 0x7b4   : > { %10004 = vmatprep.mubr.msk.bf16.mxu0 %vm10940_vm6, %v16456_v63 }
 0x7bb   : > { %10005 = vmatmul.mubr.bf16.gmra.mrb[144].mxu0 %v3110_v36 }
 0x7bc   : > { %10008 = vmatprep.mubr.msk.bf16.mxu0 %vm10940_vm6, %v16456_v63 }
 0x7c3   : > { %10009 = vmatmul.mubr.bf16.gmra.mrb[148].mxu0 %v3115_v51 }
 0x7c4   : > { %10012 = vmatprep.mubr.msk.bf16.mxu0 %vm10940_vm6, %v16456_v63 }
 0x7cb   : > { %10013 = vmatmul.mubr.bf16.gmra.mrb[152].mxu0 %v3120_v40 }
 0x816   : > { %v9418_v9 = vpop.f32.mrb[96].mxu0 }
 0x817   : > { %v9419_v12 = vpop.f32.mrb[97].mxu0 }
 0x818   : > { %v9420_v34 = vadd.f32 %v9419_v12, %v9418_v9  ;;  %v9421_v33 = vpop.f32.mrb[98].mxu0 }
 0x819   : > { %v9422_v11 = vpop.f32.mrb[99].mxu0 }
 0x81a   : > { %v9423_v36 = vadd.f32 %v9422_v11, %v9421_v33 }
 0x81e   : > { %v9424_v26 = vpop.f32.mrb[100].mxu0 }
 0x81f   : > { %v9425_v6 = vpop.f32.mrb[101].mxu0 }
 0x820   : > { %v9426_v1 = vadd.f32 %v9425_v6, %v9424_v26  ;;  %v9427_v29 = vpop.f32.mrb[102].mxu0 }
 0x821   : > { %v9428_v20 = vpop.f32.mrb[103].mxu0 }
 0x822   : > { %v9429_v51 = vadd.f32 %v9428_v20, %v9427_v29 }
 0x826   : > { %v9430_v37 = vpop.f32.mrb[104].mxu0 }
 0x827   : > { %v9431_v27 = vpop.f32.mrb[105].mxu0 }
 0x828   : > { %v9432_v40 = vadd.f32 %v9431_v27, %v9430_v37  ;;  %v9433_v31 = vpop.f32.mrb[106].mxu0 }
 0x829   : > { %v9434_v3 = vpop.f32.mrb[107].mxu0 }
 0x82a   : > { %v9435_v15 = vadd.f32 %v9434_v3, %v9433_v31 }
 0x82e   : > { %v9436_v42 = vpop.f32.mrb[108].mxu0 }
 0x82f   : > { %v9437_v5 = vpop.f32.mrb[109].mxu0 }
 0x830   : > { %v9438_v49 = vadd.f32 %v9437_v5, %v9436_v42  ;;  %v9439_v47 = vpop.f32.mrb[110].mxu0 }
 0x831   : > { %v9440_v22 = vpop.f32.mrb[111].mxu0 }
 0x832   : > { %v9441_v46 = vadd.f32 %v9440_v22, %v9439_v47 }
 0x836   : > { %v9442_v48 = vpop.f32.mrb[112].mxu0 }
 0x837   : > { %v9443_v18 = vpop.f32.mrb[113].mxu0 }
 0x838   : > { %v9444_v50 = vadd.f32 %v9443_v18, %v9442_v48  ;;  %v9445_v32 = vpop.f32.mrb[114].mxu0 }
 0x839   : > { %v9446_v44 = vpop.f32.mrb[115].mxu0 }
 0x83a   : > { %v9447_v2 = vadd.f32 %v9446_v44, %v9445_v32 }
 0x856   : > { %v9464_v28 = vpop.f32.mrb[116].mxu0 }
 0x857   : > { %v9465_v7 = vpop.f32.mrb[117].mxu0 }
 0x858   : > { %v9466_v21 = vadd.f32 %v9465_v7, %v9464_v28  ;;  %v9467_v30 = vpop.f32.mrb[118].mxu0 }
 0x859   : > { %v9468_v14 = vpop.f32.mrb[119].mxu0 }
 0x85a   : > { %v9469_v17 = vadd.f32 %v9468_v14, %v9467_v30  ;;  %v4028_v25 = vadd.f32 %v9466_v21, %v9420_v34 }
 0x85c   : > { %v4031_v8 = vadd.f32 %v9469_v17, %v9423_v36 }
 0x85e   : > { %v9470_v62 = vpop.f32.mrb[120].mxu0 }
 0x85f   : > { %v9471_v23 = vpop.f32.mrb[121].mxu0 }
 0x860   : > { %v9472_v54 = vadd.f32 %v9471_v23, %v9470_v62  ;;  %v9473_v45 = vpop.f32.mrb[122].mxu0 }
 0x861   : > { %v9474_v39 = vpop.f32.mrb[123].mxu0 }
 0x862   : > { %v9475_v52 = vadd.f32 %v9474_v39, %v9473_v45  ;;  %v4036_v59 = vadd.f32 %v9472_v54, %v9426_v1  ;;  %v13298_v54 = vld [vmem:[%s16107_s6] sm:$0xff]  ;;  %v16485_v45 = vld [vmem:[#allocation39_spill] sm:$0xff] }
 0x863   : > { %v4142_v39 = vrot.slane %v13298_v54, %v16485_v45 }
 0x864   : > { %v4039_v43 = vadd.f32 %v9475_v52, %v9429_v51 }
 0x866   : > { %v9476_v53 = vpop.f32.mrb[124].mxu0 }
 0x867   : > { %v9477_v35 = vpop.f32.mrb[125].mxu0 }
 0x868   : > { %v9478_v10 = vadd.f32 %v9477_v35, %v9476_v53  ;;  %v9479_v4 = vpop.f32.mrb[126].mxu0  ;;  %v10773_v35 = vld [vmem:[%s11046_s23 + $0x8] sm:$0xff] }
 0x869   : > { %v9480_v0 = vpop.f32.mrb[127].mxu0 }
 0x86a   : > { %v9481_v56 = vadd.f32 %v9480_v0, %v9479_v4  ;;  %v4044_v41 = vadd.f32 %v9478_v10, %v9432_v40  ;;  %v10774_v4 = vld [vmem:[%s11046_s23] sm:$0xff] }
 0x86c   : > { %v4047_v16 = vadd.f32 %v9481_v56, %v9435_v15 }
 0x86e   : > { %v9482_v57 = vpop.f32.mrb[128].mxu0 }
 0x86f   : > { %v9483_v61 = vpop.f32.mrb[129].mxu0 }
 0x870   : > { %v9484_v58 = vadd.f32 %v9483_v61, %v9482_v57  ;;  %v9485_v9 = vpop.f32.mrb[130].mxu0 }
 0x871   : > { %v9486_v12 = vpop.f32.mrb[131].mxu0 }
 0x872   : > { %v9487_v34 = vadd.f32 %v9486_v12, %v9485_v9  ;;  %v4052_v33 = vadd.f32 %v9484_v58, %v9438_v49  ;;  %v10775_v9 = vld [vmem:[%s11046_s23 + $0x18] sm:$0xff] }
 0x874   : > { %v4055_v11 = vadd.f32 %v9487_v34, %v9441_v46  ;;  %v10776_v34 = vld [vmem:[%s11046_s23 + $0x10] sm:$0xff] }
 0x876   : > { %v9488_v36 = vpop.f32.mrb[132].mxu0 }
 0x877   : > { %v9489_v26 = vpop.f32.mrb[133].mxu0 }
 0x878   : > { %v9490_v6 = vadd.f32 %v9489_v26, %v9488_v36  ;;  %v9491_v1 = vpop.f32.mrb[134].mxu0 }
 0x879   : > { %v9492_v29 = vpop.f32.mrb[135].mxu0 }
 0x87a   : > { %v9493_v20 = vadd.f32 %v9492_v29, %v9491_v1  ;;  %v4060_v51 = vadd.f32 %v9490_v6, %v9444_v50 }
 0x87c   : > { %v4063_v13 = vadd.f32 %v9493_v20, %v9447_v2  ;;  %v10777_v20 = vld [vmem:[%s11046_s23 + $0x28] sm:$0xff] }
 0x87e   : > { %v4100_v38 = vpop.f32.mrb[136].mxu0 }
 0x87f   : > { %v4101_v55 = vadd.f32 %v4100_v38, %v4028_v25  ;;  %v9998_v37 = vpop.f32.mrb[137].mxu0 }
 0x880   : > { %v4103_v27 = vpop.f32.mrb[138].mxu0 }
 0x881   : > { %v4104_v40 = vadd.f32 %v4103_v27, %v4031_v8  ;;  %v9999_v31 = vpop.f32.mrb[139].mxu0  ;;  %10024 = vmatprep.mubr.msk.f32.mxu1 %vm635_vm0, %v4101_v55 }
 0x883   : > { %10025 = vmatmul.mubr.msk.f32.vlgmr.msra.gmra.mrb[74].mxu1 %vm635_vm0, %v4104_v40 }
 0x886   : > { %v4108_v3 = vpop.f32.mrb[140].mxu0 }
 0x887   : > { %v4109_v15 = vadd.f32 %v4108_v3, %v4036_v59  ;;  %v10002_v42 = vpop.f32.mrb[141].mxu0 }
 0x888   : > { %v4111_v5 = vpop.f32.mrb[142].mxu0 }
 0x889   : > { %v4112_v49 = vadd.f32 %v4111_v5, %v4039_v43  ;;  %v10003_v47 = vpop.f32.mrb[143].mxu0  ;;  %10027 = vmatprep.mubr.msk.f32.mxu1 %vm635_vm0, %v4109_v15  ;;  %v10779_v15 = vld [vmem:[%s11046_s23 + $0x38] sm:$0xff]  ;;  %v10780_v5 = vld [vmem:[%s11046_s23 + $0x30] sm:$0xff] }
 0x88b   : > { %10028 = vmatmul.mubr.msk.f32.gmra.mrb[156].mxu1 %vm635_vm0, %v4112_v49 }
 0x88e   : > { %v4116_v22 = vpop.f32.mrb[144].mxu0 }
 0x88f   : > { %v4117_v46 = vadd.f32 %v4116_v22, %v4044_v41  ;;  %v10006_v48 = vpop.f32.mrb[145].mxu0 }
 0x890   : > { %v4119_v18 = vpop.f32.mrb[146].mxu0 }
 0x891   : > { %v4120_v50 = vadd.f32 %v4119_v18, %v4047_v16  ;;  %v10007_v32 = vpop.f32.mrb[147].mxu0  ;;  %10030 = vmatprep.mubr.msk.f32.mxu1 %vm635_vm0, %v4117_v46 }
 0x892   : > { %v10781_v32 = vld [vmem:[%s11046_s23 + $0x48] sm:$0xff] }
 0x893   : > { %10031 = vmatmul.mubr.msk.f32.gmra.mrb[158].mxu1 %vm635_vm0, %v4120_v50 }
 0x896   : > { %v4124_v44 = vpop.f32.mrb[148].mxu0 }
 0x897   : > { %v4125_v2 = vadd.f32 %v4124_v44, %v4052_v33  ;;  %v10010_v28 = vpop.f32.mrb[149].mxu0 }
 0x898   : > { %v4127_v7 = vpop.f32.mrb[150].mxu0 }
 0x899   : > { %v4128_v21 = vadd.f32 %v4127_v7, %v4055_v11  ;;  %v10011_v30 = vpop.f32.mrb[151].mxu0  ;;  %10033 = vmatprep.mubr.msk.f32.mxu1 %vm635_vm0, %v4125_v2  ;;  %v10782_v2 = vld [vmem:[%s11046_s23 + $0x40] sm:$0xff] }
 0x89a   : > { %v784_v30 = vld [vmem:[%s16104_s3 + $0x18] sm:$0xff] }
 0x89b   : > { %10034 = vmatmul.mubr.msk.f32.gmra.mrb[160].mxu1 %vm635_vm0, %v4128_v21 }
 0x89e   : > { %v4132_v14 = vpop.f32.mrb[152].mxu0 }
 0x89f   : > { %v4133_v17 = vadd.f32 %v4132_v14, %v4060_v51  ;;  %v10014_v25 = vpop.f32.mrb[153].mxu0  ;;  %v10783_v14 = vld [vmem:[%s16104_s3 + $0x10] sm:$0xff] }
 0x8a0   : > { %v4135_v8 = vpop.f32.mrb[154].mxu0  ;;  %v10518_v25 = vpop.permute.xlu0 %10517 }
 0x8a1   : > { %v4136_v62 = vadd.f32 %v4135_v8, %v4063_v13  ;;  %v10015_v23 = vpop.f32.mrb[155].mxu0  ;;  %10036 = vmatprep.mubr.msk.f32.mxu1 %vm635_vm0, %v4133_v17  ;;  %v10778_v13 = vld [vmem:[%s11046_s23 + $0x20] sm:$0xff]  ;;  %v10521_v17 = vpack.i.bf16 %v784_v30, %v10783_v14  ;;  %s16517_s23 = smov 76  }
 0x8a3   : > { %10037 = vmatmul.mubr.msk.f32.gmra.mrb[162].mxu1 %vm635_vm0, %v4136_v62 }
 0x956   : > { %v10026_v52 = vpop.f32.mrb[74].mxu1 }
 0x957   : > { %v4261_v59 = vadd.f32 %v10026_v52, %v4142_v39  ;;  %v4255_v43 = vpop.f32.mrb[75].mxu1 }
 0x958   : > { %v4256_v53 = vadd.f32 %v4255_v43, %v4142_v39 }
 0x959   : > { %v13303_v10 = vadd.f32 %v10773_v35, %v4261_v59 }
 0x95a   : > { %v13306_v0 = vadd.f32 %v10774_v4, %v4256_v53 }
 0x95b   : > { %v4317_v56 = vsel %vm635_vm0, %v13303_v10, 0.0 }
 0x95c   : > { %4318 = vadd.xlane.f32.xlu0 %v4317_v56  ;;  %v4314_v41 = vsel %vm635_vm0, %v13306_v0, 0.0 }
 0x95d   : > { %4315 = vadd.xlane.f32.xlu1 %v4314_v41 }
 0x95e   : > { %v10029_v16 = vpop.f32.mrb[156].mxu1 }
 0x95f   : > { %v4271_v57 = vadd.f32 %v10029_v16, %v4142_v39  ;;  %v4265_v61 = vpop.f32.mrb[157].mxu1 }
 0x960   : > { %v4266_v58 = vadd.f32 %v4265_v61, %v4142_v39 }
 0x961   : > { %v13313_v12 = vadd.f32 %v10775_v9, %v4271_v57 }
 0x962   : > { %v13316_v33 = vadd.f32 %v10776_v34, %v4266_v58 }
 0x963   : > { %v4323_v11 = vsel %vm635_vm0, %v13313_v12, 0.0 }
 0x964   : > { %4324 = vadd.xlane.f32.xlu1 %v4323_v11  ;;  %v4320_v36 = vsel %vm635_vm0, %v13316_v33, 0.0 }
 0x965   : > { %4321 = vadd.xlane.f32.xlu0 %v4320_v36 }
 0x966   : > { %v10032_v26 = vpop.f32.mrb[158].mxu1 }
 0x967   : > { %v4281_v6 = vadd.f32 %v10032_v26, %v4142_v39  ;;  %v4275_v1 = vpop.f32.mrb[159].mxu1 }
 0x968   : > { %v4276_v29 = vadd.f32 %v4275_v1, %v4142_v39 }
 0x969   : > { %v13323_v51 = vadd.f32 %v10777_v20, %v4281_v6 }
 0x96a   : > { %v13326_v38 = vadd.f32 %v10778_v13, %v4276_v29 }
 0x96b   : > { %v4329_v55 = vsel %vm635_vm0, %v13323_v51, 0.0 }
 0x96c   : > { %4330 = vadd.xlane.f32.xlu1 %v4329_v55  ;;  %v4326_v37 = vsel %vm635_vm0, %v13326_v38, 0.0 }
 0x96d   : > { %4327 = vadd.xlane.f32.xlu0 %v4326_v37 }
 0x96e   : > { %v10035_v27 = vpop.f32.mrb[160].mxu1 }
 0x96f   : > { %v4291_v40 = vadd.f32 %v10035_v27, %v4142_v39  ;;  %v4285_v31 = vpop.f32.mrb[161].mxu1 }
 0x970   : > { %v4286_v3 = vadd.f32 %v4285_v31, %v4142_v39  ;;  %v10520_v31 = vunpack.i.h.bf16 %v10518_v25 }
 0x971   : > { %v4311_v42 = vadd.f32 %v10779_v15, %v4291_v40 }
 0x972   : > { %v13334_v49 = vadd.f32 %v10780_v5, %v4286_v3  ;;  %v10519_v3 = vunpack.i.l.bf16 %v10518_v25 }
 0x973   : > { %v4335_v47 = vsel %vm635_vm0, %v4311_v42, 0.0 }
 0x974   : > { %4336 = vadd.xlane.f32.xlu1 %v4335_v47  ;;  %v4332_v22 = vsel %vm635_vm0, %v13334_v49, 0.0 }
 0x975   : > { %4333 = vadd.xlane.f32.xlu0 %v4332_v22  ;;  %v4497_v22 = vsel %vm1778_vm4, %v10519_v3, %v10520_v31 }
 0x976   : > { %v10038_v46 = vpop.f32.mrb[162].mxu1 }
 0x977   : > { %v4301_v48 = vadd.f32 %v10038_v46, %v4142_v39  ;;  %v4295_v18 = vpop.f32.mrb[163].mxu1 }
 0x978   : > { %v4296_v50 = vadd.f32 %v4295_v18, %v4142_v39  ;;  %v786_v18 = vld [vmem:[%s16104_s3 + $0x28] sm:$0xff] }
 0x979   : > { %v13340_v44 = vadd.f32 %v10781_v32, %v4301_v48  ;;  %v10526_v32 = vpack.i.bf16 %v786_v18, %v13027_v19 }
 0x97a   : > { %v13343_v28 = vadd.f32 %v10782_v2, %v4296_v50 }
 0x97b   : > { %v4341_v7 = vsel %vm635_vm0, %v13340_v44, 0.0 }
 0x97c   : > { %4342 = vadd.xlane.f32.xlu1 %v4341_v7  ;;  %v4338_v21 = vsel %vm635_vm0, %v13343_v28, 0.0 }
 0x97d   : > { %4339 = vadd.xlane.f32.xlu0 %v4338_v21 }
 0x98d   : > { %10522 = vrot.lane.b32.xlu1 %v10521_v17, %s16199_s30 }
 0x9e9   : > { %v4319_v8 = vpop.xlane.xlu0 %4318 }
 0x9ea   : > { %v4346_v62 = vmul.f32 0.03125, %v4319_v8  ;;  %v4316_v23 = vpop.xlane.xlu1 %4315 }
 0x9eb   : > { %v4345_v39 = vmul.f32 0.03125, %v4316_v23 }
 0x9ec   : > { %v13357_v52 = vsub.f32 %v13303_v10, %v4346_v62 }
 0x9ed   : > { %v13360_v59 = vsub.f32 %v13306_v0, %v4345_v39  ;;  %v16486_v39 = vld [vmem:[#allocation42_spill] sm:$0xff] }
 0x9ee   : > { %v4366_v43 = vmul.f32 %v13357_v52, %v13357_v52 }
 0x9ef   : > { %v4365_v53 = vmul.f32 %v13360_v59, %v13360_v59 }
 0x9f0   : > { %v4378_v35 = vsel %vm635_vm0, %v4366_v43, 0.0  ;;  %v13429_v43 = vrot.slane %v13298_v54, %v16486_v39 }
 0x9f1   : > { %v4325_v4 = vpop.xlane.xlu1 %4324  ;;  %4379 = vadd.xlane.f32.xlu1 %v4378_v35  ;;  %v4375_v56 = vsel %vm635_vm0, %v4365_v53, 0.0  ;;  %v790_v53 = vld [vmem:[%s16106_s5 + $0x8] sm:$0xff]  ;;  %v791_v35 = vld [vmem:[%s16106_s5 + $0x10] sm:$0xff] }
 0x9f2   : > { %v4348_v41 = vmul.f32 0.03125, %v4325_v4  ;;  %v4322_v16 = vpop.xlane.xlu0 %4321  ;;  %4376 = vadd.xlane.f32.xlu0 %v4375_v56  ;;  %v792_v56 = vld [vmem:[%s16106_s5 + $0x18] sm:$0xff] }
 0x9f3   : > { %v4347_v10 = vmul.f32 0.03125, %v4322_v16  ;;  %v793_v16 = vld [vmem:[%s16106_s5 + $0x20] sm:$0xff] }
 0x9f4   : > { %v13369_v57 = vsub.f32 %v13313_v12, %v4348_v41  ;;  %v10416_v41 = vpack.c.bf16 %v792_v56, %v791_v35 }
 0x9f5   : > { %v13372_v0 = vsub.f32 %v13316_v33, %v4347_v10  ;;  %v794_v10 = vld [vmem:[%s16106_s5 + $0x28] sm:$0xff] }
 0x9f6   : > { %v4368_v61 = vmul.f32 %v13369_v57, %v13369_v57 }
 0x9f7   : > { %v4367_v58 = vmul.f32 %v13372_v0, %v13372_v0 }
 0x9f8   : > { %v4384_v9 = vsel %vm635_vm0, %v4368_v61, 0.0  ;;  %v10420_v61 = vpack.c.bf16 %v794_v10, %v793_v16 }
 0x9f9   : > { %v4331_v34 = vpop.xlane.xlu1 %4330  ;;  %4385 = vadd.xlane.f32.xlu1 %v4384_v9  ;;  %v4381_v11 = vsel %vm635_vm0, %v4367_v58, 0.0 }
 0x9fa   : > { %v4350_v36 = vmul.f32 0.03125, %v4331_v34  ;;  %v4328_v26 = vpop.xlane.xlu0 %4327  ;;  %4382 = vadd.xlane.f32.xlu0 %v4381_v11 }
 0x9fb   : > { %v4349_v12 = vmul.f32 0.03125, %v4328_v26 }
 0x9fc   : > { %v13381_v6 = vsub.f32 %v13323_v51, %v4350_v36 }
 0x9fd   : > { %v13384_v33 = vsub.f32 %v13326_v38, %v4349_v12 }
 0x9fe   : > { %v4370_v1 = vmul.f32 %v13381_v6, %v13381_v6 }
 0x9ff   : > { %v4369_v29 = vmul.f32 %v13384_v33, %v13384_v33 }
 0xa00   : > { %v4390_v20 = vsel %vm635_vm0, %v4370_v1, 0.0 }
 0xa01   : > { %v4337_v13 = vpop.xlane.xlu1 %4336  ;;  %4391 = vadd.xlane.f32.xlu1 %v4390_v20  ;;  %v4387_v55 = vsel %vm635_vm0, %v4369_v29, 0.0 }
 0xa02   : > { %v4352_v37 = vmul.f32 0.03125, %v4337_v13  ;;  %4388 = vadd.xlane.f32.xlu0 %v4387_v55  ;;  %v4334_v2 = vpop.xlane.xlu0 %4333 }
 0xa03   : > { %v4351_v7 = vmul.f32 0.03125, %v4334_v2 }
 0xa04   : > { %v13392_v27 = vsub.f32 %v4311_v42, %v4352_v37  ;;  %v788_v42 = vld [vmem:[%s16104_s3 + $0x38] sm:$0xff] }
 0xa05   : > { %v10531_v50 = vpack.i.bf16 %v788_v42, %v13032_v24  ;;  %v13410_v21 = vsub.f32 %v13334_v49, %v4351_v7 }
 0xa06   : > { %v4372_v51 = vmul.f32 %v13392_v27, %v13392_v27 }
 0xa07   : > { %v4371_v24 = vmul.f32 %v13410_v21, %v13410_v21 }
 0xa08   : > { %v4396_v38 = vsel %vm635_vm0, %v4372_v51, 0.0 }
 0xa09   : > { %4397 = vadd.xlane.f32.xlu1 %v4396_v38  ;;  %v4343_v40 = vpop.xlane.xlu1 %4342  ;;  %v4393_v8 = vsel %vm635_vm0, %v4371_v24, 0.0 }
 0xa0a   : > { %v4354_v30 = vmul.f32 0.03125, %v4343_v40  ;;  %v4340_v14 = vpop.xlane.xlu0 %4339 }
 0xa0b   : > { %v4353_v17 = vmul.f32 0.03125, %v4340_v14 }
 0xa0c   : > { %v13413_v25 = vsub.f32 %v13340_v44, %v4354_v30 }
 0xa0d   : > { %v10523_v15 = vpop.permute.xlu1 %10522  ;;  %v13418_v19 = vsub.f32 %v13343_v28, %v4353_v17  ;;  %v789_v28 = vld [vmem:[%s16106_s5] sm:$0xff] }
 0xa0e   : > { %v10525_v5 = vunpack.i.h.bf16 %v10523_v15  ;;  %v10524_v47 = vunpack.i.l.bf16 %v10523_v15  ;;  %v4374_v62 = vmul.f32 %v13413_v25, %v13413_v25  ;;  %v10412_v4 = vpack.c.bf16 %v790_v53, %v789_v28 }
 0xa0f   : > { %v4373_v49 = vmul.f32 %v13418_v19, %v13418_v19 }
 0xa10   : > { %v4498_v46 = vsel %vm1778_vm4, %v10524_v47, %v10525_v5  ;;  %v4402_v23 = vsel %vm635_vm0, %v4374_v62, 0.0  ;;  %10413 = vmatprep.subr.bf16.mxu1 %v10412_v4 }
 0xa11   : > { %v10404_v48 = vpack.c.bf16 %v4498_v46, %v4497_v22  ;;  %v4399_v44 = vsel %vm635_vm0, %v4373_v49, 0.0  ;;  %10415 = vmatpush3.bf16.msra.mxu1 %v10412_v4 }
 0xa12   : > { %10417 = vmatprep.subr.bf16.mxu1 %v10416_v41 }
 0xa13   : > { %10405 = vmatprep.subr.bf16.mxu0 %v10404_v48 }
 0xa14   : > { %10407 = vmatpush3.bf16.msra.mxu0 %v10404_v48 }
 0xa15   : > { %10419 = vmatpush3.bf16.msra.mxu1 %v10416_v41 }
 0xa16   : > { %10421 = vmatprep.subr.bf16.mxu1 %v10420_v61 }
 0xa18   : > { %10532 = vrot.lane.b32.xlu0 %v10531_v50, %s16199_s30 }
 0xa19   : > { %10423 = vmatpush3.bf16.msra.mxu1 %v10420_v61 }
 0xa1a   : > { %10527 = vrot.lane.b32.xlu1 %v10526_v32, %s16199_s30 }
 0xa37   : > { %4394 = vadd.xlane.f32.xlu0 %v4393_v8 }
 0xa3b   : > { %4403 = vadd.xlane.f32.xlu0 %v4402_v23 }
 0xa3e   : > { %4400 = vadd.xlane.f32.xlu1 %v4399_v44 }
 0xa51   : > { %4460 = vrot.lane.b32.xlu0 %v13429_v43, %s10937_s15 }
 0xa7e   : > { %v4380_v9 = vpop.xlane.xlu1 %4379 }
 0xa7f   : > { %v4377_v58 = vpop.xlane.xlu0 %4376  ;;  %v4406_v31 = vmul.f32 0.03125, %v4380_v9 }
 0xa80   : > { %v4405_v3 = vmul.f32 0.03125, %v4377_v58 }
 0xa81   : > { %v4416_v5 = vadd.f32 1e-05, %v4406_v31 }
 0xa82   : > { %v4415_v47 = vadd.f32 1e-05, %v4405_v3 }
 0xa83   : > { %10646 = vrsqrt.f32 %v4416_v5 }
 0xa84   : > { %10648 = vrsqrt.f32 %v4415_v47 }
 0xa86   : > { %v4386_v11 = vpop.xlane.xlu1 %4385 }
 0xa87   : > { %v4383_v34 = vpop.xlane.xlu0 %4382  ;;  %v4408_v22 = vmul.f32 0.03125, %v4386_v11 }
 0xa88   : > { %v4407_v15 = vmul.f32 0.03125, %v4383_v34 }
 0xa89   : > { %v4418_v42 = vadd.f32 1e-05, %v4408_v22 }
 0xa8a   : > { %v4417_v46 = vadd.f32 1e-05, %v4407_v15 }
 0xa8c   : > { %10650 = vrsqrt.f32 %v4417_v46 }
 0xa8d   : > { %10652 = vrsqrt.f32 %v4418_v42  ;;  %v10647_v7 = vpop.eup %10646 }
 0xa8e   : > { %v4392_v26 = vpop.xlane.xlu1 %4391  ;;  %v10649_v14 = vpop.eup %10648  ;;  %v4436_v62 = vmul.f32 %v10647_v7, %v13357_v52 }
 0xa8f   : > { %v4389_v36 = vpop.xlane.xlu0 %4388  ;;  %v4410_v18 = vmul.f32 0.03125, %v4392_v26  ;;  %v4435_v23 = vmul.f32 %v10649_v14, %v13360_v59 }
 0xa90   : > { %v4409_v48 = vmul.f32 0.03125, %v4389_v36  ;;  %v4450_v56 = vmul.f32 %v13429_v43, %v4436_v62 }
 0xa91   : > { %v4420_v32 = vadd.f32 1e-05, %v4410_v18  ;;  %v4449_v10 = vmul.f32 %v13429_v43, %v4435_v23  ;;  %v16488_v18 = vld [vmem:[#allocation68_spill] sm:$0xff] }
 0xa92   : > { %v4419_v50 = vadd.f32 1e-05, %v4409_v48 }
 0xa93   : > { %v10533_v12 = vpop.permute.xlu0 %10532 }
 0xa94   : > { %v10535_v29 = vunpack.i.h.bf16 %v10533_v12  ;;  %v10534_v20 = vunpack.i.l.bf16 %v10533_v12  ;;  %10654 = vrsqrt.f32 %v4419_v50  ;;  %v4476_v50 = vrot.slane %v13298_v54, %v16488_v18 }
 0xa95   : > { %10656 = vrsqrt.f32 %v4420_v32 }
 0xa96   : > { %v4398_v1 = vpop.xlane.xlu1 %4397  ;;  %v4500_v38 = vsel %vm1778_vm4, %v10534_v20, %v10535_v29  ;;  %v10651_v24 = vpop.eup %10650 }
 0xa97   : > { %v4412_v2 = vmul.f32 0.03125, %v4398_v1  ;;  %v4437_v28 = vmul.f32 %v10651_v24, %v13372_v0  ;;  %v10653_v53 = vpop.eup %10652 }
 0xa98   : > { %v4438_v9 = vmul.f32 %v10653_v53, %v13369_v57 }
 0xa99   : > { %v4422_v30 = vadd.f32 1e-05, %v4412_v2  ;;  %v4451_v52 = vmul.f32 %v13429_v43, %v4437_v28  ;;  %v16489_v28 = vld [vmem:[#allocation18_spill] sm:$0xff] }
 0xa9a   : > { %v10528_v13 = vpop.permute.xlu1 %10527  ;;  %v4452_v57 = vmul.f32 %v13429_v43, %v4438_v9 }
 0xa9b   : > { %v10530_v55 = vunpack.i.h.bf16 %v10528_v13  ;;  %v10529_v37 = vunpack.i.l.bf16 %v10528_v13  ;;  %10658 = vrsqrt.f32 %v4422_v30 }
 0xa9d   : > { %v4499_v51 = vsel %vm1778_vm4, %v10529_v37, %v10530_v55 }
 0xa9e   : > { %v10408_v40 = vpack.c.bf16 %v4500_v38, %v4499_v51  ;;  %v10655_v4 = vpop.eup %10654 }
 0xa9f   : > { %v10657_v59 = vpop.eup %10656  ;;  %v4439_v11 = vmul.f32 %v10655_v4, %v13384_v33 }
 0xaa0   : > { %10409 = vmatprep.subr.bf16.mxu0 %v10408_v40  ;;  %v4440_v12 = vmul.f32 %v10657_v59, %v13381_v6 }
 0xaa1   : > { %10411 = vmatpush3.bf16.msra.mxu0 %v10408_v40  ;;  %v4453_v33 = vmul.f32 %v13429_v43, %v4439_v11 }
 0xaa2   : > { %v4454_v55 = vmul.f32 %v13429_v43, %v4440_v12 }
 0xaa5   : > { %v10659_v1 = vpop.eup %10658 }
 0xaa6   : > { %v4442_v6 = vmul.f32 %v10659_v1, %v13392_v27 }
 0xaa8   : > { %v4456_v3 = vmul.f32 %v13429_v43, %v4442_v6 }
 0xac4   : > { %v4395_v17 = vpop.xlane.xlu0 %4394 }
 0xac5   : > { %v4411_v8 = vmul.f32 0.03125, %v4395_v17 }
 0xac7   : > { %v4421_v49 = vadd.f32 1e-05, %v4411_v8 }
 0xac8   : > { %v4404_v44 = vpop.xlane.xlu0 %4403 }
 0xac9   : > { %10660 = vrsqrt.f32 %v4421_v49  ;;  %v4414_v35 = vmul.f32 0.03125, %v4404_v44 }
 0xacb   : > { %v4424_v41 = vadd.f32 1e-05, %v4414_v35  ;;  %v4401_v16 = vpop.xlane.xlu1 %4400 }
 0xacc   : > { %v4413_v61 = vmul.f32 0.03125, %v4401_v16  ;;  %v4461_v58 = vpop.permute.xlu0 %4460 }
 0xacd   : > { %10662 = vrsqrt.f32 %v4424_v41  ;;  %v13460_v34 = vadd.f32 %v4461_v58, %v4449_v10  ;;  %v13462_v0 = vadd.f32 %v4461_v58, %v4450_v56  ;;  %v13467_v26 = vadd.f32 %v4461_v58, %v4451_v52  ;;  %v16490_v56 = vld [vmem:[#allocation19_spill] sm:$0xff] }
 0xace   : > { %v4423_v36 = vadd.f32 1e-05, %v4413_v61  ;;  %v13476_v29 = vadd.f32 %v4461_v58, %v4452_v57  ;;  %v13478_v13 = vadd.f32 %v4461_v58, %v4453_v33  ;;  %v13487_v51 = vadd.f32 %v4461_v58, %v4454_v55  ;;  %v16491_v55 = vld [vmem:[#allocation3_spill] sm:$0xff] }
 0xacf   : > { %10047 = vmatprep.mubr.msk.f32.mxu0 %vm635_vm0, %v13460_v34  ;;  %v13498_v27 = vadd.f32 %v4461_v58, %v4456_v3 }
 0xad0   : > { %10664 = vrsqrt.f32 %v4423_v36  ;;  %10048 = vmatmul.mubr.msk.f32.vlgmr.msra.gmra.mrb[156].mxu0 %vm635_vm0, %v13462_v0 }
 0xad1   : > { %10050 = vmatprep.mubr.msk.f32.mxu0 %vm635_vm0, %v13467_v26 }
 0xad3   : > { %v10661_v20 = vpop.eup %10660 }
 0xad4   : > { %10051 = vmatmul.mubr.msk.f32.gmra.mrb[158].mxu0 %vm635_vm0, %v13476_v29  ;;  %v4441_v37 = vmul.f32 %v10661_v20, %v13410_v21 }
 0xad5   : > { %10053 = vmatprep.mubr.msk.f32.mxu0 %vm635_vm0, %v13478_v13 }
 0xad6   : > { %v4455_v38 = vmul.f32 %v13429_v43, %v4441_v37  ;;  %v16204_v37 = vsub.s32 5, %v16491_v55 }
 0xad7   : > { %v10663_v40 = vpop.eup %10662 }
 0xad8   : > { %10054 = vmatmul.mubr.msk.f32.gmra.mrb[160].mxu0 %vm635_vm0, %v13487_v51  ;;  %v13492_v31 = vadd.f32 %v4461_v58, %v4455_v38  ;;  %v4444_v15 = vmul.f32 %v10663_v40, %v13413_v25  ;;  %v795_v25 = vld [vmem:[%s16106_s5 + $0x30] sm:$0xff]  ;;  %v4663_v6 = vrot.slane %v13298_v54, %v16204_v37 }
 0xada   : > { %v10665_v21 = vpop.eup %10664  ;;  %10056 = vmatprep.mubr.msk.f32.mxu0 %vm635_vm0, %v13492_v31  ;;  %v4458_v47 = vmul.f32 %v13429_v43, %v4444_v15 }
 0xadb   : > { %v4443_v5 = vmul.f32 %v10665_v21, %v13418_v19  ;;  %v796_v19 = vld [vmem:[%s16106_s5 + $0x38] sm:$0xff] }
 0xadc   : > { %10057 = vmatmul.mubr.msk.f32.gmra.mrb[162].mxu0 %vm635_vm0, %v13498_v27  ;;  %v13507_v48 = vadd.f32 %v4461_v58, %v4458_v47  ;;  %v10424_v42 = vpack.c.bf16 %v796_v19, %v795_v25 }
 0xadd   : > { %v4457_v22 = vmul.f32 %v13429_v43, %v4443_v5  ;;  %v16487_v43 = vld [vmem:[#allocation17_spill] sm:$0xff] }
 0xade   : > { %10425 = vmatprep.subr.bf16.mxu1 %v10424_v42 }
 0xadf   : > { %v13505_v46 = vadd.f32 %v4461_v58, %v4457_v22  ;;  %10427 = vmatpush3.bf16.msra.mxu1 %v10424_v42 }
 0xae0   : > { %10437 = vmatprep.subr.bf16.mxu1 %v16487_v43 }
 0xae1   : > { %10059 = vmatprep.mubr.msk.f32.mxu0 %vm635_vm0, %v13505_v46 }
 0xae2   : > { %10060 = vmatmul.mubr.msk.f32.gmra.mrb[164].mxu0 %vm635_vm0, %v13507_v48 }
 0xba3   : > { %v10049_v32 = vpop.f32.mrb[156].mxu0 }
 0xba4   : > { %v4607_v2 = vadd.f32 %v10049_v32, %v4476_v50  ;;  %v4601_v7 = vpop.f32.mrb[157].mxu0 }
 0xba5   : > { %v4602_v30 = vadd.f32 %v4601_v7, %v4476_v50 }
 0xba6   : > { %v4651_v24 = vmax.f32 %v4607_v2, 0.0 }
 0xba7   : > { %v4650_v14 = vmax.f32 %v4602_v30, 0.0  ;;  %v10052_v17 = vpop.f32.mrb[158].mxu0 }
 0xba8   : > { %v4617_v8 = vadd.f32 %v10052_v17, %v4476_v50  ;;  %v4611_v62 = vpop.f32.mrb[159].mxu0 }
 0xba9   : > { %v4612_v49 = vadd.f32 %v4611_v62, %v4476_v50  ;;  %10078 = vmatprep.mubr.msk.f32.mxu1 %vm4664_vm7, %v4650_v14 }
 0xbaa   : > { %10079 = vmatmul.mubr.msk.f32.vlgmr.msra.gmra.mrb[164].mxu1 %vm4664_vm7, %v4651_v24  ;;  %v4653_v53 = vmax.f32 %v4617_v8, 0.0 }
 0xbab   : > { %v4652_v23 = vmax.f32 %v4612_v49, 0.0  ;;  %v10055_v44 = vpop.f32.mrb[160].mxu0  ;;  %10439 = vmatpush1.bf16.msra.mxu1 %v16489_v28 }
 0xbac   : > { %v4627_v35 = vadd.f32 %v10055_v44, %v4476_v50  ;;  %v4621_v4 = vpop.f32.mrb[161].mxu0  ;;  %10445 = vmatprep.subr.bf16.mxu1 %v16490_v56 }
 0xbad   : > { %v4622_v41 = vadd.f32 %v4621_v4, %v4476_v50  ;;  %10081 = vmatprep.mubr.msk.f32.mxu1 %vm4664_vm7, %v4652_v23 }
 0xbae   : > { %10082 = vmatmul.mubr.msk.f32.gmra.mrb[166].mxu1 %vm4664_vm7, %v4653_v53  ;;  %v4655_v61 = vmax.f32 %v4627_v35, 0.0 }
 0xbaf   : > { %v4654_v16 = vmax.f32 %v4622_v41, 0.0  ;;  %v10058_v10 = vpop.f32.mrb[162].mxu0 }
 0xbb0   : > { %v4637_v58 = vadd.f32 %v10058_v10, %v4476_v50  ;;  %v4631_v52 = vpop.f32.mrb[163].mxu0 }
 0xbb1   : > { %v4632_v9 = vadd.f32 %v4631_v52, %v4476_v50  ;;  %10084 = vmatprep.mubr.msk.f32.mxu1 %vm4664_vm7, %v4654_v16 }
 0xbb2   : > { %10085 = vmatmul.mubr.msk.f32.gmra.mrb[168].mxu1 %vm4664_vm7, %v4655_v61  ;;  %v4657_v11 = vmax.f32 %v4637_v58, 0.0 }
 0xbb3   : > { %v4656_v59 = vmax.f32 %v4632_v9, 0.0 }
 0xbb5   : > { %v10061_v36 = vpop.f32.mrb[164].mxu0  ;;  %10087 = vmatprep.mubr.msk.f32.mxu1 %vm4664_vm7, %v4656_v59 }
 0xbb6   : > { %v4647_v57 = vadd.f32 %v10061_v36, %v4476_v50  ;;  %v4641_v12 = vpop.f32.mrb[165].mxu0  ;;  %10088 = vmatmul.mubr.msk.f32.gmra.mrb[170].mxu1 %vm4664_vm7, %v4657_v11 }
 0xbb7   : > { %v4642_v1 = vadd.f32 %v4641_v12, %v4476_v50 }
 0xbb8   : > { %v4659_v20 = vmax.f32 %v4647_v57, 0.0 }
 0xbb9   : > { %v4658_v33 = vmax.f32 %v4642_v1, 0.0 }
 0xbbb   : > { %10090 = vmatprep.mubr.msk.f32.mxu1 %vm4664_vm7, %v4658_v33 }
 0xbbc   : > { %10091 = vmatmul.mubr.msk.f32.gmra.mrb[172].mxu1 %vm4664_vm7, %v4659_v20 }
 0xbbd   : > { %6089 = vmatprep.mubr.f32.mxu1 %v16456_v63 }
 0xc7d   : > { %v10080_v38 = vpop.f32.mrb[164].mxu1 }
 0xc7e   : > { %v4767_v40 = vadd.f32 %v10080_v38, %v4663_v6  ;;  %v4761_v3 = vpop.f32.mrb[165].mxu1 }
 0xc7f   : > { %v4762_v15 = vadd.f32 %v4761_v3, %v4663_v6 }
 0xc80   : > { %v4811_v25 = vadd.f32 %v4767_v40, %v13462_v0 }
 0xc81   : > { %v4810_v21 = vadd.f32 %v4762_v15, %v13460_v34  ;;  %v10083_v5 = vpop.f32.mrb[166].mxu1 }
 0xc82   : > { %v4777_v47 = vadd.f32 %v10083_v5, %v4663_v6  ;;  %v4771_v22 = vpop.f32.mrb[167].mxu1  ;;  %v4823_v30 = vsel %vm635_vm0, %v4811_v25, 0.0 }
 0xc83   : > { %v4772_v19 = vadd.f32 %v4771_v22, %v4663_v6  ;;  %v4820_v42 = vsel %vm635_vm0, %v4810_v21, 0.0 }
 0xc84   : > { %4821 = vadd.xlane.f32.xlu1 %v4820_v42  ;;  %v4813_v24 = vadd.f32 %v4777_v47, %v13476_v29 }
 0xc85   : > { %v10086_v43 = vpop.f32.mrb[168].mxu1  ;;  %v4812_v2 = vadd.f32 %v4772_v19, %v13467_v26 }
 0xc86   : > { %v4787_v50 = vadd.f32 %v10086_v43, %v4663_v6  ;;  %v4781_v32 = vpop.f32.mrb[169].mxu1  ;;  %v4829_v44 = vsel %vm635_vm0, %v4813_v24, 0.0 }
 0xc87   : > { %v4782_v7 = vadd.f32 %v4781_v32, %v4663_v6  ;;  %v4826_v0 = vsel %vm635_vm0, %v4812_v2, 0.0 }
 0xc88   : > { %4824 = vadd.xlane.f32.xlu1 %v4823_v30  ;;  %v4815_v29 = vadd.f32 %v4787_v50, %v13487_v51 }
 0xc89   : > { %v10089_v14 = vpop.f32.mrb[170].mxu1  ;;  %v4814_v49 = vadd.f32 %v4782_v7, %v13478_v13 }
 0xc8a   : > { %v4797_v34 = vadd.f32 %v10089_v14, %v4663_v6  ;;  %v4791_v17 = vpop.f32.mrb[171].mxu1 }
 0xc8b   : > { %v4792_v8 = vadd.f32 %v4791_v17, %v4663_v6  ;;  %v4832_v4 = vsel %vm635_vm0, %v4814_v49, 0.0 }
 0xc8c   : > { %4827 = vadd.xlane.f32.xlu1 %v4826_v0  ;;  %v4817_v41 = vadd.f32 %v4797_v34, %v13498_v27 }
 0xc8d   : > { %v4816_v62 = vadd.f32 %v4792_v8, %v13492_v31  ;;  %v4835_v31 = vsel %vm635_vm0, %v4815_v29, 0.0 }
 0xc8e   : > { %v4841_v16 = vsel %vm635_vm0, %v4817_v41, 0.0 }
 0xc8f   : > { %v10092_v23 = vpop.f32.mrb[172].mxu1  ;;  %v4838_v26 = vsel %vm635_vm0, %v4816_v62, 0.0 }
 0xc90   : > { %v4807_v28 = vadd.f32 %v10092_v23, %v4663_v6  ;;  %v4801_v53 = vpop.f32.mrb[173].mxu1  ;;  %4839 = vadd.xlane.f32.xlu0 %v4838_v26  ;;  %4830 = vadd.xlane.f32.xlu1 %v4829_v44 }
 0xc91   : > { %v4802_v35 = vadd.f32 %v4801_v53, %v4663_v6 }
 0xc92   : > { %v4819_v10 = vadd.f32 %v4807_v28, %v13507_v48 }
 0xc93   : > { %v4818_v13 = vadd.f32 %v4802_v35, %v13505_v46 }
 0xc94   : > { %4833 = vadd.xlane.f32.xlu1 %v4832_v4  ;;  %v4847_v51 = vsel %vm635_vm0, %v4819_v10, 0.0 }
 0xc95   : > { %v4844_v61 = vsel %vm635_vm0, %v4818_v13, 0.0 }
 0xc98   : > { %4836 = vadd.xlane.f32.xlu1 %v4835_v31 }
 0xc9c   : > { %4842 = vadd.xlane.f32.xlu1 %v4841_v16  ;;  %v9110_v16 = vld [vmem:[%s16104_s3 + $0x50] sm:$0xff] }
 0xca0   : > { %4845 = vadd.xlane.f32.xlu1 %v4844_v61 }
 0xca4   : > { %4848 = vadd.xlane.f32.xlu1 %v4847_v51  ;;  %v9112_v51 = vld [vmem:[%s16104_s3 + $0x60] sm:$0xff] }
 0xd11   : > { %v4822_v58 = vpop.xlane.xlu1 %4821 }
 0xd12   : > { %v4850_v52 = vmul.f32 0.03125, %v4822_v58  ;;  %v9114_v58 = vld [vmem:[%s16104_s3 + $0x70] sm:$0xff] }
 0xd14   : > { %v13559_v9 = vsub.f32 %v4810_v21, %v4850_v52  ;;  %v10432_v52 = vpack.c.bf16 %v9114_v58, %v9112_v51 }
 0xd15   : > { %v4825_v27 = vpop.xlane.xlu1 %4824 }
 0xd16   : > { %v4851_v59 = vmul.f32 0.03125, %v4825_v27  ;;  %v4870_v46 = vmul.f32 %v13559_v9, %v13559_v9 }
 0xd18   : > { %v13563_v11 = vsub.f32 %v4811_v25, %v4851_v59  ;;  %v4880_v36 = vsel %vm635_vm0, %v4870_v46, 0.0  ;;  %v13630_v59 = vld [vmem:[%s16107_s6 + $0x8] sm:$0xff] }
 0xd19   : > { %4881 = vadd.xlane.f32.xlu1 %v4880_v36  ;;  %v4828_v48 = vpop.xlane.xlu1 %4827  ;;  %v16492_v46 = vld [vmem:[#allocation7_spill] sm:$0xff]  ;;  %v16493_v36 = vld [vmem:[#allocation5_spill] sm:$0xff] }
 0xd1a   : > { %v4852_v57 = vmul.f32 0.03125, %v4828_v48  ;;  %v4871_v12 = vmul.f32 %v13563_v11, %v13563_v11  ;;  %v5200_v48 = vrot.slane %v13630_v59, %v16493_v36 }
 0xd1c   : > { %v13568_v1 = vsub.f32 %v4812_v2, %v4852_v57  ;;  %v4883_v33 = vsel %vm635_vm0, %v4871_v12, 0.0  ;;  %v16494_v57 = vld [vmem:[#allocation2_spill] sm:$0xff] }
 0xd1d   : > { %v4840_v20 = vpop.xlane.xlu0 %4839  ;;  %4884 = vadd.xlane.f32.xlu1 %v4883_v33  ;;  %v4831_v6 = vpop.xlane.xlu1 %4830  ;;  %v16496_v12 = vld [vmem:[#allocation6_spill] sm:$0xff]  ;;  %v16497_v33 = vld [vmem:[#allocation16_spill] sm:$0xff] }
 0xd1e   : > { %v4853_v38 = vmul.f32 0.03125, %v4831_v6  ;;  %v4872_v40 = vmul.f32 %v13568_v1, %v13568_v1  ;;  %v4856_v3 = vmul.f32 0.03125, %v4840_v20  ;;  %v16498_v20 = vld [vmem:[#allocation11_spill] sm:$0xff]  ;;  %v16499_v6 = vld [vmem:[#allocation10_spill] sm:$0xff] }
 0xd20   : > { %v13573_v15 = vsub.f32 %v4813_v24, %v4853_v38  ;;  %v4886_v21 = vsel %vm635_vm0, %v4872_v40, 0.0  ;;  %v13578_v25 = vsub.f32 %v4816_v62, %v4856_v3  ;;  %v16500_v38 = vld [vmem:[#allocation15_spill] sm:$0xff]  ;;  %v16501_v40 = vld [vmem:[#allocation14_spill] sm:$0xff]  ;;  %v16502_v3 = vld [vmem:[#allocation8_spill] sm:$0xff] }
 0xd21   : > { %4887 = vadd.xlane.f32.xlu1 %v4886_v21  ;;  %v4834_v5 = vpop.xlane.xlu1 %4833  ;;  %v16503_v21 = vld [vmem:[#allocation13_spill] sm:$0xff] }
 0xd22   : > { %v4854_v47 = vmul.f32 0.03125, %v4834_v5  ;;  %v4873_v22 = vmul.f32 %v13573_v15, %v13573_v15  ;;  %v4876_v30 = vmul.f32 %v13578_v25, %v13578_v25 }
 0xd24   : > { %v13580_v19 = vsub.f32 %v4814_v49, %v4854_v47  ;;  %v4889_v42 = vsel %vm635_vm0, %v4873_v22, 0.0  ;;  %v4898_v8 = vsel %vm635_vm0, %v4876_v30, 0.0 }
 0xd25   : > { %4890 = vadd.xlane.f32.xlu1 %v4889_v42  ;;  %v4837_v43 = vpop.xlane.xlu1 %4836 }
 0xd26   : > { %v4855_v50 = vmul.f32 0.03125, %v4837_v43  ;;  %v4874_v32 = vmul.f32 %v13580_v19, %v13580_v19 }
 0xd28   : > { %v13585_v2 = vsub.f32 %v4815_v29, %v4855_v50  ;;  %v4892_v7 = vsel %vm635_vm0, %v4874_v32, 0.0 }
 0xd29   : > { %4893 = vadd.xlane.f32.xlu0 %v4892_v7  ;;  %v4843_v14 = vpop.xlane.xlu1 %4842 }
 0xd2a   : > { %v4857_v34 = vmul.f32 0.03125, %v4843_v14  ;;  %v4875_v17 = vmul.f32 %v13585_v2, %v13585_v2 }
 0xd2c   : > { %v13592_v24 = vsub.f32 %v4817_v41, %v4857_v34  ;;  %v4895_v0 = vsel %vm635_vm0, %v4875_v17, 0.0 }
 0xd2d   : > { %4899 = vadd.xlane.f32.xlu0 %v4898_v8  ;;  %4896 = vadd.xlane.f32.xlu1 %v4895_v0  ;;  %v4846_v62 = vpop.xlane.xlu1 %4845 }
 0xd2e   : > { %v4858_v49 = vmul.f32 0.03125, %v4846_v62  ;;  %v4877_v23 = vmul.f32 %v13592_v24, %v13592_v24 }
 0xd30   : > { %v13598_v26 = vsub.f32 %v4818_v13, %v4858_v49  ;;  %v4901_v44 = vsel %vm635_vm0, %v4877_v23, 0.0  ;;  %v9108_v13 = vld [vmem:[%s16104_s3 + $0x40] sm:$0xff] }
 0xd31   : > { %4902 = vadd.xlane.f32.xlu1 %v4901_v44  ;;  %v4849_v28 = vpop.xlane.xlu1 %4848  ;;  %v10428_v61 = vpack.c.bf16 %v9110_v16, %v9108_v13 }
 0xd32   : > { %v4859_v53 = vmul.f32 0.03125, %v4849_v28  ;;  %v4878_v35 = vmul.f32 %v13598_v26, %v13598_v26 }
 0xd33   : > { %10429 = vmatprep.subr.bf16.mxu0 %v10428_v61 }
 0xd34   : > { %v13603_v29 = vsub.f32 %v4819_v10, %v4859_v53  ;;  %v4904_v4 = vsel %vm635_vm0, %v4878_v35, 0.0  ;;  %v16203_v10 = vsub.s32 6, %v16491_v55  ;;  %10431 = vmatpush3.bf16.msra.mxu0 %v10428_v61 }
 0xd35   : > { %4905 = vadd.xlane.f32.xlu0 %v4904_v4  ;;  %10433 = vmatprep.subr.bf16.mxu0 %v10432_v52 }
 0xd36   : > { %v4879_v41 = vmul.f32 %v13603_v29, %v13603_v29  ;;  %v13625_v27 = vrot.slane %v13298_v54, %v16203_v10  ;;  %v16495_v54 = vld [vmem:[#allocation12_spill] sm:$0xff] }
 0xd38   : > { %v4907_v31 = vsel %vm635_vm0, %v4879_v41, 0.0  ;;  %10435 = vmatpush3.bf16.msra.mxu0 %v10432_v52 }
 0xd39   : > { %4908 = vadd.xlane.f32.xlu1 %v4907_v31  ;;  %10441 = vmatprep.subr.bf16.mxu0 %v16494_v57 }
 0xd4a   : > { %5157 = vrot.lane.b32.xlu1 %v16492_v46, %s10938_s28 }
 0xd4b   : > { %4965 = vrot.lane.b32.xlu0 %v13625_v27, %s10937_s15 }
 0xd4e   : > { %5202 = vrot.lane.b32.xlu1 %v5200_v48, %s10929_s16  ;;  %s16516_s16 = smov 64  }
 0xd4f   : > { %5161 = vrot.lane.b32.xlu0 %v16495_v54, %s10938_s28 }
 0xd52   : > { %5159 = vrot.lane.b32.xlu1 %v16496_v12, %s10938_s28 }
 0xd53   : > { %5165 = vrot.lane.b32.xlu0 %v16497_v33, %s10938_s28 }
 0xd56   : > { %5163 = vrot.lane.b32.xlu1 %v16498_v20, %s10938_s28 }
 0xd57   : > { %5169 = vrot.lane.b32.xlu0 %v16499_v6, %s10938_s28 }
 0xd5a   : > { %5167 = vrot.lane.b32.xlu1 %v16500_v38, %s10938_s28 }
 0xd5b   : > { %5173 = vrot.lane.b32.xlu0 %v16501_v40, %s10938_s28 }
 0xd5e   : > { %5171 = vrot.lane.b32.xlu1 %v16502_v3, %s10938_s28 }
 0xd62   : > { %5175 = vrot.lane.b32.xlu1 %v16503_v21, %s10938_s28 }
 0xda6   : > { %v4882_v5 = vpop.xlane.xlu1 %4881 }
 0xda7   : > { %v4910_v22 = vmul.f32 0.03125, %v4882_v5 }
 0xda9   : > { %v4920_v50 = vadd.f32 1e-05, %v4910_v22 }
 0xdaa   : > { %v4885_v47 = vpop.xlane.xlu1 %4884 }
 0xdab   : > { %v4911_v42 = vmul.f32 0.03125, %v4885_v47  ;;  %10666 = vrsqrt.f32 %v4920_v50  ;;  %v16507_v50 = vld [vmem:[#allocation4_spill] sm:$0xff] }
 0xdad   : > { %v4921_v7 = vadd.f32 1e-05, %v4911_v42 }
 0xdae   : > { %v4888_v43 = vpop.xlane.xlu1 %4887 }
 0xdaf   : > { %v4912_v32 = vmul.f32 0.03125, %v4888_v43  ;;  %10668 = vrsqrt.f32 %v4921_v7 }
 0xdb1   : > { %v4922_v30 = vadd.f32 1e-05, %v4912_v32 }
 0xdb2   : > { %v4891_v14 = vpop.xlane.xlu1 %4890 }
 0xdb3   : > { %v4913_v34 = vmul.f32 0.03125, %v4891_v14  ;;  %10670 = vrsqrt.f32 %v4922_v30 }
 0xdb5   : > { %v4923_v17 = vadd.f32 1e-05, %v4913_v34  ;;  %v10667_v53 = vpop.eup %10666 }
 0xdb6   : > { %v4894_v8 = vpop.xlane.xlu0 %4893  ;;  %v4940_v52 = vmul.f32 %v10667_v53, %v13559_v9 }
 0xdb7   : > { %10672 = vrsqrt.f32 %v4923_v17  ;;  %v4914_v0 = vmul.f32 0.03125, %v4894_v8 }
 0xdb8   : > { %v4954_v20 = vmul.f32 %v13625_v27, %v4940_v52 }
 0xdb9   : > { %v4924_v62 = vadd.f32 1e-05, %v4914_v0  ;;  %v10669_v41 = vpop.eup %10668 }
 0xdba   : > { %v4900_v49 = vpop.xlane.xlu0 %4899  ;;  %v4897_v23 = vpop.xlane.xlu1 %4896  ;;  %v4941_v51 = vmul.f32 %v10669_v41, %v13563_v11 }
 0xdbb   : > { %10674 = vrsqrt.f32 %v4924_v62  ;;  %v4916_v44 = vmul.f32 0.03125, %v4900_v49  ;;  %v4915_v28 = vmul.f32 0.03125, %v4897_v23 }
 0xdbc   : > { %v4955_v12 = vmul.f32 %v13625_v27, %v4941_v51 }
 0xdbd   : > { %v4926_v35 = vadd.f32 1e-05, %v4916_v44  ;;  %v4925_v4 = vadd.f32 1e-05, %v4915_v28  ;;  %v10671_v13 = vpop.eup %10670 }
 0xdbe   : > { %v4903_v31 = vpop.xlane.xlu1 %4902  ;;  %v4942_v36 = vmul.f32 %v10671_v13, %v13568_v1 }
 0xdbf   : > { %10676 = vrsqrt.f32 %v4926_v35  ;;  %v4917_v16 = vmul.f32 0.03125, %v4903_v31  ;;  %v16515_v31 = vld [vmem:[#allocation9_spill] sm:$0xff] }
 0xdc0   : > { %10678 = vrsqrt.f32 %v4925_v4  ;;  %v4956_v11 = vmul.f32 %v13625_v27, %v4942_v36  ;;  %v5146_v13 = vrot.slane %v13630_v59, %v16515_v31 }
 0xdc1   : > { %v10673_v61 = vpop.eup %10672  ;;  %v4927_v58 = vadd.f32 1e-05, %v4917_v16 }
 0xdc2   : > { %v4906_v46 = vpop.xlane.xlu0 %4905  ;;  %v4943_v57 = vmul.f32 %v10673_v61, %v13573_v15 }
 0xdc3   : > { %10680 = vrsqrt.f32 %v4927_v58  ;;  %v4918_v48 = vmul.f32 0.03125, %v4906_v46 }
 0xdc4   : > { %v4957_v15 = vmul.f32 %v13625_v27, %v4943_v57 }
 0xdc5   : > { %v10675_v54 = vpop.eup %10674  ;;  %v4928_v33 = vadd.f32 1e-05, %v4918_v48 }
 0xdc6   : > { %v4966_v6 = vpop.permute.xlu0 %4965  ;;  %v4909_v38 = vpop.xlane.xlu1 %4908  ;;  %v4944_v40 = vmul.f32 %v10675_v54, %v13580_v19 }
 0xdc7   : > { %10682 = vrsqrt.f32 %v4928_v33  ;;  %v4919_v9 = vmul.f32 0.03125, %v4909_v38  ;;  %v13666_v3 = vadd.f32 %v4966_v6, %v4954_v20  ;;  %v13668_v1 = vadd.f32 %v4966_v6, %v4955_v12 }
 0xdc8   : > { %v13673_v47 = vadd.f32 %v4966_v6, %v4956_v11  ;;  %v4958_v22 = vmul.f32 %v13625_v27, %v4944_v40  ;;  %v13683_v32 = vadd.f32 %v4966_v6, %v4957_v15 }
 0xdc9   : > { %16504 = vst [vmem:[#allocation23_spill] sm:$0xff] %v13666_v3  ;;  %16505 = vst [vmem:[#allocation24_spill] sm:$0xff] %v13668_v1  ;;  %v10677_v21 = vpop.eup %10676  ;;  %v4929_v5 = vadd.f32 1e-05, %v4919_v9  ;;  %10101 = vmatprep.mubr.msk.f32.mxu0 %vm635_vm0, %v13666_v3 }
 0xdca   : > { %16506 = vst [vmem:[#allocation25_spill] sm:$0xff] %v13673_v47  ;;  %v10679_v42 = vpop.eup %10678  ;;  %10102 = vmatmul.mubr.msk.f32.vlgmr.msra.gmra.mrb[166].mxu0 %vm635_vm0, %v13668_v1  ;;  %v4946_v19 = vmul.f32 %v10677_v21, %v13578_v25  ;;  %16508 = vst [vmem:[#allocation26_spill] sm:$0xff] %v13683_v32  ;;  %v13685_v30 = vadd.f32 %v4966_v6, %v4958_v22  ;;  %v5158_v35 = vpop.permute.xlu1 %5157 }
 0xdcb   : > { %10684 = vrsqrt.f32 %v4929_v5  ;;  %10104 = vmatprep.mubr.msk.f32.mxu0 %vm635_vm0, %v13673_v47  ;;  %v4945_v43 = vmul.f32 %v10679_v42, %v13585_v2  ;;  %10443 = vmatpush1.bf16.msra.mxu0 %v16507_v50  ;;  %v5162_v61 = vpop.permute.xlu0 %5161 }
 0xdcc   : > { %16509 = vst [vmem:[#allocation27_spill] sm:$0xff] %v13685_v30  ;;  %v4960_v34 = vmul.f32 %v13625_v27, %v4946_v19 }
 0xdcd   : > { %v10681_v7 = vpop.eup %10680  ;;  %v4959_v14 = vmul.f32 %v13625_v27, %v4945_v43 }
 0xdce   : > { %10105 = vmatmul.mubr.msk.f32.gmra.mrb[168].mxu0 %vm635_vm0, %v13683_v32  ;;  %v4947_v25 = vmul.f32 %v10681_v7, %v13592_v24  ;;  %v13697_v0 = vadd.f32 %v4966_v6, %v4960_v34  ;;  %v13720_v4 = vpop.permute.xlu1 %5202 }
 0xdcf   : > { %10107 = vmatprep.mubr.msk.f32.mxu0 %vm635_vm0, %v13685_v30  ;;  %v13694_v2 = vadd.f32 %v4966_v6, %v4959_v14  ;;  %v5166_v11 = vpop.permute.xlu0 %5165 }
 0xdd0   : > { %v4961_v17 = vmul.f32 %v13625_v27, %v4947_v25  ;;  %16511 = vst [vmem:[#allocation29_spill] sm:$0xff] %v13697_v0 }
 0xdd1   : > { %16510 = vst [vmem:[#allocation28_spill] sm:$0xff] %v13694_v2  ;;  %v10683_v8 = vpop.eup %10682 }
 0xdd2   : > { %10108 = vmatmul.mubr.msk.f32.gmra.mrb[170].mxu0 %vm635_vm0, %v13694_v2  ;;  %v4948_v62 = vmul.f32 %v10683_v8, %v13598_v26  ;;  %v13704_v49 = vadd.f32 %v4966_v6, %v4961_v17  ;;  %v5160_v41 = vpop.permute.xlu1 %5159 }
 0xdd3   : > { %10110 = vmatprep.mubr.msk.f32.mxu0 %vm635_vm0, %v13697_v0  ;;  %v5170_v17 = vpop.permute.xlu0 %5169 }
 0xdd4   : > { %16512 = vst [vmem:[#allocation32_spill] sm:$0xff] %v13704_v49  ;;  %v4962_v24 = vmul.f32 %v13625_v27, %v4948_v62 }
 0xdd5   : > { %v10685_v23 = vpop.eup %10684 }
 0xdd6   : > { %10111 = vmatmul.mubr.msk.f32.gmra.mrb[172].mxu0 %vm635_vm0, %v13704_v49  ;;  %v13709_v44 = vadd.f32 %v4966_v6, %v4962_v24  ;;  %v4949_v28 = vmul.f32 %v10685_v23, %v13603_v29  ;;  %v5164_v29 = vpop.permute.xlu1 %5163 }
 0xdd8   : > { %16513 = vst [vmem:[#allocation47_spill] sm:$0xff] %v13709_v44  ;;  %10113 = vmatprep.mubr.msk.f32.mxu0 %vm635_vm0, %v13709_v44  ;;  %v4963_v26 = vmul.f32 %v13625_v27, %v4949_v28 }
 0xdda   : > { %v13715_v53 = vadd.f32 %v4966_v6, %v4963_v26  ;;  %v5168_v20 = vpop.permute.xlu1 %5167 }
 0xddc   : > { %16514 = vst [vmem:[#allocation40_spill] sm:$0xff] %v13715_v53  ;;  %10114 = vmatmul.mubr.msk.f32.gmra.mrb[174].mxu0 %vm635_vm0, %v13715_v53 }
 0xddd   : > { %6334 = vmatprep.mubr.f32.mxu0 %v16456_v63 }
 0xdde   : > { %v5172_v7 = vpop.permute.xlu1 %5171 }
 0xde2   : > { %v5176_v31 = vpop.permute.xlu1 %5175 }
 0xe9d   : > { %v10103_v16 = vpop.f32.mrb[166].mxu0 }
 0xe9e   : > { %v5148_v51 = vadd.f32 %v10103_v16, %v5146_v13  ;;  %v5188_v58 = vadd.f32 %v10103_v16, %v5160_v41  ;;  %v5094_v27 = vpop.f32.mrb[167].mxu0  ;;  %v5174_v16 = vpop.permute.xlu0 %5173 }
 0xe9f   : > { %v5147_v52 = vadd.f32 %v5146_v13, %v5094_v27  ;;  %v5187_v46 = vadd.f32 %v5158_v35, %v5094_v27 }
 0xea0   : > { %v13725_v36 = vadd.f32 %v13720_v4, %v5188_v58 }
 0xea1   : > { %v13728_v48 = vadd.f32 %v13720_v4, %v5187_v46  ;;  %v13730_v57 = vpack.c.bf16 %v5148_v51, %v5147_v52  ;;  %v10106_v54 = vpop.f32.mrb[168].mxu0 }
 0xea2   : > { %v5150_v12 = vadd.f32 %v10106_v54, %v5146_v13  ;;  %v5190_v33 = vadd.f32 %v10106_v54, %v5164_v29  ;;  %v5104_v59 = vpop.f32.mrb[169].mxu0  ;;  %5227 = vrot.lane.b32.xlu1 %v13725_v36, %s10930_s19 }
 0xea3   : > { %v5149_v6 = vadd.f32 %v5146_v13, %v5104_v59  ;;  %v5189_v38 = vadd.f32 %v5162_v61, %v5104_v59  ;;  %10165 = vmatprep.subr.bf16.mxu0 %v13730_v57  ;;  %5225 = vrot.lane.b32.xlu0 %v13728_v48, %s10930_s19 }
 0xea4   : > { %v13738_v40 = vadd.f32 %v13720_v4, %v5190_v33 }
 0xea5   : > { %v13741_v9 = vadd.f32 %v13720_v4, %v5189_v38  ;;  %v13743_v15 = vpack.c.bf16 %v5150_v12, %v5149_v6  ;;  %v10109_v21 = vpop.f32.mrb[170].mxu0 }
 0xea6   : > { %v5152_v5 = vadd.f32 %v10109_v21, %v5146_v13  ;;  %v5192_v22 = vadd.f32 %v10109_v21, %v5168_v20  ;;  %v5114_v42 = vpop.f32.mrb[171].mxu0  ;;  %5231 = vrot.lane.b32.xlu1 %v13738_v40, %s10930_s19 }
 0xea7   : > { %v5151_v19 = vadd.f32 %v5146_v13, %v5114_v42  ;;  %v5191_v43 = vadd.f32 %v5166_v11, %v5114_v42  ;;  %5229 = vrot.lane.b32.xlu0 %v13741_v9, %s10930_s19 }
 0xea8   : > { %v13750_v50 = vadd.f32 %v13720_v4, %v5192_v22 }
 0xea9   : > { %v13753_v14 = vadd.f32 %v13720_v4, %v5191_v43  ;;  %v13755_v34 = vpack.c.bf16 %v5152_v5, %v5151_v19  ;;  %v10112_v25 = vpop.f32.mrb[172].mxu0 }
 0xeaa   : > { %v5154_v8 = vadd.f32 %v10112_v25, %v5146_v13  ;;  %v5194_v62 = vadd.f32 %v10112_v25, %v5172_v7  ;;  %v5124_v24 = vpop.f32.mrb[173].mxu0  ;;  %5235 = vrot.lane.b32.xlu1 %v13750_v50, %s10930_s19 }
 0xeab   : > { %v5153_v23 = vadd.f32 %v5146_v13, %v5124_v24  ;;  %v5193_v28 = vadd.f32 %v5170_v17, %v5124_v24  ;;  %5233 = vrot.lane.b32.xlu0 %v13753_v14, %s10930_s19 }
 0xeac   : > { %v13762_v26 = vadd.f32 %v13720_v4, %v5194_v62 }
 0xead   : > { %v13765_v35 = vadd.f32 %v13720_v4, %v5193_v28  ;;  %v13767_v41 = vpack.c.bf16 %v5154_v8, %v5153_v23 }
 0xeae   : > { %5239 = vrot.lane.b32.xlu1 %v13762_v26, %s10930_s19 }
 0xeaf   : > { %v10115_v29 = vpop.f32.mrb[174].mxu0  ;;  %5237 = vrot.lane.b32.xlu0 %v13765_v35, %s10930_s19 }
 0xeb0   : > { %v5156_v61 = vadd.f32 %v10115_v29, %v5146_v13  ;;  %v5196_v51 = vadd.f32 %v10115_v29, %v5176_v31  ;;  %v5134_v58 = vpop.f32.mrb[175].mxu0 }
 0xeb1   : > { %v5155_v27 = vadd.f32 %v5146_v13, %v5134_v58  ;;  %v5195_v52 = vadd.f32 %v5174_v16, %v5134_v58 }
 0xeb2   : > { %v13774_v46 = vadd.f32 %v13720_v4, %v5196_v51 }
 0xeb3   : > { %v13777_v54 = vadd.f32 %v13720_v4, %v5195_v52  ;;  %v13779_v12 = vpack.c.bf16 %v5156_v61, %v5155_v27 }
 0xeb4   : > { %5243 = vrot.lane.b32.xlu1 %v13774_v46, %s10930_s19 }
 0xeb5   : > { %5241 = vrot.lane.b32.xlu0 %v13777_v54, %s10930_s19 }
 0xf14   : > { %v5228_v33 = vpop.permute.xlu1 %5227 }
 0xf15   : > { %v5256_v59 = vmax.f32 %v13725_v36, %v5228_v33  ;;  %v5226_v20 = vpop.permute.xlu0 %5225 }
 0xf16   : > { %v5255_v13 = vmax.f32 %v13728_v48, %v5226_v20 }
 0xf17   : > { %5277 = vrot.lane.b32.xlu1 %v5256_v59, %s10931_s20 }
 0xf18   : > { %5275 = vrot.lane.b32.xlu0 %v5255_v13, %s10931_s20  ;;  %v5232_v4 = vpop.permute.xlu1 %5231 }
 0xf19   : > { %v5258_v6 = vmax.f32 %v13738_v40, %v5232_v4  ;;  %v5230_v38 = vpop.permute.xlu0 %5229 }
 0xf1a   : > { %v5257_v11 = vmax.f32 %v13741_v9, %v5230_v38 }
 0xf1b   : > { %5281 = vrot.lane.b32.xlu1 %v5258_v6, %s10931_s20 }
 0xf1c   : > { %5279 = vrot.lane.b32.xlu0 %v5257_v11, %s10931_s20  ;;  %v5236_v21 = vpop.permute.xlu1 %5235 }
 0xf1d   : > { %v5260_v5 = vmax.f32 %v13750_v50, %v5236_v21  ;;  %v5234_v22 = vpop.permute.xlu0 %5233 }
 0xf1e   : > { %v5259_v42 = vmax.f32 %v13753_v14, %v5234_v22 }
 0xf1f   : > { %5285 = vrot.lane.b32.xlu1 %v5260_v5, %s10931_s20 }
 0xf20   : > { %5283 = vrot.lane.b32.xlu0 %v5259_v42, %s10931_s20  ;;  %v5240_v19 = vpop.permute.xlu1 %5239 }
 0xf21   : > { %v5262_v43 = vmax.f32 %v13762_v26, %v5240_v19  ;;  %v5238_v7 = vpop.permute.xlu0 %5237 }
 0xf22   : > { %v5261_v25 = vmax.f32 %v13765_v35, %v5238_v7 }
 0xf23   : > { %5289 = vrot.lane.b32.xlu1 %v5262_v43, %s10931_s20 }
 0xf24   : > { %5287 = vrot.lane.b32.xlu0 %v5261_v25, %s10931_s20 }
 0xf26   : > { %v5244_v17 = vpop.permute.xlu1 %5243 }
 0xf27   : > { %v5264_v8 = vmax.f32 %v13774_v46, %v5244_v17  ;;  %v5242_v62 = vpop.permute.xlu0 %5241 }
 0xf28   : > { %v5263_v24 = vmax.f32 %v13777_v54, %v5242_v62 }
 0xf29   : > { %5293 = vrot.lane.b32.xlu1 %v5264_v8, %s10931_s20 }
 0xf2a   : > { %5291 = vrot.lane.b32.xlu0 %v5263_v24, %s10931_s20 }
 0xf89   : > { %v5278_v23 = vpop.permute.xlu1 %5277 }
 0xf8a   : > { %v5306_v28 = vmax.f32 %v5256_v59, %v5278_v23  ;;  %v5276_v31 = vpop.permute.xlu0 %5275 }
 0xf8b   : > { %v5305_v29 = vmax.f32 %v5255_v13, %v5276_v31 }
 0xf8c   : > { %5357 = vrot.lane.b32.xlu1 %v5306_v28, %s10932_s21  ;;  %5327 = vrot.lane.b32.xlu0 %v5306_v28, %s16516_s16 }
 0xf8d   : > { %v5282_v16 = vpop.permute.xlu1 %5281 }
 0xf8e   : > { %v5308_v61 = vmax.f32 %v5258_v6, %v5282_v16  ;;  %v5280_v51 = vpop.permute.xlu0 %5279 }
 0xf8f   : > { %v5307_v58 = vmax.f32 %v5257_v11, %v5280_v51 }
 0xf90   : > { %5417 = vrot.lane.b32.xlu1 %v5306_v28, %s16517_s23  ;;  %5387 = vrot.lane.b32.xlu0 %v5306_v28, %s16518_s29 }
 0xf91   : > { %v5286_v27 = vpop.permute.xlu1 %5285 }
 0xf92   : > { %v5310_v52 = vmax.f32 %v5260_v5, %v5286_v27  ;;  %v5284_v33 = vpop.permute.xlu0 %5283 }
 0xf93   : > { %v5309_v59 = vmax.f32 %v5259_v42, %v5284_v33 }
 0xf94   : > { %5355 = vrot.lane.b32.xlu1 %v5305_v29, %s10932_s21  ;;  %5325 = vrot.lane.b32.xlu0 %v5305_v29, %s16516_s16 }
 0xf95   : > { %v5290_v20 = vpop.permute.xlu1 %5289 }
 0xf96   : > { %v5312_v13 = vmax.f32 %v5262_v43, %v5290_v20  ;;  %v5288_v4 = vpop.permute.xlu0 %5287 }
 0xf97   : > { %v5311_v6 = vmax.f32 %v5261_v25, %v5288_v4 }
 0xf98   : > { %5415 = vrot.lane.b32.xlu1 %v5305_v29, %s16517_s23  ;;  %5385 = vrot.lane.b32.xlu0 %v5305_v29, %s16518_s29 }
 0xf9b   : > { %v5294_v38 = vpop.permute.xlu1 %5293 }
 0xf9c   : > { %5361 = vrot.lane.b32.xlu1 %v5308_v61, %s10932_s21  ;;  %5331 = vrot.lane.b32.xlu0 %v5308_v61, %s16516_s16  ;;  %v5314_v11 = vmax.f32 %v5264_v8, %v5294_v38  ;;  %v5292_v21 = vpop.permute.xlu0 %5291 }
 0xf9d   : > { %v5313_v5 = vmax.f32 %v5263_v24, %v5292_v21 }
 0xfa0   : > { %5421 = vrot.lane.b32.xlu1 %v5308_v61, %s16517_s23  ;;  %5391 = vrot.lane.b32.xlu0 %v5308_v61, %s16518_s29 }
 0xfa4   : > { %5359 = vrot.lane.b32.xlu1 %v5307_v58, %s10932_s21  ;;  %5329 = vrot.lane.b32.xlu0 %v5307_v58, %s16516_s16 }
 0xfa8   : > { %5419 = vrot.lane.b32.xlu1 %v5307_v58, %s16517_s23  ;;  %5389 = vrot.lane.b32.xlu0 %v5307_v58, %s16518_s29 }
 0xfac   : > { %5365 = vrot.lane.b32.xlu1 %v5310_v52, %s10932_s21  ;;  %5335 = vrot.lane.b32.xlu0 %v5310_v52, %s16516_s16 }
 0xfb0   : > { %5425 = vrot.lane.b32.xlu1 %v5310_v52, %s16517_s23  ;;  %5395 = vrot.lane.b32.xlu0 %v5310_v52, %s16518_s29 }
 0xfb4   : > { %5363 = vrot.lane.b32.xlu1 %v5309_v59, %s10932_s21  ;;  %5333 = vrot.lane.b32.xlu0 %v5309_v59, %s16516_s16 }
 0xfb8   : > { %5423 = vrot.lane.b32.xlu1 %v5309_v59, %s16517_s23  ;;  %5393 = vrot.lane.b32.xlu0 %v5309_v59, %s16518_s29 }
 0xfbc   : > { %5369 = vrot.lane.b32.xlu1 %v5312_v13, %s10932_s21  ;;  %5339 = vrot.lane.b32.xlu0 %v5312_v13, %s16516_s16 }
 0xfc0   : > { %5429 = vrot.lane.b32.xlu1 %v5312_v13, %s16517_s23  ;;  %5399 = vrot.lane.b32.xlu0 %v5312_v13, %s16518_s29 }
 0xfc4   : > { %5367 = vrot.lane.b32.xlu1 %v5311_v6, %s10932_s21  ;;  %5337 = vrot.lane.b32.xlu0 %v5311_v6, %s16516_s16 }
 0xfc8   : > { %5427 = vrot.lane.b32.xlu1 %v5311_v6, %s16517_s23  ;;  %5397 = vrot.lane.b32.xlu0 %v5311_v6, %s16518_s29 }
 0xfcc   : > { %5373 = vrot.lane.b32.xlu1 %v5314_v11, %s10932_s21  ;;  %5343 = vrot.lane.b32.xlu0 %v5314_v11, %s16516_s16 }
 0xfd0   : > { %5371 = vrot.lane.b32.xlu1 %v5313_v5, %s10932_s21  ;;  %5341 = vrot.lane.b32.xlu0 %v5313_v5, %s16516_s16 }
 0xfd4   : > { %5431 = vrot.lane.b32.xlu1 %v5313_v5, %s16517_s23  ;;  %5401 = vrot.lane.b32.xlu0 %v5313_v5, %s16518_s29 }
 0xfd8   : > { %5433 = vrot.lane.b32.xlu1 %v5314_v11, %s16517_s23  ;;  %5403 = vrot.lane.b32.xlu0 %v5314_v11, %s16518_s29 }
 0xffe   : > { %v5328_v22 = vpop.permute.xlu0 %5327  ;;  %v5358_v42 = vpop.permute.xlu1 %5357 }
 0xfff   : > { %v5446_v19 = vsel %vm1255_vm1, %v5328_v22, %v5358_v42 }
0x1002   : > { %v5388_v43 = vpop.permute.xlu0 %5387  ;;  %v5418_v7 = vpop.permute.xlu1 %5417 }
0x1003   : > { %v5456_v25 = vsel %vm1266_vm2, %v5446_v19, %v5388_v43 }
0x1004   : > { %v5466_v17 = vsel %vm1277_vm3, %v5456_v25, %v5418_v7 }
0x1005   : > { %5487 = vrot.lane.b32.xlu1 %v5466_v17, %s16516_s16 }
0x1006   : > { %v5326_v8 = vpop.permute.xlu0 %5325  ;;  %v5356_v62 = vpop.permute.xlu1 %5355 }
0x1007   : > { %v5445_v24 = vsel %vm1255_vm1, %v5326_v8, %v5356_v62 }
0x100a   : > { %v5386_v23 = vpop.permute.xlu0 %5385  ;;  %v5416_v28 = vpop.permute.xlu1 %5415 }
0x100b   : > { %v5455_v31 = vsel %vm1266_vm2, %v5445_v24, %v5386_v23 }
0x100c   : > { %v5465_v29 = vsel %vm1277_vm3, %v5455_v31, %v5416_v28 }
0x100d   : > { %5485 = vrot.lane.b32.xlu0 %v5465_v29, %s16516_s16 }
0x100e   : > { %v5332_v16 = vpop.permute.xlu0 %5331  ;;  %v5362_v61 = vpop.permute.xlu1 %5361 }
0x100f   : > { %v5448_v51 = vsel %vm1255_vm1, %v5332_v16, %v5362_v61 }
0x1012   : > { %v5392_v58 = vpop.permute.xlu0 %5391  ;;  %v5422_v27 = vpop.permute.xlu1 %5421 }
0x1013   : > { %v5458_v52 = vsel %vm1266_vm2, %v5448_v51, %v5392_v58 }
0x1014   : > { %v5468_v33 = vsel %vm1277_vm3, %v5458_v52, %v5422_v27 }
0x1015   : > { %5491 = vrot.lane.b32.xlu1 %v5468_v33, %s16516_s16 }
0x1016   : > { %v5330_v59 = vpop.permute.xlu0 %5329  ;;  %v5360_v20 = vpop.permute.xlu1 %5359 }
0x1017   : > { %v5447_v13 = vsel %vm1255_vm1, %v5330_v59, %v5360_v20 }
0x101a   : > { %v5390_v4 = vpop.permute.xlu0 %5389  ;;  %v5420_v6 = vpop.permute.xlu1 %5419 }
0x101b   : > { %v5457_v38 = vsel %vm1266_vm2, %v5447_v13, %v5390_v4 }
0x101c   : > { %v5467_v11 = vsel %vm1277_vm3, %v5457_v38, %v5420_v6 }
0x101d   : > { %5489 = vrot.lane.b32.xlu0 %v5467_v11, %s16516_s16 }
0x101e   : > { %v5336_v21 = vpop.permute.xlu0 %5335  ;;  %v5366_v5 = vpop.permute.xlu1 %5365 }
0x101f   : > { %v5450_v22 = vsel %vm1255_vm1, %v5336_v21, %v5366_v5 }
0x1022   : > { %v5396_v42 = vpop.permute.xlu0 %5395  ;;  %v5426_v19 = vpop.permute.xlu1 %5425 }
0x1023   : > { %v5460_v43 = vsel %vm1266_vm2, %v5450_v22, %v5396_v42 }
0x1024   : > { %v5470_v7 = vsel %vm1277_vm3, %v5460_v43, %v5426_v19 }
0x1025   : > { %5495 = vrot.lane.b32.xlu1 %v5470_v7, %s16516_s16 }
0x1026   : > { %v5334_v25 = vpop.permute.xlu0 %5333  ;;  %v5364_v17 = vpop.permute.xlu1 %5363 }
0x1027   : > { %v5449_v8 = vsel %vm1255_vm1, %v5334_v25, %v5364_v17 }
0x102a   : > { %v5394_v62 = vpop.permute.xlu0 %5393  ;;  %v5424_v24 = vpop.permute.xlu1 %5423 }
0x102b   : > { %v5459_v23 = vsel %vm1266_vm2, %v5449_v8, %v5394_v62 }
0x102c   : > { %v5469_v28 = vsel %vm1277_vm3, %v5459_v23, %v5424_v24 }
0x102d   : > { %5493 = vrot.lane.b32.xlu0 %v5469_v28, %s16516_s16 }
0x102e   : > { %v5340_v31 = vpop.permute.xlu0 %5339  ;;  %v5370_v29 = vpop.permute.xlu1 %5369 }
0x102f   : > { %v5452_v16 = vsel %vm1255_vm1, %v5340_v31, %v5370_v29 }
0x1032   : > { %v5400_v61 = vpop.permute.xlu0 %5399  ;;  %v5430_v51 = vpop.permute.xlu1 %5429 }
0x1033   : > { %v5462_v58 = vsel %vm1266_vm2, %v5452_v16, %v5400_v61 }
0x1034   : > { %v5472_v27 = vsel %vm1277_vm3, %v5462_v58, %v5430_v51 }
0x1035   : > { %5499 = vrot.lane.b32.xlu1 %v5472_v27, %s16516_s16 }
0x1036   : > { %v5338_v52 = vpop.permute.xlu0 %5337  ;;  %v5368_v33 = vpop.permute.xlu1 %5367 }
0x1037   : > { %v5451_v59 = vsel %vm1255_vm1, %v5338_v52, %v5368_v33 }
0x103a   : > { %v5398_v20 = vpop.permute.xlu0 %5397  ;;  %v5428_v13 = vpop.permute.xlu1 %5427 }
0x103b   : > { %v5461_v4 = vsel %vm1266_vm2, %v5451_v59, %v5398_v20 }
0x103c   : > { %v5471_v6 = vsel %vm1277_vm3, %v5461_v4, %v5428_v13 }
0x103d   : > { %5497 = vrot.lane.b32.xlu0 %v5471_v6, %s16516_s16 }
0x103e   : > { %v5344_v38 = vpop.permute.xlu0 %5343  ;;  %v5374_v11 = vpop.permute.xlu1 %5373 }
0x103f   : > { %v5454_v25 = vsel %vm1255_vm1, %v5344_v38, %v5374_v11 }
0x1042   : > { %v5342_v21 = vpop.permute.xlu0 %5341  ;;  %v5372_v5 = vpop.permute.xlu1 %5371 }
0x1043   : > { %v5453_v22 = vsel %vm1255_vm1, %v5342_v21, %v5372_v5 }
0x1046   : > { %v5402_v42 = vpop.permute.xlu0 %5401  ;;  %v5432_v19 = vpop.permute.xlu1 %5431 }
0x1047   : > { %v5463_v43 = vsel %vm1266_vm2, %v5453_v22, %v5402_v42 }
0x1048   : > { %v5473_v7 = vsel %vm1277_vm3, %v5463_v43, %v5432_v19 }
0x1049   : > { %5501 = vrot.lane.b32.xlu0 %v5473_v7, %s16516_s16 }
0x104a   : > { %v5404_v17 = vpop.permute.xlu0 %5403  ;;  %v5434_v8 = vpop.permute.xlu1 %5433 }
0x104b   : > { %v5464_v62 = vsel %vm1266_vm2, %v5454_v25, %v5404_v17 }
0x104c   : > { %v5474_v24 = vsel %vm1277_vm3, %v5464_v62, %v5434_v8 }
0x104d   : > { %5503 = vrot.lane.b32.xlu1 %v5474_v24, %s16516_s16 }
0x1077   : > { %v5488_v23 = vpop.permute.xlu1 %5487 }
0x1078   : > { %v5516_v28 = vsub.f32 %v13725_v36, %v5488_v23 }
0x107a   : > { %v5527_v31 = vmul.f32 1.442695, %v5516_v28 }
0x107c   : > { %10686 = vpow2.f32 %v5527_v31 }
0x107f   : > { %v5486_v29 = vpop.permute.xlu0 %5485 }
0x1080   : > { %v5515_v16 = vsub.f32 %v13728_v48, %v5486_v29 }
0x1082   : > { %v5525_v61 = vmul.f32 1.442695, %v5515_v16 }
0x1084   : > { %10688 = vpow2.f32 %v5525_v61 }
0x1086   : > { %v13887_v51 = vpop.eup %10686 }
0x1087   : > { %5557 = vrot.lane.b32.xlu1 %v13887_v51, %s10930_s19  ;;  %v5492_v58 = vpop.permute.xlu1 %5491 }
0x1088   : > { %v5518_v27 = vsub.f32 %v13738_v40, %v5492_v58 }
0x108a   : > { %v5531_v52 = vmul.f32 1.442695, %v5518_v27 }
0x108c   : > { %10690 = vpow2.f32 %v5531_v52 }
0x108e   : > { %v13892_v33 = vpop.eup %10688 }
0x108f   : > { %v5490_v59 = vpop.permute.xlu0 %5489  ;;  %5555 = vrot.lane.b32.xlu0 %v13892_v33, %s10930_s19 }
0x1090   : > { %v5517_v20 = vsub.f32 %v13741_v9, %v5490_v59 }
0x1092   : > { %v5529_v13 = vmul.f32 1.442695, %v5517_v20 }
0x1094   : > { %10692 = vpow2.f32 %v5529_v13 }
0x1096   : > { %v13897_v4 = vpop.eup %10690 }
0x1097   : > { %5561 = vrot.lane.b32.xlu1 %v13897_v4, %s10930_s19  ;;  %v5496_v6 = vpop.permute.xlu1 %5495 }
0x1098   : > { %v5520_v38 = vsub.f32 %v13750_v50, %v5496_v6 }
0x109a   : > { %v5535_v11 = vmul.f32 1.442695, %v5520_v38 }
0x109c   : > { %10694 = vpow2.f32 %v5535_v11 }
0x109e   : > { %v13902_v21 = vpop.eup %10692 }
0x109f   : > { %v5494_v5 = vpop.permute.xlu0 %5493  ;;  %5559 = vrot.lane.b32.xlu0 %v13902_v21, %s10930_s19 }
0x10a0   : > { %v5519_v22 = vsub.f32 %v13753_v14, %v5494_v5 }
0x10a2   : > { %v5533_v42 = vmul.f32 1.442695, %v5519_v22 }
0x10a4   : > { %10696 = vpow2.f32 %v5533_v42 }
0x10a6   : > { %v13907_v19 = vpop.eup %10694 }
0x10a7   : > { %5565 = vrot.lane.b32.xlu1 %v13907_v19, %s10930_s19  ;;  %v5500_v43 = vpop.permute.xlu1 %5499 }
0x10a8   : > { %v5522_v7 = vsub.f32 %v13762_v26, %v5500_v43 }
0x10aa   : > { %v5539_v25 = vmul.f32 1.442695, %v5522_v7 }
0x10ac   : > { %10698 = vpow2.f32 %v5539_v25 }
0x10ae   : > { %v13912_v17 = vpop.eup %10696 }
0x10af   : > { %v5498_v8 = vpop.permute.xlu0 %5497  ;;  %5563 = vrot.lane.b32.xlu0 %v13912_v17, %s10930_s19 }
0x10b0   : > { %v5521_v62 = vsub.f32 %v13765_v35, %v5498_v8 }
0x10b2   : > { %v5537_v24 = vmul.f32 1.442695, %v5521_v62 }
0x10b4   : > { %10700 = vpow2.f32 %v5537_v24 }
0x10b6   : > { %v13917_v23 = vpop.eup %10698 }
0x10b7   : > { %5569 = vrot.lane.b32.xlu1 %v13917_v23, %s10930_s19 }
0x10bb   : > { %v5502_v28 = vpop.permute.xlu0 %5501 }
0x10bc   : > { %v5523_v31 = vsub.f32 %v13777_v54, %v5502_v28 }
0x10be   : > { %v13922_v29 = vpop.eup %10700  ;;  %v5541_v16 = vmul.f32 1.442695, %v5523_v31 }
0x10bf   : > { %5567 = vrot.lane.b32.xlu0 %v13922_v29, %s10930_s19  ;;  %v5504_v61 = vpop.permute.xlu1 %5503 }
0x10c0   : > { %10702 = vpow2.f32 %v5541_v16  ;;  %v5524_v58 = vsub.f32 %v13774_v46, %v5504_v61 }
0x10c2   : > { %v5543_v27 = vmul.f32 1.442695, %v5524_v58 }
0x10c4   : > { %10704 = vpow2.f32 %v5543_v27  ;;  %v10784_v27 = vld [vmem:[%s11489_s27] sm:$0xff] }
0x10ca   : > { %v13927_v52 = vpop.eup %10702 }
0x10cb   : > { %5571 = vrot.lane.b32.xlu0 %v13927_v52, %s10930_s19 }
0x10ce   : > { %v13931_v59 = vpop.eup %10704 }
0x10cf   : > { %5865 = vrot.lane.b32.xlu0 %v13728_v48, %s10937_s15  ;;  %5573 = vrot.lane.b32.xlu1 %v13931_v59, %s10930_s19 }
0x10f9   : > { %v5558_v20 = vpop.permute.xlu1 %5557 }
0x10fa   : > { %v5586_v13 = vadd.f32 %v13887_v51, %v5558_v20 }
0x10fc   : > { %5607 = vrot.lane.b32.xlu1 %v5586_v13, %s10931_s20 }
0x1101   : > { %v5556_v6 = vpop.permute.xlu0 %5555 }
0x1102   : > { %v5585_v38 = vadd.f32 %v13892_v33, %v5556_v6 }
0x1104   : > { %5605 = vrot.lane.b32.xlu0 %v5585_v38, %s10931_s20 }
0x1109   : > { %v5562_v11 = vpop.permute.xlu1 %5561 }
0x110a   : > { %v5588_v5 = vadd.f32 %v13897_v4, %v5562_v11 }
0x110c   : > { %5611 = vrot.lane.b32.xlu1 %v5588_v5, %s10931_s20 }
0x1111   : > { %v5560_v22 = vpop.permute.xlu0 %5559 }
0x1112   : > { %v5587_v48 = vadd.f32 %v13902_v21, %v5560_v22 }
0x1114   : > { %5609 = vrot.lane.b32.xlu0 %v5587_v48, %s10931_s20 }
0x1119   : > { %v5566_v42 = vpop.permute.xlu1 %5565 }
0x111a   : > { %v5590_v43 = vadd.f32 %v13907_v19, %v5566_v42 }
0x111c   : > { %5615 = vrot.lane.b32.xlu1 %v5590_v43, %s10931_s20 }
0x1121   : > { %v5564_v7 = vpop.permute.xlu0 %5563 }
0x1122   : > { %v5589_v25 = vadd.f32 %v13912_v17, %v5564_v7 }
0x1124   : > { %5613 = vrot.lane.b32.xlu0 %v5589_v25, %s10931_s20 }
0x1129   : > { %v5570_v8 = vpop.permute.xlu1 %5569 }
0x112a   : > { %v13950_v62 = vadd.f32 %v13917_v23, %v5570_v8 }
0x112c   : > { %5619 = vrot.lane.b32.xlu1 %v13950_v62, %s10931_s20 }
0x1131   : > { %v5568_v24 = vpop.permute.xlu0 %5567 }
0x1132   : > { %v13955_v28 = vadd.f32 %v13922_v29, %v5568_v24 }
0x1134   : > { %5617 = vrot.lane.b32.xlu0 %v13955_v28, %s10931_s20 }
0x113d   : > { %v5572_v31 = vpop.permute.xlu0 %5571 }
0x113e   : > { %v13960_v16 = vadd.f32 %v13927_v52, %v5572_v31 }
0x1140   : > { %5621 = vrot.lane.b32.xlu0 %v13960_v16, %s10931_s20 }
0x1141   : > { %v5866_v61 = vpop.permute.xlu0 %5865  ;;  %v5574_v58 = vpop.permute.xlu1 %5573 }
0x1142   : > { %v13965_v20 = vadd.f32 %v10784_v27, %v5866_v61  ;;  %v13968_v6 = vadd.f32 %v13931_v59, %v5574_v58 }
0x1144   : > { %9135 = vmatmul.mubr.msk.f32.vlgmr.msra.gmra.mrb[174].mxu1 %vm1778_vm4, %v13965_v20  ;;  %9165 = vmatmul.mubr.msk.f32.vlgmr.msra.gmra.mrb[176].mxu0 %vm1778_vm4, %v13965_v20 }
0x1145   : > { %10166 = vmatpush3.bf16.msra.mxu0 %v13730_v57  ;;  %5623 = vrot.lane.b32.xlu1 %v13968_v6, %s10931_s20 }
0x1146   : > { %10167 = vmatprep.subr.bf16.mxu0 %v13743_v15  ;;  %6095 = vmatprep.mubr.f32.mxu1 %v16456_v63 }
0x1147   : > { %6340 = vmatprep.mubr.f32.mxu0 %v16456_v63  ;;  %10447 = vmatpush3.bf16.msra.mxu1 %v16490_v56 }
0x1149   : > { %10168 = vmatpush3.bf16.msra.mxu0 %v13743_v15 }
0x114a   : > { %10169 = vmatprep.subr.bf16.mxu0 %v13755_v34 }
0x114d   : > { %10170 = vmatpush3.bf16.msra.mxu0 %v13755_v34 }
0x114e   : > { %10171 = vmatprep.subr.bf16.mxu0 %v13767_v41 }
0x1151   : > { %10172 = vmatpush3.bf16.msra.mxu0 %v13767_v41 }
0x1152   : > { %10173 = vmatprep.subr.bf16.mxu0 %v13779_v12 }
0x1155   : > { %10174 = vmatpush3.bf16.msra.mxu0 %v13779_v12 }
0x116e   : > { %v5608_v57 = vpop.permute.xlu1 %5607 }
0x116f   : > { %v5636_v11 = vadd.f32 %v5608_v57, %v5586_v13 }
0x1171   : > { %5687 = vrot.lane.b32.xlu1 %v5636_v11, %s10932_s21  ;;  %5657 = vrot.lane.b32.xlu0 %v5636_v11, %s16516_s16 }
0x1175   : > { %5747 = vrot.lane.b32.xlu1 %v5636_v11, %s16517_s23  ;;  %5717 = vrot.lane.b32.xlu0 %v5636_v11, %s16518_s29 }
0x1176   : > { %v5606_v56 = vpop.permute.xlu0 %5605 }
0x1177   : > { %v5635_v15 = vadd.f32 %v5606_v56, %v5585_v38 }
0x1179   : > { %5685 = vrot.lane.b32.xlu1 %v5635_v15, %s10932_s21  ;;  %5655 = vrot.lane.b32.xlu0 %v5635_v15, %s16516_s16 }
0x117d   : > { %5745 = vrot.lane.b32.xlu1 %v5635_v15, %s16517_s23  ;;  %5715 = vrot.lane.b32.xlu0 %v5635_v15, %s16518_s29 }
0x117e   : > { %v5612_v34 = vpop.permute.xlu1 %5611 }
0x117f   : > { %v5638_v41 = vadd.f32 %v5612_v34, %v5588_v5 }
0x1181   : > { %5691 = vrot.lane.b32.xlu1 %v5638_v41, %s10932_s21  ;;  %5661 = vrot.lane.b32.xlu0 %v5638_v41, %s16516_s16 }
0x1185   : > { %5751 = vrot.lane.b32.xlu1 %v5638_v41, %s16517_s23  ;;  %5721 = vrot.lane.b32.xlu0 %v5638_v41, %s16518_s29 }
0x1186   : > { %v5610_v12 = vpop.permute.xlu0 %5609 }
0x1187   : > { %v5637_v13 = vadd.f32 %v5610_v12, %v5587_v48 }
0x1189   : > { %5689 = vrot.lane.b32.xlu1 %v5637_v13, %s10932_s21  ;;  %5659 = vrot.lane.b32.xlu0 %v5637_v13, %s16516_s16 }
0x118d   : > { %5749 = vrot.lane.b32.xlu1 %v5637_v13, %s16517_s23  ;;  %5719 = vrot.lane.b32.xlu0 %v5637_v13, %s16518_s29 }
0x118e   : > { %v5616_v38 = vpop.permute.xlu1 %5615 }
0x118f   : > { %v5640_v5 = vadd.f32 %v5616_v38, %v5590_v43 }
0x1191   : > { %5695 = vrot.lane.b32.xlu1 %v5640_v5, %s10932_s21  ;;  %5665 = vrot.lane.b32.xlu0 %v5640_v5, %s16516_s16 }
0x1195   : > { %5755 = vrot.lane.b32.xlu1 %v5640_v5, %s16517_s23  ;;  %5725 = vrot.lane.b32.xlu0 %v5640_v5, %s16518_s29 }
0x1196   : > { %v5614_v22 = vpop.permute.xlu0 %5613 }
0x1197   : > { %v5639_v48 = vadd.f32 %v5614_v22, %v5589_v25 }
0x1199   : > { %5693 = vrot.lane.b32.xlu1 %v5639_v48, %s10932_s21  ;;  %5663 = vrot.lane.b32.xlu0 %v5639_v48, %s16516_s16 }
0x119d   : > { %5753 = vrot.lane.b32.xlu1 %v5639_v48, %s16517_s23  ;;  %5723 = vrot.lane.b32.xlu0 %v5639_v48, %s16518_s29 }
0x119e   : > { %v5620_v42 = vpop.permute.xlu1 %5619 }
0x119f   : > { %v5642_v43 = vadd.f32 %v5620_v42, %v13950_v62 }
0x11a1   : > { %5699 = vrot.lane.b32.xlu1 %v5642_v43, %s10932_s21  ;;  %5669 = vrot.lane.b32.xlu0 %v5642_v43, %s16516_s16 }
0x11a5   : > { %5759 = vrot.lane.b32.xlu1 %v5642_v43, %s16517_s23  ;;  %5729 = vrot.lane.b32.xlu0 %v5642_v43, %s16518_s29 }
0x11a6   : > { %v5618_v7 = vpop.permute.xlu0 %5617 }
0x11a7   : > { %v5641_v25 = vadd.f32 %v5618_v7, %v13955_v28 }
0x11a9   : > { %5697 = vrot.lane.b32.xlu1 %v5641_v25, %s10932_s21  ;;  %5667 = vrot.lane.b32.xlu0 %v5641_v25, %s16516_s16 }
0x11ad   : > { %5757 = vrot.lane.b32.xlu1 %v5641_v25, %s16517_s23  ;;  %5727 = vrot.lane.b32.xlu0 %v5641_v25, %s16518_s29 }
0x11b2   : > { %v5622_v24 = vpop.permute.xlu0 %5621 }
0x11b3   : > { %v5643_v31 = vadd.f32 %v5622_v24, %v13960_v16 }
0x11b7   : > { %v5624_v8 = vpop.permute.xlu1 %5623 }
0x11b8   : > { %v5644_v62 = vadd.f32 %v5624_v8, %v13968_v6 }
0x11ba   : > { %5703 = vrot.lane.b32.xlu0 %v5644_v62, %s10932_s21  ;;  %5673 = vrot.lane.b32.xlu1 %v5644_v62, %s16516_s16 }
0x11be   : > { %5671 = vrot.lane.b32.xlu0 %v5643_v31, %s16516_s16  ;;  %5701 = vrot.lane.b32.xlu1 %v5643_v31, %s10932_s21 }
0x11c2   : > { %5761 = vrot.lane.b32.xlu0 %v5643_v31, %s16517_s23  ;;  %5731 = vrot.lane.b32.xlu1 %v5643_v31, %s16518_s29 }
0x11c6   : > { %5733 = vrot.lane.b32.xlu0 %v5644_v62, %s16518_s29  ;;  %5867 = vrot.lane.b32.xlu1 %v13725_v36, %s10937_s15 }
0x11ca   : > { %5869 = vrot.lane.b32.xlu0 %v13741_v9, %s10937_s15  ;;  %5763 = vrot.lane.b32.xlu1 %v5644_v62, %s16517_s23 }
0x11ce   : > { %5873 = vrot.lane.b32.xlu0 %v13753_v14, %s10937_s15  ;;  %5871 = vrot.lane.b32.xlu1 %v13738_v40, %s10937_s15 }
0x11d2   : > { %5877 = vrot.lane.b32.xlu0 %v13765_v35, %s10937_s15  ;;  %5875 = vrot.lane.b32.xlu1 %v13750_v50, %s10937_s15 }
0x11d6   : > { %5881 = vrot.lane.b32.xlu0 %v13777_v54, %s10937_s15  ;;  %5879 = vrot.lane.b32.xlu1 %v13762_v26, %s10937_s15 }
0x11da   : > { %5883 = vrot.lane.b32.xlu1 %v13774_v46, %s10937_s15 }
0x11e3   : > { %v5658_v36 = vpop.permute.xlu0 %5657  ;;  %v5688_v9 = vpop.permute.xlu1 %5687 }
0x11e4   : > { %v5776_v14 = vsel %vm1255_vm1, %v5658_v36, %v5688_v9 }
0x11e7   : > { %v5718_v40 = vpop.permute.xlu0 %5717  ;;  %v5748_v28 = vpop.permute.xlu1 %5747 }
0x11e8   : > { %v5786_v35 = vsel %vm1266_vm2, %v5776_v14, %v5718_v40 }
0x11e9   : > { %v5796_v16 = vsel %vm1277_vm3, %v5786_v35, %v5748_v28 }
0x11ea   : > { %10706 = vrcp.f32 %v5796_v16 }
0x11eb   : > { %v5656_v50 = vpop.permute.xlu0 %5655  ;;  %v5686_v61 = vpop.permute.xlu1 %5685 }
0x11ec   : > { %v5775_v54 = vsel %vm1255_vm1, %v5656_v50, %v5686_v61 }
0x11ef   : > { %v5716_v58 = vpop.permute.xlu0 %5715  ;;  %v5746_v26 = vpop.permute.xlu1 %5745 }
0x11f0   : > { %v5785_v27 = vsel %vm1266_vm2, %v5775_v54, %v5716_v58 }
0x11f1   : > { %v5795_v46 = vsel %vm1277_vm3, %v5785_v27, %v5746_v26 }
0x11f2   : > { %10708 = vrcp.f32 %v5795_v46 }
0x11f3   : > { %v5662_v6 = vpop.permute.xlu0 %5661  ;;  %v5692_v57 = vpop.permute.xlu1 %5691 }
0x11f4   : > { %v10707_v11 = vpop.eup %10706  ;;  %v5778_v56 = vsel %vm1255_vm1, %v5662_v6, %v5692_v57 }
0x11f5   : > { %5827 = vrot.lane.b32.xlu1 %v10707_v11, %s16516_s16 }
0x11f7   : > { %v5722_v15 = vpop.permute.xlu0 %5721  ;;  %v5752_v34 = vpop.permute.xlu1 %5751 }
0x11f8   : > { %v5788_v41 = vsel %vm1266_vm2, %v5778_v56, %v5722_v15 }
0x11f9   : > { %v5798_v12 = vsel %vm1277_vm3, %v5788_v41, %v5752_v34 }
0x11fa   : > { %10710 = vrcp.f32 %v5798_v12 }
0x11fb   : > { %v5660_v13 = vpop.permute.xlu0 %5659  ;;  %v5690_v38 = vpop.permute.xlu1 %5689 }
0x11fc   : > { %v10709_v5 = vpop.eup %10708  ;;  %v5777_v22 = vsel %vm1255_vm1, %v5660_v13, %v5690_v38 }
0x11fd   : > { %5825 = vrot.lane.b32.xlu0 %v10709_v5, %s16516_s16 }
0x11ff   : > { %v5720_v48 = vpop.permute.xlu0 %5719  ;;  %v5750_v42 = vpop.permute.xlu1 %5749 }
0x1200   : > { %v5787_v43 = vsel %vm1266_vm2, %v5777_v22, %v5720_v48 }
0x1201   : > { %v5797_v7 = vsel %vm1277_vm3, %v5787_v43, %v5750_v42 }
0x1202   : > { %10712 = vrcp.f32 %v5797_v7 }
0x1203   : > { %v5666_v25 = vpop.permute.xlu0 %5665  ;;  %v5696_v8 = vpop.permute.xlu1 %5695 }
0x1204   : > { %v10711_v62 = vpop.eup %10710  ;;  %v5780_v24 = vsel %vm1255_vm1, %v5666_v25, %v5696_v8 }
0x1205   : > { %5831 = vrot.lane.b32.xlu1 %v10711_v62, %s16516_s16 }
0x1207   : > { %v5726_v31 = vpop.permute.xlu0 %5725  ;;  %v5756_v36 = vpop.permute.xlu1 %5755 }
0x1208   : > { %v5790_v9 = vsel %vm1266_vm2, %v5780_v24, %v5726_v31 }
0x1209   : > { %v5800_v14 = vsel %vm1277_vm3, %v5790_v9, %v5756_v36 }
0x120a   : > { %10714 = vrcp.f32 %v5800_v14 }
0x120b   : > { %v5664_v40 = vpop.permute.xlu0 %5663  ;;  %v5694_v28 = vpop.permute.xlu1 %5693 }
0x120c   : > { %v10713_v35 = vpop.eup %10712  ;;  %v5779_v16 = vsel %vm1255_vm1, %v5664_v40, %v5694_v28 }
0x120d   : > { %5829 = vrot.lane.b32.xlu0 %v10713_v35, %s16516_s16 }
0x120f   : > { %v5724_v50 = vpop.permute.xlu0 %5723  ;;  %v5754_v61 = vpop.permute.xlu1 %5753 }
0x1210   : > { %v5789_v54 = vsel %vm1266_vm2, %v5779_v16, %v5724_v50 }
0x1211   : > { %v5799_v58 = vsel %vm1277_vm3, %v5789_v54, %v5754_v61  ;;  %v10785_v54 = vld [vmem:[%s11489_s27 + $0x8] sm:$0xff] }
0x1212   : > { %10716 = vrcp.f32 %v5799_v58 }
0x1213   : > { %v5670_v26 = vpop.permute.xlu0 %5669  ;;  %v5700_v27 = vpop.permute.xlu1 %5699 }
0x1214   : > { %v10715_v46 = vpop.eup %10714  ;;  %v5782_v38 = vsel %vm1255_vm1, %v5670_v26, %v5700_v27 }
0x1215   : > { %5835 = vrot.lane.b32.xlu1 %v10715_v46, %s16516_s16 }
0x1217   : > { %v14073_v6 = vpop.f32.mrb[174].mxu1  ;;  %v14075_v57 = vpop.f32.mrb[176].mxu0 }
0x1218   : > { %v5730_v11 = vpop.permute.xlu0 %5729  ;;  %v5760_v56 = vpop.permute.xlu1 %5759 }
0x1219   : > { %v14077_v15 = vpop.f32.mrb[175].mxu1  ;;  %v14079_v34 = vpop.f32.mrb[177].mxu0  ;;  %v5792_v42 = vsel %vm1266_vm2, %v5782_v38, %v5730_v11 }
0x121a   : > { %v5802_v25 = vsel %vm1277_vm3, %v5792_v42, %v5760_v56  ;;  %v10786_v56 = vld [vmem:[%s11489_s27 + $0x10] sm:$0xff] }
0x121c   : > { %v10717_v41 = vpop.eup %10716  ;;  %v5668_v12 = vpop.permute.xlu0 %5667 }
0x121d   : > { %v5698_v13 = vpop.permute.xlu1 %5697  ;;  %5833 = vrot.lane.b32.xlu0 %v10717_v41, %s16516_s16 }
0x121e   : > { %v5781_v5 = vsel %vm1255_vm1, %v5668_v12, %v5698_v13 }
0x1220   : > { %v5728_v22 = vpop.permute.xlu0 %5727 }
0x1221   : > { %v5758_v48 = vpop.permute.xlu1 %5757  ;;  %v5791_v43 = vsel %vm1266_vm2, %v5781_v5, %v5728_v22  ;;  %5915 = vrot.lane.b32.xlu0 %v13965_v20, %s10938_s28  ;;  %v10787_v22 = vld [vmem:[%s11489_s27 + $0x18] sm:$0xff] }
0x1222   : > { %v5801_v7 = vsel %vm1277_vm3, %v5791_v43, %v5758_v48 }
0x1223   : > { %10718 = vrcp.f32 %v5801_v7  ;;  %v10788_v7 = vld [vmem:[%s11489_s27 + $0x20] sm:$0xff] }
0x1224   : > { %10720 = vrcp.f32 %v5802_v25 }
0x122c   : > { %v5704_v8 = vpop.permute.xlu0 %5703  ;;  %v5674_v62 = vpop.permute.xlu1 %5673 }
0x122d   : > { %v10719_v24 = vpop.eup %10718  ;;  %v5784_v26 = vsel %vm1255_vm1, %v5674_v62, %v5704_v8  ;;  %v10789_v62 = vld [vmem:[%s11489_s27 + $0x30] sm:$0xff] }
0x122e   : > { %5837 = vrot.lane.b32.xlu1 %v10719_v24, %s16516_s16  ;;  %v10721_v9 = vpop.eup %10720 }
0x1230   : > { %v5672_v31 = vpop.permute.xlu0 %5671  ;;  %v5702_v36 = vpop.permute.xlu1 %5701 }
0x1231   : > { %v5783_v14 = vsel %vm1255_vm1, %v5672_v31, %v5702_v36  ;;  %v10790_v31 = vld [vmem:[%s11489_s27 + $0x28] sm:$0xff] }
0x1232   : > { %5839 = vrot.lane.b32.xlu1 %v10721_v9, %s16516_s16 }
0x1234   : > { %v5762_v40 = vpop.permute.xlu0 %5761  ;;  %v5732_v28 = vpop.permute.xlu1 %5731 }
0x1235   : > { %v5793_v35 = vsel %vm1266_vm2, %v5783_v14, %v5732_v28 }
0x1236   : > { %v5803_v16 = vsel %vm1277_vm3, %v5793_v35, %v5762_v40  ;;  %v10791_v40 = vld [vmem:[%s11489_s27 + $0x40] sm:$0xff]  ;;  %v10792_v35 = vld [vmem:[%s11489_s27 + $0x38] sm:$0xff] }
0x1237   : > { %10722 = vrcp.f32 %v5803_v16 }
0x1238   : > { %v5734_v50 = vpop.permute.xlu0 %5733  ;;  %v5868_v61 = vpop.permute.xlu1 %5867 }
0x1239   : > { %v14096_v58 = vadd.f32 %v10785_v54, %v5868_v61  ;;  %v5794_v27 = vsel %vm1266_vm2, %v5784_v26, %v5734_v50  ;;  %v10793_v61 = vld [vmem:[%s11489_s27 + $0x48] sm:$0xff] }
0x123b   : > { %5917 = vrot.lane.b32.xlu0 %v14096_v58, %s10938_s28  ;;  %9136 = vmatmul.mubr.msk.f32.gmra.mrb[176].mxu1 %vm1778_vm4, %v14096_v58 }
0x123c   : > { %9166 = vmatmul.mubr.msk.f32.gmra.mrb[178].mxu0 %vm1778_vm4, %v14096_v58  ;;  %v5870_v46 = vpop.permute.xlu0 %5869  ;;  %v5764_v11 = vpop.permute.xlu1 %5763  ;;  %6101 = vmatprep.mubr.f32.mxu1 %v16456_v63 }
0x123d   : > { %v14108_v41 = vadd.f32 %v10786_v56, %v5870_v46  ;;  %v5804_v12 = vsel %vm1277_vm3, %v5794_v27, %v5764_v11  ;;  %6346 = vmatprep.mubr.f32.mxu0 %v16456_v63 }
0x123e   : > { %10724 = vrcp.f32 %v5804_v12 }
0x123f   : > { %5919 = vrot.lane.b32.xlu0 %v14108_v41, %s10938_s28  ;;  %9137 = vmatmul.mubr.msk.f32.gmra.mrb[178].mxu1 %vm1778_vm4, %v14108_v41 }
0x1240   : > { %9167 = vmatmul.mubr.msk.f32.gmra.mrb[180].mxu0 %vm1778_vm4, %v14108_v41  ;;  %v5874_v13 = vpop.permute.xlu0 %5873  ;;  %v5872_v38 = vpop.permute.xlu1 %5871  ;;  %6107 = vmatprep.mubr.f32.mxu1 %v16456_v63 }
0x1241   : > { %v10723_v5 = vpop.eup %10722  ;;  %v14120_v48 = vadd.f32 %v10787_v22, %v5872_v38  ;;  %6352 = vmatprep.mubr.f32.mxu0 %v16456_v63  ;;  %v14132_v25 = vadd.f32 %v10788_v7, %v5874_v13 }
0x1242   : > { %5841 = vrot.lane.b32.xlu1 %v10723_v5, %s16516_s16 }
0x1243   : > { %5921 = vrot.lane.b32.xlu0 %v14120_v48, %s10938_s28  ;;  %9138 = vmatmul.mubr.msk.f32.gmra.mrb[180].mxu1 %vm1778_vm4, %v14120_v48 }
0x1244   : > { %9168 = vmatmul.mubr.msk.f32.gmra.mrb[182].mxu0 %vm1778_vm4, %v14120_v48  ;;  %v5878_v42 = vpop.permute.xlu0 %5877  ;;  %v5876_v43 = vpop.permute.xlu1 %5875  ;;  %6113 = vmatprep.mubr.f32.mxu1 %v16456_v63 }
0x1245   : > { %6358 = vmatprep.mubr.f32.mxu0 %v16456_v63  ;;  %v14143_v24 = vadd.f32 %v10789_v62, %v5878_v42  ;;  %v14146_v36 = vadd.f32 %v10790_v31, %v5876_v43 }
0x1247   : > { %5923 = vrot.lane.b32.xlu0 %v14132_v25, %s10938_s28  ;;  %9139 = vmatmul.mubr.msk.f32.gmra.mrb[182].mxu1 %vm1778_vm4, %v14132_v25 }
0x1248   : > { %v10725_v8 = vpop.eup %10724  ;;  %9169 = vmatmul.mubr.msk.f32.gmra.mrb[184].mxu0 %vm1778_vm4, %v14132_v25  ;;  %6119 = vmatprep.mubr.f32.mxu1 %v16456_v63  ;;  %v5882_v9 = vpop.permute.xlu0 %5881 }
0x1249   : > { %5843 = vrot.lane.b32.xlu1 %v10725_v8, %s16516_s16  ;;  %6364 = vmatprep.mubr.f32.mxu0 %v16456_v63  ;;  %v5880_v14 = vpop.permute.xlu1 %5879  ;;  %v14158_v28 = vadd.f32 %v10791_v40, %v5882_v9 }
0x124a   : > { %v14164_v16 = vadd.f32 %v10792_v35, %v5880_v14 }
0x124b   : > { %5927 = vrot.lane.b32.xlu0 %v14143_v24, %s10938_s28  ;;  %9140 = vmatmul.mubr.msk.f32.gmra.mrb[184].mxu1 %vm1778_vm4, %v14146_v36 }
0x124c   : > { %9170 = vmatmul.mubr.msk.f32.gmra.mrb[186].mxu0 %vm1778_vm4, %v14146_v36  ;;  %6125 = vmatprep.mubr.f32.mxu1 %v16456_v63 }
0x124d   : > { %5925 = vrot.lane.b32.xlu1 %v14146_v36, %s10938_s28  ;;  %6370 = vmatprep.mubr.f32.mxu0 %v16456_v63  ;;  %v5884_v50 = vpop.permute.xlu1 %5883 }
0x124e   : > { %v14177_v54 = vadd.f32 %v10793_v61, %v5884_v50 }
0x124f   : > { %5931 = vrot.lane.b32.xlu0 %v14158_v28, %s10938_s28  ;;  %9141 = vmatmul.mubr.msk.f32.gmra.mrb[186].mxu1 %vm1778_vm4, %v14143_v24 }
0x1250   : > { %9171 = vmatmul.mubr.msk.f32.gmra.mrb[188].mxu0 %vm1778_vm4, %v14143_v24  ;;  %6131 = vmatprep.mubr.f32.mxu1 %v16456_v63 }
0x1251   : > { %5929 = vrot.lane.b32.xlu1 %v14164_v16, %s10938_s28  ;;  %6376 = vmatprep.mubr.f32.mxu0 %v16456_v63 }
0x1253   : > { %9142 = vmatmul.mubr.msk.f32.gmra.mrb[188].mxu1 %vm1778_vm4, %v14164_v16 }
0x1254   : > { %9172 = vmatmul.mubr.msk.f32.gmra.mrb[190].mxu0 %vm1778_vm4, %v14164_v16  ;;  %6137 = vmatprep.mubr.f32.mxu1 %v16456_v63 }
0x1255   : > { %5933 = vrot.lane.b32.xlu1 %v14177_v54, %s10938_s28  ;;  %6382 = vmatprep.mubr.f32.mxu0 %v16456_v63  ;;  %s16642_s28 = smov 48  }
0x1257   : > { %9143 = vmatmul.mubr.msk.f32.gmra.mrb[190].mxu1 %vm1778_vm4, %v14158_v28 }
0x1258   : > { %9173 = vmatmul.mubr.msk.f32.gmra.mrb[192].mxu0 %vm1778_vm4, %v14158_v28  ;;  %6143 = vmatprep.mubr.f32.mxu1 %v16456_v63 }
0x1259   : > { %6388 = vmatprep.mubr.f32.mxu0 %v16456_v63 }
0x125b   : > { %9144 = vmatmul.mubr.msk.f32.gmra.mrb[192].mxu1 %vm1778_vm4, %v14177_v54 }
0x125c   : > { %9174 = vmatmul.mubr.msk.f32.gmra.mrb[194].mxu0 %vm1778_vm4, %v14177_v54  ;;  %6149 = vmatprep.mubr.f32.mxu1 %v16456_v63 }
0x125d   : > { %6394 = vmatprep.mubr.f32.mxu0 %v16456_v63 }
0x1267   : > { %v5828_v26 = vpop.permute.xlu1 %5827 }
0x1268   : > { %v5856_v27 = vmul.f32 %v13887_v51, %v5828_v26 }
0x126a   : > { %5947 = vrot.lane.b32.xlu1 %v5856_v27, %s16516_s16 }
0x126f   : > { %v5826_v46 = vpop.permute.xlu0 %5825 }
0x1270   : > { %v5855_v11 = vmul.f32 %v13892_v33, %v5826_v46 }
0x1272   : > { %5945 = vrot.lane.b32.xlu0 %v5855_v11, %s16516_s16 }
0x1277   : > { %v5832_v56 = vpop.permute.xlu1 %5831 }
0x1278   : > { %v5858_v12 = vmul.f32 %v13897_v4, %v5832_v56 }
0x127a   : > { %5951 = vrot.lane.b32.xlu1 %v5858_v12, %s16516_s16 }
0x127f   : > { %v5830_v13 = vpop.permute.xlu0 %5829 }
0x1280   : > { %v5857_v38 = vmul.f32 %v13902_v21, %v5830_v13 }
0x1282   : > { %5949 = vrot.lane.b32.xlu0 %v5857_v38, %s16516_s16 }
0x1287   : > { %v5836_v5 = vpop.permute.xlu1 %5835 }
0x1288   : > { %v5860_v51 = vmul.f32 %v13907_v19, %v5836_v5 }
0x128a   : > { %5955 = vrot.lane.b32.xlu1 %v5860_v51, %s16516_s16 }
0x128f   : > { %v5834_v22 = vpop.permute.xlu0 %5833 }
0x1290   : > { %v5859_v33 = vmul.f32 %v13912_v17, %v5834_v22 }
0x1292   : > { %5953 = vrot.lane.b32.xlu0 %v5859_v33, %s16516_s16 }
0x1293   : > { %v14211_v42 = vpop.permute.xlu0 %5915 }
0x1294   : > { %9145 = vmatmul.mubr.msk.f32.gmra.mrb[194].mxu1 %vm1778_vm4, %v14211_v42  ;;  %9175 = vmatmul.mubr.msk.f32.gmra.mrb[196].mxu0 %vm1778_vm4, %v14211_v42 }
0x1295   : > { %6155 = vmatprep.mubr.f32.mxu1 %v16456_v63  ;;  %6400 = vmatprep.mubr.f32.mxu0 %v16456_v63 }
0x12a0   : > { %v5838_v4 = vpop.permute.xlu1 %5837 }
0x12a1   : > { %v5861_v21 = vmul.f32 %v13922_v29, %v5838_v4 }
0x12a3   : > { %5957 = vrot.lane.b32.xlu0 %v5861_v21, %s16516_s16 }
0x12a4   : > { %v5840_v19 = vpop.permute.xlu1 %5839 }
0x12a5   : > { %v5862_v17 = vmul.f32 %v13917_v23, %v5840_v19 }
0x12a7   : > { %5959 = vrot.lane.b32.xlu1 %v5862_v17, %s16516_s16 }
0x12ad   : > { %v14223_v43 = vpop.permute.xlu0 %5917 }
0x12ae   : > { %9146 = vmatmul.mubr.msk.f32.gmra.mrb[196].mxu1 %vm1778_vm4, %v14223_v43  ;;  %9176 = vmatmul.mubr.msk.f32.gmra.mrb[198].mxu0 %vm1778_vm4, %v14223_v43 }
0x12af   : > { %6161 = vmatprep.mubr.f32.mxu1 %v16456_v63  ;;  %6406 = vmatprep.mubr.f32.mxu0 %v16456_v63 }
0x12b1   : > { %v14231_v29 = vpop.permute.xlu0 %5919 }
0x12b2   : > { %9147 = vmatmul.mubr.msk.f32.gmra.mrb[198].mxu1 %vm1778_vm4, %v14231_v29  ;;  %9177 = vmatmul.mubr.msk.f32.gmra.mrb[200].mxu0 %vm1778_vm4, %v14231_v29 }
0x12b3   : > { %6167 = vmatprep.mubr.f32.mxu1 %v16456_v63  ;;  %6412 = vmatprep.mubr.f32.mxu0 %v16456_v63 }
0x12b4   : > { %v5842_v23 = vpop.permute.xlu1 %5841 }
0x12b5   : > { %v5863_v7 = vmul.f32 %v13927_v52, %v5842_v23  ;;  %v14240_v8 = vpop.permute.xlu0 %5921 }
0x12b6   : > { %9148 = vmatmul.mubr.msk.f32.gmra.mrb[200].mxu1 %vm1778_vm4, %v14240_v8  ;;  %9178 = vmatmul.mubr.msk.f32.gmra.mrb[202].mxu0 %vm1778_vm4, %v14240_v8 }
0x12b7   : > { %5961 = vrot.lane.b32.xlu0 %v5863_v7, %s16516_s16  ;;  %6173 = vmatprep.mubr.f32.mxu1 %v16456_v63 }
0x12b8   : > { %6418 = vmatprep.mubr.f32.mxu0 %v16456_v63 }
0x12b9   : > { %v14249_v62 = vpop.permute.xlu0 %5923 }
0x12ba   : > { %9149 = vmatmul.mubr.msk.f32.gmra.mrb[202].mxu1 %vm1778_vm4, %v14249_v62  ;;  %9179 = vmatmul.mubr.msk.f32.gmra.mrb[204].mxu0 %vm1778_vm4, %v14249_v62 }
0x12bb   : > { %v5844_v52 = vpop.permute.xlu1 %5843  ;;  %6179 = vmatprep.mubr.f32.mxu1 %v16456_v63  ;;  %6424 = vmatprep.mubr.f32.mxu0 %v16456_v63 }
0x12bc   : > { %v5864_v31 = vmul.f32 %v13931_v59, %v5844_v52 }
0x12bd   : > { %v14267_v14 = vpop.permute.xlu0 %5927 }
0x12be   : > { %5963 = vrot.lane.b32.xlu1 %v5864_v31, %s16516_s16  ;;  %s16062_s16 = scalar_lea.vmem %s16112_s11, %s11028_s12 }
0x12bf   : > { %v14259_v9 = vpop.permute.xlu1 %5925 }
0x12c0   : > { %9150 = vmatmul.mubr.msk.f32.gmra.mrb[204].mxu1 %vm1778_vm4, %v14259_v9  ;;  %9180 = vmatmul.mubr.msk.f32.gmra.mrb[206].mxu0 %vm1778_vm4, %v14259_v9 }
0x12c1   : > { %6185 = vmatprep.mubr.f32.mxu1 %v16456_v63  ;;  %6430 = vmatprep.mubr.f32.mxu0 %v16456_v63  ;;  %v14283_v40 = vpop.permute.xlu0 %5931 }
0x12c3   : > { %v14275_v59 = vpop.permute.xlu1 %5929 }
0x12c4   : > { %9151 = vmatmul.mubr.msk.f32.gmra.mrb[206].mxu1 %vm1778_vm4, %v14267_v14  ;;  %9181 = vmatmul.mubr.msk.f32.gmra.mrb[208].mxu0 %vm1778_vm4, %v14267_v14 }
0x12c5   : > { %6191 = vmatprep.mubr.f32.mxu1 %v16456_v63  ;;  %6436 = vmatprep.mubr.f32.mxu0 %v16456_v63 }
0x12c7   : > { %v14291_v35 = vpop.permute.xlu1 %5933 }
0x12c8   : > { %9152 = vmatmul.mubr.msk.f32.gmra.mrb[208].mxu1 %vm1778_vm4, %v14275_v59  ;;  %9182 = vmatmul.mubr.msk.f32.gmra.mrb[210].mxu0 %vm1778_vm4, %v14275_v59 }
0x12c9   : > { %6197 = vmatprep.mubr.f32.mxu1 %v16456_v63  ;;  %6442 = vmatprep.mubr.f32.mxu0 %v16456_v63 }
0x12cc   : > { %9153 = vmatmul.mubr.msk.f32.gmra.mrb[210].mxu1 %vm1778_vm4, %v14283_v40  ;;  %9183 = vmatmul.mubr.msk.f32.gmra.mrb[212].mxu0 %vm1778_vm4, %v14283_v40 }
0x12cd   : > { %6203 = vmatprep.mubr.f32.mxu1 %v16456_v63  ;;  %6448 = vmatprep.mubr.f32.mxu0 %v16456_v63 }
0x12d0   : > { %9154 = vmatmul.mubr.msk.f32.gmra.mrb[212].mxu1 %vm1778_vm4, %v14291_v35  ;;  %9184 = vmatmul.mubr.msk.f32.gmra.mrb[214].mxu0 %vm1778_vm4, %v14291_v35 }
0x12d1   : > { %6209 = vmatprep.mubr.f32.mxu1 %v16456_v63  ;;  %6454 = vmatprep.mubr.f32.mxu0 %v16456_v63 }
0x12dc   : > { %v14307_v61 = vpop.permute.xlu1 %5947 }
0x12e4   : > { %v14299_v50 = vpop.permute.xlu0 %5945 }
0x12e5   : > { %9155 = vmatmul.mubr.msk.f32.gmra.mrb[214].mxu1 %vm1778_vm4, %v14299_v50  ;;  %9185 = vmatmul.mubr.msk.f32.gmra.mrb[216].mxu0 %vm1778_vm4, %v14299_v50 }
0x12e6   : > { %6215 = vmatprep.mubr.f32.mxu1 %v16456_v63  ;;  %6460 = vmatprep.mubr.f32.mxu0 %v16456_v63 }
0x12e9   : > { %9156 = vmatmul.mubr.msk.f32.gmra.mrb[216].mxu1 %vm1778_vm4, %v14307_v61  ;;  %9186 = vmatmul.mubr.msk.f32.gmra.mrb[218].mxu0 %vm1778_vm4, %v14307_v61 }
0x12ea   : > { %6221 = vmatprep.mubr.f32.mxu1 %v16456_v63  ;;  %6466 = vmatprep.mubr.f32.mxu0 %v16456_v63 }
0x12ec   : > { %v14323_v27 = vpop.permute.xlu1 %5951 }
0x12f4   : > { %v14315_v26 = vpop.permute.xlu0 %5949 }
0x12f5   : > { %9157 = vmatmul.mubr.msk.f32.gmra.mrb[218].mxu1 %vm1778_vm4, %v14315_v26  ;;  %9187 = vmatmul.mubr.msk.f32.gmra.mrb[220].mxu0 %vm1778_vm4, %v14315_v26 }
0x12f6   : > { %6227 = vmatprep.mubr.f32.mxu1 %v16456_v63  ;;  %6472 = vmatprep.mubr.f32.mxu0 %v16456_v63 }
0x12f9   : > { %9158 = vmatmul.mubr.msk.f32.gmra.mrb[220].mxu1 %vm1778_vm4, %v14323_v27  ;;  %9188 = vmatmul.mubr.msk.f32.gmra.mrb[222].mxu0 %vm1778_vm4, %v14323_v27 }
0x12fa   : > { %6233 = vmatprep.mubr.f32.mxu1 %v16456_v63  ;;  %6478 = vmatprep.mubr.f32.mxu0 %v16456_v63 }
0x12fc   : > { %v14339_v11 = vpop.permute.xlu1 %5955 }
0x1304   : > { %v14331_v46 = vpop.permute.xlu0 %5953 }
0x1305   : > { %9159 = vmatmul.mubr.msk.f32.gmra.mrb[222].mxu1 %vm1778_vm4, %v14331_v46  ;;  %9189 = vmatmul.mubr.msk.f32.gmra.mrb[224].mxu0 %vm1778_vm4, %v14331_v46 }
0x1306   : > { %6239 = vmatprep.mubr.f32.mxu1 %v16456_v63  ;;  %6484 = vmatprep.mubr.f32.mxu0 %v16456_v63 }
0x1309   : > { %9160 = vmatmul.mubr.msk.f32.gmra.mrb[224].mxu1 %vm1778_vm4, %v14339_v11  ;;  %9190 = vmatmul.mubr.msk.f32.gmra.mrb[226].mxu0 %vm1778_vm4, %v14339_v11 }
0x130a   : > { %6245 = vmatprep.mubr.f32.mxu1 %v16456_v63  ;;  %6490 = vmatprep.mubr.f32.mxu0 %v16456_v63 }
0x130e   : > { %v14347_v56 = vpop.f32.mrb[176].mxu1 }
0x130f   : > { %v14349_v12 = vpop.f32.mrb[178].mxu0  ;;  %v14351_v13 = vpop.f32.mrb[177].mxu1 }
0x1310   : > { %v14353_v38 = vpop.f32.mrb[179].mxu0 }
0x1312   : > { %v14355_v5 = vpop.f32.mrb[178].mxu1 }
0x1313   : > { %v14357_v51 = vpop.f32.mrb[180].mxu0  ;;  %v14359_v22 = vpop.f32.mrb[179].mxu1 }
0x1314   : > { %v14361_v33 = vpop.f32.mrb[181].mxu0 }
0x1315   : > { %v14363_v4 = vpop.permute.xlu0 %5957 }
0x1316   : > { %9161 = vmatmul.mubr.msk.f32.gmra.mrb[226].mxu1 %vm1778_vm4, %v14363_v4  ;;  %9191 = vmatmul.mubr.msk.f32.gmra.mrb[228].mxu0 %vm1778_vm4, %v14363_v4  ;;  %v14369_v21 = vpop.f32.mrb[180].mxu1 }
0x1317   : > { %v14371_v19 = vpop.f32.mrb[182].mxu0  ;;  %6251 = vmatprep.mubr.f32.mxu1 %v16456_v63  ;;  %6496 = vmatprep.mubr.f32.mxu0 %v16456_v63  ;;  %v14375_v17 = vpop.f32.mrb[181].mxu1 }
0x1318   : > { %v14377_v23 = vpop.f32.mrb[183].mxu0 }
0x1319   : > { %v14379_v7 = vpop.permute.xlu1 %5959 }
0x131a   : > { %9162 = vmatmul.mubr.msk.f32.gmra.mrb[228].mxu1 %vm1778_vm4, %v14379_v7  ;;  %9192 = vmatmul.mubr.msk.f32.gmra.mrb[230].mxu0 %vm1778_vm4, %v14379_v7  ;;  %v14385_v52 = vpop.f32.mrb[182].mxu1 }
0x131b   : > { %6257 = vmatprep.mubr.f32.mxu1 %v16456_v63  ;;  %6502 = vmatprep.mubr.f32.mxu0 %v16456_v63  ;;  %v14389_v31 = vpop.f32.mrb[184].mxu0  ;;  %v14391_v10 = vpop.f32.mrb[183].mxu1 }
0x131c   : > { %v14393_v37 = vpop.f32.mrb[185].mxu0 }
0x131e   : > { %v14395_v55 = vpop.f32.mrb[184].mxu1 }
0x131f   : > { %v14397_v18 = vpop.f32.mrb[186].mxu0  ;;  %v14399_v39 = vpop.f32.mrb[185].mxu1 }
0x1320   : > { %v14401_v44 = vpop.f32.mrb[187].mxu0 }
0x1322   : > { %v14403_v53 = vpop.f32.mrb[186].mxu1 }
0x1323   : > { %v14405_v0 = vpop.f32.mrb[188].mxu0  ;;  %v14407_v49 = vpop.f32.mrb[187].mxu1 }
0x1324   : > { %16519 = vst [vmem:[#allocation43_spill] sm:$0xff] %v14407_v49  ;;  %v14409_v30 = vpop.f32.mrb[189].mxu0 }
0x1325   : > { %16520 = vst [vmem:[#allocation37_spill] sm:$0xff] %v14409_v30 }
0x1326   : > { %v14411_v2 = vpop.f32.mrb[188].mxu1 }
0x1327   : > { %16521 = vst [vmem:[#allocation20_spill] sm:$0xff] %v14411_v2  ;;  %v14413_v47 = vpop.f32.mrb[190].mxu0  ;;  %v14415_v32 = vpop.f32.mrb[189].mxu1 }
0x1328   : > { %16522 = vst [vmem:[#allocation53_spill] sm:$0xff] %v14413_v47  ;;  %16523 = vst [vmem:[#allocation55_spill] sm:$0xff] %v14415_v32  ;;  %v14417_v3 = vpop.f32.mrb[191].mxu0 }
0x1329   : > { %16524 = vst [vmem:[#allocation51_spill] sm:$0xff] %v14417_v3  ;;  %v14419_v1 = vpop.permute.xlu0 %5961 }
0x132a   : > { %v14421_v45 = vpop.f32.mrb[190].mxu1  ;;  %9163 = vmatmul.mubr.msk.f32.gmra.mrb[230].mxu1 %vm1778_vm4, %v14419_v1  ;;  %9193 = vmatmul.mubr.msk.f32.gmra.mrb[232].mxu0 %vm1778_vm4, %v14419_v1 }
0x132b   : > { %16525 = vst [vmem:[#allocation66_spill] sm:$0xff] %v14421_v45  ;;  %6263 = vmatprep.mubr.f32.mxu1 %v16456_v63  ;;  %6508 = vmatprep.mubr.f32.mxu0 %v16456_v63  ;;  %v14429_v60 = vpop.f32.mrb[192].mxu0  ;;  %v14431_v47 = vpop.f32.mrb[191].mxu1  ;;  %v10794_v63 = vld [vmem:[%s16109_s8] sm:$0xff]  }
0x132c   : > { %16526 = vst [vmem:[#allocation58_spill] sm:$0xff] %v14429_v60  ;;  %16527 = vst [vmem:[#allocation63_spill] sm:$0xff] %v14431_v47  ;;  %v14433_v32 = vpop.f32.mrb[193].mxu0  ;;  %v16546_v47 = vld [vmem:[#allocation49_spill] sm:$0xff] }
0x132d   : > { %16528 = vst [vmem:[#allocation56_spill] sm:$0xff] %v14433_v32 }
0x132e   : > { %v14435_v3 = vpop.f32.mrb[192].mxu1 }
0x132f   : > { %16529 = vst [vmem:[#allocation73_spill] sm:$0xff] %v14435_v3  ;;  %v14437_v2 = vpop.f32.mrb[194].mxu0  ;;  %v14439_v45 = vpop.f32.mrb[193].mxu1 }
0x1330   : > { %16530 = vst [vmem:[#allocation31_spill] sm:$0xff] %v14437_v2  ;;  %16531 = vst [vmem:[#allocation72_spill] sm:$0xff] %v14439_v45  ;;  %v14441_v30 = vpop.f32.mrb[195].mxu0  ;;  %v14443_v49 = vpop.permute.xlu1 %5963 }
0x1331   : > { %16532 = vst [vmem:[#allocation30_spill] sm:$0xff] %v14441_v30  ;;  %9164 = vmatmul.mubr.msk.f32.gmra.mrb[232].mxu1 %vm1778_vm4, %v14443_v49  ;;  %9194 = vmatmul.mubr.msk.f32.gmra.mrb[234].mxu0 %vm1778_vm4, %v14443_v49  ;;  %v10795_v30 = vld [vmem:[%s16109_s8 + $0x8] sm:$0xff]  }
0x1332   : > { %10120 = vmatprep.mubr.msk.f32.mxu1 %vm1778_vm4, %v13965_v20  ;;  %10175 = vmatprep.mubr.msk.bf16.mxu0 %vm3326_vm5, %v10794_v63  ;;  %v10796_v20 = vld [vmem:[%s16109_s8 + $0x10] sm:$0xff]   ;;  %v10797_v63 = vld [vmem:[%s16109_s8 + $0x18] sm:$0xff]  }
0x1335   : > { %10121 = vmatmul.mubr.msk.f32.vlgmr.msra.gmra.mrb[234].mxu1 %vm1778_vm4, %v14096_v58  ;;  %10176 = vmatmul.mubr.msk.bf16.vlgmr.msra.gmra.mrb[236].mxu0 %vm3326_vm5, %v10795_v30  ;;  %v10798_v30 = vld [vmem:[%s16109_s8 + $0x20] sm:$0xff]   ;;  %v10799_v58 = vld [vmem:[%s16109_s8 + $0x28] sm:$0xff]  }
0x1336   : > { %10123 = vmatprep.mubr.msk.f32.mxu1 %vm1778_vm4, %v14108_v41  ;;  %10179 = vmatprep.mubr.msk.bf16.mxu0 %vm3326_vm5, %v10796_v20  ;;  %v10800_v41 = vld [vmem:[%s16109_s8 + $0x30] sm:$0xff]  }
0x1337   : > { %v10816_v20 = vld [vmem:[%s16109_s8 + $0xb0] sm:$0xff]  }
0x1339   : > { %10124 = vmatmul.mubr.msk.f32.gmra.mrb[236].mxu1 %vm1778_vm4, %v14120_v48  ;;  %v10801_v48 = vld [vmem:[%s16109_s8 + $0x38] sm:$0xff]  }
0x133a   : > { %10126 = vmatprep.mubr.msk.f32.mxu1 %vm1778_vm4, %v14132_v25  ;;  %v10802_v25 = vld [vmem:[%s16109_s8 + $0x40] sm:$0xff]  }
0x133d   : > { %10127 = vmatmul.mubr.msk.f32.gmra.mrb[238].mxu1 %vm1778_vm4, %v14146_v36  ;;  %10180 = vmatmul.mubr.msk.bf16.gmra.mrb[240].mxu0 %vm3326_vm5, %v10797_v63  ;;  %v10804_v36 = vld [vmem:[%s16109_s8 + $0x50] sm:$0xff]  }
0x133e   : > { %10129 = vmatprep.mubr.msk.f32.mxu1 %vm1778_vm4, %v14143_v24  ;;  %10183 = vmatprep.mubr.msk.bf16.mxu0 %vm3326_vm5, %v10798_v30  ;;  %v10803_v24 = vld [vmem:[%s16109_s8 + $0x48] sm:$0xff]  }
0x1341   : > { %10130 = vmatmul.mubr.msk.f32.gmra.mrb[240].mxu1 %vm1778_vm4, %v14164_v16  ;;  %v10806_v16 = vld [vmem:[%s16109_s8 + $0x60] sm:$0xff]  }
0x1342   : > { %10132 = vmatprep.mubr.msk.f32.mxu1 %vm1778_vm4, %v14158_v28  ;;  %v10805_v28 = vld [vmem:[%s16109_s8 + $0x58] sm:$0xff]  }
0x1345   : > { %10133 = vmatmul.mubr.msk.f32.gmra.mrb[242].mxu1 %vm1778_vm4, %v14177_v54  ;;  %10184 = vmatmul.mubr.msk.bf16.gmra.mrb[244].mxu0 %vm3326_vm5, %v10799_v58  ;;  %v10807_v54 = vld [vmem:[%s16109_s8 + $0x68] sm:$0xff]  }
0x1346   : > { %10135 = vmatprep.mubr.msk.f32.mxu1 %vm1778_vm4, %v14211_v42  ;;  %10187 = vmatprep.mubr.msk.bf16.mxu0 %vm3326_vm5, %v10800_v41 }
0x1349   : > { %10136 = vmatmul.mubr.msk.f32.gmra.mrb[244].mxu1 %vm1778_vm4, %v14223_v43 }
0x134a   : > { %10138 = vmatprep.mubr.msk.f32.mxu1 %vm1778_vm4, %v14231_v29  ;;  %v10808_v29 = vld [vmem:[%s16109_s8 + $0x70] sm:$0xff]  }
0x134d   : > { %10139 = vmatmul.mubr.msk.f32.gmra.mrb[246].mxu1 %vm1778_vm4, %v14240_v8  ;;  %10188 = vmatmul.mubr.msk.bf16.gmra.mrb[248].mxu0 %vm3326_vm5, %v10801_v48 }
0x134e   : > { %10141 = vmatprep.mubr.msk.f32.mxu1 %vm1778_vm4, %v14249_v62  ;;  %10191 = vmatprep.mubr.msk.bf16.mxu0 %vm3326_vm5, %v10802_v25 }
0x1351   : > { %10142 = vmatmul.mubr.msk.f32.gmra.mrb[248].mxu1 %vm1778_vm4, %v14259_v9  ;;  %v10809_v9 = vld [vmem:[%s16109_s8 + $0x78] sm:$0xff]  }
0x1352   : > { %10144 = vmatprep.mubr.msk.f32.mxu1 %vm1778_vm4, %v14267_v14  ;;  %v10810_v14 = vld [vmem:[%s16109_s8 + $0x80] sm:$0xff]  }
0x1355   : > { %10145 = vmatmul.mubr.msk.f32.gmra.mrb[250].mxu1 %vm1778_vm4, %v14275_v59  ;;  %10192 = vmatmul.mubr.msk.bf16.gmra.mrb[252].mxu0 %vm3326_vm5, %v10803_v24  ;;  %v10811_v59 = vld [vmem:[%s16109_s8 + $0x88] sm:$0xff]   ;;  %v10817_v24 = vld [vmem:[%s16109_s8 + $0xb8] sm:$0xff]  }
0x1356   : > { %10147 = vmatprep.mubr.msk.f32.mxu1 %vm1778_vm4, %v14283_v40  ;;  %10195 = vmatprep.mubr.msk.bf16.mxu0 %vm3326_vm5, %v10804_v36  ;;  %v10814_v40 = vld [vmem:[%s16109_s8 + $0xa0] sm:$0xff]  }
0x1359   : > { %10148 = vmatmul.mubr.msk.f32.gmra.mrb[252].mxu1 %vm1778_vm4, %v14291_v35 }
0x135a   : > { %10150 = vmatprep.mubr.msk.f32.mxu1 %vm1778_vm4, %v14299_v50 }
0x135d   : > { %10151 = vmatmul.mubr.msk.f32.gmra.mrb[254].mxu1 %vm1778_vm4, %v14307_v61  ;;  %10196 = vmatmul.mubr.msk.bf16.gmra.mrb[0].mxu0 %vm3326_vm5, %v10805_v28 }
0x135e   : > { %10153 = vmatprep.mubr.msk.f32.mxu1 %vm1778_vm4, %v14315_v26  ;;  %10199 = vmatprep.mubr.msk.bf16.mxu0 %vm3326_vm5, %v10806_v16  ;;  %v10818_v16 = vld [vmem:[%s16109_s8 + $0xc0] sm:$0xff]  }
0x1361   : > { %10154 = vmatmul.mubr.msk.f32.gmra.mrb[0].mxu1 %vm1778_vm4, %v14323_v27 }
0x1362   : > { %10156 = vmatprep.mubr.msk.f32.mxu1 %vm1778_vm4, %v14331_v46 }
0x1365   : > { %10157 = vmatmul.mubr.msk.f32.gmra.mrb[2].mxu1 %vm1778_vm4, %v14339_v11  ;;  %10200 = vmatmul.mubr.msk.bf16.gmra.mrb[4].mxu0 %vm3326_vm5, %v10807_v54  ;;  %v10815_v11 = vld [vmem:[%s16109_s8 + $0xa8] sm:$0xff]  }
0x1366   : > { %10159 = vmatprep.mubr.msk.f32.mxu1 %vm1778_vm4, %v14363_v4  ;;  %10203 = vmatprep.mubr.msk.bf16.mxu0 %vm3326_vm5, %v10808_v29 }
0x1367   : > { %v14559_v42 = vpop.f32.mrb[194].mxu1  ;;  %v14561_v43 = vpop.f32.mrb[196].mxu0 }
0x1368   : > { %v14567_v8 = vpop.f32.mrb[195].mxu1  ;;  %v14569_v62 = vpop.f32.mrb[197].mxu0 }
0x1369   : > { %10160 = vmatmul.mubr.msk.f32.gmra.mrb[4].mxu1 %vm1778_vm4, %v14379_v7 }
0x136a   : > { %10162 = vmatprep.mubr.msk.f32.mxu1 %vm1778_vm4, %v14419_v1  ;;  %v10812_v1 = vld [vmem:[%s16109_s8 + $0x90] sm:$0xff]  }
0x136d   : > { %10163 = vmatmul.mubr.msk.f32.gmra.mrb[6].mxu1 %vm1778_vm4, %v14443_v49  ;;  %10204 = vmatmul.mubr.msk.bf16.gmra.mrb[8].mxu0 %vm3326_vm5, %v10809_v9  ;;  %v10813_v49 = vld [vmem:[%s16109_s8 + $0x98] sm:$0xff]  }
0x136e   : > { %10207 = vmatprep.mubr.msk.bf16.mxu0 %vm3326_vm5, %v10810_v14 }
0x1375   : > { %10208 = vmatmul.mubr.msk.bf16.gmra.mrb[12].mxu0 %vm3326_vm5, %v10811_v59  ;;  %v16539_v59 = vld [vmem:[#allocation44_spill] sm:$0xff] }
0x1376   : > { %10211 = vmatprep.mubr.msk.bf16.mxu0 %vm3326_vm5, %v10812_v1  ;;  %v6730_v1 = vsub.f32 %v16539_v59, %v14073_v6  ;;  %v10820_v6 = vld [vmem:[%s16109_s8 + $0xd0] sm:$0xff]   ;;  %v6735_v60 = vsub.f32 %v16539_v59, %v14347_v56 }
0x137d   : > { %10212 = vmatmul.mubr.msk.bf16.gmra.mrb[16].mxu0 %vm3326_vm5, %v10813_v49  ;;  %v16540_v49 = vld [vmem:[#allocation45_spill] sm:$0xff] }
0x137e   : > { %10215 = vmatprep.mubr.msk.bf16.mxu0 %vm3326_vm5, %v10814_v40  ;;  %v6732_v40 = vsub.f32 %v16540_v49, %v14075_v57 }
0x1380   : > { %v6782_v3 = vand.u32 2147483647, %v6732_v40 }
0x1381   : > { %v14601_v35 = vpop.f32.mrb[196].mxu1  ;;  %v14603_v50 = vpop.f32.mrb[198].mxu0 }
0x1382   : > { %v14605_v61 = vpop.f32.mrb[197].mxu1  ;;  %v14607_v26 = vpop.f32.mrb[199].mxu0 }
0x1385   : > { %v14609_v27 = vpop.f32.mrb[198].mxu1  ;;  %v14611_v46 = vpop.f32.mrb[200].mxu0  ;;  %10216 = vmatmul.mubr.msk.bf16.gmra.mrb[20].mxu0 %vm3326_vm5, %v10815_v11  ;;  %v16541_v11 = vld [vmem:[#allocation48_spill] sm:$0xff] }
0x1386   : > { %v14617_v4 = vpop.f32.mrb[199].mxu1  ;;  %v14619_v7 = vpop.f32.mrb[201].mxu0  ;;  %10219 = vmatprep.mubr.msk.bf16.mxu0 %vm3326_vm5, %v10816_v20  ;;  %v6731_v20 = vsub.f32 %v16541_v11, %v14077_v15  ;;  %v6780_v15 = vand.u32 2147483647, %v6730_v1 }
0x1388   : > { %v6781_v32 = vand.u32 2147483647, %v6731_v20  ;;  %v6830_v40 = vsub.f32 1.0, %v6780_v15  ;;  %v6832_v20 = vsub.f32 1.0, %v6782_v3  ;;  %v10822_v3 = vld [vmem:[%s16109_s8 + $0xe0] sm:$0xff]  }
0x1389   : > { %v14625_v63 = vpop.f32.mrb[200].mxu1  ;;  %v14627_v30 = vpop.f32.mrb[202].mxu0 }
0x138a   : > { %v14629_v58 = vpop.f32.mrb[201].mxu1  ;;  %v14631_v41 = vpop.f32.mrb[203].mxu0  ;;  %v6831_v56 = vsub.f32 1.0, %v6781_v32 }
0x138d   : > { %v14633_v48 = vpop.f32.mrb[202].mxu1  ;;  %v14635_v25 = vpop.f32.mrb[204].mxu0  ;;  %10220 = vmatmul.mubr.msk.bf16.gmra.mrb[24].mxu0 %vm3326_vm5, %v10817_v24  ;;  %v10819_v24 = vld [vmem:[%s16109_s8 + $0xc8] sm:$0xff]  }
0x138e   : > { %v14641_v36 = vpop.f32.mrb[203].mxu1  ;;  %v14643_v28 = vpop.f32.mrb[205].mxu0  ;;  %10223 = vmatprep.mubr.msk.bf16.mxu0 %vm3326_vm5, %v10818_v16 }
0x138f   : > { %16533 = vst [vmem:[#allocation36_spill] sm:$0xff] %v14641_v36  ;;  %16534 = vst [vmem:[#allocation34_spill] sm:$0xff] %v14643_v28 }
0x1393   : > { %v14649_v54 = vpop.f32.mrb[204].mxu1  ;;  %v14651_v29 = vpop.f32.mrb[206].mxu0 }
0x1394   : > { %16535 = vst [vmem:[#allocation35_spill] sm:$0xff] %v14649_v54  ;;  %16536 = vst [vmem:[#allocation33_spill] sm:$0xff] %v14651_v29  ;;  %v14653_v9 = vpop.f32.mrb[205].mxu1  ;;  %v14655_v14 = vpop.f32.mrb[207].mxu0 }
0x1395   : > { %16537 = vst [vmem:[#allocation50_spill] sm:$0xff] %v14653_v9  ;;  %16538 = vst [vmem:[#allocation41_spill] sm:$0xff] %v14655_v14  ;;  %10224 = vmatmul.mubr.msk.bf16.gmra.mrb[28].mxu0 %vm3326_vm5, %v10819_v24  ;;  %v6733_v24 = vsub.f32 %v16546_v47, %v14079_v34 }
0x1396   : > { %10227 = vmatprep.mubr.msk.bf16.mxu0 %vm3326_vm5, %v10820_v6  ;;  %v6738_v6 = vsub.f32 %v16546_v47, %v14353_v38 }
0x1397   : > { %v14667_v16 = vpop.f32.mrb[206].mxu1  ;;  %v14669_v45 = vpop.f32.mrb[208].mxu0  ;;  %v6783_v14 = vand.u32 2147483647, %v6733_v24  ;;  %v6742_v24 = vsub.f32 %v16540_v49, %v14357_v51 }
0x1398   : > { %16542 = vst [vmem:[#allocation46_spill] sm:$0xff] %v14667_v16  ;;  %16543 = vst [vmem:[#allocation38_spill] sm:$0xff] %v14669_v45  ;;  %v14675_v57 = vpop.f32.mrb[207].mxu1  ;;  %v14677_v2 = vpop.f32.mrb[209].mxu0  ;;  %v6737_v45 = vsub.f32 %v16540_v49, %v14349_v12  ;;  %v6736_v16 = vsub.f32 %v16541_v11, %v14351_v13  ;;  %v10821_v12 = vld [vmem:[%s16109_s8 + $0xd8] sm:$0xff]  }
0x1399   : > { %16544 = vst [vmem:[#allocation21_spill] sm:$0xff] %v14675_v57  ;;  %16545 = vst [vmem:[#allocation54_spill] sm:$0xff] %v14677_v2  ;;  %v6785_v13 = vand.u32 2147483647, %v6735_v60  ;;  %v6788_v32 = vand.u32 2147483647, %v6738_v6 }
0x139a   : > { %v6787_v38 = vand.u32 2147483647, %v6737_v45  ;;  %v6786_v15 = vand.u32 2147483647, %v6736_v16  ;;  %v14715_v45 = vmax.f32 %v6830_v40, 0.0  ;;  %v6745_v16 = vsub.f32 %v16539_v59, %v14369_v21 }
0x139b   : > { %v14689_v57 = vpop.f32.mrb[208].mxu1  ;;  %v14691_v1 = vpop.f32.mrb[210].mxu0  ;;  %v6746_v40 = vsub.f32 %v16541_v11, %v14375_v17  ;;  %v6838_v9 = vsub.f32 1.0, %v6788_v32 }
0x139c   : > { %16547 = vst [vmem:[#allocation71_spill] sm:$0xff] %v14689_v57  ;;  %16548 = vst [vmem:[#allocation52_spill] sm:$0xff] %v14691_v1  ;;  %v14693_v2 = vpop.f32.mrb[209].mxu1  ;;  %v14695_v34 = vpop.f32.mrb[211].mxu0  ;;  %v6740_v57 = vsub.f32 %v16539_v59, %v14355_v5  ;;  %v14717_v5 = vmax.f32 %v6832_v20, 0.0  ;;  %v6835_v20 = vsub.f32 1.0, %v6785_v13  ;;  %v6750_v13 = vsub.f32 %v16539_v59, %v14385_v52 }
0x139d   : > { %16549 = vst [vmem:[#allocation67_spill] sm:$0xff] %v14693_v2  ;;  %16550 = vst [vmem:[#allocation59_spill] sm:$0xff] %v14695_v34  ;;  %10228 = vmatmul.mubr.msk.bf16.gmra.mrb[32].mxu0 %vm3326_vm5, %v10821_v12  ;;  %v6741_v34 = vsub.f32 %v16541_v11, %v14359_v22  ;;  %v6743_v2 = vsub.f32 %v16546_v47, %v14361_v33  ;;  %v6833_v22 = vsub.f32 1.0, %v6783_v14  ;;  %v6836_v21 = vsub.f32 1.0, %v6786_v15 }
0x139e   : > { %10231 = vmatprep.mubr.msk.bf16.mxu0 %vm3326_vm5, %v10822_v3  ;;  %v14727_v3 = vmax.f32 %v6831_v56, 0.0  ;;  %v6790_v1 = vand.u32 2147483647, %v6740_v57  ;;  %v6748_v33 = vsub.f32 %v16546_v47, %v14377_v23  ;;  %v6795_v56 = vand.u32 2147483647, %v6745_v16  ;;  %v10823_v23 = vld [vmem:[%s16109_s8 + $0xe8] sm:$0xff]  }
0x139f   : > { %v14711_v12 = vpop.f32.mrb[210].mxu1  ;;  %v14713_v60 = vpop.f32.mrb[212].mxu0  ;;  %v6791_v29 = vand.u32 2147483647, %v6741_v34  ;;  %v6796_v28 = vand.u32 2147483647, %v6746_v40  ;;  %v6752_v52 = vsub.f32 %v16540_v49, %v14389_v31 }
0x13a0   : > { %16551 = vst [vmem:[#allocation64_spill] sm:$0xff] %v14711_v12  ;;  %16552 = vst [vmem:[#allocation57_spill] sm:$0xff] %v14713_v60  ;;  %v14723_v6 = vpop.f32.mrb[211].mxu1  ;;  %v14725_v51 = vpop.f32.mrb[213].mxu0  ;;  %v6747_v60 = vsub.f32 %v16540_v49, %v14371_v19  ;;  %v6837_v12 = vsub.f32 1.0, %v6787_v38  ;;  %v14747_v57 = vmax.f32 %v6833_v22, 0.0 }
0x13a1   : > { %16553 = vst [vmem:[#allocation22_spill] sm:$0xff] %v14723_v6  ;;  %16554 = vst [vmem:[#allocation17_spill] sm:$0xff] %v14725_v51  ;;  %v6792_v6 = vand.u32 2147483647, %v6742_v24  ;;  %v6793_v51 = vand.u32 2147483647, %v6743_v2 }
0x13a2   : > { %v6797_v19 = vand.u32 2147483647, %v6747_v60  ;;  %v6840_v2 = vsub.f32 1.0, %v6790_v1  ;;  %v6798_v34 = vand.u32 2147483647, %v6748_v33  ;;  %v10824_v38 = vld [vmem:[%s16109_s8 + $0xf0] sm:$0xff]  }
0x13a3   : > { %v14735_v54 = vpop.f32.mrb[212].mxu1  ;;  %v14737_v14 = vpop.f32.mrb[214].mxu0  ;;  %v14755_v15 = vmax.f32 %v6835_v20, 0.0  ;;  %v14757_v32 = vmax.f32 %v6837_v12, 0.0  ;;  %v14759_v24 = vmax.f32 %v6836_v21, 0.0  ;;  %v6842_v60 = vsub.f32 1.0, %v6792_v6 }
0x13a4   : > { %16555 = vst [vmem:[#allocation18_spill] sm:$0xff] %v14735_v54  ;;  %16556 = vst [vmem:[#allocation19_spill] sm:$0xff] %v14737_v14  ;;  %v14739_v36 = vpop.f32.mrb[213].mxu1  ;;  %v14741_v17 = vpop.f32.mrb[215].mxu0  ;;  %v14761_v16 = vmax.f32 %v6838_v9, 0.0  ;;  %v6841_v1 = vsub.f32 1.0, %v6791_v29 }
0x13a5   : > { %16557 = vst [vmem:[#allocation7_spill] sm:$0xff] %v14739_v36  ;;  %16558 = vst [vmem:[#allocation5_spill] sm:$0xff] %v14741_v17  ;;  %10232 = vmatmul.mubr.msk.bf16.gmra.mrb[36].mxu0 %vm3326_vm5, %v10823_v23  ;;  %v6843_v22 = vsub.f32 1.0, %v6793_v51  ;;  %v6845_v40 = vsub.f32 1.0, %v6795_v56  ;;  %v6847_v33 = vsub.f32 1.0, %v6797_v19  ;;  %v6846_v23 = vsub.f32 1.0, %v6796_v28 }
0x13a6   : > { %10235 = vmatprep.mubr.msk.bf16.mxu0 %vm3326_vm5, %v10824_v38  ;;  %v6751_v38 = vsub.f32 %v16541_v11, %v14391_v10  ;;  %v14767_v20 = vmax.f32 %v6840_v2, 0.0  ;;  %v6848_v12 = vsub.f32 1.0, %v6798_v34  ;;  %v6800_v17 = vand.u32 2147483647, %v6750_v13  ;;  %v16559_v21 = vld [vmem:[#allocation61_spill] sm:$0xff]  ;;  %v16560_v29 = vld [vmem:[#allocation62_spill] sm:$0xff] }
0x13a7   : > { %v6930_v6 = vsub.f32 %v16559_v21, %v14559_v42  ;;  %v14771_v9 = vmax.f32 %v6842_v60, 0.0  ;;  %v6932_v51 = vsub.f32 %v16560_v29, %v14561_v43  ;;  %v16561_v31 = vld [vmem:[#allocation60_spill] sm:$0xff]  ;;  %v16562_v28 = vld [vmem:[#allocation65_spill] sm:$0xff]  ;;  %v14779_v36 = vmax.f32 %v6841_v1, 0.0 }
0x13a8   : > { %v6931_v56 = vsub.f32 %v16561_v31, %v14567_v8  ;;  %v6933_v19 = vsub.f32 %v16562_v28, %v14569_v62  ;;  %v14781_v10 = vmax.f32 %v6843_v22, 0.0  ;;  %v6802_v2 = vand.u32 2147483647, %v6752_v52  ;;  %v10825_v8 = vld [vmem:[%s16109_s8 + $0xf8] sm:$0xff]   ;;  %v10826_v52 = vld [vmem:[%s16109_s8 + $0x100] sm:$0xff]  }
0x13a9   : > { %v6753_v34 = vsub.f32 %v16546_v47, %v14393_v37  ;;  %v14785_v42 = vmax.f32 %v6845_v40, 0.0  ;;  %v14787_v13 = vmax.f32 %v6847_v33, 0.0  ;;  %v14789_v60 = vmax.f32 %v6846_v23, 0.0 }
0x13aa   : > { %v6801_v43 = vand.u32 2147483647, %v6751_v38  ;;  %v14795_v62 = vmax.f32 %v6848_v12, 0.0  ;;  %v6850_v1 = vsub.f32 1.0, %v6800_v17  ;;  %v6755_v22 = vsub.f32 %v16539_v59, %v14395_v55 }
0x13ab   : > { %v6980_v37 = vand.u32 2147483647, %v6930_v6  ;;  %v6982_v40 = vand.u32 2147483647, %v6932_v51  ;;  %v6981_v33 = vand.u32 2147483647, %v6931_v56  ;;  %v6935_v12 = vsub.f32 %v16559_v21, %v14601_v35 }
0x13ac   : > { %16563 = vst [vmem:[#allocation2_spill] sm:$0xff] %v14795_v62  ;;  %v6983_v23 = vand.u32 2147483647, %v6933_v19  ;;  %v6852_v38 = vsub.f32 1.0, %v6802_v2  ;;  %v14803_v14 = vand.u32 2147483647, %v6753_v34  ;;  %v6937_v17 = vsub.f32 %v16560_v29, %v14603_v50 }
0x13ad   : > { %10236 = vmatmul.mubr.msk.bf16.gmra.mrb[40].mxu0 %vm3326_vm5, %v10825_v8  ;;  %v6851_v55 = vsub.f32 1.0, %v6801_v43  ;;  %v6757_v6 = vsub.f32 %v16540_v49, %v14397_v18  ;;  %v6936_v8 = vsub.f32 %v16561_v31, %v14605_v61  ;;  %v6938_v51 = vsub.f32 %v16562_v28, %v14607_v26 }
0x13ae   : > { %10239 = vmatprep.mubr.msk.bf16.mxu0 %vm3326_vm5, %v10826_v52  ;;  %v14815_v56 = vmax.f32 %v6850_v1, 0.0  ;;  %v14817_v19 = vand.u32 2147483647, %v6755_v22  ;;  %v6756_v35 = vsub.f32 %v16541_v11, %v14399_v39  ;;  %v6758_v50 = vsub.f32 %v16546_v47, %v14401_v44  ;;  %v10827_v39 = vld [vmem:[%s16109_s8 + $0x108] sm:$0xff]  }
0x13af   : > { %v7030_v2 = vsub.f32 1.0, %v6980_v37  ;;  %v7032_v34 = vsub.f32 1.0, %v6982_v40  ;;  %v7031_v43 = vsub.f32 1.0, %v6981_v33  ;;  %v7033_v18 = vsub.f32 1.0, %v6983_v23  ;;  %v10828_v23 = vld [vmem:[%s16109_s8 + $0x110] sm:$0xff]  }
0x13b0   : > { %16564 = vst [vmem:[#allocation12_spill] sm:$0xff] %v14815_v56  ;;  %v14823_v52 = vmax.f32 %v6852_v38, 0.0  ;;  %v6985_v54 = vand.u32 2147483647, %v6935_v12  ;;  %v6987_v26 = vand.u32 2147483647, %v6937_v17 }
0x13b1   : > { %v14826_v1 = vand.u32 2147483647, %v6757_v6  ;;  %v6986_v22 = vand.u32 2147483647, %v6936_v8  ;;  %v6988_v56 = vand.u32 2147483647, %v6938_v51 }
0x13b2   : > { %16565 = vst [vmem:[#allocation6_spill] sm:$0xff] %v14823_v52  ;;  %v14832_v44 = vmax.f32 %v6851_v55, 0.0  ;;  %v14835_v40 = vand.u32 2147483647, %v6756_v35  ;;  %v14837_v33 = vand.u32 2147483647, %v6758_v50 }
0x13b3   : > { %v7080_v38 = vmax.f32 %v7030_v2, 0.0  ;;  %v7082_v12 = vmax.f32 %v7032_v34, 0.0  ;;  %v7081_v17 = vmax.f32 %v7031_v43, 0.0  ;;  %v7083_v6 = vmax.f32 %v7033_v18, 0.0 }
0x13b4   : > { %16566 = vst [vmem:[#allocation16_spill] sm:$0xff] %v14832_v44  ;;  %v7035_v55 = vsub.f32 1.0, %v6985_v54  ;;  %v7036_v44 = vsub.f32 1.0, %v6986_v22  ;;  %v7038_v52 = vsub.f32 1.0, %v6988_v56  ;;  %v6940_v2 = vsub.f32 %v16559_v21, %v14609_v27 }
0x13b5   : > { %10240 = vmatmul.mubr.msk.bf16.gmra.mrb[44].mxu0 %vm3326_vm5, %v10827_v39  ;;  %v7037_v39 = vsub.f32 1.0, %v6987_v26  ;;  %v6942_v34 = vsub.f32 %v16560_v29, %v14611_v46 }
0x13b6   : > { %10243 = vmatprep.mubr.msk.bf16.mxu0 %vm3326_vm5, %v10828_v23 }
0x13b7   : > { %v7087_v27 = vmax.f32 %v7037_v39, 0.0 }
0x13b8   : > { %v6211_v8 = vpop.f32.mrb[214].mxu1  ;;  %v6456_v51 = vpop.f32.mrb[216].mxu0 }
0x13b9   : > { %v7130_v37 = vmul.f32 %v14715_v45, %v6211_v8  ;;  %v7132_v35 = vmul.f32 %v14717_v5, %v6456_v51  ;;  %v6213_v50 = vpop.f32.mrb[215].mxu1  ;;  %v6458_v61 = vpop.f32.mrb[217].mxu0  ;;  %v6941_v45 = vsub.f32 %v16561_v31, %v14617_v4  ;;  %v6943_v5 = vsub.f32 %v16562_v28, %v14619_v7  ;;  %v10829_v7 = vld [vmem:[%s16109_s8 + $0x118] sm:$0xff]  }
0x13ba   : > { %v7131_v62 = vmul.f32 %v14727_v3, %v6213_v50  ;;  %v7133_v23 = vmul.f32 %v14747_v57, %v6458_v61  ;;  %v7085_v61 = vmax.f32 %v7035_v55, 0.0  ;;  %v6945_v51 = vsub.f32 %v16559_v21, %v14625_v63 }
0x13bb   : > { %v14851_v54 = vmul.f32 %v7130_v37, %v7080_v38  ;;  %v14853_v43 = vmul.f32 %v7132_v35, %v7082_v12  ;;  %v7086_v38 = vmax.f32 %v7036_v44, 0.0  ;;  %v7088_v12 = vmax.f32 %v7038_v52, 0.0 }
0x13bc   : > { %v7181_v56 = vmul.f32 %v7131_v62, %v7081_v17  ;;  %v14859_v3 = vmul.f32 %v7133_v23, %v7083_v6  ;;  %v6217_v57 = vpop.f32.mrb[216].mxu1  ;;  %v6462_v18 = vpop.f32.mrb[218].mxu0  ;;  %v6990_v62 = vand.u32 2147483647, %v6940_v2  ;;  %v6992_v17 = vand.u32 2147483647, %v6942_v34 }
0x13bd   : > { %16567 = vst [vmem:[#allocation11_spill] sm:$0xff] %v14853_v43  ;;  %v7135_v26 = vmul.f32 %v14755_v15, %v6217_v57  ;;  %v7137_v46 = vmul.f32 %v14757_v32, %v6462_v18  ;;  %v6219_v22 = vpop.f32.mrb[217].mxu1  ;;  %v6464_v37 = vpop.f32.mrb[219].mxu0  ;;  %10244 = vmatmul.mubr.msk.bf16.gmra.mrb[48].mxu0 %vm3326_vm5, %v10829_v7  ;;  %v10830_v32 = vld [vmem:[%s16109_s8 + $0x120] sm:$0xff]   ;;  %v6947_v55 = vsub.f32 %v16560_v29, %v14627_v30  ;;  %v16571_v63 = vsub.f32 1.0, %v14803_v14  ;;  %v16572_v57 = vld [vmem:[#allocation43_spill] sm:$0xff] }
0x13be   : > { %16568 = vst [vmem:[#allocation10_spill] sm:$0xff] %v14859_v3  ;;  %v7136_v4 = vmul.f32 %v14759_v24, %v6219_v22  ;;  %v7138_v8 = vmul.f32 %v14761_v16, %v6464_v37  ;;  %10247 = vmatprep.mubr.msk.bf16.mxu0 %vm3326_vm5, %v10830_v32  ;;  %v6991_v24 = vand.u32 2147483647, %v6941_v45  ;;  %v6993_v16 = vand.u32 2147483647, %v6943_v5 }
0x13bf   : > { %v14869_v6 = vmul.f32 %v7135_v26, %v7085_v61  ;;  %v14871_v15 = vmul.f32 %v7137_v46, %v7087_v27  ;;  %v6946_v50 = vsub.f32 %v16561_v31, %v14629_v58  ;;  %v6948_v23 = vsub.f32 %v16562_v28, %v14631_v41 }
0x13c0   : > { %v7186_v52 = vmul.f32 %v7136_v4, %v7086_v38  ;;  %v14877_v44 = vmul.f32 %v7138_v8, %v7088_v12  ;;  %v14895_v45 = vmax.f32 %v16571_v63, 0.0  ;;  %v6760_v30 = vsub.f32 %v16539_v59, %v14403_v53  ;;  %v10831_v12 = vld [vmem:[%s16109_s8 + $0x128] sm:$0xff]  }
0x13c1   : > { %16569 = vst [vmem:[#allocation15_spill] sm:$0xff] %v14871_v15  ;;  %v6762_v5 = vsub.f32 %v16540_v49, %v14405_v0  ;;  %v6761_v58 = vsub.f32 %v16541_v11, %v16572_v57  ;;  %v7040_v18 = vsub.f32 1.0, %v6990_v62  ;;  %v7042_v61 = vsub.f32 1.0, %v6992_v17  ;;  %v16574_v62 = vld [vmem:[#allocation37_spill] sm:$0xff]  ;;  %v10832_v17 = vld [vmem:[%s16109_s8 + $0x130] sm:$0xff]  }
0x13c2   : > { %16570 = vst [vmem:[#allocation14_spill] sm:$0xff] %v14877_v44  ;;  %v7231_v2 = vpack.c.bf16 %v7186_v52, %v7181_v56  ;;  %v7041_v41 = vsub.f32 1.0, %v6991_v24  ;;  %v7043_v56 = vsub.f32 1.0, %v6993_v16  ;;  %v6857_v27 = vsub.f32 1.0, %v14826_v1 }
0x13c3   : > { %v6856_v14 = vsub.f32 1.0, %v14835_v40  ;;  %v6995_v26 = vand.u32 2147483647, %v6945_v51  ;;  %v6997_v46 = vand.u32 2147483647, %v6947_v55  ;;  %v16573_v22 = vsub.f32 1.0, %v14817_v19 }
0x13c4   : > { %7765 = vmatprep.mubr.bf16.mxu1 %v7231_v2  ;;  %v6858_v0 = vsub.f32 1.0, %v14837_v33  ;;  %v6996_v37 = vand.u32 2147483647, %v6946_v50  ;;  %v6998_v38 = vand.u32 2147483647, %v6948_v23  ;;  %v6763_v19 = vsub.f32 %v16546_v47, %v16574_v62  ;;  %v16588_v33 = vld [vmem:[#allocation55_spill] sm:$0xff] }
0x13c5   : > { %v14907_v53 = vmax.f32 %v16573_v22, 0.0  ;;  %10248 = vmatmul.mubr.msk.bf16.gmra.mrb[52].mxu0 %vm3326_vm5, %v10831_v12  ;;  %v14914_v4 = vand.u32 2147483647, %v6760_v30  ;;  %v14916_v8 = vand.u32 2147483647, %v6762_v5  ;;  %v7090_v32 = vmax.f32 %v7040_v18, 0.0 }
0x13c6   : > { %v14918_v7 = vand.u32 2147483647, %v6761_v58  ;;  %10251 = vmatprep.mubr.msk.bf16.mxu0 %vm3326_vm5, %v10832_v17  ;;  %v7092_v24 = vmax.f32 %v7042_v61, 0.0  ;;  %v7091_v16 = vmax.f32 %v7041_v41, 0.0  ;;  %v7093_v52 = vmax.f32 %v7043_v56, 0.0 }
0x13c7   : > { %v7045_v50 = vsub.f32 1.0, %v6995_v26  ;;  %v7047_v23 = vsub.f32 1.0, %v6997_v46  ;;  %v7046_v57 = vsub.f32 1.0, %v6996_v37  ;;  %v7048_v58 = vsub.f32 1.0, %v6998_v38  ;;  %v16577_v26 = vld [vmem:[#allocation34_spill] sm:$0xff] }
0x13c8   : > { %v6223_v51 = vpop.f32.mrb[218].mxu1  ;;  %v6468_v55 = vpop.f32.mrb[220].mxu0  ;;  %v6950_v18 = vsub.f32 %v16559_v21, %v14633_v48  ;;  %v6952_v61 = vsub.f32 %v16560_v29, %v14635_v25  ;;  %v6953_v46 = vsub.f32 %v16562_v28, %v16577_v26  ;;  %v16584_v26 = vld [vmem:[#allocation50_spill] sm:$0xff] }
0x13c9   : > { %v7140_v2 = vmul.f32 %v14767_v20, %v6223_v51  ;;  %v7142_v63 = vmul.f32 %v14771_v9, %v6468_v55  ;;  %v6225_v30 = vpop.f32.mrb[219].mxu1  ;;  %v6470_v5 = vpop.f32.mrb[221].mxu0  ;;  %v16576_v20 = vld [vmem:[#allocation36_spill] sm:$0xff]  ;;  %v7095_v48 = vmax.f32 %v7045_v50, 0.0  ;;  %v7097_v62 = vmax.f32 %v7047_v23, 0.0 }
0x13ca   : > { %v7141_v22 = vmul.f32 %v14779_v36, %v6225_v30  ;;  %v7143_v12 = vmul.f32 %v14781_v10, %v6470_v5  ;;  %v6951_v9 = vsub.f32 %v16561_v31, %v16576_v20  ;;  %v7096_v51 = vmax.f32 %v7046_v57, 0.0 }
0x13cb   : > { %v14934_v41 = vmul.f32 %v7140_v2, %v7090_v32  ;;  %v14936_v56 = vmul.f32 %v7142_v63, %v7092_v24  ;;  %v7098_v55 = vmax.f32 %v7048_v58, 0.0  ;;  %v16579_v63 = vld [vmem:[#allocation2_spill] sm:$0xff]  ;;  %v7002_v50 = vand.u32 2147483647, %v6952_v61 }
0x13cc   : > { %v14942_v37 = vmul.f32 %v7141_v22, %v7091_v16  ;;  %v14944_v36 = vmul.f32 %v7143_v12, %v7093_v52  ;;  %v6229_v10 = vpop.f32.mrb[220].mxu1  ;;  %v6474_v38 = vpop.f32.mrb[222].mxu0  ;;  %v10833_v16 = vld [vmem:[%s16109_s8 + $0x138] sm:$0xff]   ;;  %v7000_v52 = vand.u32 2147483647, %v6950_v18 }
0x13cd   : > { %16575 = vst [vmem:[#allocation8_spill] sm:$0xff] %v14936_v56  ;;  %v7145_v25 = vmul.f32 %v14785_v42, %v6229_v10  ;;  %v7147_v17 = vmul.f32 %v14787_v13, %v6474_v38  ;;  %v6231_v32 = vpop.f32.mrb[221].mxu1  ;;  %v6476_v24 = vpop.f32.mrb[223].mxu0  ;;  %10252 = vmatmul.mubr.msk.bf16.gmra.mrb[56].mxu0 %vm3326_vm5, %v10833_v16  ;;  %v7001_v13 = vand.u32 2147483647, %v6951_v9  ;;  %v16583_v12 = vld [vmem:[#allocation33_spill] sm:$0xff]  ;;  %v6956_v9 = vsub.f32 %v16561_v31, %v16584_v26 }
0x13ce   : > { %16578 = vst [vmem:[#allocation13_spill] sm:$0xff] %v14944_v36  ;;  %v7146_v2 = vmul.f32 %v14789_v60, %v6231_v32  ;;  %v7148_v30 = vmul.f32 %v16579_v63, %v6476_v24  ;;  %v7003_v5 = vand.u32 2147483647, %v6953_v46  ;;  %v16582_v60 = vld [vmem:[#allocation35_spill] sm:$0xff]  ;;  %v6957_v20 = vsub.f32 %v16560_v29, %v16583_v12  ;;  %v16585_v46 = vld [vmem:[#allocation41_spill] sm:$0xff] }
0x13cf   : > { %v14954_v23 = vmul.f32 %v7145_v25, %v7095_v48  ;;  %v14956_v42 = vmul.f32 %v7147_v17, %v7097_v62  ;;  %v6955_v22 = vsub.f32 %v16559_v21, %v16582_v60  ;;  %v6958_v10 = vsub.f32 %v16562_v28, %v16585_v46 }
0x13d0   : > { %v14958_v57 = vmul.f32 %v7146_v2, %v7096_v51  ;;  %v14960_v58 = vmul.f32 %v7148_v30, %v7098_v55  ;;  %v6907_v62 = vmax.f32 %v6857_v27, 0.0  ;;  %v6906_v25 = vmax.f32 %v6856_v14, 0.0  ;;  %v16586_v30 = vld [vmem:[#allocation20_spill] sm:$0xff]  ;;  %v16599_v27 = vld [vmem:[#allocation51_spill] sm:$0xff] }
0x13d1   : > { %16580 = vst [vmem:[#allocation4_spill] sm:$0xff] %v14956_v42  ;;  %v6860_v17 = vsub.f32 1.0, %v14914_v4  ;;  %v14983_v32 = vand.u32 2147483647, %v6763_v19  ;;  %v7050_v24 = vsub.f32 1.0, %v7000_v52  ;;  %v7052_v51 = vsub.f32 1.0, %v7002_v50 }
0x13d2   : > { %16581 = vst [vmem:[#allocation9_spill] sm:$0xff] %v14960_v58  ;;  %v7051_v55 = vsub.f32 1.0, %v7001_v13  ;;  %v7053_v2 = vsub.f32 1.0, %v7003_v5  ;;  %v6908_v63 = vmax.f32 %v6858_v0, 0.0  ;;  %v6765_v16 = vsub.f32 %v16539_v59, %v16586_v30  ;;  %v16587_v50 = vld [vmem:[#allocation53_spill] sm:$0xff] }
0x13d3   : > { %v7005_v60 = vand.u32 2147483647, %v6955_v22  ;;  %v7007_v1 = vand.u32 2147483647, %v6957_v20  ;;  %v7006_v14 = vand.u32 2147483647, %v6956_v9  ;;  %v6767_v13 = vsub.f32 %v16540_v49, %v16587_v50 }
0x13d4   : > { %v7008_v4 = vand.u32 2147483647, %v6958_v10  ;;  %v14991_v19 = vmax.f32 %v6860_v17, 0.0  ;;  %v6766_v0 = vsub.f32 %v16541_v11, %v16588_v33  ;;  %v7100_v5 = vmax.f32 %v7050_v24, 0.0  ;;  %v16589_v9 = vld [vmem:[#allocation12_spill] sm:$0xff]  ;;  %v16590_v17 = vld [vmem:[#allocation6_spill] sm:$0xff] }
0x13d5   : > { %v7102_v12 = vmax.f32 %v7052_v51, 0.0  ;;  %v7101_v22 = vmax.f32 %v7051_v55, 0.0  ;;  %v7103_v20 = vmax.f32 %v7053_v2, 0.0  ;;  %v7055_v30 = vsub.f32 1.0, %v7005_v60  ;;  %v16591_v50 = vld [vmem:[#allocation16_spill] sm:$0xff]  ;;  %v16592_v24 = vld [vmem:[#allocation46_spill] sm:$0xff] }
0x13d6   : > { %v7057_v61 = vsub.f32 1.0, %v7007_v1  ;;  %v7056_v18 = vsub.f32 1.0, %v7006_v14  ;;  %v7058_v38 = vsub.f32 1.0, %v7008_v4  ;;  %v6960_v51 = vsub.f32 %v16559_v21, %v16592_v24  ;;  %v16593_v55 = vld [vmem:[#allocation38_spill] sm:$0xff] }
0x13d7   : > { %v6962_v2 = vsub.f32 %v16560_v29, %v16593_v55  ;;  %v6815_v40 = vand.u32 2147483647, %v6765_v16  ;;  %v16604_v16 = vld [vmem:[#allocation52_spill] sm:$0xff] }
0x13d8   : > { %v6235_v26 = vpop.f32.mrb[222].mxu1  ;;  %v6480_v46 = vpop.f32.mrb[224].mxu0  ;;  %v7108_v55 = vmax.f32 %v7058_v38, 0.0  ;;  %v16610_v38 = vld [vmem:[#allocation66_spill] sm:$0xff] }
0x13d9   : > { %v7150_v10 = vmul.f32 %v16589_v9, %v6235_v26  ;;  %v7152_v48 = vmul.f32 %v16590_v17, %v6480_v46  ;;  %v6237_v35 = vpop.f32.mrb[223].mxu1  ;;  %v6482_v34 = vpop.f32.mrb[225].mxu0  ;;  %v16596_v26 = vld [vmem:[#allocation21_spill] sm:$0xff]  ;;  %v16597_v9 = vld [vmem:[#allocation54_spill] sm:$0xff]  ;;  %v7105_v17 = vmax.f32 %v7055_v30, 0.0 }
0x13da   : > { %v7151_v39 = vmul.f32 %v16591_v50, %v6237_v35  ;;  %v7153_v33 = vmul.f32 %v14895_v45, %v6482_v34  ;;  %v6961_v46 = vsub.f32 %v16561_v31, %v16596_v26  ;;  %v6963_v14 = vsub.f32 %v16562_v28, %v16597_v9 }
0x13db   : > { %v15006_v60 = vmul.f32 %v7150_v10, %v7100_v5  ;;  %v15008_v1 = vmul.f32 %v7152_v48, %v7102_v12  ;;  %v7107_v50 = vmax.f32 %v7057_v61, 0.0  ;;  %v7106_v12 = vmax.f32 %v7056_v18, 0.0 }
0x13dc   : > { %v15014_v4 = vmul.f32 %v7151_v39, %v7101_v22  ;;  %v15016_v35 = vmul.f32 %v7153_v33, %v7103_v20  ;;  %v6241_v34 = vpop.f32.mrb[224].mxu1  ;;  %v6486_v45 = vpop.f32.mrb[226].mxu0  ;;  %v6768_v39 = vsub.f32 %v16546_v47, %v16599_v27  ;;  %v7010_v33 = vand.u32 2147483647, %v6960_v51 }
0x13dd   : > { %16594 = vst [vmem:[#allocation44_spill] sm:$0xff] %v15006_v60  ;;  %16595 = vst [vmem:[#allocation45_spill] sm:$0xff] %v15008_v1  ;;  %v7155_v24 = vmul.f32 %v14907_v53, %v6241_v34  ;;  %v7157_v5 = vmul.f32 %v6907_v62, %v6486_v45  ;;  %v6243_v10 = vpop.f32.mrb[225].mxu1  ;;  %v6488_v48 = vpop.f32.mrb[227].mxu0  ;;  %v7012_v30 = vand.u32 2147483647, %v6962_v2  ;;  %v6967_v27 = vsub.f32 %v16560_v29, %v16604_v16 }
0x13de   : > { %16598 = vst [vmem:[#allocation48_spill] sm:$0xff] %v15016_v35  ;;  %v7156_v52 = vmul.f32 %v6906_v25, %v6243_v10  ;;  %v7158_v26 = vmul.f32 %v6908_v63, %v6488_v48  ;;  %v7011_v62 = vand.u32 2147483647, %v6961_v46  ;;  %v7013_v9 = vand.u32 2147483647, %v6963_v14  ;;  %v16603_v25 = vld [vmem:[#allocation71_spill] sm:$0xff] }
0x13df   : > { %v15021_v22 = vmul.f32 %v7155_v24, %v7105_v17  ;;  %v15023_v20 = vmul.f32 %v7157_v5, %v7107_v50  ;;  %v6965_v63 = vsub.f32 %v16559_v21, %v16603_v25  ;;  %v6817_v2 = vand.u32 2147483647, %v6767_v13  ;;  %v16605_v14 = vld [vmem:[#allocation67_spill] sm:$0xff] }
0x13e0   : > { %v15025_v61 = vmul.f32 %v7156_v52, %v7106_v12  ;;  %v15027_v53 = vmul.f32 %v7158_v26, %v7108_v55  ;;  %v6816_v46 = vand.u32 2147483647, %v6766_v0  ;;  %v6966_v34 = vsub.f32 %v16561_v31, %v16605_v14  ;;  %v16606_v45 = vld [vmem:[#allocation59_spill] sm:$0xff] }
0x13e1   : > { %16600 = vst [vmem:[#allocation49_spill] sm:$0xff] %v15021_v22  ;;  %16601 = vst [vmem:[#allocation61_spill] sm:$0xff] %v15023_v20  ;;  %v6968_v17 = vsub.f32 %v16562_v28, %v16606_v45  ;;  %v16607_v50 = vsub.f32 1.0, %v14916_v8  ;;  %v16608_v5 = vsub.f32 1.0, %v14918_v7  ;;  %v6865_v48 = vsub.f32 1.0, %v6815_v40  ;;  %v16611_v40 = vld [vmem:[#allocation58_spill] sm:$0xff] }
0x13e2   : > { %16602 = vst [vmem:[#allocation62_spill] sm:$0xff] %v15027_v53  ;;  %v6818_v12 = vand.u32 2147483647, %v6768_v39  ;;  %v7060_v55 = vsub.f32 1.0, %v7010_v33  ;;  %v7062_v26 = vsub.f32 1.0, %v7012_v30  ;;  %v7061_v25 = vsub.f32 1.0, %v7011_v62 }
0x13e3   : > { %v6912_v24 = vmax.f32 %v16607_v50, 0.0  ;;  %v6911_v10 = vmax.f32 %v16608_v5, 0.0  ;;  %v7063_v16 = vsub.f32 1.0, %v7013_v9  ;;  %v16609_v13 = vsub.f32 1.0, %v14983_v32  ;;  %v16612_v33 = vld [vmem:[#allocation63_spill] sm:$0xff]  ;;  %v16613_v53 = vld [vmem:[#allocation56_spill] sm:$0xff] }
0x13e4   : > { %v6770_v14 = vsub.f32 %v16539_v59, %v16610_v38  ;;  %v7015_v51 = vand.u32 2147483647, %v6965_v63  ;;  %v7017_v45 = vand.u32 2147483647, %v6967_v27  ;;  %v6867_v18 = vsub.f32 1.0, %v6817_v2 }
0x13e5   : > { %v6913_v0 = vmax.f32 %v16609_v13, 0.0  ;;  %v6866_v8 = vsub.f32 1.0, %v6816_v46  ;;  %v7016_v50 = vand.u32 2147483647, %v6966_v34  ;;  %v7018_v52 = vand.u32 2147483647, %v6968_v17 }
0x13e6   : > { %v6915_v7 = vmax.f32 %v6865_v48, 0.0  ;;  %v6868_v5 = vsub.f32 1.0, %v6818_v12  ;;  %v6772_v39 = vsub.f32 %v16540_v49, %v16611_v40  ;;  %v6771_v30 = vsub.f32 %v16541_v11, %v16612_v33 }
0x13e7   : > { %v7110_v62 = vmax.f32 %v7060_v55, 0.0  ;;  %v7112_v32 = vmax.f32 %v7062_v26, 0.0  ;;  %v7111_v9 = vmax.f32 %v7061_v25, 0.0  ;;  %v7113_v13 = vmax.f32 %v7063_v16, 0.0 }
0x13e8   : > { %v7065_v63 = vsub.f32 1.0, %v7015_v51  ;;  %v7067_v27 = vsub.f32 1.0, %v7017_v45  ;;  %v7066_v48 = vsub.f32 1.0, %v7016_v50  ;;  %v7068_v12 = vsub.f32 1.0, %v7018_v52 }
0x13e9   : > { %v6247_v1 = vpop.f32.mrb[226].mxu1  ;;  %v6492_v38 = vpop.f32.mrb[228].mxu0  ;;  %v6917_v35 = vmax.f32 %v6867_v18, 0.0  ;;  %v6773_v55 = vsub.f32 %v16546_v47, %v16613_v53  ;;  %v6916_v16 = vmax.f32 %v6866_v8, 0.0  ;;  %v6918_v51 = vmax.f32 %v6868_v5, 0.0  ;;  %v16619_v5 = vld [vmem:[#allocation57_spill] sm:$0xff] }
0x13ea   : > { %v7160_v2 = vmul.f32 %v14991_v19, %v6247_v1  ;;  %v7162_v46 = vmul.f32 %v6912_v24, %v6492_v38  ;;  %v6249_v34 = vpop.f32.mrb[227].mxu1  ;;  %v6494_v17 = vpop.f32.mrb[229].mxu0  ;;  %v7115_v50 = vmax.f32 %v7065_v63, 0.0  ;;  %v7117_v52 = vmax.f32 %v7067_v27, 0.0  ;;  %v16622_v63 = vld [vmem:[#allocation22_spill] sm:$0xff] }
0x13eb   : > { %v7161_v20 = vmul.f32 %v6911_v10, %v6249_v34  ;;  %v7163_v40 = vmul.f32 %v6913_v0, %v6494_v17  ;;  %v7116_v38 = vmax.f32 %v7066_v48, 0.0  ;;  %v7118_v53 = vmax.f32 %v7068_v12, 0.0 }
0x13ec   : > { %v15060_v26 = vmul.f32 %v7160_v2, %v7110_v62  ;;  %v15062_v25 = vmul.f32 %v7162_v46, %v7112_v32  ;;  %v16618_v32 = vld [vmem:[#allocation64_spill] sm:$0xff]  ;;  %v6820_v17 = vand.u32 2147483647, %v6770_v14 }
0x13ed   : > { %v15064_v45 = vmul.f32 %v7161_v20, %v7111_v9  ;;  %v15066_v19 = vmul.f32 %v7163_v40, %v7113_v13  ;;  %v6253_v1 = vpop.f32.mrb[228].mxu1  ;;  %v6498_v24 = vpop.f32.mrb[230].mxu0  ;;  %v6970_v8 = vsub.f32 %v16559_v21, %v16618_v32  ;;  %v6972_v20 = vsub.f32 %v16560_v29, %v16619_v5  ;;  %v16628_v32 = vld [vmem:[#allocation72_spill] sm:$0xff] }
0x13ee   : > { %16614 = vst [vmem:[#allocation60_spill] sm:$0xff] %v15060_v26  ;;  %16615 = vst [vmem:[#allocation65_spill] sm:$0xff] %v15062_v25  ;;  %v7165_v10 = vmul.f32 %v6915_v7, %v6253_v1  ;;  %v7167_v0 = vmul.f32 %v6917_v35, %v6498_v24  ;;  %v6255_v18 = vpop.f32.mrb[229].mxu1  ;;  %v6500_v33 = vpop.f32.mrb[231].mxu0  ;;  %v6971_v7 = vsub.f32 %v16561_v31, %v16622_v63  ;;  %v16623_v35 = vld [vmem:[#allocation17_spill] sm:$0xff]  ;;  %v6870_v14 = vsub.f32 1.0, %v6820_v17 }
0x13ef   : > { %16616 = vst [vmem:[#allocation43_spill] sm:$0xff] %v15064_v45  ;;  %16617 = vst [vmem:[#allocation37_spill] sm:$0xff] %v15066_v19  ;;  %v7166_v62 = vmul.f32 %v6916_v16, %v6255_v18  ;;  %v7168_v2 = vmul.f32 %v6918_v51, %v6500_v33  ;;  %v6973_v27 = vsub.f32 %v16562_v28, %v16623_v35  ;;  %v6822_v40 = vand.u32 2147483647, %v6772_v39  ;;  %v16626_v18 = vld [vmem:[#allocation73_spill] sm:$0xff]  ;;  %v16629_v63 = vld [vmem:[#allocation30_spill] sm:$0xff] }
0x13f0   : > { %v15072_v9 = vmul.f32 %v7165_v10, %v7115_v50  ;;  %v15074_v13 = vmul.f32 %v7167_v0, %v7117_v52  ;;  %v6821_v1 = vand.u32 2147483647, %v6771_v30  ;;  %v6823_v24 = vand.u32 2147483647, %v6773_v55  ;;  %v16630_v17 = vld [vmem:[#allocation18_spill] sm:$0xff] }
0x13f1   : > { %v15080_v46 = vmul.f32 %v7166_v62, %v7116_v38  ;;  %v15082_v34 = vmul.f32 %v7168_v2, %v7118_v53  ;;  %v7020_v50 = vand.u32 2147483647, %v6970_v8  ;;  %v7022_v52 = vand.u32 2147483647, %v6972_v20  ;;  %v16627_v53 = vld [vmem:[#allocation31_spill] sm:$0xff] }
0x13f2   : > { %16620 = vst [vmem:[#allocation36_spill] sm:$0xff] %v15072_v9  ;;  %16621 = vst [vmem:[#allocation34_spill] sm:$0xff] %v15074_v13  ;;  %v7021_v10 = vand.u32 2147483647, %v6971_v7  ;;  %v7023_v0 = vand.u32 2147483647, %v6973_v27  ;;  %v6775_v33 = vsub.f32 %v16539_v59, %v16626_v18  ;;  %v6777_v39 = vsub.f32 %v16540_v49, %v16627_v53 }
0x13f3   : > { %16624 = vst [vmem:[#allocation2_spill] sm:$0xff] %v15080_v46  ;;  %16625 = vst [vmem:[#allocation35_spill] sm:$0xff] %v15082_v34  ;;  %v6872_v38 = vsub.f32 1.0, %v6822_v40  ;;  %v6871_v62 = vsub.f32 1.0, %v6821_v1  ;;  %v6873_v2 = vsub.f32 1.0, %v6823_v24  ;;  %v6776_v5 = vsub.f32 %v16541_v11, %v16628_v32  ;;  %v16631_v40 = vld [vmem:[#allocation19_spill] sm:$0xff] }
0x13f4   : > { %v6778_v30 = vsub.f32 %v16546_v47, %v16629_v63  ;;  %v7070_v55 = vsub.f32 1.0, %v7020_v50  ;;  %v7072_v8 = vsub.f32 1.0, %v7022_v52  ;;  %v7071_v20 = vsub.f32 1.0, %v7021_v10  ;;  %v16632_v18 = vld [vmem:[#allocation7_spill] sm:$0xff]  ;;  %v16633_v53 = vld [vmem:[#allocation5_spill] sm:$0xff] }
0x13f5   : > { %v7073_v7 = vsub.f32 1.0, %v7023_v0  ;;  %v6920_v35 = vmax.f32 %v6870_v14, 0.0  ;;  %v6825_v27 = vand.u32 2147483647, %v6775_v33  ;;  %v6975_v59 = vsub.f32 %v16559_v21, %v16630_v17 }
0x13f6   : > { %v6977_v49 = vsub.f32 %v16560_v29, %v16631_v40  ;;  %v6922_v1 = vmax.f32 %v6872_v38, 0.0  ;;  %v6827_v24 = vand.u32 2147483647, %v6777_v39  ;;  %v6976_v11 = vsub.f32 %v16561_v31, %v16632_v18 }
0x13f7   : > { %v6978_v47 = vsub.f32 %v16562_v28, %v16633_v53  ;;  %v6921_v50 = vmax.f32 %v6871_v62, 0.0  ;;  %v6923_v52 = vmax.f32 %v6873_v2, 0.0  ;;  %v6826_v10 = vand.u32 2147483647, %v6776_v5 }
0x13f8   : > { %v6828_v0 = vand.u32 2147483647, %v6778_v30  ;;  %v7120_v14 = vmax.f32 %v7070_v55, 0.0  ;;  %v7122_v33 = vmax.f32 %v7072_v8, 0.0  ;;  %v7121_v32 = vmax.f32 %v7071_v20, 0.0 }
0x13f9   : > { %v7123_v63 = vmax.f32 %v7073_v7, 0.0  ;;  %v7025_v12 = vand.u32 2147483647, %v6975_v59  ;;  %v7027_v29 = vand.u32 2147483647, %v6977_v49  ;;  %v6875_v62 = vsub.f32 1.0, %v6825_v27 }
0x13fa   : > { %v7026_v31 = vand.u32 2147483647, %v6976_v11  ;;  %v7028_v18 = vand.u32 2147483647, %v6978_v47  ;;  %v6877_v2 = vsub.f32 1.0, %v6827_v24  ;;  %v6876_v55 = vsub.f32 1.0, %v6826_v10 }
0x13fb   : > { %v6878_v8 = vsub.f32 1.0, %v6828_v0  ;;  %v7077_v59 = vsub.f32 1.0, %v7027_v29  ;;  %v6925_v11 = vmax.f32 %v6875_v62, 0.0 }
0x13fc   : > { %v7076_v49 = vsub.f32 1.0, %v7026_v31  ;;  %v6927_v53 = vmax.f32 %v6877_v2, 0.0  ;;  %v6926_v47 = vmax.f32 %v6876_v55, 0.0  ;;  %v16643_v31 = vld [vmem:[#allocation69_spill] sm:$0xff] }
0x13fd   : > { %v6259_v21 = vpop.f32.mrb[230].mxu1  ;;  %v6504_v17 = vpop.f32.mrb[232].mxu0 }
0x13fe   : > { %v7170_v38 = vmul.f32 %v6920_v35, %v6259_v21  ;;  %v7172_v39 = vmul.f32 %v6922_v1, %v6504_v17  ;;  %v6261_v40 = vpop.f32.mrb[231].mxu1  ;;  %v6506_v51 = vpop.f32.mrb[233].mxu0  ;;  %v7075_v35 = vsub.f32 1.0, %v7025_v12  ;;  %v7078_v1 = vsub.f32 1.0, %v7028_v18 }
0x13ff   : > { %v7171_v48 = vmul.f32 %v6921_v50, %v6261_v40  ;;  %v7173_v28 = vmul.f32 %v6923_v52, %v6506_v51  ;;  %v6928_v51 = vmax.f32 %v6878_v8, 0.0  ;;  %v7127_v52 = vmax.f32 %v7077_v59, 0.0 }
0x1400   : > { %v15108_v5 = vmul.f32 %v7170_v38, %v7120_v14  ;;  %v15110_v30 = vmul.f32 %v7172_v39, %v7122_v33  ;;  %v7125_v50 = vmax.f32 %v7075_v35, 0.0  ;;  %v10834_v35 = vld [vmem:[%s16110_s9 + $0x10] sm:$0xff] }
0x1401   : > { %v15112_v20 = vmul.f32 %v7171_v48, %v7121_v32  ;;  %v15114_v7 = vmul.f32 %v7173_v28, %v7123_v63  ;;  %v7126_v48 = vmax.f32 %v7076_v49, 0.0  ;;  %v7128_v32 = vmax.f32 %v7078_v1, 0.0  ;;  %v10835_v49 = vld [vmem:[%s16110_s9 + $0x18] sm:$0xff] }
0x1402   : > { %16634 = vst [vmem:[#allocation33_spill] sm:$0xff] %v15108_v5  ;;  %16635 = vst [vmem:[#allocation50_spill] sm:$0xff] %v15110_v30 }
0x1403   : > { %16636 = vst [vmem:[#allocation41_spill] sm:$0xff] %v15112_v20  ;;  %16637 = vst [vmem:[#allocation20_spill] sm:$0xff] %v15114_v7 }
0x1404   : > { %v6265_v27 = vpop.f32.mrb[232].mxu1  ;;  %v6510_v24 = vpop.f32.mrb[234].mxu0 }
0x1405   : > { %v7175_v14 = vmul.f32 %v6925_v11, %v6265_v27  ;;  %v7177_v33 = vmul.f32 %v6927_v53, %v6510_v24  ;;  %v6267_v10 = vpop.f32.mrb[233].mxu1  ;;  %v6512_v0 = vpop.f32.mrb[235].mxu0  ;;  %v10836_v53 = vld [vmem:[%s16110_s9] sm:$0xff] }
0x1406   : > { %v7176_v63 = vmul.f32 %v6926_v47, %v6267_v10  ;;  %v7178_v21 = vmul.f32 %v6928_v51, %v6512_v0  ;;  %v10837_v51 = vld [vmem:[%s16110_s9 + $0x8] sm:$0xff] }
0x1407   : > { %v15116_v12 = vmul.f32 %v7175_v14, %v7125_v50  ;;  %v15118_v17 = vmul.f32 %v7177_v33, %v7127_v52 }
0x1408   : > { %v15120_v29 = vmul.f32 %v7176_v63, %v7126_v48  ;;  %v15122_v38 = vmul.f32 %v7178_v21, %v7128_v32  ;;  %v15124_v39 = vpop.f32.mrb[234].mxu1  ;;  %v10177_v40 = vpop.f32.mrb[236].mxu0  ;;  %v10838_v63 = vld [vmem:[%s16110_s9 + $0x30] sm:$0xff] }
0x1409   : > { %16638 = vst [vmem:[#allocation53_spill] sm:$0xff] %v15116_v12  ;;  %16639 = vst [vmem:[#allocation55_spill] sm:$0xff] %v15118_v17  ;;  %v6581_v28 = vpop.f32.mrb[235].mxu1  ;;  %v7294_v62 = vpop.f32.mrb[237].mxu0  ;;  %v15137_v59 = vmul.f32 %v10834_v35, %v10177_v40  ;;  %v10839_v40 = vld [vmem:[%s16110_s9 + $0x38] sm:$0xff]  ;;  %v10840_v35 = vld [vmem:[%s16110_s9 + $0x20] sm:$0xff]  ;;  %v6739_v55 = vsub.f32 %v16643_v31, %v15124_v39 }
0x140a   : > { %16640 = vst [vmem:[#allocation12_spill] sm:$0xff] %v15120_v29  ;;  %16641 = vst [vmem:[#allocation6_spill] sm:$0xff] %v15122_v38  ;;  %v10178_v2 = vpop.f32.mrb[238].mxu0  ;;  %v15147_v47 = vmul.f32 %v10836_v53, %v7294_v62  ;;  %v10846_v39 = vld [vmem:[%s16110_s9 + $0x40] sm:$0xff] }
0x140b   : > { %v15142_v1 = vmul.f32 %v10835_v49, %v10178_v2  ;;  %v7297_v11 = vpop.f32.mrb[239].mxu0  ;;  %v6789_v17 = vand.u32 2147483647, %v6739_v55  ;;  %v10848_v55 = vld [vmem:[%s16110_s9 + $0x70] sm:$0xff] }
0x140c   : > { %v15152_v27 = vmul.f32 %v10837_v51, %v7297_v11  ;;  %v10125_v24 = vpop.f32.mrb[236].mxu1  ;;  %v10841_v11 = vld [vmem:[%s16110_s9 + $0x28] sm:$0xff] }
0x140d   : > { %v6591_v52 = vpop.f32.mrb[237].mxu1  ;;  %v6749_v14 = vsub.f32 %v16643_v31, %v10125_v24  ;;  %v6839_v34 = vsub.f32 1.0, %v6789_v17 }
0x140e   : > { %v6744_v38 = vsub.f32 %v16643_v31, %v6591_v52  ;;  %v10849_v52 = vld [vmem:[%s16110_s9 + $0x78] sm:$0xff] }
0x140f   : > { %v6889_v15 = vmax.f32 %v6839_v34, 0.0 }
0x1410   : > { %v15158_v33 = vpop.f32.mrb[238].mxu1  ;;  %v10181_v10 = vpop.f32.mrb[240].mxu0 }
0x1411   : > { %v15160_v0 = vpop.f32.mrb[239].mxu1  ;;  %v7310_v48 = vpop.f32.mrb[241].mxu0  ;;  %v15165_v21 = vmul.f32 %v10838_v63, %v10181_v10  ;;  %v6734_v10 = vsub.f32 %v16643_v31, %v6581_v28  ;;  %v10844_v63 = vld [vmem:[%s16110_s9 + $0x50] sm:$0xff] }
0x1412   : > { %v10182_v32 = vpop.f32.mrb[242].mxu0  ;;  %v15175_v49 = vmul.f32 %v10840_v35, %v7310_v48  ;;  %v10842_v48 = vld [vmem:[%s16104_s3 + $0x40] sm:$0xff] }
0x1413   : > { %v15170_v62 = vmul.f32 %v10839_v40, %v10182_v32  ;;  %v7313_v2 = vpop.f32.mrb[243].mxu0  ;;  %v10843_v40 = vld [vmem:[%s16104_s3 + $0x50] sm:$0xff]  ;;  %v6784_v7 = vand.u32 2147483647, %v6734_v10 }
0x1414   : > { %v15180_v53 = vmul.f32 %v10841_v11, %v7313_v2  ;;  %v15182_v51 = vpop.f32.mrb[240].mxu1  ;;  %v10536_v2 = vpack.i.bf16 %v10843_v40, %v10842_v48  ;;  %v10845_v48 = vld [vmem:[%s16110_s9 + $0x58] sm:$0xff] }
0x1415   : > { %v15186_v32 = vpop.f32.mrb[241].mxu1  ;;  %v6834_v56 = vsub.f32 1.0, %v6784_v7  ;;  %v10850_v7 = vld [vmem:[%s16110_s9 + $0x60] sm:$0xff] }
0x1416   : > { %10537 = vrot.lane.b32.xlu0 %v10536_v2, %s16642_s28 }
0x1418   : > { %v15196_v35 = vpop.f32.mrb[242].mxu1  ;;  %v10185_v11 = vpop.f32.mrb[244].mxu0 }
0x1419   : > { %v15199_v18 = vpop.f32.mrb[243].mxu1  ;;  %v7326_v8 = vpop.f32.mrb[245].mxu0  ;;  %v15207_v50 = vmul.f32 %v10844_v63, %v10185_v11  ;;  %v10847_v63 = vld [vmem:[%s16110_s9 + $0x48] sm:$0xff] }
0x141a   : > { %v10186_v16 = vpop.f32.mrb[246].mxu0  ;;  %v15218_v28 = vmul.f32 %v10846_v39, %v7326_v8  ;;  %v6799_v8 = vand.u32 2147483647, %v6749_v14 }
0x141b   : > { %v15212_v40 = vmul.f32 %v10845_v48, %v10186_v16  ;;  %v7329_v2 = vpop.f32.mrb[247].mxu0  ;;  %v6794_v16 = vand.u32 2147483647, %v6744_v38 }
0x141c   : > { %v15223_v11 = vmul.f32 %v10847_v63, %v7329_v2  ;;  %v10137_v30 = vpop.f32.mrb[244].mxu1  ;;  %v6759_v2 = vsub.f32 %v16643_v31, %v15158_v33  ;;  %v6849_v17 = vsub.f32 1.0, %v6799_v8  ;;  %v6754_v33 = vsub.f32 %v16643_v31, %v15160_v0 }
0x141d   : > { %v6631_v48 = vpop.f32.mrb[245].mxu1 }
0x141e   : > { %v6809_v58 = vand.u32 2147483647, %v6759_v2  ;;  %v15266_v3 = vand.u32 2147483647, %v6754_v33  ;;  %v6764_v2 = vsub.f32 %v16643_v31, %v15186_v32  ;;  %v10852_v32 = vld [vmem:[%s16110_s9 + $0x90] sm:$0xff] }
0x1420   : > { %v10140_v39 = vpop.f32.mrb[246].mxu1  ;;  %v10189_v25 = vpop.f32.mrb[248].mxu0 }
0x1421   : > { %v6641_v13 = vpop.f32.mrb[247].mxu1  ;;  %v7342_v19 = vpop.f32.mrb[249].mxu0  ;;  %v15235_v24 = vmul.f32 %v10848_v55, %v10189_v25  ;;  %v10851_v25 = vld [vmem:[%s16110_s9 + $0x68] sm:$0xff] }
0x1422   : > { %v10190_v63 = vpop.f32.mrb[250].mxu0  ;;  %v15247_v38 = vmul.f32 %v10850_v7, %v7342_v19 }
0x1423   : > { %v15240_v14 = vmul.f32 %v10849_v52, %v10190_v63  ;;  %v7345_v10 = vpop.f32.mrb[251].mxu0  ;;  %v16644_v63 = vld [vmem:[#allocation70_spill] sm:$0xff] }
0x1424   : > { %v15252_v55 = vmul.f32 %v10851_v25, %v7345_v10  ;;  %v10143_v42 = vpop.f32.mrb[248].mxu1  ;;  %v6939_v52 = vsub.f32 %v16644_v63, %v10137_v30  ;;  %v6934_v8 = vsub.f32 %v16644_v63, %v6631_v48  ;;  %v6949_v43 = vsub.f32 %v16644_v63, %v10140_v39 }
0x1425   : > { %v6651_v36 = vpop.f32.mrb[249].mxu1  ;;  %v6944_v19 = vsub.f32 %v16644_v63, %v6641_v13  ;;  %v6884_v10 = vmax.f32 %v6834_v56, 0.0  ;;  %v6769_v25 = vsub.f32 %v16643_v31, %v15182_v51  ;;  %v15264_v30 = vmax.f32 %v6849_v17, 0.0 }
0x1426   : > { %v6844_v48 = vsub.f32 1.0, %v6794_v16  ;;  %v6989_v13 = vand.u32 2147483647, %v6939_v52  ;;  %v6984_v44 = vand.u32 2147483647, %v6934_v8  ;;  %v6859_v56 = vsub.f32 1.0, %v6809_v58 }
0x1427   : > { %v6999_v7 = vand.u32 2147483647, %v6949_v43  ;;  %v6994_v12 = vand.u32 2147483647, %v6944_v19  ;;  %v6959_v51 = vsub.f32 %v16644_v63, %v10143_v42  ;;  %v15275_v16 = vand.u32 2147483647, %v6769_v25 }
0x1428   : > { %v15270_v0 = vpop.f32.mrb[250].mxu1  ;;  %v10193_v39 = vpop.f32.mrb[252].mxu0  ;;  %v6954_v33 = vsub.f32 %v16644_v63, %v6651_v36  ;;  %v10853_v52 = vld [vmem:[%s16110_s9 + $0x98] sm:$0xff]  ;;  %v15284_v43 = vand.u32 2147483647, %v6764_v2  ;;  %v6779_v42 = vsub.f32 %v16643_v31, %v15196_v35  ;;  %v10854_v36 = vld [vmem:[%s16110_s9 + $0x80] sm:$0xff] }
0x1429   : > { %v15272_v5 = vpop.f32.mrb[251].mxu1  ;;  %v7358_v34 = vpop.f32.mrb[253].mxu0  ;;  %v7631_v20 = vmul.f32 %v10852_v32, %v10193_v39  ;;  %v10855_v25 = vld [vmem:[%s16110_s9 + $0x88] sm:$0xff]  ;;  %v6894_v29 = vmax.f32 %v6844_v48, 0.0  ;;  %v7049_v9 = vsub.f32 1.0, %v6999_v7  ;;  %v7044_v35 = vsub.f32 1.0, %v6994_v12 }
0x142a   : > { %v10194_v17 = vpop.f32.mrb[254].mxu0  ;;  %v7629_v19 = vmul.f32 %v10854_v36, %v7358_v34  ;;  %v7009_v45 = vand.u32 2147483647, %v6959_v51  ;;  %v6909_v60 = vmax.f32 %v6859_v56, 0.0  ;;  %v6854_v34 = vsub.f32 1.0, %v15266_v3 }
0x142b   : > { %v7632_v8 = vmul.f32 %v10853_v52, %v10194_v17  ;;  %v7361_v58 = vpop.f32.mrb[255].mxu0  ;;  %v7039_v17 = vsub.f32 1.0, %v6989_v13  ;;  %v7034_v52 = vsub.f32 1.0, %v6984_v44  ;;  %v6869_v36 = vsub.f32 1.0, %v15275_v16 }
0x142c   : > { %v7630_v39 = vmul.f32 %v10855_v25, %v7361_v58  ;;  %v15294_v32 = vpop.f32.mrb[252].mxu1  ;;  %v15300_v22 = vand.u32 2147483647, %v6954_v33  ;;  %v6864_v58 = vsub.f32 1.0, %v15284_v43  ;;  %v15303_v25 = vand.u32 2147483647, %v6779_v42 }
0x142d   : > { %v7702_v2 = vpack.c.bf16 %v7632_v8, %v7631_v20  ;;  %v15296_v26 = vpop.f32.mrb[253].mxu1  ;;  %v6774_v44 = vsub.f32 %v16643_v31, %v15199_v18  ;;  %v6969_v20 = vsub.f32 %v16644_v63, %v15270_v0  ;;  %v7089_v48 = vmax.f32 %v7039_v17, 0.0 }
0x142e   : > { %v7701_v46 = vpack.c.bf16 %v7630_v39, %v7629_v19  ;;  %v7084_v13 = vmax.f32 %v7034_v52, 0.0  ;;  %v6964_v3 = vsub.f32 %v16644_v63, %v15272_v5  ;;  %v16645_v33 = vpack.c.bf16 %v15152_v27, %v15147_v47  ;;  %v10857_v47 = vld [vmem:[%s16110_s9 + $0xb8] sm:$0xff]  ;;  %v10859_v39 = vld [vmem:[%s16110_s9 + $0xa8] sm:$0xff] }
0x142f   : > { %v7099_v8 = vmax.f32 %v7049_v9, 0.0  ;;  %v7094_v31 = vmax.f32 %v7044_v35, 0.0  ;;  %v7059_v18 = vsub.f32 1.0, %v7009_v45  ;;  %v7019_v19 = vand.u32 2147483647, %v6969_v20 }
0x1430   : > { %v10152_v12 = vpop.f32.mrb[254].mxu1  ;;  %v10197_v7 = vpop.f32.mrb[0].mxu0  ;;  %9644 = vmatprep.subr.bf16.mxu1 %v7701_v46  ;;  %v7054_v46 = vsub.f32 1.0, %v15300_v22  ;;  %v10858_v22 = vld [vmem:[%s16110_s9 + $0xa0] sm:$0xff]  ;;  %v6979_v35 = vsub.f32 %v16644_v63, %v15294_v32 }
0x1431   : > { %v7139_v56 = vmul.f32 %v10152_v12, %v6889_v15  ;;  %v6681_v51 = vpop.f32.mrb[255].mxu1  ;;  %v7374_v16 = vpop.f32.mrb[1].mxu0  ;;  %9645 = vmatpush3.bf16.msra.mxu1 %v16645_v33  ;;  %v10856_v15 = vld [vmem:[%s16110_s9 + $0xb0] sm:$0xff]  ;;  %v6919_v33 = vmax.f32 %v6869_v36, 0.0 }
0x1432   : > { %v7134_v43 = vmul.f32 %v6884_v10, %v6681_v51  ;;  %v10198_v0 = vpop.f32.mrb[2].mxu0  ;;  %9646 = vmatprep.subr.bf16.mxu1 %v7702_v2  ;;  %v7635_v5 = vmul.f32 %v10856_v15, %v10197_v7  ;;  %v7633_v10 = vmul.f32 %v10858_v22, %v7374_v16  ;;  %v7014_v2 = vand.u32 2147483647, %v6964_v3 }
0x1433   : > { %v15315_v42 = vmul.f32 %v7139_v56, %v7089_v48  ;;  %v7636_v27 = vmul.f32 %v10857_v47, %v10198_v0  ;;  %v7377_v9 = vpop.f32.mrb[3].mxu0  ;;  %v16646_v48 = vpack.c.bf16 %v15142_v1, %v15137_v59  ;;  %v6904_v3 = vmax.f32 %v6854_v34, 0.0 }
0x1434   : > { %v15323_v45 = vmul.f32 %v7134_v43, %v7084_v13  ;;  %v7634_v17 = vmul.f32 %v10859_v39, %v7377_v9  ;;  %v10155_v52 = vpop.f32.mrb[0].mxu1  ;;  %v6974_v13 = vsub.f32 %v16644_v63, %v15296_v26  ;;  %v6824_v43 = vand.u32 2147483647, %v6774_v44  ;;  %v10862_v39 = vld [vmem:[%s16110_s9 + $0xc0] sm:$0xff] }
0x1435   : > { %v7704_v12 = vpack.c.bf16 %v7636_v27, %v7635_v5  ;;  %v7149_v20 = vmul.f32 %v10155_v52, %v15264_v30  ;;  %v6691_v7 = vpop.f32.mrb[1].mxu1  ;;  %9647 = vmatpush3.bf16.msra.mxu1 %v16646_v48  ;;  %v6914_v0 = vmax.f32 %v6864_v58, 0.0  ;;  %v6879_v30 = vsub.f32 1.0, %v15303_v25  ;;  %v10863_v52 = vld [vmem:[%s16110_s9 + $0xc8] sm:$0xff] }
0x1436   : > { %v7234_v56 = vpack.c.bf16 %v15315_v42, %v15323_v45  ;;  %v7703_v51 = vpack.c.bf16 %v7634_v17, %v7633_v10  ;;  %v7144_v16 = vmul.f32 %v6894_v29, %v6691_v7  ;;  %v7069_v15 = vsub.f32 1.0, %v7019_v19 }
0x1437   : > { %v15341_v32 = vmul.f32 %v7149_v20, %v7099_v8  ;;  %v7109_v26 = vmax.f32 %v7059_v18, 0.0  ;;  %v7064_v63 = vsub.f32 1.0, %v7014_v2  ;;  %v7029_v47 = vand.u32 2147483647, %v6979_v35 }
0x1438   : > { %v15344_v5 = vmul.f32 %v7144_v16, %v7094_v31  ;;  %v10158_v59 = vpop.f32.mrb[2].mxu1  ;;  %v10201_v1 = vpop.f32.mrb[4].mxu0  ;;  %9648 = vmatprep.subr.bf16.mxu1 %v7703_v51  ;;  %v16647_v34 = vpack.c.bf16 %v15180_v53, %v15175_v49  ;;  %v7104_v36 = vmax.f32 %v7054_v46, 0.0  ;;  %v7024_v58 = vand.u32 2147483647, %v6974_v13  ;;  %v10861_v49 = vld [vmem:[%s16110_s9 + $0xd8] sm:$0xff] }
0x1439   : > { %v7159_v27 = vmul.f32 %v10158_v59, %v6909_v60  ;;  %v6701_v9 = vpop.f32.mrb[3].mxu1  ;;  %v7390_v29 = vpop.f32.mrb[5].mxu0  ;;  %v6874_v31 = vsub.f32 1.0, %v6824_v43  ;;  %v10860_v60 = vld [vmem:[%s16110_s9 + $0xd0] sm:$0xff]  ;;  %v7119_v22 = vmax.f32 %v7069_v15, 0.0  ;;  %v7079_v20 = vsub.f32 1.0, %v7029_v47 }
0x143a   : > { %9649 = vmatpush3.bf16.msra.mxu1 %v16647_v34  ;;  %v7239_v25 = vpack.c.bf16 %v15341_v32, %v15344_v5  ;;  %v7154_v44 = vmul.f32 %v6904_v3, %v6701_v9  ;;  %v10202_v8 = vpop.f32.mrb[6].mxu0  ;;  %v7639_v18 = vmul.f32 %v10860_v60, %v10201_v1  ;;  %v7637_v17 = vmul.f32 %v10862_v39, %v7390_v29 }
0x143b   : > { %9650 = vmatprep.subr.bf16.mxu1 %v7704_v12  ;;  %v15351_v19 = vmul.f32 %v7159_v27, %v7109_v26  ;;  %v7640_v53 = vmul.f32 %v10861_v49, %v10202_v8  ;;  %v7393_v46 = vpop.f32.mrb[7].mxu0  ;;  %v7114_v12 = vmax.f32 %v7064_v63, 0.0  ;;  %v16648_v51 = vpack.c.bf16 %v15170_v62, %v15165_v21 }
0x143c   : > { %v15359_v10 = vmul.f32 %v7154_v44, %v7104_v36  ;;  %v7638_v2 = vmul.f32 %v10863_v52, %v7393_v46  ;;  %v10161_v35 = vpop.f32.mrb[4].mxu1  ;;  %v7074_v16 = vsub.f32 1.0, %v7024_v58  ;;  %v6929_v59 = vmax.f32 %v6879_v30, 0.0  ;;  %v10864_v44 = vld [vmem:[%s16110_s9 + $0xf0] sm:$0xff] }
0x143d   : > { %v7706_v7 = vpack.c.bf16 %v7640_v53, %v7639_v18  ;;  %v7169_v48 = vmul.f32 %v10161_v35, %v6919_v33  ;;  %v6711_v13 = vpop.f32.mrb[5].mxu1  ;;  %v6924_v26 = vmax.f32 %v6874_v31, 0.0  ;;  %v7129_v33 = vmax.f32 %v7079_v20, 0.0  ;;  %v10865_v31 = vld [vmem:[%s16110_s9 + $0xf8] sm:$0xff]  ;;  %v10866_v18 = vld [vmem:[%s16110_s9 + $0xe0] sm:$0xff]  ;;  %v10867_v53 = vld [vmem:[%s16110_s9 + $0xe8] sm:$0xff] }
0x143e   : > { %9651 = vmatpush3.bf16.msra.mxu1 %v16648_v51  ;;  %v7244_v3 = vpack.c.bf16 %v15351_v19, %v15359_v10  ;;  %v7705_v43 = vpack.c.bf16 %v7638_v2, %v7637_v17  ;;  %v7164_v15 = vmul.f32 %v6914_v0, %v6711_v13  ;;  %v16649_v62 = vpack.c.bf16 %v15223_v11, %v15218_v28  ;;  %v10871_v51 = vld [vmem:[%s16110_s9 + $0x108] sm:$0xff] }
0x143f   : > { %v15372_v1 = vmul.f32 %v7169_v48, %v7119_v22  ;;  %v7124_v34 = vmax.f32 %v7074_v16, 0.0  ;;  %v16650_v39 = vpack.c.bf16 %v15212_v40, %v15207_v50  ;;  %v10869_v50 = vld [vmem:[%s16110_s9 + $0x118] sm:$0xff] }
0x1440   : > { %v15374_v27 = vmul.f32 %v7164_v15, %v7114_v12  ;;  %v10164_v63 = vpop.f32.mrb[6].mxu1  ;;  %v10205_v47 = vpop.f32.mrb[8].mxu0  ;;  %9652 = vmatprep.subr.bf16.mxu1 %v7705_v43  ;;  %v16651_v12 = vpack.c.bf16 %v15252_v55, %v15247_v38  ;;  %v10870_v38 = vld [vmem:[%s16110_s9 + $0x100] sm:$0xff]  ;;  %v16652_v15 = vpack.c.bf16 %v15240_v14, %v15235_v24  ;;  %v10873_v14 = vld [vmem:[%s16110_s9 + $0x138] sm:$0xff] }
0x1441   : > { %v7179_v9 = vmul.f32 %v10164_v63, %v6929_v59  ;;  %v6721_v29 = vpop.f32.mrb[7].mxu1  ;;  %v7406_v21 = vpop.f32.mrb[9].mxu0  ;;  %v7643_v8 = vmul.f32 %v10864_v44, %v10205_v47  ;;  %v16653_v63 = vpack.c.bf16 %v14869_v6, %v14851_v54  ;;  %v10874_v6 = vld [vmem:[%s16110_s9 + $0x120] sm:$0xff]  ;;  %v16655_v44 = vpack.c.bf16 %v14954_v23, %v14934_v41  ;;  %v10878_v23 = vld [vmem:[%s16110_s9 + $0x150] sm:$0xff] }
0x1442   : > { %9653 = vmatpush3.bf16.msra.mxu1 %v16649_v62  ;;  %v7249_v0 = vpack.c.bf16 %v15372_v1, %v15374_v27  ;;  %v7174_v30 = vmul.f32 %v6924_v26, %v6721_v29  ;;  %v10206_v36 = vpop.f32.mrb[10].mxu0  ;;  %v7641_v49 = vmul.f32 %v10866_v18, %v7406_v21  ;;  %v10872_v29 = vld [vmem:[%s16110_s9 + $0x130] sm:$0xff]  ;;  %v16656_v18 = vpack.c.bf16 %v15025_v61, %v15014_v4  ;;  %v10880_v4 = vld [vmem:[%s16110_s9 + $0x140] sm:$0xff] }
0x1443   : > { %9654 = vmatprep.subr.bf16.mxu1 %v7706_v7  ;;  %v15381_v58 = vmul.f32 %v7179_v9, %v7129_v33  ;;  %v7644_v28 = vmul.f32 %v10865_v31, %v10206_v36  ;;  %v7409_v11 = vpop.f32.mrb[11].mxu0  ;;  %v10868_v7 = vld [vmem:[%s16110_s9 + $0x110] sm:$0xff]  ;;  %v16654_v33 = vpack.c.bf16 %v14958_v57, %v14942_v37  ;;  %v10875_v57 = vld [vmem:[%s16110_s9 + $0x128] sm:$0xff] }
0x1444   : > { %v15389_v60 = vmul.f32 %v7174_v30, %v7124_v34  ;;  %v7642_v46 = vmul.f32 %v10867_v53, %v7409_v11  ;;  %v15473_v31 = vld [vmem:[%s16104_s3 + $0x70] sm:$0xff]  ;;  %v10879_v53 = vld [vmem:[%s16110_s9 + $0x158] sm:$0xff] }
0x1445   : > { %v7708_v22 = vpack.c.bf16 %v7644_v28, %v7643_v8  ;;  %v15468_v8 = vld [vmem:[%s16104_s3 + $0x60] sm:$0xff] }
0x1446   : > { %9655 = vmatpush3.bf16.msra.mxu1 %v16650_v39  ;;  %v7254_v17 = vpack.c.bf16 %v15381_v58, %v15389_v60  ;;  %v7707_v52 = vpack.c.bf16 %v7642_v46, %v7641_v49  ;;  %v10541_v28 = vpack.i.bf16 %v15473_v31, %v15468_v8  ;;  %v10881_v39 = vld [vmem:[%s16110_s9 + $0x148] sm:$0xff] }
0x1448   : > { %v10209_v2 = vpop.f32.mrb[12].mxu0  ;;  %9656 = vmatprep.subr.bf16.mxu1 %v7707_v52  ;;  %10542 = vrot.lane.b32.xlu1 %v10541_v28, %s16642_s28 }
0x1449   : > { %v7422_v35 = vpop.f32.mrb[13].mxu0  ;;  %v15408_v48 = vmul.f32 %v10868_v7, %v10209_v2  ;;  %v16658_v7 = vld [vmem:[#allocation44_spill] sm:$0xff] }
0x144a   : > { %9657 = vmatpush3.bf16.msra.mxu1 %v16651_v12  ;;  %v10210_v20 = vpop.f32.mrb[14].mxu0  ;;  %v15418_v55 = vmul.f32 %v10870_v38, %v7422_v35  ;;  %v16660_v38 = vld [vmem:[#allocation2_spill] sm:$0xff] }
0x144b   : > { %9658 = vmatprep.subr.bf16.mxu1 %v7708_v22  ;;  %v15413_v40 = vmul.f32 %v10869_v50, %v10210_v20  ;;  %v7425_v13 = vpop.f32.mrb[15].mxu0  ;;  %v16657_v20 = vld [vmem:[#allocation49_spill] sm:$0xff] }
0x144c   : > { %v15423_v16 = vmul.f32 %v10871_v51, %v7425_v13  ;;  %v16659_v50 = vpack.c.bf16 %v16657_v20, %v16658_v7  ;;  %v16661_v51 = vld [vmem:[#allocation43_spill] sm:$0xff]  ;;  %v10887_v7 = vld [vmem:[%s16110_s9 + $0x198] sm:$0xff] }
0x144d   : > { %v7710_v43 = vpack.c.bf16 %v15413_v40, %v15408_v48  ;;  %v10895_v48 = vld [vmem:[%s16110_s9 + $0x1d8] sm:$0xff] }
0x144e   : > { %9659 = vmatpush3.bf16.msra.mxu1 %v16652_v15  ;;  %v7709_v59 = vpack.c.bf16 %v15423_v16, %v15418_v55  ;;  %v16662_v15 = vpack.c.bf16 %v16660_v38, %v16661_v51  ;;  %v10888_v38 = vld [vmem:[%s16110_s9 + $0x180] sm:$0xff] }
0x144f   : > { %v10892_v55 = vld [vmem:[%s16110_s9 + $0x1a0] sm:$0xff] }
0x1450   : > { %v10213_v26 = vpop.f32.mrb[16].mxu0 }
0x1451   : > { %7766 = vmatmul.mubr.bf16.vlgmr.msra.gmra.mrb[8].mxu1 %v16653_v63  ;;  %v7438_v47 = vpop.f32.mrb[17].mxu0  ;;  %v15441_v24 = vmul.f32 %v10872_v29, %v10213_v26  ;;  %v10882_v63 = vld [vmem:[%s16110_s9 + $0x170] sm:$0xff] }
0x1452   : > { %7773 = vmatprep.mubr.bf16.mxu1 %v16654_v33  ;;  %v10214_v9 = vpop.f32.mrb[18].mxu0  ;;  %v15451_v37 = vmul.f32 %v10874_v6, %v7438_v47  ;;  %v10883_v33 = vld [vmem:[%s16110_s9 + $0x178] sm:$0xff]  ;;  %v10885_v6 = vld [vmem:[%s16110_s9 + $0x168] sm:$0xff] }
0x1453   : > { %v15446_v21 = vmul.f32 %v10873_v14, %v10214_v9  ;;  %v7441_v54 = vpop.f32.mrb[19].mxu0  ;;  %v10884_v14 = vld [vmem:[%s16110_s9 + $0x160] sm:$0xff] }
0x1454   : > { %v15456_v62 = vmul.f32 %v10875_v57, %v7441_v54 }
0x1455   : > { %v7712_v34 = vpack.c.bf16 %v15446_v21, %v15441_v24  ;;  %v10899_v24 = vld [vmem:[%s16110_s9 + $0x1f8] sm:$0xff] }
0x1456   : > { %v7711_v30 = vpack.c.bf16 %v15456_v62, %v15451_v37  ;;  %v10897_v37 = vld [vmem:[%s16110_s9 + $0x1c8] sm:$0xff] }
0x1458   : > { %v10217_v36 = vpop.f32.mrb[20].mxu0 }
0x1459   : > { %7774 = vmatmul.mubr.bf16.gmra.mrb[12].mxu1 %v16655_v44  ;;  %v7454_v11 = vpop.f32.mrb[21].mxu0  ;;  %v15484_v49 = vmul.f32 %v10878_v23, %v10217_v36 }
0x145a   : > { %7781 = vmatprep.mubr.bf16.mxu1 %v16656_v18  ;;  %v10218_v41 = vpop.f32.mrb[22].mxu0  ;;  %v15494_v61 = vmul.f32 %v10880_v4, %v7454_v11  ;;  %v16663_v11 = vld [vmem:[#allocation36_spill] sm:$0xff] }
0x145b   : > { %v15489_v46 = vmul.f32 %v10879_v53, %v10218_v41  ;;  %v7457_v22 = vpop.f32.mrb[23].mxu0  ;;  %v16664_v18 = vld [vmem:[#allocation60_spill] sm:$0xff] }
0x145c   : > { %v15499_v52 = vmul.f32 %v10881_v39, %v7457_v22  ;;  %v16665_v41 = vpack.c.bf16 %v16663_v11, %v16664_v18  ;;  %v16666_v53 = vld [vmem:[#allocation12_spill] sm:$0xff]  ;;  %v16667_v22 = vld [vmem:[#allocation41_spill] sm:$0xff]  ;;  %v16672_v18 = vld [vmem:[#allocation14_spill] sm:$0xff] }
0x145d   : > { %v7714_v2 = vpack.c.bf16 %v15489_v46, %v15484_v49  ;;  %v16668_v4 = vpack.c.bf16 %v16666_v53, %v16667_v22  ;;  %v10890_v22 = vld [vmem:[%s16110_s9 + $0x1b0] sm:$0xff] }
0x145e   : > { %v7713_v35 = vpack.c.bf16 %v15499_v52, %v15494_v61  ;;  %v10901_v61 = vld [vmem:[%s16110_s9 + $0x1e8] sm:$0xff] }
0x1460   : > { %v10221_v12 = vpop.f32.mrb[24].mxu0 }
0x1461   : > { %7782 = vmatmul.mubr.bf16.gmra.mrb[16].mxu1 %v16659_v50  ;;  %v7470_v13 = vpop.f32.mrb[25].mxu0  ;;  %v15514_v47 = vmul.f32 %v10882_v63, %v10221_v12  ;;  %v10886_v12 = vld [vmem:[%s16110_s9 + $0x190] sm:$0xff] }
0x1462   : > { %7789 = vmatprep.mubr.bf16.mxu1 %v16662_v15  ;;  %v10222_v26 = vpop.f32.mrb[26].mxu0  ;;  %v15524_v54 = vmul.f32 %v10884_v14, %v7470_v13  ;;  %v10889_v15 = vld [vmem:[%s16110_s9 + $0x188] sm:$0xff]  ;;  %v16669_v14 = vld [vmem:[#allocation53_spill] sm:$0xff] }
0x1463   : > { %v15519_v9 = vmul.f32 %v10883_v33, %v10222_v26  ;;  %v7473_v29 = vpop.f32.mrb[27].mxu0 }
0x1464   : > { %v15529_v57 = vmul.f32 %v10885_v6, %v7473_v29  ;;  %v16670_v6 = vld [vmem:[#allocation33_spill] sm:$0xff] }
0x1465   : > { %v7716_v36 = vpack.c.bf16 %v15519_v9, %v15514_v47  ;;  %v10906_v47 = vld [vmem:[%s16110_s9 + $0x230] sm:$0xff] }
0x1466   : > { %v7715_v44 = vpack.c.bf16 %v15529_v57, %v15524_v54 }
0x1468   : > { %v10225_v28 = vpop.f32.mrb[28].mxu0 }
0x1469   : > { %7790 = vmatmul.mubr.bf16.gmra.mrb[20].mxu1 %v16665_v41  ;;  %v7486_v23 = vpop.f32.mrb[29].mxu0  ;;  %v7663_v20 = vmul.f32 %v10886_v12, %v10225_v28  ;;  %v16671_v28 = vpack.c.bf16 %v16669_v14, %v16670_v6  ;;  %v16673_v41 = vld [vmem:[#allocation10_spill] sm:$0xff] }
0x146a   : > { %7797 = vmatprep.mubr.bf16.mxu1 %v16668_v4  ;;  %v10226_v39 = vpop.f32.mrb[30].mxu0  ;;  %v7661_v51 = vmul.f32 %v10888_v38, %v7486_v23  ;;  %v16674_v23 = vpack.c.bf16 %v16672_v18, %v16673_v41  ;;  %v10898_v18 = vld [vmem:[%s16110_s9 + $0x1f0] sm:$0xff] }
0x146b   : > { %v7664_v50 = vmul.f32 %v10887_v7, %v10226_v39  ;;  %v7489_v13 = vpop.f32.mrb[31].mxu0  ;;  %v10891_v39 = vld [vmem:[%s16110_s9 + $0x1b8] sm:$0xff] }
0x146c   : > { %v7662_v26 = vmul.f32 %v10889_v15, %v7489_v13 }
0x146d   : > { %v7718_v63 = vpack.c.bf16 %v7664_v50, %v7663_v20 }
0x146e   : > { %v7717_v33 = vpack.c.bf16 %v7662_v26, %v7661_v51  ;;  %v10894_v26 = vld [vmem:[%s16110_s9 + $0x1d0] sm:$0xff] }
0x1470   : > { %v10229_v29 = vpop.f32.mrb[32].mxu0  ;;  %9690 = vmatprep.subr.bf16.mxu1 %v7717_v33  ;;  %v10896_v33 = vld [vmem:[%s16110_s9 + $0x1c0] sm:$0xff] }
0x1471   : > { %7798 = vmatmul.mubr.bf16.gmra.mrb[24].mxu1 %v16671_v28  ;;  %v7502_v11 = vpop.f32.mrb[33].mxu0  ;;  %v7667_v4 = vmul.f32 %v10890_v22, %v10229_v29 }
0x1472   : > { %9691 = vmatpush3.bf16.msra.mxu1 %v7709_v59  ;;  %7838 = vmatprep.mubr.bf16.mxu1 %v16674_v23  ;;  %v10230_v53 = vpop.f32.mrb[34].mxu0  ;;  %v7665_v16 = vmul.f32 %v10892_v55, %v7502_v11  ;;  %v10893_v59 = vld [vmem:[%s16110_s9 + $0x1a8] sm:$0xff]  ;;  %v10900_v23 = vld [vmem:[%s16110_s9 + $0x1e0] sm:$0xff] }
0x1473   : > { %9692 = vmatprep.subr.bf16.mxu1 %v7718_v63  ;;  %v7668_v12 = vmul.f32 %v10891_v39, %v10230_v53  ;;  %v7505_v20 = vpop.f32.mrb[35].mxu0  ;;  %v10902_v39 = vld [vmem:[%s16110_s9 + $0x210] sm:$0xff]  ;;  %v10903_v55 = vld [vmem:[%s16110_s9 + $0x200] sm:$0xff] }
0x1474   : > { %v7666_v7 = vmul.f32 %v10893_v59, %v7505_v20 }
0x1475   : > { %v7720_v50 = vpack.c.bf16 %v7668_v12, %v7667_v4 }
0x1476   : > { %9693 = vmatpush3.bf16.msra.mxu1 %v7710_v43  ;;  %v7719_v13 = vpack.c.bf16 %v7666_v7, %v7665_v16  ;;  %v10904_v16 = vld [vmem:[%s16110_s9 + $0x218] sm:$0xff]  ;;  %v10905_v7 = vld [vmem:[%s16110_s9 + $0x208] sm:$0xff] }
0x1478   : > { %v10233_v38 = vpop.f32.mrb[36].mxu0  ;;  %9694 = vmatprep.subr.bf16.mxu1 %v7719_v13 }
0x1479   : > { %v7518_v51 = vpop.f32.mrb[37].mxu0  ;;  %v7671_v63 = vmul.f32 %v10894_v26, %v10233_v38  ;;  %v16676_v26 = vld [vmem:[#allocation15_spill] sm:$0xff] }
0x147a   : > { %9695 = vmatpush3.bf16.msra.mxu1 %v7711_v30  ;;  %v10234_v15 = vpop.f32.mrb[38].mxu0  ;;  %v7669_v29 = vmul.f32 %v10896_v33, %v7518_v51  ;;  %v16680_v33 = vld [vmem:[#allocation13_spill] sm:$0xff] }
0x147b   : > { %9696 = vmatprep.subr.bf16.mxu1 %v7720_v50  ;;  %v7672_v40 = vmul.f32 %v10895_v48, %v10234_v15  ;;  %v7521_v43 = vpop.f32.mrb[39].mxu0  ;;  %v16675_v15 = vmov 0.0  }
0x147c   : > { %v7670_v62 = vmul.f32 %v10897_v37, %v7521_v43  ;;  %v16679_v43 = vld [vmem:[#allocation9_spill] sm:$0xff]  ;;  %v10907_v37 = vld [vmem:[%s16110_s9 + $0x220] sm:$0xff] }
0x147d   : > { %v7722_v30 = vpack.c.bf16 %v7672_v40, %v7671_v63  ;;  %v16677_v63 = vld [vmem:[#allocation11_spill] sm:$0xff] }
0x147e   : > { %9697 = vmatpush3.bf16.msra.mxu1 %v7712_v34  ;;  %v7721_v14 = vpack.c.bf16 %v7670_v62, %v7669_v29  ;;  %v16678_v48 = vpack.c.bf16 %v16676_v26, %v16677_v63  ;;  %v16681_v29 = vpack.c.bf16 %v16679_v43, %v16680_v33  ;;  %v10914_v63 = vld [vmem:[%s16110_s9 + $0x270] sm:$0xff]  ;;  %v10915_v43 = vld [vmem:[%s16110_s9 + $0x260] sm:$0xff] }
0x1480   : > { %v10237_v6 = vpop.f32.mrb[40].mxu0  ;;  %9698 = vmatprep.subr.bf16.mxu1 %v7721_v14  ;;  %v10908_v14 = vld [vmem:[%s16110_s9 + $0x238] sm:$0xff] }
0x1481   : > { %v7534_v28 = vpop.f32.mrb[41].mxu0  ;;  %v7675_v41 = vmul.f32 %v10898_v18, %v10237_v6 }
0x1482   : > { %9699 = vmatpush3.bf16.msra.mxu1 %v7713_v35  ;;  %v10238_v11 = vpop.f32.mrb[42].mxu0  ;;  %v7673_v53 = vmul.f32 %v10900_v23, %v7534_v28 }
0x1483   : > { %9700 = vmatprep.subr.bf16.mxu1 %v7722_v30  ;;  %v7676_v21 = vmul.f32 %v10899_v24, %v10238_v11  ;;  %v7537_v34 = vpop.f32.mrb[43].mxu0  ;;  %v10909_v11 = vld [vmem:[%s16110_s9 + $0x228] sm:$0xff] }
0x1484   : > { %v7674_v52 = vmul.f32 %v10901_v61, %v7537_v34  ;;  %v16683_v34 = vld [vmem:[#allocation8_spill] sm:$0xff]  ;;  %v16685_v61 = vld [vmem:[#allocation62_spill] sm:$0xff] }
0x1485   : > { %v7724_v35 = vpack.c.bf16 %v7676_v21, %v7675_v41  ;;  %v16682_v21 = vld [vmem:[#allocation4_spill] sm:$0xff] }
0x1486   : > { %9701 = vmatpush3.bf16.msra.mxu1 %v7714_v2  ;;  %v7723_v22 = vpack.c.bf16 %v7674_v52, %v7673_v53  ;;  %v16684_v23 = vpack.c.bf16 %v16682_v21, %v16683_v34  ;;  %v16686_v52 = vld [vmem:[#allocation48_spill] sm:$0xff]  ;;  %v16700_v21 = vld [vmem:[#allocation55_spill] sm:$0xff]  ;;  %v16701_v34 = vld [vmem:[#allocation50_spill] sm:$0xff] }
0x1488   : > { %9702 = vmatprep.subr.bf16.mxu1 %v7723_v22  ;;  %v10241_v4 = vpop.f32.mrb[44].mxu0  ;;  %v10538_v2 = vpop.permute.xlu0 %10537  ;;  %v10910_v22 = vld [vmem:[%s16110_s9 + $0x250] sm:$0xff] }
0x1489   : > { %v7679_v12 = vmul.f32 %v10902_v39, %v10241_v4  ;;  %v7550_v20 = vpop.f32.mrb[45].mxu0  ;;  %v10539_v59 = vunpack.i.l.bf16 %v10538_v2 }
0x148a   : > { %9703 = vmatpush3.bf16.msra.mxu1 %v7715_v44  ;;  %v7677_v49 = vmul.f32 %v10903_v55, %v7550_v20  ;;  %v10242_v46 = vpop.f32.mrb[46].mxu0  ;;  %v10540_v44 = vunpack.i.h.bf16 %v10538_v2 }
0x148b   : > { %9704 = vmatprep.subr.bf16.mxu1 %v7724_v35  ;;  %v7680_v54 = vmul.f32 %v10904_v16, %v10242_v46  ;;  %v7553_v57 = vpop.f32.mrb[47].mxu0  ;;  %v16687_v35 = vpack.c.bf16 %v16685_v61, %v16686_v52  ;;  %v10913_v16 = vld [vmem:[%s16110_s9 + $0x248] sm:$0xff] }
0x148c   : > { %v7678_v50 = vmul.f32 %v10905_v7, %v7553_v57  ;;  %v10448_v38 = vpack.c.bf16 %v10540_v44, %v10539_v59  ;;  %v16688_v59 = vld [vmem:[#allocation61_spill] sm:$0xff] }
0x148d   : > { %v7726_v13 = vpack.c.bf16 %v7680_v54, %v7679_v12  ;;  %v10911_v12 = vld [vmem:[%s16110_s9 + $0x240] sm:$0xff]  ;;  %v16689_v7 = vld [vmem:[#allocation45_spill] sm:$0xff] }
0x148e   : > { %9705 = vmatpush3.bf16.msra.mxu1 %v7716_v36  ;;  %v7725_v51 = vpack.c.bf16 %v7678_v50, %v7677_v49  ;;  %10449 = vmatprep.subr.bf16.mxu0 %v10448_v38  ;;  %v10912_v49 = vld [vmem:[%s16110_s9 + $0x258] sm:$0xff]  ;;  %v16690_v50 = vpack.c.bf16 %v16688_v59, %v16689_v7 }
0x148f   : > { %10255 = vmatprep.subr.bf16.mxu1 %v16675_v15  ;;  %10451 = vmatpush3.bf16.msra.mxu0 %v10448_v38  ;;  %v16691_v38 = vld [vmem:[#allocation35_spill] sm:$0xff] }
0x1490   : > { %v10245_v40 = vpop.f32.mrb[48].mxu0 }
0x1491   : > { %7839 = vmatmul.mubr.bf16.vlgmr.msra.gmra.mrb[28].mxu1 %v16678_v48  ;;  %v7683_v9 = vmul.f32 %v10906_v47, %v10245_v40  ;;  %v7566_v36 = vpop.f32.mrb[49].mxu0  ;;  %v10916_v47 = vld [vmem:[%s16110_s9 + $0x278] sm:$0xff] }
0x1492   : > { %7846 = vmatprep.mubr.bf16.mxu1 %v16681_v29  ;;  %10256 = vmatpush3.bf16.msra.mxu1 %v7725_v51  ;;  %v7681_v62 = vmul.f32 %v10907_v37, %v7566_v36  ;;  %v10246_v30 = vpop.f32.mrb[50].mxu0  ;;  %v16692_v51 = vld [vmem:[#allocation37_spill] sm:$0xff]  ;;  %v10917_v37 = vld [vmem:[%s16110_s9 + $0x268] sm:$0xff] }
0x1493   : > { %10257 = vmatprep.subr.bf16.mxu1 %v16675_v15  ;;  %v7684_v6 = vmul.f32 %v10908_v14, %v10246_v30  ;;  %v7569_v28 = vpop.f32.mrb[51].mxu0  ;;  %v16693_v26 = vpack.c.bf16 %v16691_v38, %v16692_v51 }
0x1494   : > { %v7682_v18 = vmul.f32 %v10909_v11, %v7569_v28  ;;  %v16695_v28 = vld [vmem:[#allocation65_spill] sm:$0xff] }
0x1495   : > { %v7728_v41 = vpack.c.bf16 %v7684_v6, %v7683_v9  ;;  %v16694_v6 = vld [vmem:[#allocation34_spill] sm:$0xff] }
0x1496   : > { %10258 = vmatpush3.bf16.msra.mxu1 %v7726_v13  ;;  %v7727_v24 = vpack.c.bf16 %v7682_v18, %v7681_v62  ;;  %v16696_v11 = vpack.c.bf16 %v16694_v6, %v16695_v28  ;;  %v16697_v18 = vld [vmem:[#allocation6_spill] sm:$0xff] }
0x1497   : > { %10259 = vmatprep.subr.bf16.mxu1 %v16675_v15 }
0x1498   : > { %v10249_v53 = vpop.f32.mrb[52].mxu0 }
0x1499   : > { %7847 = vmatmul.mubr.bf16.gmra.mrb[32].mxu1 %v16684_v23  ;;  %v7687_v4 = vmul.f32 %v10910_v22, %v10249_v53  ;;  %v7582_v39 = vpop.f32.mrb[53].mxu0  ;;  %v16702_v23 = vpack.c.bf16 %v16700_v21, %v16701_v34 }
0x149a   : > { %7854 = vmatprep.mubr.bf16.mxu1 %v16687_v35  ;;  %10260 = vmatpush3.bf16.msra.mxu1 %v7727_v24  ;;  %v7685_v20 = vmul.f32 %v10911_v12, %v7582_v39  ;;  %v10250_v55 = vpop.f32.mrb[54].mxu0 }
0x149b   : > { %10261 = vmatprep.subr.bf16.mxu1 %v16675_v15  ;;  %v7688_v46 = vmul.f32 %v10912_v49, %v10250_v55  ;;  %v7585_v2 = vpop.f32.mrb[55].mxu0 }
0x149c   : > { %v7686_v54 = vmul.f32 %v10913_v16, %v7585_v2 }
0x149d   : > { %v7730_v57 = vpack.c.bf16 %v7688_v46, %v7687_v4 }
0x149e   : > { %10262 = vmatpush3.bf16.msra.mxu1 %v7728_v41  ;;  %v7729_v44 = vpack.c.bf16 %v7686_v54, %v7685_v20  ;;  %v16698_v41 = vld [vmem:[#allocation20_spill] sm:$0xff] }
0x149f   : > { %10263 = vmatprep.subr.bf16.mxu1 %v16675_v15  ;;  %v16699_v24 = vpack.c.bf16 %v16697_v18, %v16698_v41 }
0x14a0   : > { %v10253_v13 = vpop.f32.mrb[56].mxu0 }
0x14a1   : > { %7855 = vmatmul.mubr.bf16.gmra.mrb[36].mxu1 %v16690_v50  ;;  %v7691_v48 = vmul.f32 %v10914_v63, %v10253_v13  ;;  %v7598_v40 = vpop.f32.mrb[57].mxu0 }
0x14a2   : > { %7862 = vmatprep.mubr.bf16.mxu1 %v16693_v26  ;;  %10264 = vmatpush3.bf16.msra.mxu1 %v7729_v44  ;;  %v7689_v33 = vmul.f32 %v10915_v43, %v7598_v40  ;;  %v10254_v29 = vpop.f32.mrb[58].mxu0 }
0x14a3   : > { %10265 = vmatprep.subr.bf16.mxu1 %v16675_v15  ;;  %v7692_v9 = vmul.f32 %v10916_v47, %v10254_v29  ;;  %v7601_v36 = vpop.f32.mrb[59].mxu0 }
0x14a4   : > { %v7690_v62 = vmul.f32 %v10917_v37, %v7601_v36 }
0x14a5   : > { %v7732_v30 = vpack.c.bf16 %v7692_v9, %v7691_v48 }
0x14a6   : > { %10266 = vmatpush3.bf16.msra.mxu1 %v7730_v57  ;;  %v7731_v14 = vpack.c.bf16 %v7690_v62, %v7689_v33 }
0x14a7   : > { %10267 = vmatprep.subr.bf16.mxu1 %v16675_v15 }
0x14a9   : > { %7863 = vmatmul.mubr.bf16.gmra.mrb[40].mxu1 %v16696_v11 }
0x14aa   : > { %7870 = vmatprep.mubr.bf16.mxu1 %v16699_v24  ;;  %10268 = vmatpush3.bf16.msra.mxu1 %v7731_v14 }
0x14ab   : > { %10269 = vmatprep.subr.bf16.mxu1 %v16675_v15 }
0x14ae   : > { %10270 = vmatpush3.bf16.msra.mxu1 %v7732_v30 }
0x14b1   : > { %7871 = vmatmul.mubr.bf16.gmra.mrb[44].mxu1 %v16702_v23 }
0x14b2   : > { %10271 = vmatprep.mubr.msk.bf16.mxu1 %vm10940_vm6, %v16675_v15 }
0x14b9   : > { %10272 = vmatmul.mubr.bf16.vlgmr.msra.gmra.mrb[48].mxu1 %v7234_v56 }
0x14ba   : > { %10275 = vmatprep.mubr.msk.bf16.mxu1 %vm10940_vm6, %v16675_v15  ;;  %v10543_v53 = vpop.permute.xlu1 %10542 }
0x14bb   : > { %v10545_v42 = vunpack.i.h.bf16 %v10543_v53  ;;  %v10544_v45 = vunpack.i.l.bf16 %v10543_v53 }
0x14bd   : > { %v10452_v56 = vpack.c.bf16 %v10545_v42, %v10544_v45 }
0x14bf   : > { %10453 = vmatprep.subr.bf16.mxu0 %v10452_v56 }
0x14c0   : > { %10455 = vmatpush3.bf16.msra.mxu0 %v10452_v56 }
0x14c1   : > { %10276 = vmatmul.mubr.bf16.gmra.mrb[52].mxu1 %v7239_v25 }
0x14c2   : > { %10279 = vmatprep.mubr.msk.bf16.mxu1 %vm10940_vm6, %v16675_v15 }
0x14c9   : > { %10280 = vmatmul.mubr.bf16.gmra.mrb[56].mxu1 %v7244_v3 }
0x14ca   : > { %10283 = vmatprep.mubr.msk.bf16.mxu1 %vm10940_vm6, %v16675_v15 }
0x14d1   : > { %10284 = vmatmul.mubr.bf16.gmra.mrb[60].mxu1 %v7249_v0 }
0x14d2   : > { %10287 = vmatprep.mubr.msk.bf16.mxu1 %vm10940_vm6, %v16675_v15 }
0x14d9   : > { %10288 = vmatmul.mubr.bf16.gmra.mrb[64].mxu1 %v7254_v17 }
0x1524   : > { %v9660_v32 = vpop.f32.mrb[8].mxu1 }
0x1525   : > { %v9661_v5 = vpop.f32.mrb[9].mxu1 }
0x1526   : > { %v9662_v25 = vadd.f32 %v9661_v5, %v9660_v32  ;;  %v9663_v19 = vpop.f32.mrb[10].mxu1 }
0x1527   : > { %v9664_v10 = vpop.f32.mrb[11].mxu1 }
0x1528   : > { %v9665_v3 = vadd.f32 %v9664_v10, %v9663_v19 }
0x152c   : > { %v9666_v61 = vpop.f32.mrb[12].mxu1 }
0x152d   : > { %v9667_v52 = vpop.f32.mrb[13].mxu1 }
0x152e   : > { %v9668_v35 = vadd.f32 %v9667_v52, %v9666_v61  ;;  %v9669_v1 = vpop.f32.mrb[14].mxu1 }
0x152f   : > { %v9670_v27 = vpop.f32.mrb[15].mxu1 }
0x1530   : > { %v9671_v0 = vadd.f32 %v9670_v27, %v9669_v1 }
0x1534   : > { %v9672_v22 = vpop.f32.mrb[16].mxu1 }
0x1535   : > { %v9673_v15 = vpop.f32.mrb[17].mxu1 }
0x1536   : > { %v9674_v4 = vadd.f32 %v9673_v15, %v9672_v22  ;;  %v9675_v39 = vpop.f32.mrb[18].mxu1 }
0x1537   : > { %v9676_v12 = vpop.f32.mrb[19].mxu1 }
0x1538   : > { %v9677_v20 = vadd.f32 %v9676_v12, %v9675_v39 }
0x153c   : > { %v9678_v58 = vpop.f32.mrb[20].mxu1 }
0x153d   : > { %v9679_v60 = vpop.f32.mrb[21].mxu1 }
0x153e   : > { %v9680_v17 = vadd.f32 %v9679_v60, %v9678_v58  ;;  %v9681_v55 = vpop.f32.mrb[22].mxu1 }
0x153f   : > { %v9682_v49 = vpop.f32.mrb[23].mxu1 }
0x1540   : > { %v9683_v46 = vadd.f32 %v9682_v49, %v9681_v55 }
0x1544   : > { %v9684_v2 = vpop.f32.mrb[24].mxu1 }
0x1545   : > { %v9685_v16 = vpop.f32.mrb[25].mxu1 }
0x1546   : > { %v9686_v54 = vadd.f32 %v9685_v16, %v9684_v2  ;;  %v9687_v57 = vpop.f32.mrb[26].mxu1 }
0x1547   : > { %v9688_v44 = vpop.f32.mrb[27].mxu1 }
0x1548   : > { %v9689_v59 = vadd.f32 %v9688_v44, %v9687_v57 }
0x1564   : > { %v9706_v7 = vpop.f32.mrb[28].mxu1 }
0x1565   : > { %v9707_v50 = vpop.f32.mrb[29].mxu1 }
0x1566   : > { %v9708_v13 = vadd.f32 %v9707_v50, %v9706_v7  ;;  %v9709_v38 = vpop.f32.mrb[30].mxu1 }
0x1567   : > { %v9710_v51 = vpop.f32.mrb[31].mxu1 }
0x1568   : > { %v9711_v26 = vadd.f32 %v9710_v51, %v9709_v38  ;;  %v7841_v63 = vadd.f32 %v9708_v13, %v9662_v25 }
0x156a   : > { %v7844_v48 = vadd.f32 %v9711_v26, %v9665_v3 }
0x156c   : > { %v9712_v40 = vpop.f32.mrb[32].mxu1 }
0x156d   : > { %v9713_v43 = vpop.f32.mrb[33].mxu1 }
0x156e   : > { %v9714_v33 = vadd.f32 %v9713_v43, %v9712_v40  ;;  %v9715_v29 = vpop.f32.mrb[34].mxu1  ;;  %v15740_v40 = vld [vmem:[%s16107_s6 + $0x8] sm:$0xff] }
0x156f   : > { %v9716_v47 = vpop.f32.mrb[35].mxu1  ;;  %v16703_v43 = vld [vmem:[#allocation39_spill] sm:$0xff] }
0x1570   : > { %v9717_v9 = vadd.f32 %v9716_v47, %v9715_v29  ;;  %v7849_v36 = vadd.f32 %v9714_v33, %v9668_v35  ;;  %v7955_v33 = vrot.slane %v15740_v40, %v16703_v43 }
0x1572   : > { %v7852_v37 = vadd.f32 %v9717_v9, %v9671_v0 }
0x1574   : > { %v9718_v62 = vpop.f32.mrb[36].mxu1 }
0x1575   : > { %v9719_v30 = vpop.f32.mrb[37].mxu1 }
0x1576   : > { %v9720_v14 = vadd.f32 %v9719_v30, %v9718_v62  ;;  %v9721_v6 = vpop.f32.mrb[38].mxu1  ;;  %v16705_v30 = vld [vmem:[#allocation23_spill] sm:$0xff] }
0x1577   : > { %v9722_v28 = vpop.f32.mrb[39].mxu1 }
0x1578   : > { %v9723_v11 = vadd.f32 %v9722_v28, %v9721_v6  ;;  %v7857_v18 = vadd.f32 %v9720_v14, %v9674_v4 }
0x157a   : > { %v7860_v41 = vadd.f32 %v9723_v11, %v9677_v20 }
0x157c   : > { %v9724_v24 = vpop.f32.mrb[40].mxu1 }
0x157d   : > { %v9725_v21 = vpop.f32.mrb[41].mxu1 }
0x157e   : > { %v9726_v34 = vadd.f32 %v9725_v21, %v9724_v24  ;;  %v9727_v23 = vpop.f32.mrb[42].mxu1  ;;  %v16706_v21 = vld [vmem:[#allocation26_spill] sm:$0xff] }
0x157f   : > { %v9728_v53 = vpop.f32.mrb[43].mxu1 }
0x1580   : > { %v9729_v42 = vadd.f32 %v9728_v53, %v9727_v23  ;;  %v7865_v45 = vadd.f32 %v9726_v34, %v9680_v17  ;;  %v16707_v23 = vld [vmem:[#allocation25_spill] sm:$0xff] }
0x1582   : > { %v7868_v56 = vadd.f32 %v9729_v42, %v9683_v46 }
0x1584   : > { %v9730_v32 = vpop.f32.mrb[44].mxu1 }
0x1585   : > { %v9731_v5 = vpop.f32.mrb[45].mxu1 }
0x1586   : > { %v9732_v25 = vadd.f32 %v9731_v5, %v9730_v32  ;;  %v9733_v19 = vpop.f32.mrb[46].mxu1 }
0x1587   : > { %v9734_v10 = vpop.f32.mrb[47].mxu1 }
0x1588   : > { %v9735_v3 = vadd.f32 %v9734_v10, %v9733_v19  ;;  %v7873_v61 = vadd.f32 %v9732_v25, %v9686_v54  ;;  %v16708_v19 = vld [vmem:[#allocation28_spill] sm:$0xff] }
0x158a   : > { %v7876_v52 = vadd.f32 %v9735_v3, %v9689_v59  ;;  %v16709_v3 = vld [vmem:[#allocation27_spill] sm:$0xff] }
0x158c   : > { %v7913_v35 = vpop.f32.mrb[48].mxu1 }
0x158d   : > { %v7914_v1 = vadd.f32 %v7913_v35, %v7841_v63  ;;  %v10273_v27 = vpop.f32.mrb[49].mxu1 }
0x158e   : > { %v7916_v0 = vpop.f32.mrb[50].mxu1 }
0x158f   : > { %v7917_v22 = vadd.f32 %v7916_v0, %v7844_v48  ;;  %v10274_v15 = vpop.f32.mrb[51].mxu1  ;;  %10299 = vmatprep.mubr.msk.f32.mxu0 %vm635_vm0, %v7914_v1 }
0x1590   : > { %v16710_v15 = vld [vmem:[#allocation32_spill] sm:$0xff] }
0x1591   : > { %10300 = vmatmul.mubr.msk.f32.vlgmr.msra.gmra.mrb[60].mxu0 %vm635_vm0, %v7917_v22 }
0x1594   : > { %v7921_v4 = vpop.f32.mrb[52].mxu1 }
0x1595   : > { %v7922_v39 = vadd.f32 %v7921_v4, %v7849_v36  ;;  %v10277_v12 = vpop.f32.mrb[53].mxu1 }
0x1596   : > { %v7924_v20 = vpop.f32.mrb[54].mxu1 }
0x1597   : > { %v7925_v58 = vadd.f32 %v7924_v20, %v7852_v37  ;;  %v10278_v60 = vpop.f32.mrb[55].mxu1  ;;  %10302 = vmatprep.mubr.msk.f32.mxu0 %vm635_vm0, %v7922_v39  ;;  %v16704_v37 = vld [vmem:[#allocation24_spill] sm:$0xff]  ;;  %v16711_v39 = vld [vmem:[#allocation29_spill] sm:$0xff] }
0x1599   : > { %10303 = vmatmul.mubr.msk.f32.gmra.mrb[62].mxu0 %vm635_vm0, %v7925_v58 }
0x159c   : > { %v7929_v17 = vpop.f32.mrb[56].mxu1 }
0x159d   : > { %v7930_v55 = vadd.f32 %v7929_v17, %v7857_v18  ;;  %v10281_v49 = vpop.f32.mrb[57].mxu1 }
0x159e   : > { %v7932_v46 = vpop.f32.mrb[58].mxu1 }
0x159f   : > { %v7933_v2 = vadd.f32 %v7932_v46, %v7860_v41  ;;  %v10282_v16 = vpop.f32.mrb[59].mxu1  ;;  %10305 = vmatprep.mubr.msk.f32.mxu0 %vm635_vm0, %v7930_v55  ;;  %v16712_v46 = vld [vmem:[#allocation40_spill] sm:$0xff] }
0x15a0   : > { %v16713_v16 = vld [vmem:[#allocation47_spill] sm:$0xff] }
0x15a1   : > { %10306 = vmatmul.mubr.msk.f32.gmra.mrb[64].mxu0 %vm635_vm0, %v7933_v2 }
0x15a4   : > { %v7937_v54 = vpop.f32.mrb[60].mxu1 }
0x15a5   : > { %v7938_v57 = vadd.f32 %v7937_v54, %v7865_v45  ;;  %v10285_v44 = vpop.f32.mrb[61].mxu1 }
0x15a6   : > { %v7940_v59 = vpop.f32.mrb[62].mxu1 }
0x15a7   : > { %v7941_v7 = vadd.f32 %v7940_v59, %v7868_v56  ;;  %v10286_v50 = vpop.f32.mrb[63].mxu1  ;;  %10308 = vmatprep.mubr.msk.f32.mxu0 %vm635_vm0, %v7938_v57  ;;  %v9111_v59 = vld [vmem:[%s16104_s3 + $0x58] sm:$0xff] }
0x15a9   : > { %10309 = vmatmul.mubr.msk.f32.gmra.mrb[66].mxu0 %vm635_vm0, %v7941_v7  ;;  %v10919_v7 = vld [vmem:[%s16104_s3 + $0x50] sm:$0xff] }
0x15aa   : > { %v10551_v50 = vpack.i.bf16 %v9111_v59, %v10919_v7 }
0x15ac   : > { %v7945_v13 = vpop.f32.mrb[64].mxu1 }
0x15ad   : > { %v7946_v38 = vadd.f32 %v7945_v13, %v7873_v61  ;;  %v10289_v51 = vpop.f32.mrb[65].mxu1  ;;  %v9113_v13 = vld [vmem:[%s16104_s3 + $0x68] sm:$0xff] }
0x15ae   : > { %v7948_v26 = vpop.f32.mrb[66].mxu1  ;;  %v10556_v51 = vpack.i.bf16 %v9113_v13, %v15468_v8 }
0x15af   : > { %v7949_v63 = vadd.f32 %v7948_v26, %v7876_v52  ;;  %v10290_v48 = vpop.f32.mrb[67].mxu1  ;;  %10311 = vmatprep.mubr.msk.f32.mxu0 %vm635_vm0, %v7946_v38  ;;  %v9109_v38 = vld [vmem:[%s16104_s3 + $0x48] sm:$0xff]  ;;  %v10920_v26 = vld [vmem:[%s16104_s3 + $0x40] sm:$0xff] }
0x15b1   : > { %10312 = vmatmul.mubr.msk.f32.gmra.mrb[68].mxu0 %vm635_vm0, %v7949_v63  ;;  %v10546_v63 = vpack.i.bf16 %v9109_v38, %v10920_v26 }
0x1664   : > { %v10301_v29 = vpop.f32.mrb[60].mxu0 }
0x1665   : > { %v8074_v47 = vadd.f32 %v10301_v29, %v7955_v33  ;;  %v8068_v9 = vpop.f32.mrb[61].mxu0 }
0x1666   : > { %v8069_v36 = vadd.f32 %v8068_v9, %v7955_v33 }
0x1667   : > { %v8118_v62 = vadd.f32 %v8074_v47, %v16704_v37 }
0x1668   : > { %v8117_v14 = vadd.f32 %v8069_v36, %v16705_v30 }
0x1669   : > { %v8130_v6 = vsel %vm635_vm0, %v8118_v62, 0.0 }
0x166a   : > { %8131 = vadd.xlane.f32.xlu1 %v8130_v6  ;;  %v8127_v28 = vsel %vm635_vm0, %v8117_v14, 0.0 }
0x166b   : > { %8128 = vadd.xlane.f32.xlu0 %v8127_v28 }
0x166c   : > { %v10304_v11 = vpop.f32.mrb[62].mxu0 }
0x166d   : > { %v8084_v18 = vadd.f32 %v10304_v11, %v7955_v33  ;;  %v8078_v41 = vpop.f32.mrb[63].mxu0 }
0x166e   : > { %v8079_v24 = vadd.f32 %v8078_v41, %v7955_v33 }
0x166f   : > { %v8120_v34 = vadd.f32 %v8084_v18, %v16706_v21 }
0x1670   : > { %v15750_v53 = vadd.f32 %v8079_v24, %v16707_v23 }
0x1671   : > { %v8136_v42 = vsel %vm635_vm0, %v8120_v34, 0.0 }
0x1672   : > { %8137 = vadd.xlane.f32.xlu0 %v8136_v42  ;;  %v8133_v5 = vsel %vm635_vm0, %v15750_v53, 0.0 }
0x1674   : > { %v10307_v45 = vpop.f32.mrb[64].mxu0 }
0x1675   : > { %v8094_v56 = vadd.f32 %v10307_v45, %v7955_v33  ;;  %v8088_v32 = vpop.f32.mrb[65].mxu0 }
0x1676   : > { %v8089_v25 = vadd.f32 %v8088_v32, %v7955_v33  ;;  %8134 = vadd.xlane.f32.xlu0 %v8133_v5 }
0x1677   : > { %v15756_v10 = vadd.f32 %v8094_v56, %v16708_v19 }
0x1678   : > { %v15759_v61 = vadd.f32 %v8089_v25, %v16709_v3 }
0x1679   : > { %v8142_v52 = vsel %vm635_vm0, %v15756_v10, 0.0 }
0x167a   : > { %8143 = vadd.xlane.f32.xlu1 %v8142_v52  ;;  %v8139_v35 = vsel %vm635_vm0, %v15759_v61, 0.0 }
0x167b   : > { %8140 = vadd.xlane.f32.xlu0 %v8139_v35 }
0x167c   : > { %v10310_v1 = vpop.f32.mrb[66].mxu0 }
0x167d   : > { %v8104_v27 = vadd.f32 %v10310_v1, %v7955_v33  ;;  %v8098_v0 = vpop.f32.mrb[67].mxu0 }
0x167e   : > { %v8099_v22 = vadd.f32 %v8098_v0, %v7955_v33 }
0x167f   : > { %v15766_v4 = vadd.f32 %v8104_v27, %v16710_v15 }
0x1680   : > { %v15769_v12 = vadd.f32 %v8099_v22, %v16711_v39 }
0x1681   : > { %v8148_v20 = vsel %vm635_vm0, %v15766_v4, 0.0 }
0x1682   : > { %8149 = vadd.xlane.f32.xlu1 %v8148_v20  ;;  %v8145_v58 = vsel %vm635_vm0, %v15769_v12, 0.0 }
0x1683   : > { %8146 = vadd.xlane.f32.xlu0 %v8145_v58 }
0x1684   : > { %v10313_v60 = vpop.f32.mrb[68].mxu0 }
0x1685   : > { %v8114_v17 = vadd.f32 %v10313_v60, %v7955_v33  ;;  %v8108_v55 = vpop.f32.mrb[69].mxu0 }
0x1686   : > { %v8109_v49 = vadd.f32 %v8108_v55, %v7955_v33 }
0x1687   : > { %v15776_v2 = vadd.f32 %v8114_v17, %v16712_v46 }
0x1688   : > { %v15779_v54 = vadd.f32 %v8109_v49, %v16713_v16 }
0x1689   : > { %v8154_v57 = vsel %vm635_vm0, %v15776_v2, 0.0 }
0x168a   : > { %8155 = vadd.xlane.f32.xlu1 %v8154_v57  ;;  %v8151_v44 = vsel %vm635_vm0, %v15779_v54, 0.0 }
0x168b   : > { %8152 = vadd.xlane.f32.xlu0 %v8151_v44 }
0x169b   : > { %10552 = vrot.lane.b32.xlu1 %v10551_v50, %s16714_s26 }
0x169f   : > { %10557 = vrot.lane.b32.xlu1 %v10556_v51, %s16714_s26  ;;  %v9115_v51 = vld [vmem:[%s16104_s3 + $0x78] sm:$0xff] }
0x16a0   : > { %v10561_v26 = vpack.i.bf16 %v9115_v51, %v15473_v31  ;;  %v9118_v31 = vld [vmem:[%s16106_s5 + $0x50] sm:$0xff] }
0x16a1   : > { %10547 = vrot.lane.b32.xlu0 %v10546_v63, %s16714_s26  ;;  %v16715_v63 = vld [vmem:[#allocation42_spill] sm:$0xff] }
0x16f7   : > { %v8132_v48 = vpop.xlane.xlu1 %8131 }
0x16f8   : > { %v8158_v43 = vmul.f32 0.03125, %v8132_v48  ;;  %v8129_v33 = vpop.xlane.xlu0 %8128  ;;  %v15870_v48 = vrot.slane %v15740_v40, %v16715_v63 }
0x16f9   : > { %v8157_v29 = vmul.f32 0.03125, %v8129_v33  ;;  %v9117_v33 = vld [vmem:[%s16106_s5 + $0x48] sm:$0xff] }
0x16fa   : > { %v15804_v47 = vsub.f32 %v8118_v62, %v8158_v43  ;;  %v9116_v43 = vld [vmem:[%s16106_s5 + $0x40] sm:$0xff] }
0x16fb   : > { %v15806_v9 = vsub.f32 %v8117_v14, %v8157_v29  ;;  %v10464_v29 = vpack.c.bf16 %v9117_v33, %v9116_v43 }
0x16fc   : > { %v8178_v8 = vmul.f32 %v15804_v47, %v15804_v47 }
0x16fd   : > { %v8177_v36 = vmul.f32 %v15806_v9, %v15806_v9  ;;  %10465 = vmatprep.subr.bf16.mxu0 %v10464_v29 }
0x16fe   : > { %v8190_v37 = vsel %vm635_vm0, %v8178_v8, 0.0  ;;  %v9119_v8 = vld [vmem:[%s16106_s5 + $0x58] sm:$0xff]  ;;  %10467 = vmatpush3.bf16.msra.mxu0 %v10464_v29 }
0x16ff   : > { %8191 = vadd.xlane.f32.xlu1 %v8190_v37  ;;  %v8138_v30 = vpop.xlane.xlu0 %8137  ;;  %v8187_v6 = vsel %vm635_vm0, %v8177_v36, 0.0  ;;  %v10468_v36 = vpack.c.bf16 %v9119_v8, %v9118_v31  ;;  %v9120_v37 = vld [vmem:[%s16106_s5 + $0x60] sm:$0xff] }
0x1700   : > { %v8160_v28 = vmul.f32 0.03125, %v8138_v30  ;;  %8188 = vadd.xlane.f32.xlu0 %v8187_v6  ;;  %v9121_v30 = vld [vmem:[%s16106_s5 + $0x68] sm:$0xff] }
0x1701   : > { %10469 = vmatprep.subr.bf16.mxu0 %v10468_v36  ;;  %v10472_v6 = vpack.c.bf16 %v9121_v30, %v9120_v37 }
0x1702   : > { %v15814_v11 = vsub.f32 %v8120_v34, %v8160_v28  ;;  %10471 = vmatpush3.bf16.msra.mxu0 %v10468_v36 }
0x1703   : > { %v8135_v62 = vpop.xlane.xlu0 %8134  ;;  %10473 = vmatprep.subr.bf16.mxu0 %v10472_v6 }
0x1704   : > { %v8159_v18 = vmul.f32 0.03125, %v8135_v62  ;;  %v8180_v14 = vmul.f32 %v15814_v11, %v15814_v11 }
0x1706   : > { %v15819_v41 = vsub.f32 %v15750_v53, %v8159_v18  ;;  %v8196_v24 = vsel %vm635_vm0, %v8180_v14, 0.0  ;;  %10475 = vmatpush3.bf16.msra.mxu0 %v10472_v6 }
0x1707   : > { %v8144_v21 = vpop.xlane.xlu1 %8143  ;;  %8197 = vadd.xlane.f32.xlu1 %v8196_v24 }
0x1708   : > { %v8162_v23 = vmul.f32 0.03125, %v8144_v21  ;;  %v8141_v42 = vpop.xlane.xlu0 %8140  ;;  %v8179_v45 = vmul.f32 %v15819_v41, %v15819_v41 }
0x1709   : > { %v8161_v56 = vmul.f32 0.03125, %v8141_v42 }
0x170a   : > { %v15825_v34 = vsub.f32 %v15756_v10, %v8162_v23  ;;  %v8193_v32 = vsel %vm635_vm0, %v8179_v45, 0.0 }
0x170b   : > { %v15829_v5 = vsub.f32 %v15759_v61, %v8161_v56  ;;  %8194 = vadd.xlane.f32.xlu0 %v8193_v32 }
0x170c   : > { %v8182_v53 = vmul.f32 %v15825_v34, %v15825_v34 }
0x170d   : > { %v8181_v25 = vmul.f32 %v15829_v5, %v15829_v5 }
0x170e   : > { %v8202_v19 = vsel %vm635_vm0, %v8182_v53, 0.0 }
0x170f   : > { %v8150_v3 = vpop.xlane.xlu1 %8149  ;;  %8203 = vadd.xlane.f32.xlu1 %v8202_v19  ;;  %v8199_v52 = vsel %vm635_vm0, %v8181_v25, 0.0 }
0x1710   : > { %v8164_v10 = vmul.f32 0.03125, %v8150_v3  ;;  %8200 = vadd.xlane.f32.xlu0 %v8199_v52  ;;  %v8147_v35 = vpop.xlane.xlu0 %8146 }
0x1711   : > { %v8163_v1 = vmul.f32 0.03125, %v8147_v35 }
0x1712   : > { %v15838_v61 = vsub.f32 %v15766_v4, %v8164_v10 }
0x1713   : > { %v15841_v27 = vsub.f32 %v15769_v12, %v8163_v1 }
0x1714   : > { %v8184_v0 = vmul.f32 %v15838_v61, %v15838_v61 }
0x1715   : > { %v8183_v22 = vmul.f32 %v15841_v27, %v15841_v27 }
0x1716   : > { %v8208_v15 = vsel %vm635_vm0, %v8184_v0, 0.0 }
0x1717   : > { %v8156_v39 = vpop.xlane.xlu1 %8155  ;;  %8209 = vadd.xlane.f32.xlu1 %v8208_v15  ;;  %v8205_v20 = vsel %vm635_vm0, %v8183_v22, 0.0 }
0x1718   : > { %v8166_v58 = vmul.f32 0.03125, %v8156_v39  ;;  %8206 = vadd.xlane.f32.xlu0 %v8205_v20  ;;  %v8153_v60 = vpop.xlane.xlu0 %8152 }
0x1719   : > { %v8165_v4 = vmul.f32 0.03125, %v8153_v60 }
0x171a   : > { %v15850_v17 = vsub.f32 %v15776_v2, %v8166_v58 }
0x171b   : > { %v15853_v12 = vsub.f32 %v15779_v54, %v8165_v4  ;;  %v10553_v55 = vpop.permute.xlu1 %10552 }
0x171c   : > { %v8186_v49 = vmul.f32 %v15850_v17, %v15850_v17  ;;  %v10555_v46 = vunpack.i.h.bf16 %v10553_v55  ;;  %v10554_v16 = vunpack.i.l.bf16 %v10553_v55  ;;  %v10548_v57 = vpop.permute.xlu0 %10547 }
0x171d   : > { %v8185_v44 = vmul.f32 %v15853_v12, %v15853_v12  ;;  %v10550_v59 = vunpack.i.h.bf16 %v10548_v57  ;;  %v10549_v7 = vunpack.i.l.bf16 %v10548_v57 }
0x171e   : > { %v8214_v50 = vsel %vm635_vm0, %v8186_v49, 0.0  ;;  %v8310_v2 = vsel %vm1778_vm4, %v10554_v16, %v10555_v46 }
0x171f   : > { %8215 = vadd.xlane.f32.xlu1 %v8214_v50  ;;  %v8211_v54 = vsel %vm635_vm0, %v8185_v44, 0.0  ;;  %v8309_v13 = vsel %vm1778_vm4, %v10549_v7, %v10550_v59  ;;  %v10558_v28 = vpop.permute.xlu1 %10557 }
0x1720   : > { %8212 = vadd.xlane.f32.xlu0 %v8211_v54  ;;  %v10456_v38 = vpack.c.bf16 %v8310_v2, %v8309_v13  ;;  %v10560_v44 = vunpack.i.h.bf16 %v10558_v28  ;;  %v10559_v59 = vunpack.i.l.bf16 %v10558_v28 }
0x1722   : > { %10457 = vmatprep.subr.bf16.mxu1 %v10456_v38  ;;  %v8311_v31 = vsel %vm1778_vm4, %v10559_v59, %v10560_v44 }
0x1723   : > { %10459 = vmatpush3.bf16.msra.mxu1 %v10456_v38 }
0x1730   : > { %10562 = vrot.lane.b32.xlu1 %v10561_v26, %s16714_s26 }
0x1736   : > { %8272 = vrot.lane.b32.xlu0 %v15870_v48, %s10937_s15 }
0x178c   : > { %v8192_v14 = vpop.xlane.xlu1 %8191 }
0x178d   : > { %v8189_v62 = vpop.xlane.xlu0 %8188  ;;  %v8218_v42 = vmul.f32 0.03125, %v8192_v14 }
0x178e   : > { %v8217_v18 = vmul.f32 0.03125, %v8189_v62 }
0x178f   : > { %v8228_v25 = vadd.f32 1e-05, %v8218_v42 }
0x1790   : > { %v8227_v21 = vadd.f32 1e-05, %v8217_v18 }
0x1792   : > { %10726 = vrsqrt.f32 %v8227_v21 }
0x1793   : > { %10728 = vrsqrt.f32 %v8228_v25 }
0x1794   : > { %v8198_v23 = vpop.xlane.xlu1 %8197 }
0x1795   : > { %v8220_v19 = vmul.f32 0.03125, %v8198_v23 }
0x1797   : > { %v8230_v35 = vadd.f32 1e-05, %v8220_v19 }
0x1798   : > { %v8195_v24 = vpop.xlane.xlu0 %8194 }
0x1799   : > { %v8219_v56 = vmul.f32 0.03125, %v8195_v24 }
0x179b   : > { %v8229_v3 = vadd.f32 1e-05, %v8219_v56 }
0x179c   : > { %v8204_v32 = vpop.xlane.xlu1 %8203  ;;  %v10727_v20 = vpop.eup %10726 }
0x179d   : > { %v8201_v45 = vpop.xlane.xlu0 %8200  ;;  %v8222_v1 = vmul.f32 0.03125, %v8204_v32  ;;  %10730 = vrsqrt.f32 %v8229_v3  ;;  %v8247_v55 = vmul.f32 %v10727_v20, %v15806_v9  ;;  %v10729_v57 = vpop.eup %10728 }
0x179e   : > { %v8221_v53 = vmul.f32 0.03125, %v8201_v45  ;;  %v8248_v9 = vmul.f32 %v10729_v57, %v15804_v47 }
0x179f   : > { %v8232_v58 = vadd.f32 1e-05, %v8222_v1  ;;  %v8261_v13 = vmul.f32 %v15870_v48, %v8247_v55  ;;  %v9122_v1 = vld [vmem:[%s16106_s5 + $0x70] sm:$0xff] }
0x17a0   : > { %v8231_v52 = vadd.f32 1e-05, %v8221_v53  ;;  %v8262_v47 = vmul.f32 %v15870_v48, %v8248_v9 }
0x17a2   : > { %10732 = vrsqrt.f32 %v8231_v52 }
0x17a3   : > { %10734 = vrsqrt.f32 %v8230_v35 }
0x17a4   : > { %v8210_v10 = vpop.xlane.xlu1 %8209 }
0x17a5   : > { %v8207_v0 = vpop.xlane.xlu0 %8206  ;;  %v8224_v15 = vmul.f32 0.03125, %v8210_v10 }
0x17a6   : > { %v8223_v22 = vmul.f32 0.03125, %v8207_v0 }
0x17a7   : > { %v8234_v60 = vadd.f32 1e-05, %v8224_v15  ;;  %v10731_v50 = vpop.eup %10730 }
0x17a8   : > { %v8233_v39 = vadd.f32 1e-05, %v8223_v22  ;;  %v8249_v8 = vmul.f32 %v10731_v50, %v15819_v41  ;;  %v16716_v22 = vld [vmem:[#allocation68_spill] sm:$0xff] }
0x17a9   : > { %v8288_v15 = vrot.slane %v15740_v40, %v16716_v22 }
0x17aa   : > { %10736 = vrsqrt.f32 %v8233_v39  ;;  %v8263_v62 = vmul.f32 %v15870_v48, %v8249_v8 }
0x17ab   : > { %10738 = vrsqrt.f32 %v8232_v58 }
0x17ac   : > { %v8216_v4 = vpop.xlane.xlu1 %8215  ;;  %10740 = vrsqrt.f32 %v8234_v60  ;;  %v10733_v63 = vpop.eup %10732 }
0x17ad   : > { %v8226_v49 = vmul.f32 0.03125, %v8216_v4  ;;  %v8213_v46 = vpop.xlane.xlu0 %8212  ;;  %v10735_v33 = vpop.eup %10734  ;;  %v8251_v37 = vmul.f32 %v10733_v63, %v15829_v5 }
0x17ae   : > { %v8225_v16 = vmul.f32 0.03125, %v8213_v46  ;;  %v8250_v6 = vmul.f32 %v10735_v33, %v15814_v11 }
0x17af   : > { %v8236_v7 = vadd.f32 1e-05, %v8226_v49  ;;  %v8265_v24 = vmul.f32 %v15870_v48, %v8251_v37 }
0x17b0   : > { %v8235_v2 = vadd.f32 1e-05, %v8225_v16  ;;  %v10563_v54 = vpop.permute.xlu1 %10562  ;;  %v8264_v5 = vmul.f32 %v15870_v48, %v8250_v6  ;;  %v16717_v6 = vld [vmem:[#allocation3_spill] sm:$0xff] }
0x17b1   : > { %v10565_v38 = vunpack.i.h.bf16 %v10563_v54  ;;  %v10564_v51 = vunpack.i.l.bf16 %v10563_v54  ;;  %v8273_v26 = vpop.permute.xlu0 %8272 }
0x17b2   : > { %10742 = vrsqrt.f32 %v8235_v2  ;;  %v15895_v43 = vadd.f32 %v8273_v26, %v8261_v13  ;;  %v15906_v18 = vadd.f32 %v8273_v26, %v8262_v47  ;;  %v15908_v41 = vadd.f32 %v8273_v26, %v8263_v62 }
0x17b3   : > { %10744 = vrsqrt.f32 %v8236_v7  ;;  %v8312_v29 = vsel %vm1778_vm4, %v10564_v51, %v10565_v38  ;;  %v15919_v45 = vadd.f32 %v8273_v26, %v8264_v5  ;;  %v15921_v32 = vadd.f32 %v8273_v26, %v8265_v24 }
0x17b4   : > { %10322 = vmatprep.mubr.msk.f32.mxu1 %vm635_vm0, %v15895_v43  ;;  %v10460_v36 = vpack.c.bf16 %v8312_v29, %v8311_v31  ;;  %v10737_v30 = vpop.eup %10736 }
0x17b5   : > { %v10739_v28 = vpop.eup %10738  ;;  %v8253_v21 = vmul.f32 %v10737_v30, %v15841_v27 }
0x17b6   : > { %10461 = vmatprep.subr.bf16.mxu1 %v10460_v36  ;;  %v10741_v14 = vpop.eup %10740  ;;  %v8252_v23 = vmul.f32 %v10739_v28, %v15825_v34  ;;  %v16718_v28 = vsub.s32 5, %v16717_v6 }
0x17b7   : > { %10463 = vmatpush3.bf16.msra.mxu1 %v10460_v36  ;;  %v8254_v42 = vmul.f32 %v10741_v14, %v15838_v61  ;;  %v8267_v27 = vmul.f32 %v15870_v48, %v8253_v21 }
0x17b8   : > { %v8266_v34 = vmul.f32 %v15870_v48, %v8252_v23  ;;  %v8475_v62 = vrot.slane %v15740_v40, %v16718_v28 }
0x17b9   : > { %v8268_v25 = vmul.f32 %v15870_v48, %v8254_v42  ;;  %v15934_v3 = vadd.f32 %v8273_v26, %v8267_v27 }
0x17ba   : > { %10323 = vmatmul.mubr.msk.f32.vlgmr.msra.gmra.mrb[68].mxu1 %vm635_vm0, %v15906_v18  ;;  %v15932_v19 = vadd.f32 %v8273_v26, %v8266_v34 }
0x17bb   : > { %10325 = vmatprep.mubr.msk.f32.mxu1 %vm635_vm0, %v15908_v41  ;;  %v15942_v10 = vadd.f32 %v8273_v26, %v8268_v25 }
0x17bc   : > { %v10743_v11 = vpop.eup %10742 }
0x17bd   : > { %v10745_v56 = vpop.eup %10744  ;;  %v8255_v53 = vmul.f32 %v10743_v11, %v15853_v12 }
0x17be   : > { %10326 = vmatmul.mubr.msk.f32.gmra.mrb[70].mxu1 %vm635_vm0, %v15919_v45  ;;  %v8256_v61 = vmul.f32 %v10745_v56, %v15850_v17 }
0x17bf   : > { %10328 = vmatprep.mubr.msk.f32.mxu1 %vm635_vm0, %v15921_v32  ;;  %v8269_v52 = vmul.f32 %v15870_v48, %v8255_v53 }
0x17c0   : > { %v8270_v12 = vmul.f32 %v15870_v48, %v8256_v61  ;;  %v9123_v48 = vld [vmem:[%s16106_s5 + $0x78] sm:$0xff] }
0x17c1   : > { %v15944_v35 = vadd.f32 %v8273_v26, %v8269_v52  ;;  %v10476_v0 = vpack.c.bf16 %v9123_v48, %v9122_v1 }
0x17c2   : > { %10329 = vmatmul.mubr.msk.f32.gmra.mrb[72].mxu1 %vm635_vm0, %v15932_v19  ;;  %v15950_v17 = vadd.f32 %v8273_v26, %v8270_v12 }
0x17c3   : > { %10331 = vmatprep.mubr.msk.f32.mxu1 %vm635_vm0, %v15934_v3  ;;  %10477 = vmatprep.subr.bf16.mxu0 %v10476_v0 }
0x17c4   : > { %10479 = vmatpush3.bf16.msra.mxu0 %v10476_v0 }
0x17c6   : > { %10332 = vmatmul.mubr.msk.f32.gmra.mrb[76].mxu1 %vm635_vm0, %v15942_v10 }
0x17c7   : > { %10334 = vmatprep.mubr.msk.f32.mxu1 %vm635_vm0, %v15944_v35 }
0x17ca   : > { %10335 = vmatmul.mubr.msk.f32.gmra.mrb[78].mxu1 %vm635_vm0, %v15950_v17 }
0x188d   : > { %v10324_v39 = vpop.f32.mrb[68].mxu1 }
0x188e   : > { %v8419_v20 = vadd.f32 %v10324_v39, %v8288_v15  ;;  %v8413_v58 = vpop.f32.mrb[69].mxu1 }
0x188f   : > { %v8414_v60 = vadd.f32 %v8413_v58, %v8288_v15 }
0x1890   : > { %v8463_v49 = vmax.f32 %v8419_v20, 0.0 }
0x1891   : > { %v8462_v4 = vmax.f32 %v8414_v60, 0.0  ;;  %v10327_v55 = vpop.f32.mrb[70].mxu1 }
0x1892   : > { %v8429_v46 = vadd.f32 %v10327_v55, %v8288_v15  ;;  %v8423_v16 = vpop.f32.mrb[71].mxu1 }
0x1893   : > { %v8424_v57 = vadd.f32 %v8423_v16, %v8288_v15  ;;  %10353 = vmatprep.mubr.msk.f32.mxu0 %vm4664_vm7, %v8462_v4 }
0x1894   : > { %10354 = vmatmul.mubr.msk.f32.vlgmr.msra.gmra.mrb[70].mxu0 %vm4664_vm7, %v8463_v49  ;;  %v8465_v7 = vmax.f32 %v8429_v46, 0.0 }
0x1895   : > { %v8464_v44 = vmax.f32 %v8424_v57, 0.0  ;;  %v10330_v59 = vpop.f32.mrb[72].mxu1 }
0x1896   : > { %v8439_v50 = vadd.f32 %v10330_v59, %v8288_v15  ;;  %v8433_v2 = vpop.f32.mrb[73].mxu1 }
0x1897   : > { %v8434_v54 = vadd.f32 %v8433_v2, %v8288_v15  ;;  %10356 = vmatprep.mubr.msk.f32.mxu0 %vm4664_vm7, %v8464_v44 }
0x1898   : > { %10357 = vmatmul.mubr.msk.f32.gmra.mrb[72].mxu0 %vm4664_vm7, %v8465_v7  ;;  %v8467_v51 = vmax.f32 %v8439_v50, 0.0 }
0x1899   : > { %v8466_v13 = vmax.f32 %v8434_v54, 0.0  ;;  %v10333_v38 = vpop.f32.mrb[76].mxu1 }
0x189a   : > { %v8449_v26 = vadd.f32 %v10333_v38, %v8288_v15  ;;  %v8443_v63 = vpop.f32.mrb[77].mxu1 }
0x189b   : > { %v8444_v9 = vadd.f32 %v8443_v63, %v8288_v15  ;;  %10359 = vmatprep.mubr.msk.f32.mxu0 %vm4664_vm7, %v8466_v13 }
0x189c   : > { %10360 = vmatmul.mubr.msk.f32.gmra.mrb[74].mxu0 %vm4664_vm7, %v8467_v51  ;;  %v8469_v29 = vmax.f32 %v8449_v26, 0.0 }
0x189d   : > { %v8468_v33 = vmax.f32 %v8444_v9, 0.0  ;;  %v10336_v31 = vpop.f32.mrb[78].mxu1 }
0x189e   : > { %v8459_v8 = vadd.f32 %v10336_v31, %v8288_v15  ;;  %v8453_v36 = vpop.f32.mrb[79].mxu1 }
0x189f   : > { %v8454_v37 = vadd.f32 %v8453_v36, %v8288_v15  ;;  %10362 = vmatprep.mubr.msk.f32.mxu0 %vm4664_vm7, %v8468_v33 }
0x18a0   : > { %10363 = vmatmul.mubr.msk.f32.gmra.mrb[76].mxu0 %vm4664_vm7, %v8469_v29  ;;  %v8471_v47 = vmax.f32 %v8459_v8, 0.0 }
0x18a1   : > { %v8470_v30 = vmax.f32 %v8454_v37, 0.0 }
0x18a3   : > { %10365 = vmatprep.mubr.msk.f32.mxu0 %vm4664_vm7, %v8470_v30 }
0x18a4   : > { %10366 = vmatmul.mubr.msk.f32.gmra.mrb[78].mxu0 %vm4664_vm7, %v8471_v47 }
0x1967   : > { %v10355_v14 = vpop.f32.mrb[70].mxu0 }
0x1968   : > { %v8578_v24 = vadd.f32 %v10355_v14, %v8475_v62  ;;  %v8572_v21 = vpop.f32.mrb[71].mxu0 }
0x1969   : > { %v8573_v5 = vadd.f32 %v8572_v21, %v8475_v62 }
0x196a   : > { %v8622_v23 = vadd.f32 %v8578_v24, %v15906_v18 }
0x196b   : > { %v8621_v11 = vadd.f32 %v8573_v5, %v15895_v43  ;;  %v10358_v42 = vpop.f32.mrb[72].mxu0 }
0x196c   : > { %v8588_v56 = vadd.f32 %v10358_v42, %v8475_v62  ;;  %v8582_v27 = vpop.f32.mrb[73].mxu0  ;;  %v8634_v53 = vsel %vm635_vm0, %v8622_v23, 0.0 }
0x196d   : > { %v8583_v34 = vadd.f32 %v8582_v27, %v8475_v62  ;;  %8635 = vadd.xlane.f32.xlu0 %v8634_v53  ;;  %v8631_v25 = vsel %vm635_vm0, %v8621_v11, 0.0 }
0x196e   : > { %v8624_v61 = vadd.f32 %v8588_v56, %v15919_v45  ;;  %8632 = vadd.xlane.f32.xlu1 %v8631_v25 }
0x196f   : > { %v10361_v52 = vpop.f32.mrb[74].mxu0  ;;  %v8623_v12 = vadd.f32 %v8583_v34, %v15908_v41 }
0x1970   : > { %v8598_v1 = vadd.f32 %v10361_v52, %v8475_v62  ;;  %v8592_v48 = vpop.f32.mrb[75].mxu0  ;;  %v8640_v18 = vsel %vm635_vm0, %v8624_v61, 0.0 }
0x1971   : > { %v8593_v43 = vadd.f32 %v8592_v48, %v8475_v62  ;;  %8641 = vadd.xlane.f32.xlu0 %v8640_v18  ;;  %v8637_v58 = vsel %vm635_vm0, %v8623_v12, 0.0 }
0x1972   : > { %v8626_v15 = vadd.f32 %v8598_v1, %v15932_v19 }
0x1973   : > { %v8625_v0 = vadd.f32 %v8593_v43, %v15921_v32  ;;  %v10364_v22 = vpop.f32.mrb[76].mxu0 }
0x1974   : > { %v8608_v39 = vadd.f32 %v10364_v22, %v8475_v62  ;;  %v8602_v20 = vpop.f32.mrb[77].mxu0  ;;  %v8646_v32 = vsel %vm635_vm0, %v8626_v15, 0.0 }
0x1975   : > { %v8603_v45 = vadd.f32 %v8602_v20, %v8475_v62  ;;  %8638 = vadd.xlane.f32.xlu0 %v8637_v58  ;;  %v8643_v60 = vsel %vm635_vm0, %v8625_v0, 0.0 }
0x1976   : > { %8644 = vadd.xlane.f32.xlu1 %v8643_v60  ;;  %v8628_v55 = vadd.f32 %v8608_v39, %v15942_v10 }
0x1977   : > { %v8627_v41 = vadd.f32 %v8603_v45, %v15934_v3  ;;  %v10367_v4 = vpop.f32.mrb[78].mxu0 }
0x1978   : > { %v8618_v49 = vadd.f32 %v10367_v4, %v8475_v62  ;;  %v8612_v46 = vpop.f32.mrb[79].mxu0  ;;  %v8652_v59 = vsel %vm635_vm0, %v8628_v55, 0.0  ;;  %v16719_v4 = vsub.s32 6, %v16717_v6 }
0x1979   : > { %v8613_v16 = vadd.f32 %v8612_v46, %v8475_v62  ;;  %8647 = vadd.xlane.f32.xlu0 %v8646_v32  ;;  %v8649_v19 = vsel %vm635_vm0, %v8627_v41, 0.0 }
0x197a   : > { %8650 = vadd.xlane.f32.xlu1 %v8649_v19  ;;  %v8630_v44 = vadd.f32 %v8618_v49, %v15950_v17 }
0x197b   : > { %v8629_v57 = vadd.f32 %v8613_v16, %v15944_v35 }
0x197c   : > { %v8658_v10 = vsel %vm635_vm0, %v8630_v44, 0.0 }
0x197d   : > { %8653 = vadd.xlane.f32.xlu0 %v8652_v59  ;;  %v8655_v3 = vsel %vm635_vm0, %v8629_v57, 0.0 }
0x197e   : > { %8656 = vadd.xlane.f32.xlu1 %v8655_v3 }
0x1981   : > { %8659 = vadd.xlane.f32.xlu0 %v8658_v10 }
0x19fa   : > { %v8636_v7 = vpop.xlane.xlu0 %8635 }
0x19fb   : > { %v8662_v50 = vmul.f32 0.03125, %v8636_v7  ;;  %v8633_v2 = vpop.xlane.xlu1 %8632 }
0x19fc   : > { %v8661_v54 = vmul.f32 0.03125, %v8633_v2 }
0x19fd   : > { %v15995_v13 = vsub.f32 %v8622_v23, %v8662_v50 }
0x19fe   : > { %v15997_v38 = vsub.f32 %v8621_v11, %v8661_v54  ;;  %v8642_v35 = vpop.xlane.xlu0 %8641 }
0x19ff   : > { %v8664_v51 = vmul.f32 0.03125, %v8642_v35  ;;  %v8682_v17 = vmul.f32 %v15995_v13, %v15995_v13 }
0x1a00   : > { %v8681_v26 = vmul.f32 %v15997_v38, %v15997_v38 }
0x1a01   : > { %v16003_v63 = vsub.f32 %v8624_v61, %v8664_v51  ;;  %v8694_v9 = vsel %vm635_vm0, %v8682_v17, 0.0 }
0x1a02   : > { %8695 = vadd.xlane.f32.xlu0 %v8694_v9  ;;  %v8639_v33 = vpop.xlane.xlu0 %8638  ;;  %v8691_v31 = vsel %vm635_vm0, %v8681_v26, 0.0 }
0x1a03   : > { %v8663_v29 = vmul.f32 0.03125, %v8639_v33  ;;  %8692 = vadd.xlane.f32.xlu1 %v8691_v31  ;;  %v8645_v8 = vpop.xlane.xlu1 %8644  ;;  %v8684_v36 = vmul.f32 %v16003_v63, %v16003_v63 }
0x1a04   : > { %v8665_v37 = vmul.f32 0.03125, %v8645_v8 }
0x1a05   : > { %v16009_v30 = vsub.f32 %v8623_v12, %v8663_v29  ;;  %v8700_v47 = vsel %vm635_vm0, %v8684_v36, 0.0 }
0x1a06   : > { %v16012_v28 = vsub.f32 %v8625_v0, %v8665_v37  ;;  %8701 = vadd.xlane.f32.xlu0 %v8700_v47  ;;  %v8648_v62 = vpop.xlane.xlu0 %8647 }
0x1a07   : > { %v8666_v14 = vmul.f32 0.03125, %v8648_v62  ;;  %v8651_v24 = vpop.xlane.xlu1 %8650  ;;  %v8683_v21 = vmul.f32 %v16009_v30, %v16009_v30 }
0x1a08   : > { %v8667_v5 = vmul.f32 0.03125, %v8651_v24  ;;  %v8685_v42 = vmul.f32 %v16012_v28, %v16012_v28 }
0x1a09   : > { %v16016_v23 = vsub.f32 %v8626_v15, %v8666_v14  ;;  %v8697_v11 = vsel %vm635_vm0, %v8683_v21, 0.0 }
0x1a0a   : > { %v16021_v56 = vsub.f32 %v8627_v41, %v8667_v5  ;;  %v8654_v27 = vpop.xlane.xlu0 %8653  ;;  %8698 = vadd.xlane.f32.xlu1 %v8697_v11  ;;  %v8703_v1 = vsel %vm635_vm0, %v8685_v42, 0.0 }
0x1a0b   : > { %v8668_v53 = vmul.f32 0.03125, %v8654_v27  ;;  %v8657_v34 = vpop.xlane.xlu1 %8656  ;;  %v8686_v25 = vmul.f32 %v16016_v23, %v16016_v23 }
0x1a0c   : > { %v8669_v61 = vmul.f32 0.03125, %v8657_v34  ;;  %v8687_v48 = vmul.f32 %v16021_v56, %v16021_v56 }
0x1a0d   : > { %v16025_v52 = vsub.f32 %v8628_v55, %v8668_v53  ;;  %v8706_v12 = vsel %vm635_vm0, %v8686_v25, 0.0  ;;  %v16048_v55 = vrot.slane %v15740_v40, %v16719_v4 }
0x1a0e   : > { %v16031_v18 = vsub.f32 %v8629_v57, %v8669_v61  ;;  %8707 = vadd.xlane.f32.xlu0 %v8706_v12  ;;  %v8660_v43 = vpop.xlane.xlu0 %8659  ;;  %8704 = vadd.xlane.f32.xlu1 %v8703_v1  ;;  %v8709_v20 = vsel %vm635_vm0, %v8687_v48, 0.0 }
0x1a0f   : > { %v8670_v0 = vmul.f32 0.03125, %v8660_v43  ;;  %v8688_v22 = vmul.f32 %v16025_v52, %v16025_v52 }
0x1a10   : > { %v8689_v58 = vmul.f32 %v16031_v18, %v16031_v18 }
0x1a11   : > { %v16035_v15 = vsub.f32 %v8630_v44, %v8670_v0  ;;  %v8712_v39 = vsel %vm635_vm0, %v8688_v22, 0.0 }
0x1a12   : > { %8713 = vadd.xlane.f32.xlu0 %v8712_v39  ;;  %8710 = vadd.xlane.f32.xlu1 %v8709_v20  ;;  %v8715_v41 = vsel %vm635_vm0, %v8689_v58, 0.0 }
0x1a13   : > { %v8690_v45 = vmul.f32 %v16035_v15, %v16035_v15 }
0x1a15   : > { %v8718_v60 = vsel %vm635_vm0, %v8690_v45, 0.0 }
0x1a16   : > { %8719 = vadd.xlane.f32.xlu0 %v8718_v60  ;;  %8716 = vadd.xlane.f32.xlu1 %v8715_v41 }
0x1a27   : > { %8776 = vrot.lane.b32.xlu1 %v16048_v55, %s10937_s15 }
0x1a8f   : > { %v8696_v49 = vpop.xlane.xlu0 %8695 }
0x1a90   : > { %v8722_v46 = vmul.f32 0.03125, %v8696_v49  ;;  %v8693_v32 = vpop.xlane.xlu1 %8692 }
0x1a91   : > { %v8721_v16 = vmul.f32 0.03125, %v8693_v32 }
0x1a92   : > { %v8732_v19 = vadd.f32 1e-05, %v8722_v46 }
0x1a93   : > { %v8731_v57 = vadd.f32 1e-05, %v8721_v16  ;;  %v8702_v44 = vpop.xlane.xlu0 %8701 }
0x1a94   : > { %10746 = vrsqrt.f32 %v8732_v19  ;;  %v8724_v59 = vmul.f32 0.03125, %v8702_v44 }
0x1a95   : > { %10748 = vrsqrt.f32 %v8731_v57 }
0x1a96   : > { %v8734_v3 = vadd.f32 1e-05, %v8724_v59 }
0x1a97   : > { %v8699_v10 = vpop.xlane.xlu1 %8698 }
0x1a98   : > { %10750 = vrsqrt.f32 %v8734_v3  ;;  %v8723_v6 = vmul.f32 0.03125, %v8699_v10 }
0x1a9a   : > { %v8733_v7 = vadd.f32 1e-05, %v8723_v6 }
0x1a9b   : > { %v8708_v40 = vpop.xlane.xlu0 %8707  ;;  %v8705_v50 = vpop.xlane.xlu1 %8704 }
0x1a9c   : > { %10752 = vrsqrt.f32 %v8733_v7  ;;  %v8726_v2 = vmul.f32 0.03125, %v8708_v40  ;;  %v8725_v54 = vmul.f32 0.03125, %v8705_v50 }
0x1a9e   : > { %v10747_v35 = vpop.eup %10746  ;;  %v8736_v51 = vadd.f32 1e-05, %v8726_v2  ;;  %v8735_v17 = vadd.f32 1e-05, %v8725_v54 }
0x1a9f   : > { %v10749_v26 = vpop.eup %10748  ;;  %v8714_v9 = vpop.xlane.xlu0 %8713  ;;  %v8752_v36 = vmul.f32 %v10747_v35, %v15995_v13 }
0x1aa0   : > { %v8711_v33 = vpop.xlane.xlu1 %8710  ;;  %10754 = vrsqrt.f32 %v8736_v51  ;;  %v8728_v31 = vmul.f32 0.03125, %v8714_v9  ;;  %v8751_v37 = vmul.f32 %v10749_v26, %v15997_v38 }
0x1aa1   : > { %v8727_v29 = vmul.f32 0.03125, %v8711_v33  ;;  %10756 = vrsqrt.f32 %v8735_v17  ;;  %v8766_v53 = vmul.f32 %v16048_v55, %v8752_v36 }
0x1aa2   : > { %v10751_v8 = vpop.eup %10750  ;;  %v8738_v47 = vadd.f32 1e-05, %v8728_v31  ;;  %v8765_v13 = vmul.f32 %v16048_v55, %v8751_v37 }
0x1aa3   : > { %v8737_v62 = vadd.f32 1e-05, %v8727_v29  ;;  %v8754_v14 = vmul.f32 %v10751_v8, %v16003_v63  ;;  %v8720_v24 = vpop.xlane.xlu0 %8719 }
0x1aa4   : > { %v8717_v21 = vpop.xlane.xlu1 %8716  ;;  %10758 = vrsqrt.f32 %v8738_v47  ;;  %v8730_v5 = vmul.f32 0.03125, %v8720_v24 }
0x1aa5   : > { %v8729_v11 = vmul.f32 0.03125, %v8717_v21  ;;  %v8768_v42 = vmul.f32 %v16048_v55, %v8754_v14  ;;  %10760 = vrsqrt.f32 %v8737_v62 }
0x1aa6   : > { %v10753_v27 = vpop.eup %10752  ;;  %v8740_v34 = vadd.f32 1e-05, %v8730_v5 }
0x1aa7   : > { %v8739_v38 = vadd.f32 1e-05, %v8729_v11  ;;  %v8753_v63 = vmul.f32 %v10753_v27, %v16009_v30 }
0x1aa8   : > { %v8777_v25 = vpop.permute.xlu1 %8776  ;;  %10762 = vrsqrt.f32 %v8740_v34 }
0x1aa9   : > { %v8779_v61 = vadd.f32 %v8777_v25, %v8765_v13  ;;  %v8780_v12 = vadd.f32 %v8777_v25, %v8766_v53  ;;  %v8782_v1 = vadd.f32 %v8777_v25, %v8768_v42  ;;  %v8767_v48 = vmul.f32 %v16048_v55, %v8753_v63 }
0x1aaa   : > { %10764 = vrsqrt.f32 %v8739_v38  ;;  %v10755_v43 = vpop.eup %10754 }
0x1aab   : > { %8789 = vst.msk [vmem:[%s16062_s16] sm:$0xff] %vm635_vm0, %v8779_v61  ;;  %8790 = vst.msk [vmem:[%s16062_s16 + $0x8] sm:$0xff] %vm635_vm0, %v8780_v12  ;;  %v10757_v0 = vpop.eup %10756  ;;  %v8756_v30 = vmul.f32 %v10755_v43, %v16016_v23  ;;  %v8781_v22 = vadd.f32 %v8777_v25, %v8767_v48 }
0x1aac   : > { %8792 = vst.msk [vmem:[%s16062_s16 + $0x18] sm:$0xff] %vm635_vm0, %v8782_v1  ;;  %v8755_v39 = vmul.f32 %v10757_v0, %v16012_v28 }
0x1aad   : > { %v8770_v20 = vmul.f32 %v16048_v55, %v8756_v30  ;;  %8791 = vst.msk [vmem:[%s16062_s16 + $0x10] sm:$0xff] %vm635_vm0, %v8781_v22 }
0x1aae   : > { %v10759_v58 = vpop.eup %10758  ;;  %v8769_v45 = vmul.f32 %v16048_v55, %v8755_v39 }
0x1aaf   : > { %v10761_v60 = vpop.eup %10760  ;;  %v8758_v41 = vmul.f32 %v10759_v58, %v16025_v52  ;;  %v8784_v4 = vadd.f32 %v8777_v25, %v8770_v20 }
0x1ab0   : > { %v8757_v49 = vmul.f32 %v10761_v60, %v16021_v56  ;;  %v8783_v23 = vadd.f32 %v8777_v25, %v8769_v45 }
0x1ab1   : > { %v8772_v46 = vmul.f32 %v16048_v55, %v8758_v41  ;;  %8794 = vst.msk [vmem:[%s16062_s16 + $0x28] sm:$0xff] %vm635_vm0, %v8784_v4 }
0x1ab2   : > { %v10763_v28 = vpop.eup %10762  ;;  %v8771_v32 = vmul.f32 %v16048_v55, %v8757_v49  ;;  %8793 = vst.msk [vmem:[%s16062_s16 + $0x20] sm:$0xff] %vm635_vm0, %v8783_v23 }
0x1ab3   : > { %v8760_v19 = vmul.f32 %v10763_v28, %v16035_v15  ;;  %v8786_v52 = vadd.f32 %v8777_v25, %v8772_v46 }
0x1ab4   : > { %v10765_v16 = vpop.eup %10764  ;;  %v8785_v44 = vadd.f32 %v8777_v25, %v8771_v32 }
0x1ab5   : > { %v8759_v57 = vmul.f32 %v10765_v16, %v16031_v18  ;;  %v8774_v56 = vmul.f32 %v16048_v55, %v8760_v19  ;;  %8796 = vst.msk [vmem:[%s16062_s16 + $0x38] sm:$0xff] %vm635_vm0, %v8786_v52 }
0x1ab6   : > { %8795 = vst.msk [vmem:[%s16062_s16 + $0x30] sm:$0xff] %vm635_vm0, %v8785_v44 }
0x1ab7   : > { %v8773_v59 = vmul.f32 %v16048_v55, %v8759_v57  ;;  %v8788_v3 = vadd.f32 %v8777_v25, %v8774_v56 }
0x1ab9   : > { %v8787_v10 = vadd.f32 %v8777_v25, %v8773_v59  ;;  %8798 = vst.msk [vmem:[%s16062_s16 + $0x48] sm:$0xff] %vm635_vm0, %v8788_v3 }
0x1abb   : > { %8797 = vst.msk [vmem:[%s16062_s16 + $0x40] sm:$0xff] %vm635_vm0, %v8787_v10 }
0x1abc PF: > { %s21_s17 = sadd.s32 1, %s10927_s17  }
0x1abd   : > { %p18_p4 = scmp.ge.s32.totalorder %s21_s17, 4  }
0x1abf   :  { %20 = sbr.rel (!%p18_p4) target bundleno = 1 (0x1), region = 104 }

</bundles_post_ra>
